<compile_context>
chip_gen: v7x
topology: tpu7x:2x2x1
jax: 0.10.0
libtpu: 0.0.40
codegen_flags: <defaults>
</compile_context>

<pallas_src>
import jax
import jax.numpy as jnp
from jax.experimental import pallas as pl
from jax.experimental.pallas import tpu as pltpu

CLASS_NUM = 10
NCHANNELS = 576                     # self.nchannels
HIDDEN = int(576 // 0.5)            # fc1 out features = 1152
POOL = 7                            # AvgPool2d(7) on a 7x7 map
SPATIAL = POOL * POOL               # 49
K_TOTAL = NCHANNELS * SPATIAL       # 28224 flattened reduction dim
OUT_PAD = 128                       # lane-dense padded class dimension
INV_POOL_AREA = 1.0 / SPATIAL


def _round_up(x, m):
    return ((x + m - 1) // m) * m


def head_kernel(feat_ref, w_ref, b_ref, out_ref):
    # feat_ref: (tn, 28224) bf16   w_ref: (28224, 128) bf16   b_ref: (1, 128) f32
    # out_ref:  (tn, 128) f32
    out = jnp.dot(feat_ref[...], w_ref[...],
                  preferred_element_type=jnp.float32) + b_ref[...]
    out_ref[...] = out


def prepare_head_params(w1, b1, w2, b2):
    """One-time (static) fold of pool -> fc1 -> dropout(id) -> fc2.

    Exact in eval mode: dropout is identity and there is no nonlinearity
    between the two Linears.
    """
    hi = jax.lax.Precision.HIGHEST
    w_fold = jnp.dot(w1.T.astype(jnp.float32), w2.T.astype(jnp.float32),
                     precision=hi)                               # (576, classNum)
    b_fold = jnp.dot(b1.astype(jnp.float32), w2.T.astype(jnp.float32),
                     precision=hi) + b2.astype(jnp.float32)      # (classNum,)

    # Fold AvgPool2d(7) (mean over 49 spatial positions) into the weight.
    # feat flattens channel-major (index = c*49 + s), so repeat each channel
    # row 49x: W_big[c*49 + s, :] = w_fold[c, :] / 49.
    w_pool = jnp.repeat(w_fold * INV_POOL_AREA, SPATIAL, axis=0)  # (28224, cls)

    # Pad class dim 10 -> 128 for lane-dense output stores; bf16 resident weight.
    w_big = jnp.zeros((K_TOTAL, OUT_PAD), jnp.float32).at[:, :CLASS_NUM].set(w_pool)
    b_pad = jnp.zeros((1, OUT_PAD), jnp.float32).at[0, :CLASS_NUM].set(b_fold)
    return w_big.astype(jnp.bfloat16), b_pad


def micronet_m0_head(feat_nchw, w_big, b_pad, *, batch_tile=128):
    n, c, hh, ww = feat_nchw.shape
    assert c == NCHANNELS and hh == POOL and ww == POOL

    # Free, contiguous reshape: (N, C, H, W) -> (N, C*H*W); pooling is already
    # folded into w_big, so the kernel is a pure (N, 28224) @ (28224, 128).
    feat = feat_nchw.reshape(n, K_TOTAL)
    if feat.dtype != jnp.bfloat16:
        # Prefer feeding bf16 directly from the backbone; cast here as fallback.
        feat = feat.astype(jnp.bfloat16)

    # Batch tile: aim for >= 2 grid steps (both TensorCores on v7x) once the
    # batch is big enough, keep sublane-aligned tiles, cap at batch_tile.
    tn = max(8, min(batch_tile, _round_up(pl.cdiv(n, 2), 8)))
    if tn > n:                      # tiny batches: one exact-size block
        tn = n
    grid = (pl.cdiv(n, tn),)

    # Roofline hint: kernel is HBM-bound on the feature stream + weight.
    bytes_accessed = (n * K_TOTAL * 2            # bf16 features
                      + K_TOTAL * OUT_PAD * 2    # bf16 resident weight
                      + OUT_PAD * 4              # bias
                      + n * OUT_PAD * 4)         # f32 output
    cost = pl.CostEstimate(flops=2 * n * K_TOTAL * OUT_PAD,
                           transcendentals=0,
                           bytes_accessed=bytes_accessed)

    out_padded = pl.pallas_call(
        head_kernel,
        out_shape=jax.ShapeDtypeStruct((n, OUT_PAD), jnp.float32),
        grid=grid,
        in_specs=[
            pl.BlockSpec((tn, K_TOTAL), lambda i: (i, 0)),
            pl.BlockSpec((K_TOTAL, OUT_PAD), lambda i: (0, 0)),   # VMEM-resident
            pl.BlockSpec((1, OUT_PAD), lambda i: (0, 0)),         # VMEM-resident
        ],
        out_specs=pl.BlockSpec((tn, OUT_PAD), lambda i: (i, 0)),
        compiler_params=pltpu.CompilerParams(
            dimension_semantics=("parallel",),
            vmem_limit_bytes=48 * 1024 * 1024),
        cost_estimate=cost,
    )(feat, w_big, b_pad)

    return out_padded[:, :CLASS_NUM]


if __name__ == "__main__":
    key = jax.random.PRNGKey(0)
    k_feat, k_w1, k_w2 = jax.random.split(key, 3)

    n = 2
    # Stage4 output feature map (what feeds avg_pooling in the PyTorch forward),
    # supplied in bf16 as the kernel's preferred streaming dtype.
    feat = jax.random.normal(
        k_feat, (n, NCHANNELS, POOL, POOL), jnp.float32).astype(jnp.bfloat16)

    # Deterministic parameter init: Linear biases zeroed per module __init__,
    # Linear weights drawn from a fixed PRNG (synthetic, not a checkpoint).
    w1 = jax.random.normal(k_w1, (HIDDEN, NCHANNELS), jnp.float32) * (NCHANNELS ** -0.5)
    b1 = jnp.zeros((HIDDEN,), jnp.float32)
    w2 = jax.random.normal(k_w2, (CLASS_NUM, HIDDEN), jnp.float32) * (HIDDEN ** -0.5)
    b2 = jnp.zeros((CLASS_NUM,), jnp.float32)

    # One-time static preparation (hoisted out of the per-call path).
    w_big, b_pad = prepare_head_params(w1, b1, w2, b2)
    jax.block_until_ready((w_big, b_pad))

    out = micronet_m0_head(feat, w_big, b_pad)
    jax.block_until_ready(out)

    # Plain-JAX f32 reference of the same head (pool -> fc1 -> fc2) on the
    # same (bf16-rounded) features.
    hi = jax.lax.Precision.HIGHEST
    feat_f32 = feat.astype(jnp.float32)
    pooled_ref = jnp.mean(feat_f32.reshape(n, NCHANNELS, -1), axis=-1)
    h_ref = jnp.dot(pooled_ref, w1.T, precision=hi) + b1
    ref = jnp.dot(h_ref, w2.T, precision=hi) + b2

    assert out.shape == (n, CLASS_NUM)
    # Tolerance accounts for bf16 weights/features on the MXU (f32 accumulate).
    assert jnp.allclose(out, ref, atol=1e-2, rtol=1e-2), "mismatch vs reference"

    print("KERNEL_OK")
</pallas_src>

<mosaic_0001>
module attributes {stable_mosaic.version = 11 : i64} {
  func.func @head_kernel(%arg0: i32, %arg1: memref<2x28224xbf16, #tpu.memory_space<vmem>>, %arg2: memref<28224x128xbf16, #tpu.memory_space<vmem>>, %arg3: memref<1x128xf32, #tpu.memory_space<vmem>>, %arg4: memref<2x128xf32, #tpu.memory_space<vmem>>) attributes {dimension_semantics = [#tpu.dimension_semantics<parallel>], iteration_bounds = array<i64: 1>, scalar_prefetch = 0 : i64, scratch_operands = 0 : i64, tpu.core_type = #tpu.core_type<tc>, window_params = [{transform_indices = @transform_0, window_bounds = array<i64: 2, 28224>}, {pipeline_mode = #tpu.pipeline_mode<synchronous>, transform_indices = @transform_1, window_bounds = array<i64: 28224, 128>}, {pipeline_mode = #tpu.pipeline_mode<synchronous>, transform_indices = @transform_2, window_bounds = array<i64: 1, 128>}, {transform_indices = @transform_3, window_bounds = array<i64: 2, 128>}]} {
    %c0 = arith.constant 0 : index
    %c0_0 = arith.constant 0 : index
    %0 = vector.load %arg1[%c0, %c0_0] : memref<2x28224xbf16, #tpu.memory_space<vmem>>, vector<2x28224xbf16>
    %c0_1 = arith.constant 0 : index
    %c0_2 = arith.constant 0 : index
    %1 = vector.load %arg2[%c0_1, %c0_2] : memref<28224x128xbf16, #tpu.memory_space<vmem>>, vector<28224x128xbf16>
    %cst = arith.constant dense<0.000000e+00> : vector<2x128xf32>
    %2 = tpu.matmul %0, %1, %cst {dimension_numbers = #tpu.dot_dimension_numbers<[1], [0], [0], [1], [0, 0, 1, 1], [], []>} : vector<2x28224xbf16>, vector<28224x128xbf16>, vector<2x128xf32> -> vector<2x128xf32>
    %c0_3 = arith.constant 0 : index
    %c0_4 = arith.constant 0 : index
    %3 = vector.load %arg3[%c0_3, %c0_4] : memref<1x128xf32, #tpu.memory_space<vmem>>, vector<1x128xf32>
    %4 = vector.broadcast %3 : vector<1x128xf32> to vector<2x128xf32>
    %5 = arith.addf %2, %4 : vector<2x128xf32>
    %c0_5 = arith.constant 0 : index
    %c0_6 = arith.constant 0 : index
    %6 = vector.load %arg4[%c0_5, %c0_6] : memref<2x128xf32, #tpu.memory_space<vmem>>, vector<2x128xf32>
    tpu.vector_store %arg4[%c0_5, %c0_6], %5 {strides = array<i32>} : memref<2x128xf32, #tpu.memory_space<vmem>>, vector<2x128xf32>,
    return
  }
  func.func @transform_0(%arg0: i32) -> (i32, i32) {
    %c0_i32 = arith.constant 0 : i32
    %c0_i32_0 = arith.constant 0 : i32
    return %arg0, %c0_i32 : i32, i32
  }
  func.func @transform_1(%arg0: i32) -> (i32, i32) {
    %c0_i32 = arith.constant 0 : i32
    %c0_i32_0 = arith.constant 0 : i32
    %c0_i32_1 = arith.constant 0 : i32
    return %c0_i32, %c0_i32_0 : i32, i32
  }
  func.func @transform_2(%arg0: i32) -> (i32, i32) {
    %c0_i32 = arith.constant 0 : i32
    %c0_i32_0 = arith.constant 0 : i32
    %c0_i32_1 = arith.constant 0 : i32
    return %c0_i32, %c0_i32_0 : i32, i32
  }
  func.func @transform_3(%arg0: i32) -> (i32, i32) {
    %c0_i32 = arith.constant 0 : i32
    %c0_i32_0 = arith.constant 0 : i32
    return %arg0, %c0_i32 : i32, i32
  }
}

</mosaic_0001>

<bundles_post_ra>
// kernel: tpu_custom_call.1
= control target key start
LH: loop header
LB: loop body
LE: loop exit
PB: predicated region body
PF: predicated region fallthrough
CT: control target
= control target key end

     0   :  { %8 = vsyncpa [#allocation3], 0  ;;  %s26891_s0 = inlined_call_operand.hbm [shape: bf16[2,28224], index: 0, kind: input, shape index: {}]   ;;  %s26892_s1 = inlined_call_operand.hbm [shape: bf16[28224,128], index: 1, kind: input, shape index: {}]   ;;  %s26893_s2 = inlined_call_operand.hbm [shape: f32[1,128], index: 2, kind: input, shape index: {}]   ;;  %s26894_s3 = inlined_call_operand.hbm [shape: f32[2,128], index: 3, kind: output, shape index: {}]  }
   0x1   :  { %9 = vsyncpa [#allocation6], 0 }
   0x2   :  { %10 = vsyncpa [#allocation4], 0  ;;  %s26369_s12 = smov [#allocation5]   ;;  %s26275_s16 = scalar_lea.hbm %s26892_s1, 225792 }
   0x3   :  { %s26_s13 = sshll.u32 %s26369_s12, 4  ;;  %p26276_p0 = scmp.ne.s32.totalorder %s26892_s1, %s26275_s16  ;;  %s27_s13 = int_to_ptr.vmem [resolvable:$true] %s26_s13 }
   0x4   :  { %p26279_p1 = scmp.lt.u32.totalorder %s26275_s16, %s26892_s1 }
   0x6   :  { %p26281_p2 = pnand %p26279_p1, %p26276_p0 }
   0x8   :  { %26284 = shalt.err (!%p26281_p2)
}
   0x9   :  { %s26285_s21 = scalar_lea.vmem %s27_s13, 225792  ;;  %p26290_p4 = scmp.lt.s32.totalorder %s27_s13, %s27_s13 }
   0xa   :  { %p26286_p3 = scmp.ne.s32.totalorder %s27_s13, %s26285_s21  ;;  %p26291_p5 = scmp.lt.s32.totalorder %s26285_s21, %s26285_s21 }
   0xc   :  { %p26292_p6 = por %p26291_p5, %p26290_p4 }
   0xe   :  { %p26293_p7 = pnand %p26292_p6, %p26286_p3 }
  0x10   :  { %26296 = shalt.err (!%p26293_p7)
}
  0x11   :  { %s26370_s22 = smov 64   ;;  %s26371_s23 = smov 4  }
  0x12   :  { %32 = dma.hbm_to_vmem [thread:$0]  %s26892_s1, 225792, %s27_s13, [#allocation6], %s26370_s22, %s26370_s22, %s26371_s23  }
  0x13   :  { %s26372_s26 = smov [#allocation2]   ;;  %s26373_s28 = smov [#allocation7]  }
  0x14   :  { %s17_s27 = sshll.u32 %s26372_s26, 4  ;;  %s39_s29 = sshll.u32 %s26373_s28, 4  ;;  %s18_s27 = int_to_ptr.vmem [resolvable:$true] %s17_s27  ;;  %s40_s29 = int_to_ptr.vmem [resolvable:$true] %s39_s29 }
  0x15   :  { %s26297_s5 = scalar_lea.hbm %s26891_s0, 3536 }
  0x16   :  { %p26298_p8 = scmp.ne.s32.totalorder %s26891_s0, %s26297_s5  ;;  %p26301_p9 = scmp.lt.u32.totalorder %s26297_s5, %s26891_s0 }
  0x18   :  { %p26303_p10 = pnand %p26301_p9, %p26298_p8 }
  0x1a   :  { %26306 = shalt.err (!%p26303_p10)
}
  0x1b   :  { %s26307_s1 = scalar_lea.vmem %s18_s27, 3536  ;;  %s26311_s10 = scalar_lea.vmem %s18_s27, 3552 }
  0x1c   :  { %p26308_p11 = scmp.ne.s32.totalorder %s18_s27, %s26307_s1  ;;  %p26312_p12 = scmp.lt.s32.totalorder %s18_s27, %s18_s27 }
  0x1d   :  { %p26313_p13 = scmp.lt.s32.totalorder %s26311_s10, %s26307_s1 }
  0x1f   :  { %p26314_p0 = por %p26313_p13, %p26312_p12 }
  0x21   :  { %p26315_p1 = pnand %p26314_p0, %p26308_p11 }
  0x23   :  { %26318 = shalt.err (!%p26315_p1)
}
  0x24   :  { %20 = dma.hbm_to_vmem [thread:$0]  %s26891_s0, 3536, %s18_s27, [#allocation3]  }
  0x25   :  { %s26319_s15 = scalar_lea.hbm %s26893_s2, 16 }
  0x26   :  { %p26320_p2 = scmp.ne.s32.totalorder %s26893_s2, %s26319_s15  ;;  %p26323_p3 = scmp.lt.u32.totalorder %s26319_s15, %s26893_s2 }
  0x28   :  { %p26325_p4 = pnand %p26323_p3, %p26320_p2 }
  0x2a   :  { %26328 = shalt.err (!%p26325_p4)
}
  0x2b   :  { %s26329_s20 = scalar_lea.vmem %s40_s29, 16  ;;  %s26333_s21 = scalar_lea.vmem %s40_s29, 32 }
  0x2c   :  { %p26330_p5 = scmp.ne.s32.totalorder %s40_s29, %s26329_s20  ;;  %p26334_p6 = scmp.lt.s32.totalorder %s40_s29, %s40_s29 }
  0x2d   :  { %p26335_p7 = scmp.lt.s32.totalorder %s26333_s21, %s26329_s20 }
  0x2f   :  { %p26336_p8 = por %p26335_p7, %p26334_p6 }
  0x31   :  { %p26337_p9 = pnand %p26336_p8, %p26330_p5 }
  0x33   :  { %26340 = shalt.err (!%p26337_p9)
}
  0x34   :  { %42 = dma.hbm_to_vmem [thread:$0]  %s26893_s2, 16, %s40_s29, [#allocation6]  }
  0x35   :  { %26363 = dma.done.wait [#allocation3], 3536  }
  0x36   :  { %26364 = vsyncadd [#allocation3], 4294963760 }
  0x37   :  { %26365 = dma.done.wait [#allocation6], 225808  }
  0x38   :  { %26366 = vsyncadd [#allocation6], 4294741488  ;;  %v24483_v0 = vld [vmem:[#allocation5 + $0x40] sm:$0xff]   ;;  %v24487_v4 = vld [vmem:[#allocation5 + $0x48] sm:$0xff]   ;;  %v26374_v21 = vmov 1966171168   ;;  %v3648_v23 = vlaneseq }
  0x39   :  { %v24484_v1 = vld [vmem:[#allocation5] sm:$0xff]   ;;  %22037 = vmatprep.subr.bf16.mxu0 %v24483_v0  ;;  %v24488_v5 = vld [vmem:[#allocation5 + $0x8] sm:$0xff]   ;;  %v24491_v8 = vld [vmem:[#allocation5 + $0x50] sm:$0xff]   ;;  %v3646_v22 = vunpack.c.l.s4 %v26374_v21  ;;  %vm26376_vm0 = vmmov 0   ;;  %vm15810_vm1 = vcmask 523264   ;;  %s26377_s2 = smov [#allocation8]  }
  0x3a   :  { %v24485_v2 = vld [vmem:[#allocation5 + $0xc0] sm:$0xff]   ;;  %22038 = vmatpush3.bf16.msra.mxu0 %v24484_v1  ;;  %v24489_v6 = vld [vmem:[#allocation5 + $0xc8] sm:$0xff]   ;;  %v24492_v9 = vld [vmem:[#allocation5 + $0x10] sm:$0xff]   ;;  %v3649_v29 = vshrl.u32 %v3648_v23, 7  ;;  %s20261_s23 = sshll.u32 %s26377_s2, 4  ;;  %s20262_s23 = int_to_ptr.vmem [resolvable:$true] %s20261_s23 }
  0x3b   :  { %v24486_v3 = vld [vmem:[#allocation5 + $0x80] sm:$0xff]   ;;  %22059 = vmatprep.subr.bf16.mxu1 %v24485_v2  ;;  %22039 = vmatprep.subr.bf16.mxu0 %v24487_v4  ;;  %v24490_v7 = vld [vmem:[#allocation5 + $0x88] sm:$0xff]   ;;  %v24493_v10 = vld [vmem:[#allocation5 + $0xd0] sm:$0xff]   ;;  %v3647_v28 = vunpack.c.0.s8 %v3646_v22  ;;  %s26341_s24 = scalar_lea.vmem %s20262_s23, 32  ;;  %p26346_p11 = scmp.lt.s32.totalorder %s20262_s23, %s20262_s23 }
  0x3c   :  { %22060 = vmatpush3.bf16.msra.mxu1 %v24486_v3  ;;  %v24494_v11 = vld [vmem:[#allocation5 + $0x90] sm:$0xff]   ;;  %v24495_v12 = vld [vmem:[#allocation5 + $0x58] sm:$0xff]   ;;  %v24499_v16 = vld [vmem:[#allocation5 + $0x60] sm:$0xff]   ;;  %p26342_p10 = scmp.ne.s32.totalorder %s20262_s23, %s26341_s24  ;;  %p26347_p12 = scmp.lt.s32.totalorder %s26341_s24, %s26341_s24 }
  0x3d   :  { %22061 = vmatprep.subr.bf16.mxu1 %v24489_v6  ;;  %v24496_v13 = vld [vmem:[#allocation5 + $0x18] sm:$0xff]   ;;  %v24500_v17 = vld [vmem:[#allocation5 + $0x20] sm:$0xff]   ;;  %v24503_v20 = vld [vmem:[#allocation5 + $0x68] sm:$0xff]   ;;  %v26434_v34 = vsub.s32 %v3647_v28, %v3649_v29 }
  0x3e   :  { %22040 = vmatpush3.bf16.msra.mxu0 %v24488_v5  ;;  %v24497_v14 = vld [vmem:[#allocation5 + $0xd8] sm:$0xff]   ;;  %v24501_v18 = vld [vmem:[#allocation5 + $0xe0] sm:$0xff]   ;;  %v24504_v24 = vld [vmem:[#allocation5 + $0x28] sm:$0xff]   ;;  %p26348_p13 = por %p26347_p12, %p26346_p11 }
  0x3f   :  { %22041 = vmatprep.subr.bf16.mxu0 %v24491_v8  ;;  %v24498_v15 = vld [vmem:[#allocation5 + $0x98] sm:$0xff]   ;;  %v24502_v19 = vld [vmem:[#allocation5 + $0xa0] sm:$0xff]   ;;  %v24505_v25 = vld [vmem:[#allocation5 + $0xe8] sm:$0xff]  }
  0x40   :  { %22062 = vmatpush3.bf16.msra.mxu1 %v24490_v7  ;;  %v24506_v26 = vld [vmem:[#allocation5 + $0xa8] sm:$0xff]   ;;  %v24507_v27 = vld [vmem:[#allocation5 + $0x70] sm:$0xff]   ;;  %v24511_v33 = vld [vmem:[#allocation5 + $0x78] sm:$0xff]   ;;  %p26349_p0 = pnand %p26348_p13, %p26342_p10 }
  0x41   :  { %22063 = vmatprep.subr.bf16.mxu1 %v24493_v10  ;;  %v24508_v30 = vld [vmem:[#allocation5 + $0x30] sm:$0xff]   ;;  %v24512_v35 = vld [vmem:[#allocation5 + $0x38] sm:$0xff]   ;;  %v53_v37 = vld [vmem:[#allocation2] sm:$0xff] }
  0x42   :  { %22042 = vmatpush3.bf16.msra.mxu0 %v24492_v9  ;;  %v24509_v31 = vld [vmem:[#allocation5 + $0xf0] sm:$0xff]   ;;  %v24513_v36 = vld [vmem:[#allocation5 + $0xf8] sm:$0xff]   ;;  %v3644_v38 = vcombine.high %v53_v37, %v53_v37  ;;  %v3651_v39 = vrot.slane %v53_v37, %v26434_v34  ;;  %v24516_v41 = vld [vmem:[#allocation5 + $0x140] sm:$0xff]  }
  0x43   :  { %22043 = vmatprep.subr.bf16.mxu0 %v24495_v12  ;;  %v24510_v32 = vld [vmem:[#allocation5 + $0xb0] sm:$0xff]   ;;  %v24515_v40 = vld [vmem:[#allocation5 + $0xb8] sm:$0xff]   ;;  %v24517_v44 = vld [vmem:[#allocation5 + $0x100] sm:$0xff]  }
  0x44   :  { %22064 = vmatpush3.bf16.msra.mxu1 %v24494_v11  ;;  %v3659_v42 = vcombine.high %v3651_v39, %v3651_v39  ;;  %v3667_v43 = vrot.slane %v3651_v39, %v26434_v34  ;;  %v26439_v45 = vrot.slane %v3644_v38, %v26434_v34  ;;  %v24518_v46 = vld [vmem:[#allocation5 + $0x1c0] sm:$0xff]   ;;  %v24520_v51 = vld [vmem:[#allocation5 + $0x148] sm:$0xff]   ;;  %v24524_v58 = vld [vmem:[#allocation5 + $0x150] sm:$0xff]  }
  0x45   :  { %22065 = vmatprep.subr.bf16.mxu1 %v24497_v14  ;;  %v24519_v48 = vld [vmem:[#allocation5 + $0x180] sm:$0xff]   ;;  %v24521_v53 = vld [vmem:[#allocation5 + $0x108] sm:$0xff]   ;;  %v24525_v59 = vld [vmem:[#allocation5 + $0x110] sm:$0xff]  }
  0x46   :  { %22044 = vmatpush3.bf16.msra.mxu0 %v24496_v13  ;;  %v3681_v47 = vrot.slane %v3659_v42, %v26434_v34  ;;  %v3660_v49 = vcombine.high %v26439_v45, %v26439_v45  ;;  %v3689_v50 = vcombine.high %v3667_v43, %v3667_v43  ;;  %v24522_v55 = vld [vmem:[#allocation5 + $0x1c8] sm:$0xff]   ;;  %v24526_v60 = vld [vmem:[#allocation5 + $0x1d0] sm:$0xff]   ;;  %v24528_v62 = vld [vmem:[#allocation5 + $0x158] sm:$0xff]  }
  0x47   :  { %22045 = vmatprep.subr.bf16.mxu0 %v24499_v16  ;;  %v24523_v56 = vld [vmem:[#allocation5 + $0x188] sm:$0xff]   ;;  %v24527_v61 = vld [vmem:[#allocation5 + $0x190] sm:$0xff]   ;;  %v24529_v63 = vld [vmem:[#allocation5 + $0x118] sm:$0xff]  }
  0x48   :  { %22066 = vmatpush3.bf16.msra.mxu1 %v24498_v15  ;;  %15846 = vmatprep.mubr.bf16.mxu0 %v3681_v47  ;;  %v3691_v52 = vcombine.high %v3681_v47, %v3681_v47  ;;  %v3688_v54 = vrot.slane %v3660_v49, %v26434_v34  ;;  %v24530_v0 = vld [vmem:[#allocation5 + $0x1d8] sm:$0xff]   ;;  %v24532_v2 = vld [vmem:[#allocation5 + $0x160] sm:$0xff]   ;;  %v24536_v6 = vld [vmem:[#allocation5 + $0x168] sm:$0xff]  }
  0x49   :  { %22067 = vmatprep.subr.bf16.mxu1 %v24501_v18  ;;  %v24531_v1 = vld [vmem:[#allocation5 + $0x198] sm:$0xff]   ;;  %v24533_v3 = vld [vmem:[#allocation5 + $0x120] sm:$0xff]   ;;  %v24537_v7 = vld [vmem:[#allocation5 + $0x128] sm:$0xff]   ;;  %v3674_v18 = vrot.slane %v26439_v45, %v26434_v34 }
  0x4a   :  { %22046 = vmatpush3.bf16.msra.mxu0 %v24500_v17  ;;  %15886 = vmatprep.mubr.bf16.mxu1 %v3691_v52  ;;  %v3692_v57 = vcombine.high %v3688_v54, %v3688_v54  ;;  %v24534_v4 = vld [vmem:[#allocation5 + $0x1e0] sm:$0xff]   ;;  %v24538_v8 = vld [vmem:[#allocation5 + $0x1e8] sm:$0xff]   ;;  %v24540_v10 = vld [vmem:[#allocation5 + $0x170] sm:$0xff]  }
  0x4b   :  { %22047 = vmatprep.subr.bf16.mxu0 %v24503_v20  ;;  %v24535_v5 = vld [vmem:[#allocation5 + $0x1a0] sm:$0xff]   ;;  %v24539_v9 = vld [vmem:[#allocation5 + $0x1a8] sm:$0xff]   ;;  %v24541_v11 = vld [vmem:[#allocation5 + $0x130] sm:$0xff]   ;;  %v3690_v23 = vcombine.high %v3674_v18, %v3674_v18 }
  0x4c   :  { %22068 = vmatpush3.bf16.msra.mxu1 %v24502_v19  ;;  %v24542_v12 = vld [vmem:[#allocation5 + $0x1f0] sm:$0xff]   ;;  %v24544_v14 = vld [vmem:[#allocation5 + $0x178] sm:$0xff]   ;;  %v24548_v19 = vld [vmem:[#allocation5 + $0x240] sm:$0xff]  }
  0x4d   :  { %22069 = vmatprep.subr.bf16.mxu1 %v24505_v25  ;;  %v24543_v13 = vld [vmem:[#allocation5 + $0x1b0] sm:$0xff]   ;;  %v24545_v15 = vld [vmem:[#allocation5 + $0x138] sm:$0xff]   ;;  %v24549_v20 = vld [vmem:[#allocation5 + $0x200] sm:$0xff]  }
  0x4e   :  { %22048 = vmatpush3.bf16.msra.mxu0 %v24504_v24  ;;  %v24546_v16 = vld [vmem:[#allocation5 + $0x1f8] sm:$0xff]   ;;  %v24550_v21 = vld [vmem:[#allocation5 + $0x2c0] sm:$0xff]   ;;  %v24552_v24 = vld [vmem:[#allocation5 + $0x248] sm:$0xff]  }
  0x4f   :  { %22049 = vmatprep.subr.bf16.mxu0 %v24507_v27  ;;  %v24547_v17 = vld [vmem:[#allocation5 + $0x1b8] sm:$0xff]   ;;  %v24551_v22 = vld [vmem:[#allocation5 + $0x280] sm:$0xff]   ;;  %v24553_v25 = vld [vmem:[#allocation5 + $0x208] sm:$0xff]  }
  0x50   :  { %22070 = vmatpush3.bf16.msra.mxu1 %v24506_v26  ;;  %v24554_v26 = vld [vmem:[#allocation5 + $0x2c8] sm:$0xff]   ;;  %v24556_v28 = vld [vmem:[#allocation5 + $0x250] sm:$0xff]   ;;  %v24564_v37 = vld [vmem:[#allocation5 + $0x260] sm:$0xff]  }
  0x51   :  { %22071 = vmatprep.subr.bf16.mxu1 %v24509_v31  ;;  %v24555_v27 = vld [vmem:[#allocation5 + $0x288] sm:$0xff]   ;;  %v24557_v29 = vld [vmem:[#allocation5 + $0x210] sm:$0xff]   ;;  %v24565_v38 = vld [vmem:[#allocation5 + $0x220] sm:$0xff]  }
  0x52   :  { %22050 = vmatpush3.bf16.msra.mxu0 %v24508_v30  ;;  %v24558_v30 = vld [vmem:[#allocation5 + $0x2d0] sm:$0xff]   ;;  %v24566_v39 = vld [vmem:[#allocation5 + $0x2e0] sm:$0xff]   ;;  %v24569_v42 = vld [vmem:[#allocation5 + $0x228] sm:$0xff]  }
  0x53   :  { %22051 = vmatprep.subr.bf16.mxu0 %v24511_v33  ;;  %v24559_v31 = vld [vmem:[#allocation5 + $0x290] sm:$0xff]   ;;  %v24561_v33 = vld [vmem:[#allocation5 + $0x218] sm:$0xff]  }
  0x54   :  { %22072 = vmatpush3.bf16.msra.mxu1 %v24510_v32  ;;  %v24560_v32 = vld [vmem:[#allocation5 + $0x258] sm:$0xff]   ;;  %v24572_v45 = vld [vmem:[#allocation5 + $0x270] sm:$0xff]  }
  0x55   :  { %22073 = vmatprep.subr.bf16.mxu1 %v24513_v36  ;;  %v24563_v36 = vld [vmem:[#allocation5 + $0x298] sm:$0xff]   ;;  %v24574_v47 = vld [vmem:[#allocation5 + $0x2f0] sm:$0xff]  }
  0x56   :  { %22052 = vmatpush3.bf16.msra.mxu0 %v24512_v35  ;;  %v24562_v35 = vld [vmem:[#allocation5 + $0x2d8] sm:$0xff]   ;;  %v54_v52 = vld [vmem:[#allocation2 + $0x8] sm:$0xff] }
  0x57   :  { %22081 = vmatprep.subr.bf16.mxu0 %v24516_v41  ;;  %v24568_v41 = vld [vmem:[#allocation5 + $0x268] sm:$0xff]   ;;  %v24576_v49 = vld [vmem:[#allocation5 + $0x278] sm:$0xff]  }
  0x58   :  { %22074 = vmatpush3.bf16.msra.mxu1 %v24515_v40  ;;  %v24567_v40 = vld [vmem:[#allocation5 + $0x2a0] sm:$0xff]  }
  0x59   :  { %22103 = vmatprep.subr.bf16.mxu1 %v24518_v46  ;;  %15847 = vmatmul.mubr.bf16.vlgmr.msra.gmra.mrb[0].mxu0 %v3667_v43  ;;  %v24570_v43 = vld [vmem:[#allocation5 + $0x2e8] sm:$0xff]   ;;  %v24573_v46 = vld [vmem:[#allocation5 + $0x230] sm:$0xff]  }
  0x5a   :  { %22082 = vmatpush3.bf16.msra.mxu0 %v24517_v44  ;;  %15926 = vmatprep.mubr.bf16.mxu0 %v3688_v54  ;;  %v24571_v44 = vld [vmem:[#allocation5 + $0x2a8] sm:$0xff]   ;;  %v24579_v54 = vld [vmem:[#allocation5 + $0x2b8] sm:$0xff]  }
  0x5b   :  { %15887 = vmatmul.mubr.bf16.vlgmr.msra.gmra.mrb[0].mxu1 %v3689_v50  ;;  %22083 = vmatprep.subr.bf16.mxu0 %v24520_v51  ;;  %v24577_v50 = vld [vmem:[#allocation5 + $0x238] sm:$0xff]  }
  0x5c   :  { %22104 = vmatpush3.bf16.msra.mxu1 %v24519_v48  ;;  %15966 = vmatprep.mubr.bf16.mxu1 %v3692_v57  ;;  %v24575_v48 = vld [vmem:[#allocation5 + $0x2b0] sm:$0xff]   ;;  %v24578_v51 = vld [vmem:[#allocation5 + $0x2f8] sm:$0xff]  }
  0x5d   :  { %22105 = vmatprep.subr.bf16.mxu1 %v24522_v55  ;;  %v3693_v55 = vcombine.high %v54_v52, %v54_v52 }
  0x5e   :  { %22084 = vmatpush3.bf16.msra.mxu0 %v24521_v53  ;;  %v3700_v53 = vrot.slane %v54_v52, %v26434_v34  ;;  %v24629_v52 = vld [vmem:[#allocation5 + $0x460] sm:$0xff]  }
  0x5f   :  { %22085 = vmatprep.subr.bf16.mxu0 %v24524_v58 }
  0x60   :  { %22106 = vmatpush3.bf16.msra.mxu1 %v24523_v56  ;;  %v24580_v56 = vld [vmem:[#allocation5 + $0x340] sm:$0xff]   ;;  %v3708_v57 = vcombine.high %v3700_v53, %v3700_v53  ;;  %v3716_v58 = vrot.slane %v3700_v53, %v26434_v34 }
  0x61   :  { %22107 = vmatprep.subr.bf16.mxu1 %v24526_v60  ;;  %v26450_v60 = vrot.slane %v3693_v55, %v26434_v34  ;;  %v24630_v53 = vld [vmem:[#allocation5 + $0x420] sm:$0xff]  }
  0x62   :  { %22086 = vmatpush3.bf16.msra.mxu0 %v24525_v59  ;;  %v24581_v59 = vld [vmem:[#allocation5 + $0x300] sm:$0xff]  }
  0x63   :  { %22087 = vmatprep.subr.bf16.mxu0 %v24528_v62  ;;  %v3730_v62 = vrot.slane %v3708_v57, %v26434_v34  ;;  %v24632_v55 = vld [vmem:[#allocation5 + $0x4a0] sm:$0xff]   ;;  %v24634_v57 = vld [vmem:[#allocation5 + $0x428] sm:$0xff]  }
  0x64   :  { %22108 = vmatpush3.bf16.msra.mxu1 %v24527_v61  ;;  %v24582_v61 = vld [vmem:[#allocation5 + $0x3c0] sm:$0xff]  }
  0x65   :  { %22109 = vmatprep.subr.bf16.mxu1 %v24530_v0  ;;  %v3709_v0 = vcombine.high %v26450_v60, %v26450_v60 }
  0x66   :  { %22088 = vmatpush3.bf16.msra.mxu0 %v24529_v63  ;;  %v24583_v63 = vld [vmem:[#allocation5 + $0x380] sm:$0xff]  }
  0x67   :  { %22089 = vmatprep.subr.bf16.mxu0 %v24532_v2  ;;  %v24584_v2 = vld [vmem:[#allocation5 + $0x348] sm:$0xff]  }
  0x68   :  { %22110 = vmatpush3.bf16.msra.mxu1 %v24531_v1  ;;  %v3738_v1 = vcombine.high %v3716_v58, %v3716_v58 }
  0x69   :  { %22111 = vmatprep.subr.bf16.mxu1 %v24534_v4  ;;  %v24585_v4 = vld [vmem:[#allocation5 + $0x308] sm:$0xff]  }
  0x6a   :  { %22090 = vmatpush3.bf16.msra.mxu0 %v24533_v3  ;;  %v3740_v3 = vcombine.high %v3730_v62, %v3730_v62 }
  0x6b   :  { %22091 = vmatprep.subr.bf16.mxu0 %v24536_v6  ;;  %v24586_v6 = vld [vmem:[#allocation5 + $0x3c8] sm:$0xff]  }
  0x6c   :  { %22112 = vmatpush3.bf16.msra.mxu1 %v24535_v5  ;;  %v3737_v5 = vrot.slane %v3709_v0, %v26434_v34  ;;  %v24641_v0 = vld [vmem:[#allocation5 + $0x478] sm:$0xff]  }
  0x6d   :  { %22113 = vmatprep.subr.bf16.mxu1 %v24538_v8 }
  0x6e   :  { %22092 = vmatpush3.bf16.msra.mxu0 %v24537_v7  ;;  %v24587_v7 = vld [vmem:[#allocation5 + $0x388] sm:$0xff]   ;;  %v3741_v8 = vcombine.high %v3737_v5, %v3737_v5 }
  0x6f   :  { %22093 = vmatprep.subr.bf16.mxu0 %v24540_v10  ;;  %v24589_v10 = vld [vmem:[#allocation5 + $0x310] sm:$0xff]  }
  0x70   :  { %22114 = vmatpush3.bf16.msra.mxu1 %v24539_v9  ;;  %v24588_v9 = vld [vmem:[#allocation5 + $0x350] sm:$0xff]  }
  0x71   :  { %22115 = vmatprep.subr.bf16.mxu1 %v24542_v12  ;;  %v24591_v12 = vld [vmem:[#allocation5 + $0x390] sm:$0xff]  }
  0x72   :  { %22094 = vmatpush3.bf16.msra.mxu0 %v24541_v11  ;;  %v24590_v11 = vld [vmem:[#allocation5 + $0x3d0] sm:$0xff]  }
  0x73   :  { %22095 = vmatprep.subr.bf16.mxu0 %v24544_v14  ;;  %v24593_v14 = vld [vmem:[#allocation5 + $0x318] sm:$0xff]  }
  0x74   :  { %22116 = vmatpush3.bf16.msra.mxu1 %v24543_v13  ;;  %v24592_v13 = vld [vmem:[#allocation5 + $0x358] sm:$0xff]  }
  0x75   :  { %22117 = vmatprep.subr.bf16.mxu1 %v24546_v16  ;;  %v24595_v16 = vld [vmem:[#allocation5 + $0x398] sm:$0xff]  }
  0x76   :  { %22096 = vmatpush3.bf16.msra.mxu0 %v24545_v15  ;;  %v24594_v15 = vld [vmem:[#allocation5 + $0x3d8] sm:$0xff]  }
  0x77   :  { %22125 = vmatprep.subr.bf16.mxu0 %v24548_v19  ;;  %v24598_v19 = vld [vmem:[#allocation5 + $0x3e0] sm:$0xff]  }
  0x78   :  { %22118 = vmatpush3.bf16.msra.mxu1 %v24547_v17  ;;  %v24596_v17 = vld [vmem:[#allocation5 + $0x360] sm:$0xff]  }
  0x79   :  { %15927 = vmatmul.mubr.bf16.vlgmr.msra.gmra.mrb[4].mxu0 %v3674_v18  ;;  %22147 = vmatprep.subr.bf16.mxu1 %v24550_v21  ;;  %v24597_v18 = vld [vmem:[#allocation5 + $0x320] sm:$0xff]   ;;  %v24600_v21 = vld [vmem:[#allocation5 + $0x368] sm:$0xff]  }
  0x7a   :  { %22126 = vmatpush3.bf16.msra.mxu0 %v24549_v20  ;;  %16006 = vmatprep.mubr.bf16.mxu0 %v3730_v62  ;;  %v24599_v20 = vld [vmem:[#allocation5 + $0x3a0] sm:$0xff]   ;;  %v24639_v62 = vld [vmem:[#allocation5 + $0x4f0] sm:$0xff]  }
  0x7b   :  { %15967 = vmatmul.mubr.bf16.vlgmr.msra.gmra.mrb[4].mxu1 %v3690_v23  ;;  %22127 = vmatprep.subr.bf16.mxu0 %v24552_v24  ;;  %v24602_v23 = vld [vmem:[#allocation5 + $0x3e8] sm:$0xff]  }
  0x7c   :  { %22148 = vmatpush3.bf16.msra.mxu1 %v24551_v22  ;;  %16046 = vmatprep.mubr.bf16.mxu1 %v3740_v3  ;;  %v24601_v22 = vld [vmem:[#allocation5 + $0x328] sm:$0xff]   ;;  %v55_v3 = vld [vmem:[#allocation2 + $0x10] sm:$0xff] }
  0x7d   :  { %22149 = vmatprep.subr.bf16.mxu1 %v24554_v26  ;;  %v24603_v24 = vld [vmem:[#allocation5 + $0x3a8] sm:$0xff]   ;;  %v24605_v26 = vld [vmem:[#allocation5 + $0x330] sm:$0xff]  }
  0x7e   :  { %22128 = vmatpush3.bf16.msra.mxu0 %v24553_v25  ;;  %v24604_v25 = vld [vmem:[#allocation5 + $0x370] sm:$0xff]  }
  0x7f   :  { %22129 = vmatprep.subr.bf16.mxu0 %v24556_v28  ;;  %v24607_v28 = vld [vmem:[#allocation5 + $0x3b0] sm:$0xff]  }
  0x80   :  { %22150 = vmatpush3.bf16.msra.mxu1 %v24555_v27  ;;  %v24606_v27 = vld [vmem:[#allocation5 + $0x3f0] sm:$0xff]  }
  0x81   :  { %22151 = vmatprep.subr.bf16.mxu1 %v24558_v30  ;;  %v24609_v30 = vld [vmem:[#allocation5 + $0x338] sm:$0xff]  }
  0x82   :  { %22130 = vmatpush3.bf16.msra.mxu0 %v24557_v29  ;;  %v24608_v29 = vld [vmem:[#allocation5 + $0x378] sm:$0xff]  }
  0x83   :  { %22131 = vmatprep.subr.bf16.mxu0 %v24560_v32  ;;  %v24612_v32 = vld [vmem:[#allocation5 + $0x3b8] sm:$0xff]  }
  0x84   :  { %22152 = vmatpush3.bf16.msra.mxu1 %v24559_v31  ;;  %v24610_v31 = vld [vmem:[#allocation5 + $0x3f8] sm:$0xff]  }
  0x85   :  { %22153 = vmatprep.subr.bf16.mxu1 %v24562_v35  ;;  %v24613_v35 = vld [vmem:[#allocation5 + $0x440] sm:$0xff]  }
  0x86   :  { %22132 = vmatpush3.bf16.msra.mxu0 %v24561_v33  ;;  %v3723_v33 = vrot.slane %v26450_v60, %v26434_v34  ;;  %v24637_v60 = vld [vmem:[#allocation5 + $0x470] sm:$0xff]  }
  0x87   :  { %22133 = vmatprep.subr.bf16.mxu0 %v24564_v37  ;;  %v24615_v37 = vld [vmem:[#allocation5 + $0x4c0] sm:$0xff]  }
  0x88   :  { %22154 = vmatpush3.bf16.msra.mxu1 %v24563_v36  ;;  %v24614_v36 = vld [vmem:[#allocation5 + $0x400] sm:$0xff]  }
  0x89   :  { %22155 = vmatprep.subr.bf16.mxu1 %v24566_v39  ;;  %v3739_v39 = vcombine.high %v3723_v33, %v3723_v33 }
  0x8a   :  { %22134 = vmatpush3.bf16.msra.mxu0 %v24565_v38  ;;  %v24616_v38 = vld [vmem:[#allocation5 + $0x480] sm:$0xff]  }
  0x8b   :  { %22135 = vmatprep.subr.bf16.mxu0 %v24568_v41  ;;  %v24618_v41 = vld [vmem:[#allocation5 + $0x408] sm:$0xff]  }
  0x8c   :  { %22156 = vmatpush3.bf16.msra.mxu1 %v24567_v40  ;;  %v24617_v40 = vld [vmem:[#allocation5 + $0x448] sm:$0xff]  }
  0x8d   :  { %22157 = vmatprep.subr.bf16.mxu1 %v24570_v43  ;;  %v24620_v43 = vld [vmem:[#allocation5 + $0x488] sm:$0xff]  }
  0x8e   :  { %22136 = vmatpush3.bf16.msra.mxu0 %v24569_v42  ;;  %v24619_v42 = vld [vmem:[#allocation5 + $0x4c8] sm:$0xff]  }
  0x8f   :  { %22137 = vmatprep.subr.bf16.mxu0 %v24572_v45  ;;  %v24622_v45 = vld [vmem:[#allocation5 + $0x410] sm:$0xff]  }
  0x90   :  { %22158 = vmatpush3.bf16.msra.mxu1 %v24571_v44  ;;  %v24621_v44 = vld [vmem:[#allocation5 + $0x450] sm:$0xff]  }
  0x91   :  { %22159 = vmatprep.subr.bf16.mxu1 %v24574_v47  ;;  %v24624_v47 = vld [vmem:[#allocation5 + $0x490] sm:$0xff]  }
  0x92   :  { %22138 = vmatpush3.bf16.msra.mxu0 %v24573_v46  ;;  %v24623_v46 = vld [vmem:[#allocation5 + $0x4d0] sm:$0xff]  }
  0x93   :  { %22139 = vmatprep.subr.bf16.mxu0 %v24576_v49  ;;  %v24626_v49 = vld [vmem:[#allocation5 + $0x418] sm:$0xff]  }
  0x94   :  { %22160 = vmatpush3.bf16.msra.mxu1 %v24575_v48  ;;  %v24625_v48 = vld [vmem:[#allocation5 + $0x458] sm:$0xff]  }
  0x95   :  { %22161 = vmatprep.subr.bf16.mxu1 %v24578_v51  ;;  %v24628_v51 = vld [vmem:[#allocation5 + $0x498] sm:$0xff]  }
  0x96   :  { %22140 = vmatpush3.bf16.msra.mxu0 %v24577_v50  ;;  %v24627_v50 = vld [vmem:[#allocation5 + $0x4d8] sm:$0xff]  }
  0x97   :  { %22169 = vmatprep.subr.bf16.mxu0 %v24580_v56  ;;  %v24633_v56 = vld [vmem:[#allocation5 + $0x468] sm:$0xff]  }
  0x98   :  { %22162 = vmatpush3.bf16.msra.mxu1 %v24579_v54  ;;  %v24631_v54 = vld [vmem:[#allocation5 + $0x4e0] sm:$0xff]  }
  0x99   :  { %16007 = vmatmul.mubr.bf16.vlgmr.msra.gmra.mrb[8].mxu0 %v3716_v58  ;;  %22191 = vmatprep.subr.bf16.mxu1 %v24582_v61  ;;  %v24635_v58 = vld [vmem:[#allocation5 + $0x4e8] sm:$0xff]   ;;  %v24638_v61 = vld [vmem:[#allocation5 + $0x430] sm:$0xff]  }
  0x9a   :  { %22170 = vmatpush3.bf16.msra.mxu0 %v24581_v59  ;;  %16086 = vmatprep.mubr.bf16.mxu0 %v3737_v5  ;;  %v24636_v59 = vld [vmem:[#allocation5 + $0x4a8] sm:$0xff]   ;;  %v24644_v5 = vld [vmem:[#allocation5 + $0x4b8] sm:$0xff]  }
  0x9b   :  { %16047 = vmatmul.mubr.bf16.vlgmr.msra.gmra.mrb[8].mxu1 %v3738_v1  ;;  %22171 = vmatprep.subr.bf16.mxu0 %v24584_v2  ;;  %v24642_v1 = vld [vmem:[#allocation5 + $0x438] sm:$0xff]  }
  0x9c   :  { %22192 = vmatpush3.bf16.msra.mxu1 %v24583_v63  ;;  %16126 = vmatprep.mubr.bf16.mxu1 %v3741_v8  ;;  %v24640_v63 = vld [vmem:[#allocation5 + $0x4b0] sm:$0xff]   ;;  %v24643_v2 = vld [vmem:[#allocation5 + $0x4f8] sm:$0xff]  }
  0x9d   :  { %22193 = vmatprep.subr.bf16.mxu1 %v24586_v6  ;;  %v3742_v6 = vcombine.high %v55_v3, %v55_v3 }
  0x9e   :  { %22172 = vmatpush3.bf16.msra.mxu0 %v24585_v4  ;;  %v3749_v4 = vrot.slane %v55_v3, %v26434_v34  ;;  %v24694_v3 = vld [vmem:[#allocation5 + $0x660] sm:$0xff]  }
  0x9f   :  { %22173 = vmatprep.subr.bf16.mxu0 %v24588_v9 }
  0xa0   :  { %22194 = vmatpush3.bf16.msra.mxu1 %v24587_v7  ;;  %v24645_v7 = vld [vmem:[#allocation5 + $0x540] sm:$0xff]   ;;  %v3757_v8 = vcombine.high %v3749_v4, %v3749_v4  ;;  %v3765_v9 = vrot.slane %v3749_v4, %v26434_v34 }
  0xa1   :  { %22195 = vmatprep.subr.bf16.mxu1 %v24590_v11  ;;  %v26461_v11 = vrot.slane %v3742_v6, %v26434_v34  ;;  %v24695_v4 = vld [vmem:[#allocation5 + $0x620] sm:$0xff]  }
  0xa2   :  { %22174 = vmatpush3.bf16.msra.mxu0 %v24589_v10  ;;  %v24646_v10 = vld [vmem:[#allocation5 + $0x500] sm:$0xff]  }
  0xa3   :  { %22175 = vmatprep.subr.bf16.mxu0 %v24592_v13  ;;  %v3779_v13 = vrot.slane %v3757_v8, %v26434_v34  ;;  %v24697_v6 = vld [vmem:[#allocation5 + $0x6a0] sm:$0xff]   ;;  %v24699_v8 = vld [vmem:[#allocation5 + $0x628] sm:$0xff]  }
  0xa4   :  { %22196 = vmatpush3.bf16.msra.mxu1 %v24591_v12  ;;  %v24647_v12 = vld [vmem:[#allocation5 + $0x5c0] sm:$0xff]  }
  0xa5   :  { %22197 = vmatprep.subr.bf16.mxu1 %v24594_v15  ;;  %v3758_v15 = vcombine.high %v26461_v11, %v26461_v11 }
  0xa6   :  { %22176 = vmatpush3.bf16.msra.mxu0 %v24593_v14  ;;  %v24648_v14 = vld [vmem:[#allocation5 + $0x580] sm:$0xff]  }
  0xa7   :  { %22177 = vmatprep.subr.bf16.mxu0 %v24596_v17  ;;  %v24649_v17 = vld [vmem:[#allocation5 + $0x548] sm:$0xff]  }
  0xa8   :  { %22198 = vmatpush3.bf16.msra.mxu1 %v24595_v16  ;;  %v3787_v16 = vcombine.high %v3765_v9, %v3765_v9 }
  0xa9   :  { %22199 = vmatprep.subr.bf16.mxu1 %v24598_v19  ;;  %v24650_v19 = vld [vmem:[#allocation5 + $0x508] sm:$0xff]  }
  0xaa   :  { %22178 = vmatpush3.bf16.msra.mxu0 %v24597_v18  ;;  %v3789_v18 = vcombine.high %v3779_v13, %v3779_v13 }
  0xab   :  { %22179 = vmatprep.subr.bf16.mxu0 %v24600_v21  ;;  %v24651_v21 = vld [vmem:[#allocation5 + $0x5c8] sm:$0xff]  }
  0xac   :  { %22200 = vmatpush3.bf16.msra.mxu1 %v24599_v20  ;;  %v3786_v20 = vrot.slane %v3758_v15, %v26434_v34  ;;  %v24706_v15 = vld [vmem:[#allocation5 + $0x678] sm:$0xff]  }
  0xad   :  { %22201 = vmatprep.subr.bf16.mxu1 %v24602_v23 }
  0xae   :  { %22180 = vmatpush3.bf16.msra.mxu0 %v24601_v22  ;;  %v24652_v22 = vld [vmem:[#allocation5 + $0x588] sm:$0xff]   ;;  %v3790_v23 = vcombine.high %v3786_v20, %v3786_v20 }
  0xaf   :  { %22181 = vmatprep.subr.bf16.mxu0 %v24604_v25  ;;  %v24654_v25 = vld [vmem:[#allocation5 + $0x510] sm:$0xff]  }
  0xb0   :  { %22202 = vmatpush3.bf16.msra.mxu1 %v24603_v24  ;;  %v24653_v24 = vld [vmem:[#allocation5 + $0x550] sm:$0xff]  }
  0xb1   :  { %22203 = vmatprep.subr.bf16.mxu1 %v24606_v27  ;;  %v24656_v27 = vld [vmem:[#allocation5 + $0x590] sm:$0xff]  }
  0xb2   :  { %22182 = vmatpush3.bf16.msra.mxu0 %v24605_v26  ;;  %v24655_v26 = vld [vmem:[#allocation5 + $0x5d0] sm:$0xff]  }
  0xb3   :  { %22183 = vmatprep.subr.bf16.mxu0 %v24608_v29  ;;  %v24658_v29 = vld [vmem:[#allocation5 + $0x518] sm:$0xff]  }
  0xb4   :  { %22204 = vmatpush3.bf16.msra.mxu1 %v24607_v28  ;;  %v24657_v28 = vld [vmem:[#allocation5 + $0x558] sm:$0xff]  }
  0xb5   :  { %22205 = vmatprep.subr.bf16.mxu1 %v24610_v31  ;;  %v24660_v31 = vld [vmem:[#allocation5 + $0x598] sm:$0xff]  }
  0xb6   :  { %22184 = vmatpush3.bf16.msra.mxu0 %v24609_v30  ;;  %v24659_v30 = vld [vmem:[#allocation5 + $0x5d8] sm:$0xff]  }
  0xb7   :  { %22213 = vmatprep.subr.bf16.mxu0 %v24613_v35  ;;  %v24663_v35 = vld [vmem:[#allocation5 + $0x5e0] sm:$0xff]  }
  0xb8   :  { %22206 = vmatpush3.bf16.msra.mxu1 %v24612_v32  ;;  %v24661_v32 = vld [vmem:[#allocation5 + $0x560] sm:$0xff]  }
  0xb9   :  { %16087 = vmatmul.mubr.bf16.vlgmr.msra.gmra.mrb[12].mxu0 %v3723_v33  ;;  %22235 = vmatprep.subr.bf16.mxu1 %v24615_v37  ;;  %v24662_v33 = vld [vmem:[#allocation5 + $0x520] sm:$0xff]   ;;  %v24665_v37 = vld [vmem:[#allocation5 + $0x568] sm:$0xff]  }
  0xba   :  { %22214 = vmatpush3.bf16.msra.mxu0 %v24614_v36  ;;  %16166 = vmatprep.mubr.bf16.mxu0 %v3779_v13  ;;  %v24664_v36 = vld [vmem:[#allocation5 + $0x5a0] sm:$0xff]   ;;  %v24704_v13 = vld [vmem:[#allocation5 + $0x6f0] sm:$0xff]  }
  0xbb   :  { %16127 = vmatmul.mubr.bf16.vlgmr.msra.gmra.mrb[12].mxu1 %v3739_v39  ;;  %22215 = vmatprep.subr.bf16.mxu0 %v24617_v40  ;;  %v24667_v39 = vld [vmem:[#allocation5 + $0x5e8] sm:$0xff]  }
  0xbc   :  { %22236 = vmatpush3.bf16.msra.mxu1 %v24616_v38  ;;  %16206 = vmatprep.mubr.bf16.mxu1 %v3789_v18  ;;  %v24666_v38 = vld [vmem:[#allocation5 + $0x528] sm:$0xff]   ;;  %v56_v18 = vld [vmem:[#allocation2 + $0x18] sm:$0xff] }
  0xbd   :  { %22237 = vmatprep.subr.bf16.mxu1 %v24619_v42  ;;  %v24668_v40 = vld [vmem:[#allocation5 + $0x5a8] sm:$0xff]   ;;  %v24670_v42 = vld [vmem:[#allocation5 + $0x530] sm:$0xff]  }
  0xbe   :  { %22216 = vmatpush3.bf16.msra.mxu0 %v24618_v41  ;;  %v24669_v41 = vld [vmem:[#allocation5 + $0x570] sm:$0xff]  }
  0xbf   :  { %22217 = vmatprep.subr.bf16.mxu0 %v24621_v44  ;;  %v24672_v44 = vld [vmem:[#allocation5 + $0x5b0] sm:$0xff]  }
  0xc0   :  { %22238 = vmatpush3.bf16.msra.mxu1 %v24620_v43  ;;  %v24671_v43 = vld [vmem:[#allocation5 + $0x5f0] sm:$0xff]  }
  0xc1   :  { %22239 = vmatprep.subr.bf16.mxu1 %v24623_v46  ;;  %v24674_v46 = vld [vmem:[#allocation5 + $0x538] sm:$0xff]  }
  0xc2   :  { %22218 = vmatpush3.bf16.msra.mxu0 %v24622_v45  ;;  %v24673_v45 = vld [vmem:[#allocation5 + $0x578] sm:$0xff]  }
  0xc3   :  { %22219 = vmatprep.subr.bf16.mxu0 %v24625_v48  ;;  %v24677_v48 = vld [vmem:[#allocation5 + $0x5b8] sm:$0xff]  }
  0xc4   :  { %22240 = vmatpush3.bf16.msra.mxu1 %v24624_v47  ;;  %v24675_v47 = vld [vmem:[#allocation5 + $0x5f8] sm:$0xff]  }
  0xc5   :  { %22241 = vmatprep.subr.bf16.mxu1 %v24627_v50  ;;  %v24678_v50 = vld [vmem:[#allocation5 + $0x640] sm:$0xff]  }
  0xc6   :  { %22220 = vmatpush3.bf16.msra.mxu0 %v24626_v49  ;;  %v3772_v49 = vrot.slane %v26461_v11, %v26434_v34  ;;  %v24702_v11 = vld [vmem:[#allocation5 + $0x670] sm:$0xff]  }
  0xc7   :  { %22221 = vmatprep.subr.bf16.mxu0 %v24629_v52  ;;  %v24680_v52 = vld [vmem:[#allocation5 + $0x6c0] sm:$0xff]  }
  0xc8   :  { %22242 = vmatpush3.bf16.msra.mxu1 %v24628_v51  ;;  %v24679_v51 = vld [vmem:[#allocation5 + $0x600] sm:$0xff]  }
  0xc9   :  { %22243 = vmatprep.subr.bf16.mxu1 %v24631_v54  ;;  %v3788_v54 = vcombine.high %v3772_v49, %v3772_v49 }
  0xca   :  { %22222 = vmatpush3.bf16.msra.mxu0 %v24630_v53  ;;  %v24681_v53 = vld [vmem:[#allocation5 + $0x680] sm:$0xff]  }
  0xcb   :  { %22223 = vmatprep.subr.bf16.mxu0 %v24633_v56  ;;  %v24683_v56 = vld [vmem:[#allocation5 + $0x608] sm:$0xff]  }
  0xcc   :  { %22244 = vmatpush3.bf16.msra.mxu1 %v24632_v55  ;;  %v24682_v55 = vld [vmem:[#allocation5 + $0x648] sm:$0xff]  }
  0xcd   :  { %22245 = vmatprep.subr.bf16.mxu1 %v24635_v58  ;;  %v24685_v58 = vld [vmem:[#allocation5 + $0x688] sm:$0xff]  }
  0xce   :  { %22224 = vmatpush3.bf16.msra.mxu0 %v24634_v57  ;;  %v24684_v57 = vld [vmem:[#allocation5 + $0x6c8] sm:$0xff]  }
  0xcf   :  { %22225 = vmatprep.subr.bf16.mxu0 %v24637_v60  ;;  %v24687_v60 = vld [vmem:[#allocation5 + $0x610] sm:$0xff]  }
  0xd0   :  { %22246 = vmatpush3.bf16.msra.mxu1 %v24636_v59  ;;  %v24686_v59 = vld [vmem:[#allocation5 + $0x650] sm:$0xff]  }
  0xd1   :  { %22247 = vmatprep.subr.bf16.mxu1 %v24639_v62  ;;  %v24689_v62 = vld [vmem:[#allocation5 + $0x690] sm:$0xff]  }
  0xd2   :  { %22226 = vmatpush3.bf16.msra.mxu0 %v24638_v61  ;;  %v24688_v61 = vld [vmem:[#allocation5 + $0x6d0] sm:$0xff]  }
  0xd3   :  { %22227 = vmatprep.subr.bf16.mxu0 %v24641_v0  ;;  %v24691_v0 = vld [vmem:[#allocation5 + $0x618] sm:$0xff]  }
  0xd4   :  { %22248 = vmatpush3.bf16.msra.mxu1 %v24640_v63  ;;  %v24690_v63 = vld [vmem:[#allocation5 + $0x658] sm:$0xff]  }
  0xd5   :  { %22249 = vmatprep.subr.bf16.mxu1 %v24643_v2  ;;  %v24693_v2 = vld [vmem:[#allocation5 + $0x698] sm:$0xff]  }
  0xd6   :  { %22228 = vmatpush3.bf16.msra.mxu0 %v24642_v1  ;;  %v24692_v1 = vld [vmem:[#allocation5 + $0x6d8] sm:$0xff]  }
  0xd7   :  { %22257 = vmatprep.subr.bf16.mxu0 %v24645_v7  ;;  %v24698_v7 = vld [vmem:[#allocation5 + $0x668] sm:$0xff]  }
  0xd8   :  { %22250 = vmatpush3.bf16.msra.mxu1 %v24644_v5  ;;  %v24696_v5 = vld [vmem:[#allocation5 + $0x6e0] sm:$0xff]  }
  0xd9   :  { %16167 = vmatmul.mubr.bf16.vlgmr.msra.gmra.mrb[16].mxu0 %v3765_v9  ;;  %22279 = vmatprep.subr.bf16.mxu1 %v24647_v12  ;;  %v24700_v9 = vld [vmem:[#allocation5 + $0x6e8] sm:$0xff]   ;;  %v24703_v12 = vld [vmem:[#allocation5 + $0x630] sm:$0xff]  }
  0xda   :  { %22258 = vmatpush3.bf16.msra.mxu0 %v24646_v10  ;;  %16246 = vmatprep.mubr.bf16.mxu0 %v3786_v20  ;;  %v24701_v10 = vld [vmem:[#allocation5 + $0x6a8] sm:$0xff]   ;;  %v24709_v20 = vld [vmem:[#allocation5 + $0x6b8] sm:$0xff]  }
  0xdb   :  { %16207 = vmatmul.mubr.bf16.vlgmr.msra.gmra.mrb[16].mxu1 %v3787_v16  ;;  %22259 = vmatprep.subr.bf16.mxu0 %v24649_v17  ;;  %v24707_v16 = vld [vmem:[#allocation5 + $0x638] sm:$0xff]  }
  0xdc   :  { %22280 = vmatpush3.bf16.msra.mxu1 %v24648_v14  ;;  %16286 = vmatprep.mubr.bf16.mxu1 %v3790_v23  ;;  %v24705_v14 = vld [vmem:[#allocation5 + $0x6b0] sm:$0xff]   ;;  %v24708_v17 = vld [vmem:[#allocation5 + $0x6f8] sm:$0xff]  }
  0xdd   :  { %22281 = vmatprep.subr.bf16.mxu1 %v24651_v21  ;;  %v3791_v21 = vcombine.high %v56_v18, %v56_v18 }
  0xde   :  { %22260 = vmatpush3.bf16.msra.mxu0 %v24650_v19  ;;  %v3798_v19 = vrot.slane %v56_v18, %v26434_v34 }
  0xdf   :  { %22261 = vmatprep.subr.bf16.mxu0 %v24653_v24 }
  0xe0   :  { %22282 = vmatpush3.bf16.msra.mxu1 %v24652_v22  ;;  %v24710_v22 = vld [vmem:[#allocation5 + $0x740] sm:$0xff]   ;;  %v3806_v23 = vcombine.high %v3798_v19, %v3798_v19  ;;  %v3814_v24 = vrot.slane %v3798_v19, %v26434_v34  ;;  %v24747_v19 = vld [vmem:[#allocation5 + $0x848] sm:$0xff]  }
  0xe1   :  { %22283 = vmatprep.subr.bf16.mxu1 %v24655_v26  ;;  %v24712_v26 = vld [vmem:[#allocation5 + $0x7c0] sm:$0xff]  }
  0xe2   :  { %22262 = vmatpush3.bf16.msra.mxu0 %v24654_v25  ;;  %v26472_v25 = vrot.slane %v3791_v21, %v26434_v34  ;;  %v24749_v21 = vld [vmem:[#allocation5 + $0x8c8] sm:$0xff]  }
  0xe3   :  { %22263 = vmatprep.subr.bf16.mxu0 %v24657_v28  ;;  %v24711_v28 = vld [vmem:[#allocation5 + $0x700] sm:$0xff]  }
  0xe4   :  { %22284 = vmatpush3.bf16.msra.mxu1 %v24656_v27  ;;  %v3828_v27 = vrot.slane %v3806_v23, %v26434_v34  ;;  %v24751_v23 = vld [vmem:[#allocation5 + $0x850] sm:$0xff]  }
  0xe5   :  { %22285 = vmatprep.subr.bf16.mxu1 %v24659_v30  ;;  %v3836_v30 = vcombine.high %v3814_v24, %v3814_v24 }
  0xe6   :  { %22264 = vmatpush3.bf16.msra.mxu0 %v24658_v29  ;;  %v3807_v29 = vcombine.high %v26472_v25, %v26472_v25 }
  0xe7   :  { %22265 = vmatprep.subr.bf16.mxu0 %v24661_v32  ;;  %v3838_v32 = vcombine.high %v3828_v27, %v3828_v27 }
  0xe8   :  { %22286 = vmatpush3.bf16.msra.mxu1 %v24660_v31  ;;  %v24714_v31 = vld [vmem:[#allocation5 + $0x748] sm:$0xff]  }
  0xe9   :  { %22287 = vmatprep.subr.bf16.mxu1 %v24663_v35  ;;  %v3835_v35 = vrot.slane %v3807_v29, %v26434_v34  ;;  %v24757_v29 = vld [vmem:[#allocation5 + $0x8d8] sm:$0xff]  }
  0xea   :  { %22266 = vmatpush3.bf16.msra.mxu0 %v24662_v33  ;;  %v24713_v33 = vld [vmem:[#allocation5 + $0x780] sm:$0xff]  }
  0xeb   :  { %22267 = vmatprep.subr.bf16.mxu0 %v24665_v37  ;;  %v24715_v37 = vld [vmem:[#allocation5 + $0x708] sm:$0xff]  }
  0xec   :  { %22288 = vmatpush3.bf16.msra.mxu1 %v24664_v36  ;;  %v24716_v36 = vld [vmem:[#allocation5 + $0x7c8] sm:$0xff]  }
  0xed   :  { %22289 = vmatprep.subr.bf16.mxu1 %v24667_v39  ;;  %v24718_v39 = vld [vmem:[#allocation5 + $0x750] sm:$0xff]  }
  0xee   :  { %22268 = vmatpush3.bf16.msra.mxu0 %v24666_v38  ;;  %v3839_v38 = vcombine.high %v3835_v35, %v3835_v35 }
  0xef   :  { %22269 = vmatprep.subr.bf16.mxu0 %v24669_v41  ;;  %v24720_v41 = vld [vmem:[#allocation5 + $0x7d0] sm:$0xff]  }
  0xf0   :  { %22290 = vmatpush3.bf16.msra.mxu1 %v24668_v40  ;;  %v24717_v40 = vld [vmem:[#allocation5 + $0x788] sm:$0xff]  }
  0xf1   :  { %22291 = vmatprep.subr.bf16.mxu1 %v24671_v43  ;;  %v24722_v43 = vld [vmem:[#allocation5 + $0x758] sm:$0xff]  }
  0xf2   :  { %22270 = vmatpush3.bf16.msra.mxu0 %v24670_v42  ;;  %v24719_v42 = vld [vmem:[#allocation5 + $0x710] sm:$0xff]  }
  0xf3   :  { %22271 = vmatprep.subr.bf16.mxu0 %v24673_v45  ;;  %v24724_v45 = vld [vmem:[#allocation5 + $0x7d8] sm:$0xff]  }
  0xf4   :  { %22292 = vmatpush3.bf16.msra.mxu1 %v24672_v44  ;;  %v24721_v44 = vld [vmem:[#allocation5 + $0x790] sm:$0xff]  }
  0xf5   :  { %22293 = vmatprep.subr.bf16.mxu1 %v24675_v47  ;;  %v24726_v47 = vld [vmem:[#allocation5 + $0x760] sm:$0xff]  }
  0xf6   :  { %22272 = vmatpush3.bf16.msra.mxu0 %v24674_v46  ;;  %v24723_v46 = vld [vmem:[#allocation5 + $0x718] sm:$0xff]  }
  0xf7   :  { %22301 = vmatprep.subr.bf16.mxu0 %v24678_v50  ;;  %v24727_v50 = vld [vmem:[#allocation5 + $0x720] sm:$0xff]  }
  0xf8   :  { %22294 = vmatpush3.bf16.msra.mxu1 %v24677_v48  ;;  %v24725_v48 = vld [vmem:[#allocation5 + $0x798] sm:$0xff]  }
  0xf9   :  { %16247 = vmatmul.mubr.bf16.vlgmr.msra.gmra.mrb[20].mxu0 %v3772_v49  ;;  %22323 = vmatprep.subr.bf16.mxu1 %v24680_v52  ;;  %v24728_v49 = vld [vmem:[#allocation5 + $0x7e0] sm:$0xff]  }
  0xfa   :  { %22302 = vmatpush3.bf16.msra.mxu0 %v24679_v51  ;;  %16326 = vmatprep.mubr.bf16.mxu0 %v3828_v27  ;;  %v24730_v51 = vld [vmem:[#allocation5 + $0x768] sm:$0xff]   ;;  %v24729_v52 = vld [vmem:[#allocation5 + $0x7a0] sm:$0xff]   ;;  %v24755_v27 = vld [vmem:[#allocation5 + $0x858] sm:$0xff]  }
  0xfb   :  { %16287 = vmatmul.mubr.bf16.vlgmr.msra.gmra.mrb[20].mxu1 %v3788_v54  ;;  %22303 = vmatprep.subr.bf16.mxu0 %v24682_v55  ;;  %v20271_v54 = vld [vmem:[#allocation7] ss:$0 sm:$0xff]  ;;  %v24731_v55 = vld [vmem:[#allocation5 + $0x728] sm:$0xff]  }
  0xfc   :  { %22324 = vmatpush3.bf16.msra.mxu1 %v24681_v53  ;;  %16366 = vmatprep.mubr.bf16.mxu1 %v3838_v32  ;;  %v24732_v53 = vld [vmem:[#allocation5 + $0x7e8] sm:$0xff]   ;;  %v24760_v32 = vld [vmem:[#allocation5 + $0x820] sm:$0xff]  }
  0xfd   :  { %22325 = vmatprep.subr.bf16.mxu1 %v24684_v57  ;;  %v24734_v57 = vld [vmem:[#allocation5 + $0x770] sm:$0xff]  }
  0xfe   :  { %22304 = vmatpush3.bf16.msra.mxu0 %v24683_v56 }
  0xff   :  { %22305 = vmatprep.subr.bf16.mxu0 %v24686_v59  ;;  %v24733_v59 = vld [vmem:[#allocation5 + $0x7a8] sm:$0xff]  }
 0x100   :  { %22326 = vmatpush3.bf16.msra.mxu1 %v24685_v58 }
 0x101   :  { %22327 = vmatprep.subr.bf16.mxu1 %v24688_v61 }
 0x102   :  { %22306 = vmatpush3.bf16.msra.mxu0 %v24687_v60 }
 0x103   :  { %22307 = vmatprep.subr.bf16.mxu0 %v24690_v63  ;;  %v24735_v63 = vld [vmem:[#allocation5 + $0x730] sm:$0xff]  }
 0x104   :  { %22328 = vmatpush3.bf16.msra.mxu1 %v24689_v62 }
 0x105   :  { %22329 = vmatprep.subr.bf16.mxu1 %v24692_v1 }
 0x106   :  { %22308 = vmatpush3.bf16.msra.mxu0 %v24691_v0  ;;  %v24736_v0 = vld [vmem:[#allocation5 + $0x7f0] sm:$0xff]  }
 0x107   :  { %22309 = vmatprep.subr.bf16.mxu0 %v24694_v3  ;;  %v24737_v3 = vld [vmem:[#allocation5 + $0x7b0] sm:$0xff]  }
 0x108   :  { %22330 = vmatpush3.bf16.msra.mxu1 %v24693_v2 }
 0x109   :  { %22331 = vmatprep.subr.bf16.mxu1 %v24696_v5 }
 0x10a   :  { %22310 = vmatpush3.bf16.msra.mxu0 %v24695_v4 }
 0x10b   :  { %22311 = vmatprep.subr.bf16.mxu0 %v24698_v7 }
 0x10c   :  { %22332 = vmatpush3.bf16.msra.mxu1 %v24697_v6  ;;  %v24738_v6 = vld [vmem:[#allocation5 + $0x778] sm:$0xff]  }
 0x10d   :  { %22333 = vmatprep.subr.bf16.mxu1 %v24700_v9 }
 0x10e   :  { %22312 = vmatpush3.bf16.msra.mxu0 %v24699_v8  ;;  %v24739_v8 = vld [vmem:[#allocation5 + $0x738] sm:$0xff]  }
 0x10f   :  { %22313 = vmatprep.subr.bf16.mxu0 %v24702_v11  ;;  %v24740_v11 = vld [vmem:[#allocation5 + $0x7f8] sm:$0xff]  }
 0x110   :  { %22334 = vmatpush3.bf16.msra.mxu1 %v24701_v10 }
 0x111   :  { %22335 = vmatprep.subr.bf16.mxu1 %v24704_v13  ;;  %v3821_v13 = vrot.slane %v26472_v25, %v26434_v34  ;;  %v24753_v25 = vld [vmem:[#allocation5 + $0x8d0] sm:$0xff]  }
 0x112   :  { %22314 = vmatpush3.bf16.msra.mxu0 %v24703_v12  ;;  %v24742_v12 = vld [vmem:[#allocation5 + $0x7b8] sm:$0xff]  }
 0x113   :  { %22315 = vmatprep.subr.bf16.mxu0 %v24706_v15  ;;  %v24744_v15 = vld [vmem:[#allocation5 + $0x800] sm:$0xff]   ;;  %v3837_v18 = vcombine.high %v3821_v13, %v3821_v13 }
 0x114   :  { %22336 = vmatpush3.bf16.msra.mxu1 %v24705_v14  ;;  %v24743_v14 = vld [vmem:[#allocation5 + $0x840] sm:$0xff]  }
 0x115   :  { %22337 = vmatprep.subr.bf16.mxu1 %v24708_v17  ;;  %v24746_v17 = vld [vmem:[#allocation5 + $0x880] sm:$0xff]  }
 0x116   :  { %22316 = vmatpush3.bf16.msra.mxu0 %v24707_v16  ;;  %v24745_v16 = vld [vmem:[#allocation5 + $0x8c0] sm:$0xff]  }
 0x117   :  { %22345 = vmatprep.subr.bf16.mxu0 %v24710_v22  ;;  %v24750_v22 = vld [vmem:[#allocation5 + $0x888] sm:$0xff]  }
 0x118   :  { %22338 = vmatpush3.bf16.msra.mxu1 %v24709_v20  ;;  %v24748_v20 = vld [vmem:[#allocation5 + $0x808] sm:$0xff]  }
 0x119   :  { %22367 = vmatprep.subr.bf16.mxu1 %v24712_v26  ;;  %16327 = vmatmul.mubr.bf16.vlgmr.msra.gmra.mrb[24].mxu0 %v3814_v24  ;;  %v24752_v24 = vld [vmem:[#allocation5 + $0x810] sm:$0xff]  }
 0x11a   :  { %22346 = vmatpush3.bf16.msra.mxu0 %v24711_v28  ;;  %16406 = vmatprep.mubr.bf16.mxu0 %v3835_v35  ;;  %v24754_v26 = vld [vmem:[#allocation5 + $0x890] sm:$0xff]   ;;  %v24756_v28 = vld [vmem:[#allocation5 + $0x818] sm:$0xff]   ;;  %v24762_v35 = vld [vmem:[#allocation5 + $0x8a0] sm:$0xff]  }
 0x11b   :  { %16367 = vmatmul.mubr.bf16.vlgmr.msra.gmra.mrb[24].mxu1 %v3836_v30  ;;  %22347 = vmatprep.subr.bf16.mxu0 %v24714_v31  ;;  %v24758_v30 = vld [vmem:[#allocation5 + $0x898] sm:$0xff]   ;;  %v24759_v31 = vld [vmem:[#allocation5 + $0x860] sm:$0xff]  }
 0x11c   :  { %22368 = vmatpush3.bf16.msra.mxu1 %v24713_v33  ;;  %16446 = vmatprep.mubr.bf16.mxu1 %v3839_v38  ;;  %v24761_v33 = vld [vmem:[#allocation5 + $0x8e0] sm:$0xff]   ;;  %v24765_v38 = vld [vmem:[#allocation5 + $0x8e8] sm:$0xff]  }
 0x11d   :  { %22369 = vmatprep.subr.bf16.mxu1 %v24716_v36  ;;  %v24763_v36 = vld [vmem:[#allocation5 + $0x868] sm:$0xff]  }
 0x11e   :  { %22348 = vmatpush3.bf16.msra.mxu0 %v24715_v37  ;;  %v24764_v37 = vld [vmem:[#allocation5 + $0x828] sm:$0xff]  }
 0x11f   :  { %22349 = vmatprep.subr.bf16.mxu0 %v24718_v39  ;;  %v24766_v39 = vld [vmem:[#allocation5 + $0x8a8] sm:$0xff]  }
 0x120   :  { %22370 = vmatpush3.bf16.msra.mxu1 %v24717_v40 }
 0x121   :  { %22371 = vmatprep.subr.bf16.mxu1 %v24720_v41  ;;  %v24767_v41 = vld [vmem:[#allocation5 + $0x870] sm:$0xff]  }
 0x122   :  { %22350 = vmatpush3.bf16.msra.mxu0 %v24719_v42 }
 0x123   :  { %22351 = vmatprep.subr.bf16.mxu0 %v24722_v43  ;;  %v24768_v43 = vld [vmem:[#allocation5 + $0x830] sm:$0xff]  }
 0x124   :  { %22372 = vmatpush3.bf16.msra.mxu1 %v24721_v44 }
 0x125   :  { %22373 = vmatprep.subr.bf16.mxu1 %v24724_v45 }
 0x126   :  { %22352 = vmatpush3.bf16.msra.mxu0 %v24723_v46 }
 0x127   :  { %22353 = vmatprep.subr.bf16.mxu0 %v24726_v47 }
 0x128   :  { %22374 = vmatpush3.bf16.msra.mxu1 %v24725_v48 }
 0x129   :  { %22375 = vmatprep.subr.bf16.mxu1 %v24728_v49  ;;  %v24769_v49 = vld [vmem:[#allocation5 + $0x8f0] sm:$0xff]  }
 0x12a   :  { %22354 = vmatpush3.bf16.msra.mxu0 %v24727_v50  ;;  %v24770_v50 = vld [vmem:[#allocation5 + $0x8b0] sm:$0xff]  }
 0x12b   :  { %22355 = vmatprep.subr.bf16.mxu0 %v24730_v51 }
 0x12c   :  { %v22053_v56 = vpop.f32.mrb[0].mxu0  ;;  %22376 = vmatpush3.bf16.msra.mxu1 %v24729_v52 }
 0x12d   :  { %v22054_v58 = vpop.f32.mrb[1].mxu0  ;;  %22377 = vmatprep.subr.bf16.mxu1 %v24732_v53  ;;  %v24771_v53 = vld [vmem:[#allocation5 + $0x878] sm:$0xff]  }
 0x12e   :  { %v22055_v60 = vadd.f32 %v22054_v58, %v22053_v56  ;;  %v22056_v61 = vpop.f32.mrb[2].mxu0  ;;  %v22075_v62 = vpop.f32.mrb[0].mxu1  ;;  %22356 = vmatpush3.bf16.msra.mxu0 %v24731_v55  ;;  %v24772_v56 = vld [vmem:[#allocation5 + $0x838] sm:$0xff]  }
 0x12f   :  { %v22057_v1 = vpop.f32.mrb[3].mxu0  ;;  %v22076_v2 = vpop.f32.mrb[1].mxu1  ;;  %22357 = vmatprep.subr.bf16.mxu0 %v24734_v57  ;;  %v24773_v58 = vld [vmem:[#allocation5 + $0x8f8] sm:$0xff]  }
 0x130   :  { %v15849_v4 = vadd.f32 %v22055_v60, %v20271_v54  ;;  %v22077_v5 = vadd.f32 %v22076_v2, %v22075_v62  ;;  %v22078_v7 = vpop.f32.mrb[2].mxu1  ;;  %22378 = vmatpush3.bf16.msra.mxu1 %v24733_v59  ;;  %v57_v59 = vld [vmem:[#allocation2 + $0x20] sm:$0xff]  ;;  %v24774_v61 = vld [vmem:[#allocation5 + $0x8b8] sm:$0xff]  }
 0x131   :  { %v22079_v9 = vpop.f32.mrb[3].mxu1  ;;  %22379 = vmatprep.subr.bf16.mxu1 %v24736_v0  ;;  %v3847_v60 = vrot.slane %v57_v59, %v26434_v34  ;;  %v3840_v62 = vcombine.high %v57_v59, %v57_v59  ;;  %v24776_v2 = vld [vmem:[#allocation5 + $0x900] sm:$0xff]   ;;  %v24812_v59 = vld [vmem:[#allocation5 + $0xa48] sm:$0xff]  }
 0x132   :  { %v26478_v10 = vadd.f32 %v22077_v5, %v15849_v4  ;;  %22358 = vmatpush3.bf16.msra.mxu0 %v24735_v63  ;;  %v24775_v63 = vld [vmem:[#allocation5 + $0x940] sm:$0xff]   ;;  %v24779_v9 = vld [vmem:[#allocation5 + $0x948] sm:$0xff]  }
 0x133   :  { %22359 = vmatprep.subr.bf16.mxu0 %v24738_v6  ;;  %v3855_v0 = vcombine.high %v3847_v60, %v3847_v60  ;;  %v3863_v1 = vrot.slane %v3847_v60, %v26434_v34  ;;  %v24777_v4 = vld [vmem:[#allocation5 + $0x9c0] sm:$0xff]   ;;  %v24813_v60 = vld [vmem:[#allocation5 + $0xa08] sm:$0xff]  }
 0x134   :  { %22380 = vmatpush3.bf16.msra.mxu1 %v24737_v3  ;;  %v26488_v3 = vrot.slane %v3840_v62, %v26434_v34  ;;  %v24778_v6 = vld [vmem:[#allocation5 + $0x980] sm:$0xff]   ;;  %v24815_v62 = vld [vmem:[#allocation5 + $0xa88] sm:$0xff]  }
 0x135   :  { %22381 = vmatprep.subr.bf16.mxu1 %v24740_v11  ;;  %v3877_v5 = vrot.slane %v3855_v0, %v26434_v34  ;;  %v24780_v11 = vld [vmem:[#allocation5 + $0x908] sm:$0xff]   ;;  %v24817_v0 = vld [vmem:[#allocation5 + $0xa10] sm:$0xff]  }
 0x136   :  { %22360 = vmatpush3.bf16.msra.mxu0 %v24739_v8  ;;  %v3856_v7 = vcombine.high %v26488_v3, %v26488_v3  ;;  %v3885_v8 = vcombine.high %v3863_v1, %v3863_v1 }
 0x137   :  { %22389 = vmatprep.subr.bf16.mxu0 %v24743_v14  ;;  %v24782_v14 = vld [vmem:[#allocation5 + $0x988] sm:$0xff]  }
 0x138   :  { %22382 = vmatpush3.bf16.msra.mxu1 %v24742_v12  ;;  %v3884_v12 = vrot.slane %v3856_v7, %v26434_v34  ;;  %v24824_v7 = vld [vmem:[#allocation5 + $0xa60] sm:$0xff]  }
 0x139   :  { %16407 = vmatmul.mubr.bf16.vlgmr.msra.gmra.mrb[28].mxu0 %v3821_v13  ;;  %22411 = vmatprep.subr.bf16.mxu1 %v24745_v16  ;;  %v24781_v13 = vld [vmem:[#allocation5 + $0x9c8] sm:$0xff]   ;;  %v24783_v16 = vld [vmem:[#allocation5 + $0x950] sm:$0xff]  }
 0x13a   :  { %22390 = vmatpush3.bf16.msra.mxu0 %v24744_v15  ;;  %16486 = vmatprep.mubr.bf16.mxu0 %v3877_v5  ;;  %v3888_v15 = vcombine.high %v3884_v12, %v3884_v12 }
 0x13b   :  { %16447 = vmatmul.mubr.bf16.vlgmr.msra.gmra.mrb[28].mxu1 %v3837_v18  ;;  %22391 = vmatprep.subr.bf16.mxu0 %v24747_v19  ;;  %v24785_v18 = vld [vmem:[#allocation5 + $0x9d0] sm:$0xff]  }
 0x13c   :  { %22412 = vmatpush3.bf16.msra.mxu1 %v24746_v17  ;;  %v24784_v17 = vld [vmem:[#allocation5 + $0x910] sm:$0xff]  }
 0x13d   :  { %22413 = vmatprep.subr.bf16.mxu1 %v24749_v21  ;;  %v24786_v19 = vld [vmem:[#allocation5 + $0x990] sm:$0xff]   ;;  %v24788_v21 = vld [vmem:[#allocation5 + $0x918] sm:$0xff]  }
 0x13e   :  { %22392 = vmatpush3.bf16.msra.mxu0 %v24748_v20  ;;  %v24787_v20 = vld [vmem:[#allocation5 + $0x958] sm:$0xff]  }
 0x13f   :  { %22393 = vmatprep.subr.bf16.mxu0 %v24751_v23  ;;  %v24790_v23 = vld [vmem:[#allocation5 + $0x998] sm:$0xff]  }
 0x140   :  { %22414 = vmatpush3.bf16.msra.mxu1 %v24750_v22  ;;  %v24789_v22 = vld [vmem:[#allocation5 + $0x9d8] sm:$0xff]  }
 0x141   :  { %22415 = vmatprep.subr.bf16.mxu1 %v24753_v25  ;;  %v24792_v25 = vld [vmem:[#allocation5 + $0x920] sm:$0xff]  }
 0x142   :  { %22394 = vmatpush3.bf16.msra.mxu0 %v24752_v24  ;;  %v24791_v24 = vld [vmem:[#allocation5 + $0x960] sm:$0xff]  }
 0x143   :  { %22395 = vmatprep.subr.bf16.mxu0 %v24755_v27  ;;  %v24794_v27 = vld [vmem:[#allocation5 + $0x9a0] sm:$0xff]  }
 0x144   :  { %22416 = vmatpush3.bf16.msra.mxu1 %v24754_v26  ;;  %v24793_v26 = vld [vmem:[#allocation5 + $0x9e0] sm:$0xff]  }
 0x145   :  { %22417 = vmatprep.subr.bf16.mxu1 %v24757_v29  ;;  %v24796_v29 = vld [vmem:[#allocation5 + $0x928] sm:$0xff]  }
 0x146   :  { %22396 = vmatpush3.bf16.msra.mxu0 %v24756_v28  ;;  %v24795_v28 = vld [vmem:[#allocation5 + $0x968] sm:$0xff]  }
 0x147   :  { %22397 = vmatprep.subr.bf16.mxu0 %v24759_v31 }
 0x148   :  { %22418 = vmatpush3.bf16.msra.mxu1 %v24758_v30  ;;  %v24797_v30 = vld [vmem:[#allocation5 + $0x9e8] sm:$0xff]  }
 0x149   :  { %22419 = vmatprep.subr.bf16.mxu1 %v24761_v33 }
 0x14a   :  { %22398 = vmatpush3.bf16.msra.mxu0 %v24760_v32  ;;  %v24798_v32 = vld [vmem:[#allocation5 + $0x9a8] sm:$0xff]  }
 0x14b   :  { %22399 = vmatprep.subr.bf16.mxu0 %v24763_v36 }
 0x14c   :  { %v22097_v40 = vpop.f32.mrb[4].mxu0  ;;  %22420 = vmatpush3.bf16.msra.mxu1 %v24762_v35  ;;  %v24799_v35 = vld [vmem:[#allocation5 + $0x970] sm:$0xff]  }
 0x14d   :  { %v22098_v42 = vpop.f32.mrb[5].mxu0  ;;  %22421 = vmatprep.subr.bf16.mxu1 %v24765_v38 }
 0x14e   :  { %v22099_v44 = vadd.f32 %v22098_v42, %v22097_v40  ;;  %v22100_v45 = vpop.f32.mrb[6].mxu0  ;;  %v22119_v46 = vpop.f32.mrb[4].mxu1  ;;  %22400 = vmatpush3.bf16.msra.mxu0 %v24764_v37  ;;  %v24801_v40 = vld [vmem:[#allocation5 + $0x9f0] sm:$0xff]  }
 0x14f   :  { %v22101_v47 = vpop.f32.mrb[7].mxu0  ;;  %v22120_v48 = vpop.f32.mrb[5].mxu1  ;;  %22401 = vmatprep.subr.bf16.mxu0 %v24767_v41  ;;  %v24802_v45 = vld [vmem:[#allocation5 + $0x9b0] sm:$0xff]  }
 0x150   :  { %v15929_v51 = vadd.f32 %v22099_v44, %v26478_v10  ;;  %v22121_v52 = vadd.f32 %v22120_v48, %v22119_v46  ;;  %22422 = vmatpush3.bf16.msra.mxu1 %v24766_v39  ;;  %v22122_v54 = vpop.f32.mrb[6].mxu1  ;;  %v3887_v10 = vcombine.high %v3877_v5, %v3877_v5  ;;  %v24800_v39 = vld [vmem:[#allocation5 + $0x930] sm:$0xff]   ;;  %v24803_v47 = vld [vmem:[#allocation5 + $0x978] sm:$0xff]  }
 0x151   :  { %22423 = vmatprep.subr.bf16.mxu1 %v24769_v49  ;;  %v22123_v57 = vpop.f32.mrb[7].mxu1  ;;  %v24808_v54 = vld [vmem:[#allocation5 + $0xa40] sm:$0xff]   ;;  %v24822_v5 = vld [vmem:[#allocation5 + $0xad8] sm:$0xff]  }
 0x152   :  { %v26483_v55 = vadd.f32 %v22121_v52, %v15929_v51  ;;  %22402 = vmatpush3.bf16.msra.mxu0 %v24768_v43  ;;  %16526 = vmatprep.mubr.bf16.mxu1 %v3887_v10  ;;  %v24805_v51 = vld [vmem:[#allocation5 + $0x9f8] sm:$0xff]   ;;  %v24811_v57 = vld [vmem:[#allocation5 + $0xa80] sm:$0xff]  }
 0x153   :  { %22403 = vmatprep.subr.bf16.mxu0 %v24771_v53  ;;  %v24807_v52 = vld [vmem:[#allocation5 + $0x9b8] sm:$0xff]   ;;  %v3870_v53 = vrot.slane %v26488_v3, %v26434_v34  ;;  %v24827_v10 = vld [vmem:[#allocation5 + $0xaa0] sm:$0xff]  }
 0x154   :  { %22424 = vmatpush3.bf16.msra.mxu1 %v24770_v50  ;;  %v24804_v50 = vld [vmem:[#allocation5 + $0x938] sm:$0xff]  }
 0x155   :  { %22425 = vmatprep.subr.bf16.mxu1 %v24773_v58  ;;  %v3886_v58 = vcombine.high %v3870_v53, %v3870_v53  ;;  %v24820_v3 = vld [vmem:[#allocation5 + $0xa58] sm:$0xff]  }
 0x156   :  { %22404 = vmatpush3.bf16.msra.mxu0 %v24772_v56  ;;  %v24810_v56 = vld [vmem:[#allocation5 + $0xac0] sm:$0xff]  }
 0x157   :  { %22433 = vmatprep.subr.bf16.mxu0 %v24775_v63  ;;  %v24816_v63 = vld [vmem:[#allocation5 + $0xa50] sm:$0xff]  }
 0x158   :  { %22426 = vmatpush3.bf16.msra.mxu1 %v24774_v61  ;;  %v24814_v61 = vld [vmem:[#allocation5 + $0xac8] sm:$0xff]  }
 0x159   :  { %22455 = vmatprep.subr.bf16.mxu1 %v24777_v4  ;;  %16487 = vmatmul.mubr.bf16.vlgmr.msra.gmra.mrb[32].mxu0 %v3863_v1  ;;  %v24818_v1 = vld [vmem:[#allocation5 + $0xad0] sm:$0xff]   ;;  %v24821_v4 = vld [vmem:[#allocation5 + $0xa18] sm:$0xff]  }
 0x15a   :  { %22434 = vmatpush3.bf16.msra.mxu0 %v24776_v2  ;;  %16566 = vmatprep.mubr.bf16.mxu0 %v3884_v12  ;;  %v24819_v2 = vld [vmem:[#allocation5 + $0xa90] sm:$0xff]   ;;  %v24829_v12 = vld [vmem:[#allocation5 + $0xa28] sm:$0xff]  }
 0x15b   :  { %16527 = vmatmul.mubr.bf16.vlgmr.msra.gmra.mrb[32].mxu1 %v3885_v8  ;;  %22435 = vmatprep.subr.bf16.mxu0 %v24779_v9  ;;  %v24825_v8 = vld [vmem:[#allocation5 + $0xa20] sm:$0xff]  }
 0x15c   :  { %22456 = vmatpush3.bf16.msra.mxu1 %v24778_v6  ;;  %16606 = vmatprep.mubr.bf16.mxu1 %v3888_v15  ;;  %v24823_v6 = vld [vmem:[#allocation5 + $0xa98] sm:$0xff]   ;;  %v24826_v9 = vld [vmem:[#allocation5 + $0xae0] sm:$0xff]   ;;  %v24831_v15 = vld [vmem:[#allocation5 + $0xaa8] sm:$0xff]  }
 0x15d   :  { %22457 = vmatprep.subr.bf16.mxu1 %v24781_v13  ;;  %v24830_v13 = vld [vmem:[#allocation5 + $0xae8] sm:$0xff]  }
 0x15e   :  { %22436 = vmatpush3.bf16.msra.mxu0 %v24780_v11  ;;  %v24828_v11 = vld [vmem:[#allocation5 + $0xa68] sm:$0xff]  }
 0x15f   :  { %22437 = vmatprep.subr.bf16.mxu0 %v24783_v16 }
 0x160   :  { %22458 = vmatpush3.bf16.msra.mxu1 %v24782_v14 }
 0x161   :  { %22459 = vmatprep.subr.bf16.mxu1 %v24785_v18 }
 0x162   :  { %22438 = vmatpush3.bf16.msra.mxu0 %v24784_v17  ;;  %v24832_v17 = vld [vmem:[#allocation5 + $0xa70] sm:$0xff]  }
 0x163   :  { %22439 = vmatprep.subr.bf16.mxu0 %v24787_v20 }
 0x164   :  { %22460 = vmatpush3.bf16.msra.mxu1 %v24786_v19 }
 0x165   :  { %22461 = vmatprep.subr.bf16.mxu1 %v24789_v22 }
 0x166   :  { %22440 = vmatpush3.bf16.msra.mxu0 %v24788_v21 }
 0x167   :  { %22441 = vmatprep.subr.bf16.mxu0 %v24791_v24  ;;  %v24834_v24 = vld [vmem:[#allocation5 + $0xaf0] sm:$0xff]  }
 0x168   :  { %22462 = vmatpush3.bf16.msra.mxu1 %v24790_v23  ;;  %v24833_v23 = vld [vmem:[#allocation5 + $0xa30] sm:$0xff]  }
 0x169   :  { %22463 = vmatprep.subr.bf16.mxu1 %v24793_v26 }
 0x16a   :  { %22442 = vmatpush3.bf16.msra.mxu0 %v24792_v25 }
 0x16b   :  { %22443 = vmatprep.subr.bf16.mxu0 %v24795_v28 }
 0x16c   :  { %v22141_v31 = vpop.f32.mrb[8].mxu0  ;;  %22464 = vmatpush3.bf16.msra.mxu1 %v24794_v27  ;;  %v24835_v27 = vld [vmem:[#allocation5 + $0xab0] sm:$0xff]  }
 0x16d   :  { %v22142_v33 = vpop.f32.mrb[9].mxu0  ;;  %22465 = vmatprep.subr.bf16.mxu1 %v24797_v30  ;;  %v24836_v30 = vld [vmem:[#allocation5 + $0xa78] sm:$0xff]  }
 0x16e   :  { %v22143_v36 = vadd.f32 %v22142_v33, %v22141_v31  ;;  %v22144_v37 = vpop.f32.mrb[10].mxu0  ;;  %v22163_v38 = vpop.f32.mrb[8].mxu1  ;;  %22444 = vmatpush3.bf16.msra.mxu0 %v24796_v29  ;;  %v24838_v33 = vld [vmem:[#allocation5 + $0xaf8] sm:$0xff]  }
 0x16f   :  { %v22145_v41 = vpop.f32.mrb[11].mxu0  ;;  %v22164_v42 = vpop.f32.mrb[9].mxu1  ;;  %22445 = vmatprep.subr.bf16.mxu0 %v24799_v35  ;;  %v58_v35 = vld [vmem:[#allocation2 + $0x28] sm:$0xff]  ;;  %v24839_v37 = vld [vmem:[#allocation5 + $0xab8] sm:$0xff]  }
 0x170   :  { %v16009_v43 = vadd.f32 %v22143_v36, %v26483_v55  ;;  %v22165_v44 = vadd.f32 %v22164_v42, %v22163_v38  ;;  %v22166_v46 = vpop.f32.mrb[10].mxu1  ;;  %22466 = vmatpush3.bf16.msra.mxu1 %v24798_v32  ;;  %v24809_v55 = vld [vmem:[#allocation5 + $0xa00] sm:$0xff]   ;;  %v24837_v32 = vld [vmem:[#allocation5 + $0xa38] sm:$0xff]   ;;  %v3896_v36 = vrot.slane %v58_v35, %v26434_v34  ;;  %v3889_v38 = vcombine.high %v58_v35, %v58_v35  ;;  %v24877_v35 = vld [vmem:[#allocation5 + $0xc48] sm:$0xff]  }
 0x171   :  { %v22167_v48 = vpop.f32.mrb[11].mxu1  ;;  %22467 = vmatprep.subr.bf16.mxu1 %v24801_v40 }
 0x172   :  { %v26495_v49 = vadd.f32 %v22165_v44, %v16009_v43  ;;  %22446 = vmatpush3.bf16.msra.mxu0 %v24800_v39  ;;  %v24840_v39 = vld [vmem:[#allocation5 + $0xb40] sm:$0xff]   ;;  %v3904_v40 = vcombine.high %v3896_v36, %v3896_v36  ;;  %v3912_v41 = vrot.slane %v3896_v36, %v26434_v34  ;;  %v26505_v42 = vrot.slane %v3889_v38, %v26434_v34  ;;  %v24844_v48 = vld [vmem:[#allocation5 + $0xb48] sm:$0xff]  }
 0x173   :  { %22447 = vmatprep.subr.bf16.mxu0 %v24803_v47  ;;  %v24842_v43 = vld [vmem:[#allocation5 + $0xbc0] sm:$0xff]   ;;  %v24878_v36 = vld [vmem:[#allocation5 + $0xc08] sm:$0xff]  }
 0x174   :  { %22468 = vmatpush3.bf16.msra.mxu1 %v24802_v45  ;;  %v3926_v44 = vrot.slane %v3904_v40, %v26434_v34  ;;  %v24841_v45 = vld [vmem:[#allocation5 + $0xb00] sm:$0xff]   ;;  %v3905_v46 = vcombine.high %v26505_v42, %v26505_v42  ;;  %v3934_v47 = vcombine.high %v3912_v41, %v3912_v41  ;;  %v24880_v38 = vld [vmem:[#allocation5 + $0xc88] sm:$0xff]   ;;  %v24882_v40 = vld [vmem:[#allocation5 + $0xc10] sm:$0xff]  }
 0x175   :  { %22469 = vmatprep.subr.bf16.mxu1 %v24805_v51 }
 0x176   :  { %22448 = vmatpush3.bf16.msra.mxu0 %v24804_v50  ;;  %v24843_v50 = vld [vmem:[#allocation5 + $0xb80] sm:$0xff]   ;;  %v3933_v51 = vrot.slane %v3905_v46, %v26434_v34  ;;  %v24888_v46 = vld [vmem:[#allocation5 + $0xc98] sm:$0xff]  }
 0x177   :  { %22477 = vmatprep.subr.bf16.mxu0 %v24808_v54 }
 0x178   :  { %22470 = vmatpush3.bf16.msra.mxu1 %v24807_v52  ;;  %v24846_v52 = vld [vmem:[#allocation5 + $0xbc8] sm:$0xff]   ;;  %v3937_v54 = vcombine.high %v3933_v51, %v3933_v51 }
 0x179   :  { %16567 = vmatmul.mubr.bf16.vlgmr.msra.gmra.mrb[36].mxu0 %v3870_v53  ;;  %22499 = vmatprep.subr.bf16.mxu1 %v24810_v56  ;;  %v24845_v53 = vld [vmem:[#allocation5 + $0xb08] sm:$0xff]  }
 0x17a   :  { %22478 = vmatpush3.bf16.msra.mxu0 %v24809_v55  ;;  %16646 = vmatprep.mubr.bf16.mxu0 %v3926_v44  ;;  %v24848_v55 = vld [vmem:[#allocation5 + $0xb50] sm:$0xff]   ;;  %v24847_v56 = vld [vmem:[#allocation5 + $0xb88] sm:$0xff]  }
 0x17b   :  { %16607 = vmatmul.mubr.bf16.vlgmr.msra.gmra.mrb[36].mxu1 %v3886_v58  ;;  %22479 = vmatprep.subr.bf16.mxu0 %v24812_v59  ;;  %v24849_v58 = vld [vmem:[#allocation5 + $0xb10] sm:$0xff]   ;;  %v24852_v59 = vld [vmem:[#allocation5 + $0xb58] sm:$0xff]  }
 0x17c   :  { %22500 = vmatpush3.bf16.msra.mxu1 %v24811_v57  ;;  %v24850_v57 = vld [vmem:[#allocation5 + $0xbd0] sm:$0xff]  }
 0x17d   :  { %22501 = vmatprep.subr.bf16.mxu1 %v24814_v61  ;;  %v24854_v61 = vld [vmem:[#allocation5 + $0xbd8] sm:$0xff]  }
 0x17e   :  { %22480 = vmatpush3.bf16.msra.mxu0 %v24813_v60  ;;  %v24851_v60 = vld [vmem:[#allocation5 + $0xb90] sm:$0xff]  }
 0x17f   :  { %22481 = vmatprep.subr.bf16.mxu0 %v24816_v63  ;;  %v24856_v63 = vld [vmem:[#allocation5 + $0xb60] sm:$0xff]  }
 0x180   :  { %22502 = vmatpush3.bf16.msra.mxu1 %v24815_v62  ;;  %v24853_v62 = vld [vmem:[#allocation5 + $0xb18] sm:$0xff]  }
 0x181   :  { %22503 = vmatprep.subr.bf16.mxu1 %v24818_v1  ;;  %v24858_v1 = vld [vmem:[#allocation5 + $0xbe0] sm:$0xff]  }
 0x182   :  { %22482 = vmatpush3.bf16.msra.mxu0 %v24817_v0  ;;  %v24855_v0 = vld [vmem:[#allocation5 + $0xb98] sm:$0xff]  }
 0x183   :  { %22483 = vmatprep.subr.bf16.mxu0 %v24820_v3  ;;  %v24860_v3 = vld [vmem:[#allocation5 + $0xb68] sm:$0xff]  }
 0x184   :  { %22504 = vmatpush3.bf16.msra.mxu1 %v24819_v2  ;;  %v24857_v2 = vld [vmem:[#allocation5 + $0xb20] sm:$0xff]  }
 0x185   :  { %22505 = vmatprep.subr.bf16.mxu1 %v24822_v5 }
 0x186   :  { %22484 = vmatpush3.bf16.msra.mxu0 %v24821_v4  ;;  %v24859_v4 = vld [vmem:[#allocation5 + $0xba0] sm:$0xff]  }
 0x187   :  { %22485 = vmatprep.subr.bf16.mxu0 %v24824_v7 }
 0x188   :  { %22506 = vmatpush3.bf16.msra.mxu1 %v24823_v6  ;;  %v24862_v6 = vld [vmem:[#allocation5 + $0xbe8] sm:$0xff]  }
 0x189   :  { %22507 = vmatprep.subr.bf16.mxu1 %v24826_v9 }
 0x18a   :  { %22486 = vmatpush3.bf16.msra.mxu0 %v24825_v8  ;;  %v24861_v8 = vld [vmem:[#allocation5 + $0xb28] sm:$0xff]  }
 0x18b   :  { %22487 = vmatprep.subr.bf16.mxu0 %v24828_v11 }
 0x18c   :  { %v22185_v14 = vpop.f32.mrb[12].mxu0  ;;  %22508 = vmatpush3.bf16.msra.mxu1 %v24827_v10 }
 0x18d   :  { %v22186_v16 = vpop.f32.mrb[13].mxu0  ;;  %22509 = vmatprep.subr.bf16.mxu1 %v24830_v13  ;;  %v24864_v13 = vld [vmem:[#allocation5 + $0xb70] sm:$0xff]  }
 0x18e   :  { %v22187_v18 = vadd.f32 %v22186_v16, %v22185_v14  ;;  %v22188_v19 = vpop.f32.mrb[14].mxu0  ;;  %v22207_v20 = vpop.f32.mrb[12].mxu1  ;;  %22488 = vmatpush3.bf16.msra.mxu0 %v24829_v12  ;;  %v24863_v12 = vld [vmem:[#allocation5 + $0xba8] sm:$0xff]   ;;  %v24865_v16 = vld [vmem:[#allocation5 + $0xb30] sm:$0xff]  }
 0x18f   :  { %v22189_v21 = vpop.f32.mrb[15].mxu0  ;;  %v22208_v22 = vpop.f32.mrb[13].mxu1  ;;  %22489 = vmatprep.subr.bf16.mxu0 %v24832_v17  ;;  %v24866_v19 = vld [vmem:[#allocation5 + $0xbf0] sm:$0xff]  }
 0x190   :  { %v16089_v25 = vadd.f32 %v22187_v18, %v26495_v49  ;;  %v22209_v26 = vadd.f32 %v22208_v22, %v22207_v20  ;;  %v22210_v28 = vpop.f32.mrb[14].mxu1  ;;  %22510 = vmatpush3.bf16.msra.mxu1 %v24831_v15  ;;  %v3936_v49 = vcombine.high %v3926_v44, %v3926_v44  ;;  %v24867_v21 = vld [vmem:[#allocation5 + $0xbb0] sm:$0xff]   ;;  %v24886_v44 = vld [vmem:[#allocation5 + $0xc18] sm:$0xff]  }
 0x191   :  { %v22211_v31 = vpop.f32.mrb[15].mxu1  ;;  %22511 = vmatprep.subr.bf16.mxu1 %v24834_v24  ;;  %v24868_v24 = vld [vmem:[#allocation5 + $0xb78] sm:$0xff]   ;;  %v3919_v28 = vrot.slane %v26505_v42, %v26434_v34  ;;  %v24884_v42 = vld [vmem:[#allocation5 + $0xc90] sm:$0xff]  }
 0x192   :  { %v26500_v29 = vadd.f32 %v22209_v26, %v16089_v25  ;;  %22490 = vmatpush3.bf16.msra.mxu0 %v24833_v23  ;;  %16686 = vmatprep.mubr.bf16.mxu1 %v3936_v49  ;;  %v24869_v25 = vld [vmem:[#allocation5 + $0xb38] sm:$0xff]   ;;  %v24875_v31 = vld [vmem:[#allocation5 + $0xcc0] sm:$0xff]  }
 0x193   :  { %22491 = vmatprep.subr.bf16.mxu0 %v24836_v30  ;;  %v24870_v26 = vld [vmem:[#allocation5 + $0xbf8] sm:$0xff]   ;;  %v24874_v30 = vld [vmem:[#allocation5 + $0xc00] sm:$0xff]  }
 0x194   :  { %22512 = vmatpush3.bf16.msra.mxu1 %v24835_v27  ;;  %v24872_v27 = vld [vmem:[#allocation5 + $0xbb8] sm:$0xff]   ;;  %v24891_v49 = vld [vmem:[#allocation5 + $0xce0] sm:$0xff]  }
 0x195   :  { %22513 = vmatprep.subr.bf16.mxu1 %v24838_v33  ;;  %v3935_v33 = vcombine.high %v3919_v28, %v3919_v28 }
 0x196   :  { %22492 = vmatpush3.bf16.msra.mxu0 %v24837_v32  ;;  %v24876_v32 = vld [vmem:[#allocation5 + $0xc80] sm:$0xff]  }
 0x197   :  { %22521 = vmatprep.subr.bf16.mxu0 %v24840_v39  ;;  %v24881_v39 = vld [vmem:[#allocation5 + $0xc50] sm:$0xff]  }
 0x198   :  { %22514 = vmatpush3.bf16.msra.mxu1 %v24839_v37  ;;  %v24879_v37 = vld [vmem:[#allocation5 + $0xcc8] sm:$0xff]  }
 0x199   :  { %22543 = vmatprep.subr.bf16.mxu1 %v24842_v43  ;;  %16647 = vmatmul.mubr.bf16.vlgmr.msra.gmra.mrb[40].mxu0 %v3912_v41  ;;  %v24883_v41 = vld [vmem:[#allocation5 + $0xcd0] sm:$0xff]   ;;  %v24885_v43 = vld [vmem:[#allocation5 + $0xc58] sm:$0xff]  }
 0x19a   :  { %22522 = vmatpush3.bf16.msra.mxu0 %v24841_v45  ;;  %16726 = vmatprep.mubr.bf16.mxu0 %v3933_v51  ;;  %v24887_v45 = vld [vmem:[#allocation5 + $0xcd8] sm:$0xff]   ;;  %v24893_v51 = vld [vmem:[#allocation5 + $0xc68] sm:$0xff]  }
 0x19b   :  { %16687 = vmatmul.mubr.bf16.vlgmr.msra.gmra.mrb[40].mxu1 %v3934_v47  ;;  %22523 = vmatprep.subr.bf16.mxu0 %v24844_v48  ;;  %v24889_v47 = vld [vmem:[#allocation5 + $0xc60] sm:$0xff]  }
 0x19c   :  { %22544 = vmatpush3.bf16.msra.mxu1 %v24843_v50  ;;  %16766 = vmatprep.mubr.bf16.mxu1 %v3937_v54  ;;  %v24890_v48 = vld [vmem:[#allocation5 + $0xc20] sm:$0xff]   ;;  %v24895_v54 = vld [vmem:[#allocation5 + $0xce8] sm:$0xff]  }
 0x19d   :  { %22545 = vmatprep.subr.bf16.mxu1 %v24846_v52  ;;  %v24892_v50 = vld [vmem:[#allocation5 + $0xca0] sm:$0xff]   ;;  %v24894_v52 = vld [vmem:[#allocation5 + $0xc28] sm:$0xff]  }
 0x19e   :  { %22524 = vmatpush3.bf16.msra.mxu0 %v24845_v53 }
 0x19f   :  { %22525 = vmatprep.subr.bf16.mxu0 %v24848_v55 }
 0x1a0   :  { %22546 = vmatpush3.bf16.msra.mxu1 %v24847_v56  ;;  %v24896_v56 = vld [vmem:[#allocation5 + $0xca8] sm:$0xff]  }
 0x1a1   :  { %22547 = vmatprep.subr.bf16.mxu1 %v24850_v57 }
 0x1a2   :  { %22526 = vmatpush3.bf16.msra.mxu0 %v24849_v58 }
 0x1a3   :  { %22527 = vmatprep.subr.bf16.mxu0 %v24852_v59 }
 0x1a4   :  { %22548 = vmatpush3.bf16.msra.mxu1 %v24851_v60 }
 0x1a5   :  { %22549 = vmatprep.subr.bf16.mxu1 %v24854_v61 }
 0x1a6   :  { %22528 = vmatpush3.bf16.msra.mxu0 %v24853_v62  ;;  %v24897_v62 = vld [vmem:[#allocation5 + $0xc70] sm:$0xff]  }
 0x1a7   :  { %22529 = vmatprep.subr.bf16.mxu0 %v24856_v63  ;;  %v24898_v63 = vld [vmem:[#allocation5 + $0xc30] sm:$0xff]  }
 0x1a8   :  { %22550 = vmatpush3.bf16.msra.mxu1 %v24855_v0 }
 0x1a9   :  { %22551 = vmatprep.subr.bf16.mxu1 %v24858_v1 }
 0x1aa   :  { %22530 = vmatpush3.bf16.msra.mxu0 %v24857_v2  ;;  %v24899_v2 = vld [vmem:[#allocation5 + $0xcf0] sm:$0xff]  }
 0x1ab   :  { %22531 = vmatprep.subr.bf16.mxu0 %v24860_v3 }
 0x1ac   :  { %v22229_v5 = vpop.f32.mrb[16].mxu0  ;;  %22552 = vmatpush3.bf16.msra.mxu1 %v24859_v4 }
 0x1ad   :  { %v22230_v7 = vpop.f32.mrb[17].mxu0  ;;  %22553 = vmatprep.subr.bf16.mxu1 %v24862_v6 }
 0x1ae   :  { %v22231_v9 = vadd.f32 %v22230_v7, %v22229_v5  ;;  %v22232_v10 = vpop.f32.mrb[18].mxu0  ;;  %v22251_v11 = vpop.f32.mrb[16].mxu1  ;;  %22532 = vmatpush3.bf16.msra.mxu0 %v24861_v8  ;;  %v24900_v5 = vld [vmem:[#allocation5 + $0xcb0] sm:$0xff]   ;;  %v24901_v7 = vld [vmem:[#allocation5 + $0xc78] sm:$0xff]  }
 0x1af   :  { %v22233_v14 = vpop.f32.mrb[19].mxu0  ;;  %v22252_v15 = vpop.f32.mrb[17].mxu1  ;;  %22533 = vmatprep.subr.bf16.mxu0 %v24864_v13  ;;  %v24902_v8 = vld [vmem:[#allocation5 + $0xc38] sm:$0xff]  }
 0x1b0   :  { %v16169_v17 = vadd.f32 %v22231_v9, %v26500_v29  ;;  %v22253_v18 = vadd.f32 %v22252_v15, %v22251_v11  ;;  %v22254_v20 = vpop.f32.mrb[18].mxu1  ;;  %22554 = vmatpush3.bf16.msra.mxu1 %v24863_v12  ;;  %v24873_v29 = vld [vmem:[#allocation5 + $0xc40] sm:$0xff]   ;;  %v24903_v9 = vld [vmem:[#allocation5 + $0xcf8] sm:$0xff]  }
 0x1b1   :  { %v22255_v22 = vpop.f32.mrb[19].mxu1  ;;  %22555 = vmatprep.subr.bf16.mxu1 %v24866_v19  ;;  %v59_v10 = vld [vmem:[#allocation2 + $0x30] sm:$0xff]  ;;  %v24905_v14 = vld [vmem:[#allocation5 + $0xd40] sm:$0xff]  }
 0x1b2   :  { %v26512_v23 = vadd.f32 %v22253_v18, %v16169_v17  ;;  %22534 = vmatpush3.bf16.msra.mxu0 %v24865_v16  ;;  %v3945_v11 = vrot.slane %v59_v10, %v26434_v34  ;;  %v24904_v12 = vld [vmem:[#allocation5 + $0xcb8] sm:$0xff]   ;;  %v3938_v13 = vcombine.high %v59_v10, %v59_v10  ;;  %v24907_v18 = vld [vmem:[#allocation5 + $0xdc0] sm:$0xff]   ;;  %v24942_v10 = vld [vmem:[#allocation5 + $0xe48] sm:$0xff]  }
 0x1b3   :  { %22535 = vmatprep.subr.bf16.mxu0 %v24868_v24  ;;  %v24906_v20 = vld [vmem:[#allocation5 + $0xd00] sm:$0xff]  }
 0x1b4   :  { %22556 = vmatpush3.bf16.msra.mxu1 %v24867_v21  ;;  %v3953_v15 = vcombine.high %v3945_v11, %v3945_v11  ;;  %v3961_v16 = vrot.slane %v3945_v11, %v26434_v34  ;;  %v26522_v17 = vrot.slane %v3938_v13, %v26434_v34  ;;  %v24943_v11 = vld [vmem:[#allocation5 + $0xe08] sm:$0xff]  }
 0x1b5   :  { %22557 = vmatprep.subr.bf16.mxu1 %v24870_v26  ;;  %v24945_v13 = vld [vmem:[#allocation5 + $0xe88] sm:$0xff]  }
 0x1b6   :  { %22536 = vmatpush3.bf16.msra.mxu0 %v24869_v25  ;;  %v3975_v19 = vrot.slane %v3953_v15, %v26434_v34  ;;  %v3954_v21 = vcombine.high %v26522_v17, %v26522_v17  ;;  %v3983_v22 = vcombine.high %v3961_v16, %v3961_v16  ;;  %v24908_v25 = vld [vmem:[#allocation5 + $0xd80] sm:$0xff]   ;;  %v24947_v15 = vld [vmem:[#allocation5 + $0xe10] sm:$0xff]  }
 0x1b7   :  { %22565 = vmatprep.subr.bf16.mxu0 %v24873_v29 }
 0x1b8   :  { %22558 = vmatpush3.bf16.msra.mxu1 %v24872_v27  ;;  %v3985_v24 = vcombine.high %v3975_v19, %v3975_v19  ;;  %v3982_v26 = vrot.slane %v3954_v21, %v26434_v34  ;;  %v24911_v27 = vld [vmem:[#allocation5 + $0xdc8] sm:$0xff]   ;;  %v24953_v21 = vld [vmem:[#allocation5 + $0xe98] sm:$0xff]  }
 0x1b9   :  { %16727 = vmatmul.mubr.bf16.vlgmr.msra.gmra.mrb[44].mxu0 %v3919_v28  ;;  %22587 = vmatprep.subr.bf16.mxu1 %v24875_v31  ;;  %v24910_v28 = vld [vmem:[#allocation5 + $0xd08] sm:$0xff]  }
 0x1ba   :  { %22566 = vmatpush3.bf16.msra.mxu0 %v24874_v30  ;;  %16806 = vmatprep.mubr.bf16.mxu0 %v3975_v19  ;;  %v3986_v29 = vcombine.high %v3982_v26, %v3982_v26  ;;  %v24913_v30 = vld [vmem:[#allocation5 + $0xd50] sm:$0xff]   ;;  %v24912_v31 = vld [vmem:[#allocation5 + $0xd88] sm:$0xff]   ;;  %v24951_v19 = vld [vmem:[#allocation5 + $0xe18] sm:$0xff]  }
 0x1bb   :  { %16767 = vmatmul.mubr.bf16.vlgmr.msra.gmra.mrb[44].mxu1 %v3935_v33  ;;  %22567 = vmatprep.subr.bf16.mxu0 %v24877_v35  ;;  %v24914_v33 = vld [vmem:[#allocation5 + $0xd10] sm:$0xff]   ;;  %v24917_v35 = vld [vmem:[#allocation5 + $0xd58] sm:$0xff]  }
 0x1bc   :  { %22588 = vmatpush3.bf16.msra.mxu1 %v24876_v32  ;;  %16846 = vmatprep.mubr.bf16.mxu1 %v3985_v24  ;;  %v24915_v32 = vld [vmem:[#allocation5 + $0xdd0] sm:$0xff]   ;;  %v24956_v24 = vld [vmem:[#allocation5 + $0xee0] sm:$0xff]  }
 0x1bd   :  { %22589 = vmatprep.subr.bf16.mxu1 %v24879_v37  ;;  %v24919_v37 = vld [vmem:[#allocation5 + $0xdd8] sm:$0xff]  }
 0x1be   :  { %22568 = vmatpush3.bf16.msra.mxu0 %v24878_v36  ;;  %v24916_v36 = vld [vmem:[#allocation5 + $0xd90] sm:$0xff]  }
 0x1bf   :  { %22569 = vmatprep.subr.bf16.mxu0 %v24881_v39  ;;  %v24921_v39 = vld [vmem:[#allocation5 + $0xd60] sm:$0xff]  }
 0x1c0   :  { %22590 = vmatpush3.bf16.msra.mxu1 %v24880_v38  ;;  %v24918_v38 = vld [vmem:[#allocation5 + $0xd18] sm:$0xff]  }
 0x1c1   :  { %22591 = vmatprep.subr.bf16.mxu1 %v24883_v41  ;;  %v24923_v41 = vld [vmem:[#allocation5 + $0xde0] sm:$0xff]  }
 0x1c2   :  { %22570 = vmatpush3.bf16.msra.mxu0 %v24882_v40  ;;  %v24920_v40 = vld [vmem:[#allocation5 + $0xd98] sm:$0xff]  }
 0x1c3   :  { %22571 = vmatprep.subr.bf16.mxu0 %v24885_v43  ;;  %v24925_v43 = vld [vmem:[#allocation5 + $0xd68] sm:$0xff]  }
 0x1c4   :  { %22592 = vmatpush3.bf16.msra.mxu1 %v24884_v42  ;;  %v24922_v42 = vld [vmem:[#allocation5 + $0xd20] sm:$0xff]  }
 0x1c5   :  { %22593 = vmatprep.subr.bf16.mxu1 %v24887_v45 }
 0x1c6   :  { %22572 = vmatpush3.bf16.msra.mxu0 %v24886_v44  ;;  %v24924_v44 = vld [vmem:[#allocation5 + $0xda0] sm:$0xff]  }
 0x1c7   :  { %22573 = vmatprep.subr.bf16.mxu0 %v24889_v47 }
 0x1c8   :  { %22594 = vmatpush3.bf16.msra.mxu1 %v24888_v46  ;;  %v24927_v46 = vld [vmem:[#allocation5 + $0xde8] sm:$0xff]  }
 0x1c9   :  { %22595 = vmatprep.subr.bf16.mxu1 %v24891_v49 }
 0x1ca   :  { %22574 = vmatpush3.bf16.msra.mxu0 %v24890_v48  ;;  %v24926_v48 = vld [vmem:[#allocation5 + $0xd28] sm:$0xff]  }
 0x1cb   :  { %22575 = vmatprep.subr.bf16.mxu0 %v24893_v51 }
 0x1cc   :  { %v22273_v53 = vpop.f32.mrb[20].mxu0  ;;  %22596 = vmatpush3.bf16.msra.mxu1 %v24892_v50 }
 0x1cd   :  { %v22274_v55 = vpop.f32.mrb[21].mxu0  ;;  %22597 = vmatprep.subr.bf16.mxu1 %v24895_v54 }
 0x1ce   :  { %v22275_v57 = vadd.f32 %v22274_v55, %v22273_v53  ;;  %v22276_v58 = vpop.f32.mrb[22].mxu0  ;;  %v22295_v59 = vpop.f32.mrb[20].mxu1  ;;  %22576 = vmatpush3.bf16.msra.mxu0 %v24894_v52  ;;  %v24928_v52 = vld [vmem:[#allocation5 + $0xda8] sm:$0xff]   ;;  %v24929_v53 = vld [vmem:[#allocation5 + $0xd70] sm:$0xff]  }
 0x1cf   :  { %v22277_v60 = vpop.f32.mrb[23].mxu0  ;;  %v22296_v61 = vpop.f32.mrb[21].mxu1  ;;  %22577 = vmatprep.subr.bf16.mxu0 %v24897_v62 }
 0x1d0   :  { %v16249_v0 = vadd.f32 %v22275_v57, %v26512_v23  ;;  %v22297_v1 = vadd.f32 %v22296_v61, %v22295_v59  ;;  %v22298_v3 = vpop.f32.mrb[22].mxu1  ;;  %22598 = vmatpush3.bf16.msra.mxu1 %v24896_v56  ;;  %v24909_v23 = vld [vmem:[#allocation5 + $0xd48] sm:$0xff]   ;;  %v24930_v56 = vld [vmem:[#allocation5 + $0xd30] sm:$0xff]  }
 0x1d1   :  { %v22299_v6 = vpop.f32.mrb[23].mxu1  ;;  %22599 = vmatprep.subr.bf16.mxu1 %v24899_v2  ;;  %v24931_v59 = vld [vmem:[#allocation5 + $0xdf0] sm:$0xff]   ;;  %v24935_v2 = vld [vmem:[#allocation5 + $0xdf8] sm:$0xff]  }
 0x1d2   :  { %v26517_v4 = vadd.f32 %v22297_v1, %v16249_v0  ;;  %22578 = vmatpush3.bf16.msra.mxu0 %v24898_v63  ;;  %v24932_v61 = vld [vmem:[#allocation5 + $0xdb0] sm:$0xff]   ;;  %v24933_v0 = vld [vmem:[#allocation5 + $0xd78] sm:$0xff]   ;;  %v24939_v6 = vld [vmem:[#allocation5 + $0xe00] sm:$0xff]  }
 0x1d3   :  { %22579 = vmatprep.subr.bf16.mxu0 %v24901_v7  ;;  %v24934_v1 = vld [vmem:[#allocation5 + $0xd38] sm:$0xff]   ;;  %v24940_v7 = vld [vmem:[#allocation5 + $0xec0] sm:$0xff]  }
 0x1d4   :  { %22600 = vmatpush3.bf16.msra.mxu1 %v24900_v5  ;;  %v24937_v3 = vld [vmem:[#allocation5 + $0xdb8] sm:$0xff]   ;;  %v24938_v5 = vld [vmem:[#allocation5 + $0xe40] sm:$0xff]  }
 0x1d5   :  { %22601 = vmatprep.subr.bf16.mxu1 %v24903_v9 }
 0x1d6   :  { %22580 = vmatpush3.bf16.msra.mxu0 %v24902_v8  ;;  %v24941_v8 = vld [vmem:[#allocation5 + $0xe80] sm:$0xff]  }
 0x1d7   :  { %22609 = vmatprep.subr.bf16.mxu0 %v24905_v14  ;;  %v24946_v14 = vld [vmem:[#allocation5 + $0xe50] sm:$0xff]  }
 0x1d8   :  { %22602 = vmatpush3.bf16.msra.mxu1 %v24904_v12  ;;  %v24944_v12 = vld [vmem:[#allocation5 + $0xec8] sm:$0xff]  }
 0x1d9   :  { %22631 = vmatprep.subr.bf16.mxu1 %v24907_v18  ;;  %16807 = vmatmul.mubr.bf16.vlgmr.msra.gmra.mrb[48].mxu0 %v3961_v16  ;;  %v24948_v16 = vld [vmem:[#allocation5 + $0xed0] sm:$0xff]   ;;  %v24950_v18 = vld [vmem:[#allocation5 + $0xe58] sm:$0xff]  }
 0x1da   :  { %22610 = vmatpush3.bf16.msra.mxu0 %v24906_v20  ;;  %16886 = vmatprep.mubr.bf16.mxu0 %v3982_v26  ;;  %v24952_v20 = vld [vmem:[#allocation5 + $0xed8] sm:$0xff]   ;;  %v24958_v26 = vld [vmem:[#allocation5 + $0xe68] sm:$0xff]  }
 0x1db   :  { %16847 = vmatmul.mubr.bf16.vlgmr.msra.gmra.mrb[48].mxu1 %v3983_v22  ;;  %22611 = vmatprep.subr.bf16.mxu0 %v24909_v23  ;;  %v24954_v22 = vld [vmem:[#allocation5 + $0xe60] sm:$0xff]  }
 0x1dc   :  { %22632 = vmatpush3.bf16.msra.mxu1 %v24908_v25  ;;  %16926 = vmatprep.mubr.bf16.mxu1 %v3986_v29  ;;  %v24955_v23 = vld [vmem:[#allocation5 + $0xe20] sm:$0xff]   ;;  %v24960_v29 = vld [vmem:[#allocation5 + $0xee8] sm:$0xff]  }
 0x1dd   :  { %22633 = vmatprep.subr.bf16.mxu1 %v24911_v27  ;;  %v24957_v25 = vld [vmem:[#allocation5 + $0xea0] sm:$0xff]   ;;  %v24959_v27 = vld [vmem:[#allocation5 + $0xe28] sm:$0xff]  }
 0x1de   :  { %22612 = vmatpush3.bf16.msra.mxu0 %v24910_v28 }
 0x1df   :  { %22613 = vmatprep.subr.bf16.mxu0 %v24913_v30 }
 0x1e0   :  { %22634 = vmatpush3.bf16.msra.mxu1 %v24912_v31  ;;  %v24961_v31 = vld [vmem:[#allocation5 + $0xea8] sm:$0xff]  }
 0x1e1   :  { %22635 = vmatprep.subr.bf16.mxu1 %v24915_v32 }
 0x1e2   :  { %22614 = vmatpush3.bf16.msra.mxu0 %v24914_v33 }
 0x1e3   :  { %22615 = vmatprep.subr.bf16.mxu0 %v24917_v35 }
 0x1e4   :  { %22636 = vmatpush3.bf16.msra.mxu1 %v24916_v36 }
 0x1e5   :  { %22637 = vmatprep.subr.bf16.mxu1 %v24919_v37 }
 0x1e6   :  { %22616 = vmatpush3.bf16.msra.mxu0 %v24918_v38  ;;  %v24962_v38 = vld [vmem:[#allocation5 + $0xe70] sm:$0xff]  }
 0x1e7   :  { %22617 = vmatprep.subr.bf16.mxu0 %v24921_v39  ;;  %v24963_v39 = vld [vmem:[#allocation5 + $0xe30] sm:$0xff]  }
 0x1e8   :  { %22638 = vmatpush3.bf16.msra.mxu1 %v24920_v40 }
 0x1e9   :  { %22639 = vmatprep.subr.bf16.mxu1 %v24923_v41 }
 0x1ea   :  { %22618 = vmatpush3.bf16.msra.mxu0 %v24922_v42  ;;  %v24964_v42 = vld [vmem:[#allocation5 + $0xef0] sm:$0xff]  }
 0x1eb   :  { %22619 = vmatprep.subr.bf16.mxu0 %v24925_v43 }
 0x1ec   :  { %v22317_v45 = vpop.f32.mrb[24].mxu0  ;;  %22640 = vmatpush3.bf16.msra.mxu1 %v24924_v44 }
 0x1ed   :  { %v22318_v47 = vpop.f32.mrb[25].mxu0  ;;  %22641 = vmatprep.subr.bf16.mxu1 %v24927_v46 }
 0x1ee   :  { %v22319_v49 = vadd.f32 %v22318_v47, %v22317_v45  ;;  %v22320_v50 = vpop.f32.mrb[26].mxu0  ;;  %v22339_v51 = vpop.f32.mrb[24].mxu1  ;;  %22620 = vmatpush3.bf16.msra.mxu0 %v24926_v48  ;;  %v24965_v45 = vld [vmem:[#allocation5 + $0xeb0] sm:$0xff]   ;;  %v24966_v47 = vld [vmem:[#allocation5 + $0xe78] sm:$0xff]  }
 0x1ef   :  { %v22321_v54 = vpop.f32.mrb[27].mxu0  ;;  %v22340_v55 = vpop.f32.mrb[25].mxu1  ;;  %22621 = vmatprep.subr.bf16.mxu0 %v24929_v53  ;;  %v24967_v48 = vld [vmem:[#allocation5 + $0xe38] sm:$0xff]  }
 0x1f0   :  { %v16329_v57 = vadd.f32 %v22319_v49, %v26517_v4  ;;  %v22341_v58 = vadd.f32 %v22340_v55, %v22339_v51  ;;  %v22342_v60 = vpop.f32.mrb[26].mxu1  ;;  %22642 = vmatpush3.bf16.msra.mxu1 %v24928_v52  ;;  %v3968_v4 = vrot.slane %v26522_v17, %v26434_v34  ;;  %v24949_v17 = vld [vmem:[#allocation5 + $0xe90] sm:$0xff]   ;;  %v24968_v49 = vld [vmem:[#allocation5 + $0xef8] sm:$0xff]   ;;  %v24970_v54 = vld [vmem:[#allocation5 + $0xf40] sm:$0xff]  }
 0x1f1   :  { %v22343_v62 = vpop.f32.mrb[27].mxu1  ;;  %22643 = vmatprep.subr.bf16.mxu1 %v24931_v59  ;;  %v60_v50 = vld [vmem:[#allocation2 + $0x38] sm:$0xff] }
 0x1f2   :  { %v26529_v63 = vadd.f32 %v22341_v58, %v16329_v57  ;;  %22622 = vmatpush3.bf16.msra.mxu0 %v24930_v56  ;;  %v3984_v9 = vcombine.high %v3968_v4, %v3968_v4  ;;  %v3994_v51 = vrot.slane %v60_v50, %v26434_v34  ;;  %v24969_v52 = vld [vmem:[#allocation5 + $0xeb8] sm:$0xff]   ;;  %v3987_v53 = vcombine.high %v60_v50, %v60_v50  ;;  %v24972_v58 = vld [vmem:[#allocation5 + $0xfc0] sm:$0xff]   ;;  %v25007_v50 = vld [vmem:[#allocation5 + $0x1048] sm:$0xff]  }
 0x1f3   :  { %22623 = vmatprep.subr.bf16.mxu0 %v24933_v0  ;;  %v24971_v60 = vld [vmem:[#allocation5 + $0xf00] sm:$0xff]  }
 0x1f4   :  { %22644 = vmatpush3.bf16.msra.mxu1 %v24932_v61  ;;  %v4002_v55 = vcombine.high %v3994_v51, %v3994_v51  ;;  %v4010_v56 = vrot.slane %v3994_v51, %v26434_v34  ;;  %v26539_v57 = vrot.slane %v3987_v53, %v26434_v34  ;;  %v25008_v51 = vld [vmem:[#allocation5 + $0x1008] sm:$0xff]  }
 0x1f5   :  { %22645 = vmatprep.subr.bf16.mxu1 %v24935_v2  ;;  %v25010_v53 = vld [vmem:[#allocation5 + $0x1088] sm:$0xff]  }
 0x1f6   :  { %22624 = vmatpush3.bf16.msra.mxu0 %v24934_v1  ;;  %v4024_v59 = vrot.slane %v4002_v55, %v26434_v34  ;;  %v4003_v61 = vcombine.high %v26539_v57, %v26539_v57  ;;  %v4032_v62 = vcombine.high %v4010_v56, %v4010_v56  ;;  %v24973_v1 = vld [vmem:[#allocation5 + $0xf80] sm:$0xff]   ;;  %v25012_v55 = vld [vmem:[#allocation5 + $0x1010] sm:$0xff]  }
 0x1f7   :  { %22653 = vmatprep.subr.bf16.mxu0 %v24938_v5 }
 0x1f8   :  { %22646 = vmatpush3.bf16.msra.mxu1 %v24937_v3  ;;  %v4034_v0 = vcombine.high %v4024_v59, %v4024_v59  ;;  %v4031_v2 = vrot.slane %v4003_v61, %v26434_v34  ;;  %v24976_v3 = vld [vmem:[#allocation5 + $0xfc8] sm:$0xff]   ;;  %v25018_v61 = vld [vmem:[#allocation5 + $0x1098] sm:$0xff]  }
 0x1f9   :  { %16887 = vmatmul.mubr.bf16.vlgmr.msra.gmra.mrb[52].mxu0 %v3968_v4  ;;  %22675 = vmatprep.subr.bf16.mxu1 %v24940_v7  ;;  %v24975_v4 = vld [vmem:[#allocation5 + $0xf08] sm:$0xff]  }
 0x1fa   :  { %22654 = vmatpush3.bf16.msra.mxu0 %v24939_v6  ;;  %16966 = vmatprep.mubr.bf16.mxu0 %v4024_v59  ;;  %v4035_v5 = vcombine.high %v4031_v2, %v4031_v2  ;;  %v24978_v6 = vld [vmem:[#allocation5 + $0xf50] sm:$0xff]   ;;  %v24977_v7 = vld [vmem:[#allocation5 + $0xf88] sm:$0xff]   ;;  %v25016_v59 = vld [vmem:[#allocation5 + $0x1018] sm:$0xff]  }
 0x1fb   :  { %16927 = vmatmul.mubr.bf16.vlgmr.msra.gmra.mrb[52].mxu1 %v3984_v9  ;;  %22655 = vmatprep.subr.bf16.mxu0 %v24942_v10  ;;  %v24979_v9 = vld [vmem:[#allocation5 + $0xf10] sm:$0xff]   ;;  %v24982_v10 = vld [vmem:[#allocation5 + $0xf58] sm:$0xff]  }
 0x1fc   :  { %22676 = vmatpush3.bf16.msra.mxu1 %v24941_v8  ;;  %17006 = vmatprep.mubr.bf16.mxu1 %v4034_v0  ;;  %v24980_v8 = vld [vmem:[#allocation5 + $0xfd0] sm:$0xff]   ;;  %v25021_v0 = vld [vmem:[#allocation5 + $0x10e0] sm:$0xff]  }
 0x1fd   :  { %22677 = vmatprep.subr.bf16.mxu1 %v24944_v12  ;;  %v24984_v12 = vld [vmem:[#allocation5 + $0xfd8] sm:$0xff]  }
 0x1fe   :  { %22656 = vmatpush3.bf16.msra.mxu0 %v24943_v11  ;;  %v24981_v11 = vld [vmem:[#allocation5 + $0xf90] sm:$0xff]  }
 0x1ff   :  { %22657 = vmatprep.subr.bf16.mxu0 %v24946_v14  ;;  %v24986_v14 = vld [vmem:[#allocation5 + $0xf60] sm:$0xff]  }
 0x200   :  { %22678 = vmatpush3.bf16.msra.mxu1 %v24945_v13  ;;  %v24983_v13 = vld [vmem:[#allocation5 + $0xf18] sm:$0xff]  }
 0x201   :  { %22679 = vmatprep.subr.bf16.mxu1 %v24948_v16  ;;  %v24988_v16 = vld [vmem:[#allocation5 + $0xfe0] sm:$0xff]  }
 0x202   :  { %22658 = vmatpush3.bf16.msra.mxu0 %v24947_v15  ;;  %v24985_v15 = vld [vmem:[#allocation5 + $0xf98] sm:$0xff]  }
 0x203   :  { %22659 = vmatprep.subr.bf16.mxu0 %v24950_v18  ;;  %v24990_v18 = vld [vmem:[#allocation5 + $0xf68] sm:$0xff]  }
 0x204   :  { %22680 = vmatpush3.bf16.msra.mxu1 %v24949_v17  ;;  %v24987_v17 = vld [vmem:[#allocation5 + $0xf20] sm:$0xff]  }
 0x205   :  { %22681 = vmatprep.subr.bf16.mxu1 %v24952_v20 }
 0x206   :  { %22660 = vmatpush3.bf16.msra.mxu0 %v24951_v19  ;;  %v24989_v19 = vld [vmem:[#allocation5 + $0xfa0] sm:$0xff]  }
 0x207   :  { %22661 = vmatprep.subr.bf16.mxu0 %v24954_v22 }
 0x208   :  { %22682 = vmatpush3.bf16.msra.mxu1 %v24953_v21  ;;  %v24992_v21 = vld [vmem:[#allocation5 + $0xfe8] sm:$0xff]  }
 0x209   :  { %22683 = vmatprep.subr.bf16.mxu1 %v24956_v24 }
 0x20a   :  { %22662 = vmatpush3.bf16.msra.mxu0 %v24955_v23  ;;  %v24991_v23 = vld [vmem:[#allocation5 + $0xf28] sm:$0xff]  }
 0x20b   :  { %22663 = vmatprep.subr.bf16.mxu0 %v24958_v26 }
 0x20c   :  { %v22361_v28 = vpop.f32.mrb[28].mxu0  ;;  %22684 = vmatpush3.bf16.msra.mxu1 %v24957_v25 }
 0x20d   :  { %v22362_v30 = vpop.f32.mrb[29].mxu0  ;;  %22685 = vmatprep.subr.bf16.mxu1 %v24960_v29 }
 0x20e   :  { %v22363_v32 = vadd.f32 %v22362_v30, %v22361_v28  ;;  %v22364_v33 = vpop.f32.mrb[30].mxu0  ;;  %v22383_v35 = vpop.f32.mrb[28].mxu1  ;;  %22664 = vmatpush3.bf16.msra.mxu0 %v24959_v27  ;;  %v24993_v27 = vld [vmem:[#allocation5 + $0xfa8] sm:$0xff]   ;;  %v24994_v28 = vld [vmem:[#allocation5 + $0xf70] sm:$0xff]  }
 0x20f   :  { %v22365_v36 = vpop.f32.mrb[31].mxu0  ;;  %v22384_v37 = vpop.f32.mrb[29].mxu1  ;;  %22665 = vmatprep.subr.bf16.mxu0 %v24962_v38 }
 0x210   :  { %v16409_v40 = vadd.f32 %v22363_v32, %v26529_v63  ;;  %v22385_v41 = vadd.f32 %v22384_v37, %v22383_v35  ;;  %v22386_v43 = vpop.f32.mrb[30].mxu1  ;;  %22686 = vmatpush3.bf16.msra.mxu1 %v24961_v31  ;;  %v24974_v63 = vld [vmem:[#allocation5 + $0xf48] sm:$0xff]   ;;  %v24995_v31 = vld [vmem:[#allocation5 + $0xf30] sm:$0xff]  }
 0x211   :  { %v22387_v46 = vpop.f32.mrb[31].mxu1  ;;  %22687 = vmatprep.subr.bf16.mxu1 %v24964_v42  ;;  %v24996_v35 = vld [vmem:[#allocation5 + $0xff0] sm:$0xff]   ;;  %v25000_v42 = vld [vmem:[#allocation5 + $0xff8] sm:$0xff]  }
 0x212   :  { %v26534_v44 = vadd.f32 %v22385_v41, %v16409_v40  ;;  %22666 = vmatpush3.bf16.msra.mxu0 %v24963_v39  ;;  %v24997_v37 = vld [vmem:[#allocation5 + $0xfb0] sm:$0xff]   ;;  %v24998_v40 = vld [vmem:[#allocation5 + $0xf78] sm:$0xff]   ;;  %v25004_v46 = vld [vmem:[#allocation5 + $0x1000] sm:$0xff]  }
 0x213   :  { %22667 = vmatprep.subr.bf16.mxu0 %v24966_v47  ;;  %v24999_v41 = vld [vmem:[#allocation5 + $0xf38] sm:$0xff]   ;;  %v25005_v47 = vld [vmem:[#allocation5 + $0x10c0] sm:$0xff]  }
 0x214   :  { %22688 = vmatpush3.bf16.msra.mxu1 %v24965_v45  ;;  %v25002_v43 = vld [vmem:[#allocation5 + $0xfb8] sm:$0xff]   ;;  %v25003_v45 = vld [vmem:[#allocation5 + $0x1040] sm:$0xff]  }
 0x215   :  { %22689 = vmatprep.subr.bf16.mxu1 %v24968_v49 }
 0x216   :  { %22668 = vmatpush3.bf16.msra.mxu0 %v24967_v48  ;;  %v25006_v48 = vld [vmem:[#allocation5 + $0x1080] sm:$0xff]  }
 0x217   :  { %22697 = vmatprep.subr.bf16.mxu0 %v24970_v54  ;;  %v25011_v54 = vld [vmem:[#allocation5 + $0x1050] sm:$0xff]  }
 0x218   :  { %22690 = vmatpush3.bf16.msra.mxu1 %v24969_v52  ;;  %v25009_v52 = vld [vmem:[#allocation5 + $0x10c8] sm:$0xff]  }
 0x219   :  { %22719 = vmatprep.subr.bf16.mxu1 %v24972_v58  ;;  %16967 = vmatmul.mubr.bf16.vlgmr.msra.gmra.mrb[56].mxu0 %v4010_v56  ;;  %v25013_v56 = vld [vmem:[#allocation5 + $0x10d0] sm:$0xff]   ;;  %v25015_v58 = vld [vmem:[#allocation5 + $0x1058] sm:$0xff]  }
 0x21a   :  { %22698 = vmatpush3.bf16.msra.mxu0 %v24971_v60  ;;  %17046 = vmatprep.mubr.bf16.mxu0 %v4031_v2  ;;  %v25017_v60 = vld [vmem:[#allocation5 + $0x10d8] sm:$0xff]   ;;  %v25023_v2 = vld [vmem:[#allocation5 + $0x1068] sm:$0xff]  }
 0x21b   :  { %17007 = vmatmul.mubr.bf16.vlgmr.msra.gmra.mrb[56].mxu1 %v4032_v62  ;;  %22699 = vmatprep.subr.bf16.mxu0 %v24974_v63  ;;  %v25019_v62 = vld [vmem:[#allocation5 + $0x1060] sm:$0xff]  }
 0x21c   :  { %22720 = vmatpush3.bf16.msra.mxu1 %v24973_v1  ;;  %17086 = vmatprep.mubr.bf16.mxu1 %v4035_v5  ;;  %v25020_v63 = vld [vmem:[#allocation5 + $0x1020] sm:$0xff]   ;;  %v25025_v5 = vld [vmem:[#allocation5 + $0x10e8] sm:$0xff]  }
 0x21d   :  { %22721 = vmatprep.subr.bf16.mxu1 %v24976_v3  ;;  %v25022_v1 = vld [vmem:[#allocation5 + $0x10a0] sm:$0xff]   ;;  %v25024_v3 = vld [vmem:[#allocation5 + $0x1028] sm:$0xff]  }
 0x21e   :  { %22700 = vmatpush3.bf16.msra.mxu0 %v24975_v4 }
 0x21f   :  { %22701 = vmatprep.subr.bf16.mxu0 %v24978_v6 }
 0x220   :  { %22722 = vmatpush3.bf16.msra.mxu1 %v24977_v7  ;;  %v25026_v7 = vld [vmem:[#allocation5 + $0x10a8] sm:$0xff]  }
 0x221   :  { %22723 = vmatprep.subr.bf16.mxu1 %v24980_v8 }
 0x222   :  { %22702 = vmatpush3.bf16.msra.mxu0 %v24979_v9 }
 0x223   :  { %22703 = vmatprep.subr.bf16.mxu0 %v24982_v10 }
 0x224   :  { %22724 = vmatpush3.bf16.msra.mxu1 %v24981_v11 }
 0x225   :  { %22725 = vmatprep.subr.bf16.mxu1 %v24984_v12 }
 0x226   :  { %22704 = vmatpush3.bf16.msra.mxu0 %v24983_v13  ;;  %v25027_v13 = vld [vmem:[#allocation5 + $0x1070] sm:$0xff]  }
 0x227   :  { %22705 = vmatprep.subr.bf16.mxu0 %v24986_v14  ;;  %v25028_v14 = vld [vmem:[#allocation5 + $0x1030] sm:$0xff]  }
 0x228   :  { %22726 = vmatpush3.bf16.msra.mxu1 %v24985_v15 }
 0x229   :  { %22727 = vmatprep.subr.bf16.mxu1 %v24988_v16 }
 0x22a   :  { %22706 = vmatpush3.bf16.msra.mxu0 %v24987_v17  ;;  %v25029_v17 = vld [vmem:[#allocation5 + $0x10f0] sm:$0xff]  }
 0x22b   :  { %22707 = vmatprep.subr.bf16.mxu0 %v24990_v18 }
 0x22c   :  { %v22405_v20 = vpop.f32.mrb[32].mxu0  ;;  %22728 = vmatpush3.bf16.msra.mxu1 %v24989_v19 }
 0x22d   :  { %v22406_v22 = vpop.f32.mrb[33].mxu0  ;;  %22729 = vmatprep.subr.bf16.mxu1 %v24992_v21 }
 0x22e   :  { %v22407_v24 = vadd.f32 %v22406_v22, %v22405_v20  ;;  %v22408_v25 = vpop.f32.mrb[34].mxu0  ;;  %v22427_v26 = vpop.f32.mrb[32].mxu1  ;;  %22708 = vmatpush3.bf16.msra.mxu0 %v24991_v23  ;;  %v25030_v20 = vld [vmem:[#allocation5 + $0x10b0] sm:$0xff]   ;;  %v25031_v22 = vld [vmem:[#allocation5 + $0x1078] sm:$0xff]  }
 0x22f   :  { %v22409_v29 = vpop.f32.mrb[35].mxu0  ;;  %v22428_v30 = vpop.f32.mrb[33].mxu1  ;;  %22709 = vmatprep.subr.bf16.mxu0 %v24994_v28  ;;  %v25032_v23 = vld [vmem:[#allocation5 + $0x1038] sm:$0xff]   ;;  %v61_v25 = vld [vmem:[#allocation2 + $0x40] sm:$0xff] }
 0x230   :  { %v16489_v32 = vadd.f32 %v22407_v24, %v26534_v44  ;;  %v22429_v33 = vadd.f32 %v22428_v30, %v22427_v26  ;;  %v22430_v36 = vpop.f32.mrb[34].mxu1  ;;  %22730 = vmatpush3.bf16.msra.mxu1 %v24993_v27  ;;  %v4017_v44 = vrot.slane %v26539_v57, %v26434_v34  ;;  %v25014_v57 = vld [vmem:[#allocation5 + $0x1090] sm:$0xff]   ;;  %v25033_v24 = vld [vmem:[#allocation5 + $0x10f8] sm:$0xff]   ;;  %v4043_v26 = vrot.slane %v61_v25, %v26434_v34  ;;  %v25035_v29 = vld [vmem:[#allocation5 + $0x1140] sm:$0xff]  }
 0x231   :  { %v22431_v38 = vpop.f32.mrb[35].mxu1  ;;  %22731 = vmatprep.subr.bf16.mxu1 %v24996_v35  ;;  %v25034_v27 = vld [vmem:[#allocation5 + $0x10b8] sm:$0xff]   ;;  %v4036_v28 = vcombine.high %v61_v25, %v61_v25  ;;  %v25036_v36 = vld [vmem:[#allocation5 + $0x1100] sm:$0xff]   ;;  %v25072_v25 = vld [vmem:[#allocation5 + $0x1248] sm:$0xff]  }
 0x232   :  { %v26546_v39 = vadd.f32 %v22429_v33, %v16489_v32  ;;  %22710 = vmatpush3.bf16.msra.mxu0 %v24995_v31  ;;  %v4033_v49 = vcombine.high %v4017_v44, %v4017_v44  ;;  %v4051_v30 = vcombine.high %v4043_v26, %v4043_v26  ;;  %v4059_v31 = vrot.slane %v4043_v26, %v26434_v34  ;;  %v25037_v33 = vld [vmem:[#allocation5 + $0x11c0] sm:$0xff]   ;;  %v25073_v26 = vld [vmem:[#allocation5 + $0x1208] sm:$0xff]  }
 0x233   :  { %22711 = vmatprep.subr.bf16.mxu0 %v24998_v40  ;;  %v26556_v32 = vrot.slane %v4036_v28, %v26434_v34  ;;  %v25075_v28 = vld [vmem:[#allocation5 + $0x1288] sm:$0xff]  }
 0x234   :  { %22732 = vmatpush3.bf16.msra.mxu1 %v24997_v37  ;;  %v4073_v35 = vrot.slane %v4051_v30, %v26434_v34  ;;  %v4081_v38 = vcombine.high %v4059_v31, %v4059_v31  ;;  %v25077_v30 = vld [vmem:[#allocation5 + $0x1210] sm:$0xff]  }
 0x235   :  { %22733 = vmatprep.subr.bf16.mxu1 %v25000_v42  ;;  %v4052_v37 = vcombine.high %v26556_v32, %v26556_v32 }
 0x236   :  { %22712 = vmatpush3.bf16.msra.mxu0 %v24999_v41  ;;  %v4083_v40 = vcombine.high %v4073_v35, %v4073_v35  ;;  %v25038_v41 = vld [vmem:[#allocation5 + $0x1180] sm:$0xff]  }
 0x237   :  { %22741 = vmatprep.subr.bf16.mxu0 %v25003_v45  ;;  %v4080_v42 = vrot.slane %v4052_v37, %v26434_v34  ;;  %v25083_v37 = vld [vmem:[#allocation5 + $0x1298] sm:$0xff]  }
 0x238   :  { %22734 = vmatpush3.bf16.msra.mxu1 %v25002_v43  ;;  %v25041_v43 = vld [vmem:[#allocation5 + $0x11c8] sm:$0xff]  }
 0x239   :  { %17047 = vmatmul.mubr.bf16.vlgmr.msra.gmra.mrb[60].mxu0 %v4017_v44  ;;  %22763 = vmatprep.subr.bf16.mxu1 %v25005_v47  ;;  %v25040_v44 = vld [vmem:[#allocation5 + $0x1108] sm:$0xff]   ;;  %v4084_v45 = vcombine.high %v4080_v42, %v4080_v42 }
 0x23a   :  { %22742 = vmatpush3.bf16.msra.mxu0 %v25004_v46  ;;  %17126 = vmatprep.mubr.bf16.mxu0 %v4073_v35  ;;  %v25043_v46 = vld [vmem:[#allocation5 + $0x1150] sm:$0xff]   ;;  %v25042_v47 = vld [vmem:[#allocation5 + $0x1188] sm:$0xff]   ;;  %v25081_v35 = vld [vmem:[#allocation5 + $0x1218] sm:$0xff]  }
 0x23b   :  { %17087 = vmatmul.mubr.bf16.vlgmr.msra.gmra.mrb[60].mxu1 %v4033_v49  ;;  %22743 = vmatprep.subr.bf16.mxu0 %v25007_v50  ;;  %v25044_v49 = vld [vmem:[#allocation5 + $0x1110] sm:$0xff]   ;;  %v25047_v50 = vld [vmem:[#allocation5 + $0x1158] sm:$0xff]  }
 0x23c   :  { %22764 = vmatpush3.bf16.msra.mxu1 %v25006_v48  ;;  %17166 = vmatprep.mubr.bf16.mxu1 %v4083_v40  ;;  %v25045_v48 = vld [vmem:[#allocation5 + $0x11d0] sm:$0xff]   ;;  %v25086_v40 = vld [vmem:[#allocation5 + $0x12e0] sm:$0xff]  }
 0x23d   :  { %22765 = vmatprep.subr.bf16.mxu1 %v25009_v52  ;;  %v25049_v52 = vld [vmem:[#allocation5 + $0x11d8] sm:$0xff]  }
 0x23e   :  { %22744 = vmatpush3.bf16.msra.mxu0 %v25008_v51  ;;  %v25046_v51 = vld [vmem:[#allocation5 + $0x1190] sm:$0xff]  }
 0x23f   :  { %22745 = vmatprep.subr.bf16.mxu0 %v25011_v54  ;;  %v25051_v54 = vld [vmem:[#allocation5 + $0x1160] sm:$0xff]  }
 0x240   :  { %22766 = vmatpush3.bf16.msra.mxu1 %v25010_v53  ;;  %v25048_v53 = vld [vmem:[#allocation5 + $0x1118] sm:$0xff]  }
 0x241   :  { %22767 = vmatprep.subr.bf16.mxu1 %v25013_v56  ;;  %v25053_v56 = vld [vmem:[#allocation5 + $0x11e0] sm:$0xff]  }
 0x242   :  { %22746 = vmatpush3.bf16.msra.mxu0 %v25012_v55  ;;  %v25050_v55 = vld [vmem:[#allocation5 + $0x1198] sm:$0xff]  }
 0x243   :  { %22747 = vmatprep.subr.bf16.mxu0 %v25015_v58  ;;  %v25055_v58 = vld [vmem:[#allocation5 + $0x1168] sm:$0xff]  }
 0x244   :  { %22768 = vmatpush3.bf16.msra.mxu1 %v25014_v57  ;;  %v25052_v57 = vld [vmem:[#allocation5 + $0x1120] sm:$0xff]  }
 0x245   :  { %22769 = vmatprep.subr.bf16.mxu1 %v25017_v60 }
 0x246   :  { %22748 = vmatpush3.bf16.msra.mxu0 %v25016_v59  ;;  %v25054_v59 = vld [vmem:[#allocation5 + $0x11a0] sm:$0xff]  }
 0x247   :  { %22749 = vmatprep.subr.bf16.mxu0 %v25019_v62 }
 0x248   :  { %22770 = vmatpush3.bf16.msra.mxu1 %v25018_v61  ;;  %v25057_v61 = vld [vmem:[#allocation5 + $0x11e8] sm:$0xff]  }
 0x249   :  { %22771 = vmatprep.subr.bf16.mxu1 %v25021_v0 }
 0x24a   :  { %22750 = vmatpush3.bf16.msra.mxu0 %v25020_v63  ;;  %v25056_v63 = vld [vmem:[#allocation5 + $0x1128] sm:$0xff]  }
 0x24b   :  { %22751 = vmatprep.subr.bf16.mxu0 %v25023_v2 }
 0x24c   :  { %v22449_v4 = vpop.f32.mrb[36].mxu0  ;;  %22772 = vmatpush3.bf16.msra.mxu1 %v25022_v1 }
 0x24d   :  { %v22450_v6 = vpop.f32.mrb[37].mxu0  ;;  %22773 = vmatprep.subr.bf16.mxu1 %v25025_v5 }
 0x24e   :  { %v22451_v8 = vadd.f32 %v22450_v6, %v22449_v4  ;;  %v22452_v9 = vpop.f32.mrb[38].mxu0  ;;  %v22471_v10 = vpop.f32.mrb[36].mxu1  ;;  %22752 = vmatpush3.bf16.msra.mxu0 %v25024_v3  ;;  %v25058_v3 = vld [vmem:[#allocation5 + $0x11a8] sm:$0xff]   ;;  %v25059_v4 = vld [vmem:[#allocation5 + $0x1170] sm:$0xff]  }
 0x24f   :  { %v22453_v11 = vpop.f32.mrb[39].mxu0  ;;  %v22472_v12 = vpop.f32.mrb[37].mxu1  ;;  %22753 = vmatprep.subr.bf16.mxu0 %v25027_v13 }
 0x250   :  { %v16569_v15 = vadd.f32 %v22451_v8, %v26546_v39  ;;  %v22473_v16 = vadd.f32 %v22472_v12, %v22471_v10  ;;  %v22474_v18 = vpop.f32.mrb[38].mxu1  ;;  %22774 = vmatpush3.bf16.msra.mxu1 %v25026_v7  ;;  %v25039_v39 = vld [vmem:[#allocation5 + $0x1148] sm:$0xff]   ;;  %v25060_v7 = vld [vmem:[#allocation5 + $0x1130] sm:$0xff]  }
 0x251   :  { %v22475_v21 = vpop.f32.mrb[39].mxu1  ;;  %22775 = vmatprep.subr.bf16.mxu1 %v25029_v17  ;;  %v25061_v10 = vld [vmem:[#allocation5 + $0x11f0] sm:$0xff]   ;;  %v25065_v17 = vld [vmem:[#allocation5 + $0x11f8] sm:$0xff]  }
 0x252   :  { %v26551_v19 = vadd.f32 %v22473_v16, %v16569_v15  ;;  %22754 = vmatpush3.bf16.msra.mxu0 %v25028_v14  ;;  %v25062_v12 = vld [vmem:[#allocation5 + $0x11b0] sm:$0xff]   ;;  %v25063_v15 = vld [vmem:[#allocation5 + $0x1178] sm:$0xff]   ;;  %v25069_v21 = vld [vmem:[#allocation5 + $0x1200] sm:$0xff]  }
 0x253   :  { %22755 = vmatprep.subr.bf16.mxu0 %v25031_v22  ;;  %v25064_v16 = vld [vmem:[#allocation5 + $0x1138] sm:$0xff]   ;;  %v25070_v22 = vld [vmem:[#allocation5 + $0x12c0] sm:$0xff]  }
 0x254   :  { %22776 = vmatpush3.bf16.msra.mxu1 %v25030_v20  ;;  %v25067_v18 = vld [vmem:[#allocation5 + $0x11b8] sm:$0xff]   ;;  %v25068_v20 = vld [vmem:[#allocation5 + $0x1240] sm:$0xff]  }
 0x255   :  { %22777 = vmatprep.subr.bf16.mxu1 %v25033_v24 }
 0x256   :  { %22756 = vmatpush3.bf16.msra.mxu0 %v25032_v23  ;;  %v25071_v23 = vld [vmem:[#allocation5 + $0x1280] sm:$0xff]  }
 0x257   :  { %22785 = vmatprep.subr.bf16.mxu0 %v25035_v29  ;;  %v25076_v29 = vld [vmem:[#allocation5 + $0x1250] sm:$0xff]  }
 0x258   :  { %22778 = vmatpush3.bf16.msra.mxu1 %v25034_v27  ;;  %v25074_v27 = vld [vmem:[#allocation5 + $0x12c8] sm:$0xff]  }
 0x259   :  { %22807 = vmatprep.subr.bf16.mxu1 %v25037_v33  ;;  %17127 = vmatmul.mubr.bf16.vlgmr.msra.gmra.mrb[64].mxu0 %v4059_v31  ;;  %v25078_v31 = vld [vmem:[#allocation5 + $0x12d0] sm:$0xff]   ;;  %v25080_v33 = vld [vmem:[#allocation5 + $0x1258] sm:$0xff]  }
 0x25a   :  { %22786 = vmatpush3.bf16.msra.mxu0 %v25036_v36  ;;  %17206 = vmatprep.mubr.bf16.mxu0 %v4080_v42  ;;  %v25082_v36 = vld [vmem:[#allocation5 + $0x12d8] sm:$0xff]   ;;  %v25088_v42 = vld [vmem:[#allocation5 + $0x1268] sm:$0xff]  }
 0x25b   :  { %17167 = vmatmul.mubr.bf16.vlgmr.msra.gmra.mrb[64].mxu1 %v4081_v38  ;;  %22787 = vmatprep.subr.bf16.mxu0 %v25039_v39  ;;  %v25084_v38 = vld [vmem:[#allocation5 + $0x1260] sm:$0xff]  }
 0x25c   :  { %22808 = vmatpush3.bf16.msra.mxu1 %v25038_v41  ;;  %17246 = vmatprep.mubr.bf16.mxu1 %v4084_v45  ;;  %v25085_v39 = vld [vmem:[#allocation5 + $0x1220] sm:$0xff]   ;;  %v25090_v45 = vld [vmem:[#allocation5 + $0x12e8] sm:$0xff]  }
 0x25d   :  { %22809 = vmatprep.subr.bf16.mxu1 %v25041_v43  ;;  %v25087_v41 = vld [vmem:[#allocation5 + $0x12a0] sm:$0xff]   ;;  %v25089_v43 = vld [vmem:[#allocation5 + $0x1228] sm:$0xff]  }
 0x25e   :  { %22788 = vmatpush3.bf16.msra.mxu0 %v25040_v44 }
 0x25f   :  { %22789 = vmatprep.subr.bf16.mxu0 %v25043_v46 }
 0x260   :  { %22810 = vmatpush3.bf16.msra.mxu1 %v25042_v47  ;;  %v25091_v47 = vld [vmem:[#allocation5 + $0x12a8] sm:$0xff]  }
 0x261   :  { %22811 = vmatprep.subr.bf16.mxu1 %v25045_v48 }
 0x262   :  { %22790 = vmatpush3.bf16.msra.mxu0 %v25044_v49 }
 0x263   :  { %22791 = vmatprep.subr.bf16.mxu0 %v25047_v50 }
 0x264   :  { %22812 = vmatpush3.bf16.msra.mxu1 %v25046_v51 }
 0x265   :  { %22813 = vmatprep.subr.bf16.mxu1 %v25049_v52 }
 0x266   :  { %22792 = vmatpush3.bf16.msra.mxu0 %v25048_v53  ;;  %v25092_v53 = vld [vmem:[#allocation5 + $0x1270] sm:$0xff]  }
 0x267   :  { %22793 = vmatprep.subr.bf16.mxu0 %v25051_v54  ;;  %v25093_v54 = vld [vmem:[#allocation5 + $0x1230] sm:$0xff]  }
 0x268   :  { %22814 = vmatpush3.bf16.msra.mxu1 %v25050_v55 }
 0x269   :  { %22815 = vmatprep.subr.bf16.mxu1 %v25053_v56 }
 0x26a   :  { %22794 = vmatpush3.bf16.msra.mxu0 %v25052_v57  ;;  %v25094_v57 = vld [vmem:[#allocation5 + $0x12f0] sm:$0xff]  }
 0x26b   :  { %22795 = vmatprep.subr.bf16.mxu0 %v25055_v58 }
 0x26c   :  { %v22493_v60 = vpop.f32.mrb[40].mxu0  ;;  %22816 = vmatpush3.bf16.msra.mxu1 %v25054_v59 }
 0x26d   :  { %v22494_v62 = vpop.f32.mrb[41].mxu0  ;;  %22817 = vmatprep.subr.bf16.mxu1 %v25057_v61 }
 0x26e   :  { %v22495_v0 = vadd.f32 %v22494_v62, %v22493_v60  ;;  %v22496_v1 = vpop.f32.mrb[42].mxu0  ;;  %v22515_v2 = vpop.f32.mrb[40].mxu1  ;;  %22796 = vmatpush3.bf16.msra.mxu0 %v25056_v63  ;;  %v25095_v60 = vld [vmem:[#allocation5 + $0x12b0] sm:$0xff]   ;;  %v25096_v62 = vld [vmem:[#allocation5 + $0x1278] sm:$0xff]  }
 0x26f   :  { %v22497_v5 = vpop.f32.mrb[43].mxu0  ;;  %v22516_v6 = vpop.f32.mrb[41].mxu1  ;;  %22797 = vmatprep.subr.bf16.mxu0 %v25059_v4  ;;  %v25097_v63 = vld [vmem:[#allocation5 + $0x1238] sm:$0xff]   ;;  %v62_v1 = vld [vmem:[#allocation2 + $0x48] sm:$0xff] }
 0x270   :  { %v16649_v8 = vadd.f32 %v22495_v0, %v26551_v19  ;;  %v22517_v9 = vadd.f32 %v22516_v6, %v22515_v2  ;;  %v22518_v11 = vpop.f32.mrb[42].mxu1  ;;  %22818 = vmatpush3.bf16.msra.mxu1 %v25058_v3  ;;  %v4066_v19 = vrot.slane %v26556_v32, %v26434_v34  ;;  %v25079_v32 = vld [vmem:[#allocation5 + $0x1290] sm:$0xff]   ;;  %v25098_v0 = vld [vmem:[#allocation5 + $0x12f8] sm:$0xff]   ;;  %v4092_v2 = vrot.slane %v62_v1, %v26434_v34  ;;  %v25100_v5 = vld [vmem:[#allocation5 + $0x1340] sm:$0xff]  }
 0x271   :  { %v22519_v13 = vpop.f32.mrb[43].mxu1  ;;  %22819 = vmatprep.subr.bf16.mxu1 %v25061_v10  ;;  %v25099_v3 = vld [vmem:[#allocation5 + $0x12b8] sm:$0xff]   ;;  %v4085_v4 = vcombine.high %v62_v1, %v62_v1  ;;  %v25101_v11 = vld [vmem:[#allocation5 + $0x1300] sm:$0xff]   ;;  %v25137_v1 = vld [vmem:[#allocation5 + $0x1448] sm:$0xff]  }
 0x272   :  { %v26563_v14 = vadd.f32 %v22517_v9, %v16649_v8  ;;  %22798 = vmatpush3.bf16.msra.mxu0 %v25060_v7  ;;  %v4082_v24 = vcombine.high %v4066_v19, %v4066_v19  ;;  %v4100_v6 = vcombine.high %v4092_v2, %v4092_v2  ;;  %v4108_v7 = vrot.slane %v4092_v2, %v26434_v34  ;;  %v25102_v9 = vld [vmem:[#allocation5 + $0x13c0] sm:$0xff]   ;;  %v25138_v2 = vld [vmem:[#allocation5 + $0x1408] sm:$0xff]  }
 0x273   :  { %22799 = vmatprep.subr.bf16.mxu0 %v25063_v15  ;;  %v26573_v8 = vrot.slane %v4085_v4, %v26434_v34  ;;  %v25140_v4 = vld [vmem:[#allocation5 + $0x1488] sm:$0xff]  }
 0x274   :  { %22820 = vmatpush3.bf16.msra.mxu1 %v25062_v12  ;;  %v4122_v10 = vrot.slane %v4100_v6, %v26434_v34  ;;  %v4130_v13 = vcombine.high %v4108_v7, %v4108_v7  ;;  %v25142_v6 = vld [vmem:[#allocation5 + $0x1410] sm:$0xff]  }
 0x275   :  { %22821 = vmatprep.subr.bf16.mxu1 %v25065_v17  ;;  %v4101_v12 = vcombine.high %v26573_v8, %v26573_v8 }
 0x276   :  { %22800 = vmatpush3.bf16.msra.mxu0 %v25064_v16  ;;  %v4132_v15 = vcombine.high %v4122_v10, %v4122_v10  ;;  %v25103_v16 = vld [vmem:[#allocation5 + $0x1380] sm:$0xff]  }
 0x277   :  { %22829 = vmatprep.subr.bf16.mxu0 %v25068_v20  ;;  %v4129_v17 = vrot.slane %v4101_v12, %v26434_v34  ;;  %v25148_v12 = vld [vmem:[#allocation5 + $0x1498] sm:$0xff]  }
 0x278   :  { %22822 = vmatpush3.bf16.msra.mxu1 %v25067_v18  ;;  %v25106_v18 = vld [vmem:[#allocation5 + $0x13c8] sm:$0xff]  }
 0x279   :  { %17207 = vmatmul.mubr.bf16.vlgmr.msra.gmra.mrb[68].mxu0 %v4066_v19  ;;  %22851 = vmatprep.subr.bf16.mxu1 %v25070_v22  ;;  %v25105_v19 = vld [vmem:[#allocation5 + $0x1308] sm:$0xff]   ;;  %v4133_v20 = vcombine.high %v4129_v17, %v4129_v17 }
 0x27a   :  { %22830 = vmatpush3.bf16.msra.mxu0 %v25069_v21  ;;  %17286 = vmatprep.mubr.bf16.mxu0 %v4122_v10  ;;  %v25108_v21 = vld [vmem:[#allocation5 + $0x1350] sm:$0xff]   ;;  %v25107_v22 = vld [vmem:[#allocation5 + $0x1388] sm:$0xff]   ;;  %v25146_v10 = vld [vmem:[#allocation5 + $0x1418] sm:$0xff]  }
 0x27b   :  { %17247 = vmatmul.mubr.bf16.vlgmr.msra.gmra.mrb[68].mxu1 %v4082_v24  ;;  %22831 = vmatprep.subr.bf16.mxu0 %v25072_v25  ;;  %v25109_v24 = vld [vmem:[#allocation5 + $0x1310] sm:$0xff]   ;;  %v25112_v25 = vld [vmem:[#allocation5 + $0x1358] sm:$0xff]  }
 0x27c   :  { %22852 = vmatpush3.bf16.msra.mxu1 %v25071_v23  ;;  %17326 = vmatprep.mubr.bf16.mxu1 %v4132_v15  ;;  %v25110_v23 = vld [vmem:[#allocation5 + $0x13d0] sm:$0xff]   ;;  %v25151_v15 = vld [vmem:[#allocation5 + $0x14e0] sm:$0xff]  }
 0x27d   :  { %22853 = vmatprep.subr.bf16.mxu1 %v25074_v27  ;;  %v25114_v27 = vld [vmem:[#allocation5 + $0x13d8] sm:$0xff]  }
 0x27e   :  { %22832 = vmatpush3.bf16.msra.mxu0 %v25073_v26  ;;  %v25111_v26 = vld [vmem:[#allocation5 + $0x1390] sm:$0xff]  }
 0x27f   :  { %22833 = vmatprep.subr.bf16.mxu0 %v25076_v29  ;;  %v25116_v29 = vld [vmem:[#allocation5 + $0x1360] sm:$0xff]  }
 0x280   :  { %22854 = vmatpush3.bf16.msra.mxu1 %v25075_v28  ;;  %v25113_v28 = vld [vmem:[#allocation5 + $0x1318] sm:$0xff]  }
 0x281   :  { %22855 = vmatprep.subr.bf16.mxu1 %v25078_v31  ;;  %v25118_v31 = vld [vmem:[#allocation5 + $0x13e0] sm:$0xff]  }
 0x282   :  { %22834 = vmatpush3.bf16.msra.mxu0 %v25077_v30  ;;  %v25115_v30 = vld [vmem:[#allocation5 + $0x1398] sm:$0xff]  }
 0x283   :  { %22835 = vmatprep.subr.bf16.mxu0 %v25080_v33  ;;  %v25120_v33 = vld [vmem:[#allocation5 + $0x1368] sm:$0xff]  }
 0x284   :  { %22856 = vmatpush3.bf16.msra.mxu1 %v25079_v32  ;;  %v25117_v32 = vld [vmem:[#allocation5 + $0x1320] sm:$0xff]  }
 0x285   :  { %22857 = vmatprep.subr.bf16.mxu1 %v25082_v36 }
 0x286   :  { %22836 = vmatpush3.bf16.msra.mxu0 %v25081_v35  ;;  %v25119_v35 = vld [vmem:[#allocation5 + $0x13a0] sm:$0xff]  }
 0x287   :  { %22837 = vmatprep.subr.bf16.mxu0 %v25084_v38 }
 0x288   :  { %22858 = vmatpush3.bf16.msra.mxu1 %v25083_v37  ;;  %v25122_v37 = vld [vmem:[#allocation5 + $0x13e8] sm:$0xff]  }
 0x289   :  { %22859 = vmatprep.subr.bf16.mxu1 %v25086_v40 }
 0x28a   :  { %22838 = vmatpush3.bf16.msra.mxu0 %v25085_v39  ;;  %v25121_v39 = vld [vmem:[#allocation5 + $0x1328] sm:$0xff]  }
 0x28b   :  { %22839 = vmatprep.subr.bf16.mxu0 %v25088_v42 }
 0x28c   :  { %v22537_v44 = vpop.f32.mrb[44].mxu0  ;;  %22860 = vmatpush3.bf16.msra.mxu1 %v25087_v41 }
 0x28d   :  { %v22538_v46 = vpop.f32.mrb[45].mxu0  ;;  %22861 = vmatprep.subr.bf16.mxu1 %v25090_v45 }
 0x28e   :  { %v22539_v48 = vadd.f32 %v22538_v46, %v22537_v44  ;;  %v22540_v49 = vpop.f32.mrb[46].mxu0  ;;  %v22559_v50 = vpop.f32.mrb[44].mxu1  ;;  %22840 = vmatpush3.bf16.msra.mxu0 %v25089_v43  ;;  %v25123_v43 = vld [vmem:[#allocation5 + $0x13a8] sm:$0xff]   ;;  %v25124_v44 = vld [vmem:[#allocation5 + $0x1370] sm:$0xff]  }
 0x28f   :  { %v22541_v51 = vpop.f32.mrb[47].mxu0  ;;  %v22560_v52 = vpop.f32.mrb[45].mxu1  ;;  %22841 = vmatprep.subr.bf16.mxu0 %v25092_v53 }
 0x290   :  { %v16729_v55 = vadd.f32 %v22539_v48, %v26563_v14  ;;  %v22561_v56 = vadd.f32 %v22560_v52, %v22559_v50  ;;  %v22562_v58 = vpop.f32.mrb[46].mxu1  ;;  %22862 = vmatpush3.bf16.msra.mxu1 %v25091_v47  ;;  %v25104_v14 = vld [vmem:[#allocation5 + $0x1348] sm:$0xff]   ;;  %v25125_v47 = vld [vmem:[#allocation5 + $0x1330] sm:$0xff]  }
 0x291   :  { %v22563_v61 = vpop.f32.mrb[47].mxu1  ;;  %22863 = vmatprep.subr.bf16.mxu1 %v25094_v57  ;;  %v25126_v50 = vld [vmem:[#allocation5 + $0x13f0] sm:$0xff]   ;;  %v25130_v57 = vld [vmem:[#allocation5 + $0x13f8] sm:$0xff]  }
 0x292   :  { %v26568_v59 = vadd.f32 %v22561_v56, %v16729_v55  ;;  %22842 = vmatpush3.bf16.msra.mxu0 %v25093_v54  ;;  %v25127_v52 = vld [vmem:[#allocation5 + $0x13b0] sm:$0xff]   ;;  %v25128_v55 = vld [vmem:[#allocation5 + $0x1378] sm:$0xff]   ;;  %v25134_v61 = vld [vmem:[#allocation5 + $0x1400] sm:$0xff]  }
 0x293   :  { %22843 = vmatprep.subr.bf16.mxu0 %v25096_v62  ;;  %v25129_v56 = vld [vmem:[#allocation5 + $0x1338] sm:$0xff]   ;;  %v25135_v62 = vld [vmem:[#allocation5 + $0x14c0] sm:$0xff]  }
 0x294   :  { %22864 = vmatpush3.bf16.msra.mxu1 %v25095_v60  ;;  %v25132_v58 = vld [vmem:[#allocation5 + $0x13b8] sm:$0xff]   ;;  %v25133_v60 = vld [vmem:[#allocation5 + $0x1440] sm:$0xff]  }
 0x295   :  { %22865 = vmatprep.subr.bf16.mxu1 %v25098_v0 }
 0x296   :  { %22844 = vmatpush3.bf16.msra.mxu0 %v25097_v63  ;;  %v25136_v63 = vld [vmem:[#allocation5 + $0x1480] sm:$0xff]  }
 0x297   :  { %22873 = vmatprep.subr.bf16.mxu0 %v25100_v5  ;;  %v25141_v5 = vld [vmem:[#allocation5 + $0x1450] sm:$0xff]  }
 0x298   :  { %22866 = vmatpush3.bf16.msra.mxu1 %v25099_v3  ;;  %v25139_v3 = vld [vmem:[#allocation5 + $0x14c8] sm:$0xff]  }
 0x299   :  { %22895 = vmatprep.subr.bf16.mxu1 %v25102_v9  ;;  %17287 = vmatmul.mubr.bf16.vlgmr.msra.gmra.mrb[72].mxu0 %v4108_v7  ;;  %v25143_v7 = vld [vmem:[#allocation5 + $0x14d0] sm:$0xff]   ;;  %v25145_v9 = vld [vmem:[#allocation5 + $0x1458] sm:$0xff]  }
 0x29a   :  { %22874 = vmatpush3.bf16.msra.mxu0 %v25101_v11  ;;  %17366 = vmatprep.mubr.bf16.mxu0 %v4129_v17  ;;  %v25147_v11 = vld [vmem:[#allocation5 + $0x14d8] sm:$0xff]   ;;  %v25153_v17 = vld [vmem:[#allocation5 + $0x1468] sm:$0xff]  }
 0x29b   :  { %17327 = vmatmul.mubr.bf16.vlgmr.msra.gmra.mrb[72].mxu1 %v4130_v13  ;;  %22875 = vmatprep.subr.bf16.mxu0 %v25104_v14  ;;  %v25149_v13 = vld [vmem:[#allocation5 + $0x1460] sm:$0xff]  }
 0x29c   :  { %22896 = vmatpush3.bf16.msra.mxu1 %v25103_v16  ;;  %17406 = vmatprep.mubr.bf16.mxu1 %v4133_v20  ;;  %v25150_v14 = vld [vmem:[#allocation5 + $0x1420] sm:$0xff]   ;;  %v25155_v20 = vld [vmem:[#allocation5 + $0x14e8] sm:$0xff]  }
 0x29d   :  { %22897 = vmatprep.subr.bf16.mxu1 %v25106_v18  ;;  %v25152_v16 = vld [vmem:[#allocation5 + $0x14a0] sm:$0xff]   ;;  %v25154_v18 = vld [vmem:[#allocation5 + $0x1428] sm:$0xff]  }
 0x29e   :  { %22876 = vmatpush3.bf16.msra.mxu0 %v25105_v19 }
 0x29f   :  { %22877 = vmatprep.subr.bf16.mxu0 %v25108_v21 }
 0x2a0   :  { %22898 = vmatpush3.bf16.msra.mxu1 %v25107_v22  ;;  %v25156_v22 = vld [vmem:[#allocation5 + $0x14a8] sm:$0xff]  }
 0x2a1   :  { %22899 = vmatprep.subr.bf16.mxu1 %v25110_v23 }
 0x2a2   :  { %22878 = vmatpush3.bf16.msra.mxu0 %v25109_v24 }
 0x2a3   :  { %22879 = vmatprep.subr.bf16.mxu0 %v25112_v25 }
 0x2a4   :  { %22900 = vmatpush3.bf16.msra.mxu1 %v25111_v26 }
 0x2a5   :  { %22901 = vmatprep.subr.bf16.mxu1 %v25114_v27 }
 0x2a6   :  { %22880 = vmatpush3.bf16.msra.mxu0 %v25113_v28  ;;  %v25157_v28 = vld [vmem:[#allocation5 + $0x1470] sm:$0xff]  }
 0x2a7   :  { %22881 = vmatprep.subr.bf16.mxu0 %v25116_v29  ;;  %v25158_v29 = vld [vmem:[#allocation5 + $0x1430] sm:$0xff]  }
 0x2a8   :  { %22902 = vmatpush3.bf16.msra.mxu1 %v25115_v30 }
 0x2a9   :  { %22903 = vmatprep.subr.bf16.mxu1 %v25118_v31 }
 0x2aa   :  { %22882 = vmatpush3.bf16.msra.mxu0 %v25117_v32  ;;  %v25159_v32 = vld [vmem:[#allocation5 + $0x14f0] sm:$0xff]  }
 0x2ab   :  { %22883 = vmatprep.subr.bf16.mxu0 %v25120_v33 }
 0x2ac   :  { %v22581_v36 = vpop.f32.mrb[48].mxu0  ;;  %22904 = vmatpush3.bf16.msra.mxu1 %v25119_v35 }
 0x2ad   :  { %v22582_v38 = vpop.f32.mrb[49].mxu0  ;;  %22905 = vmatprep.subr.bf16.mxu1 %v25122_v37 }
 0x2ae   :  { %v22583_v40 = vadd.f32 %v22582_v38, %v22581_v36  ;;  %v22584_v41 = vpop.f32.mrb[50].mxu0  ;;  %v22603_v42 = vpop.f32.mrb[48].mxu1  ;;  %22884 = vmatpush3.bf16.msra.mxu0 %v25121_v39  ;;  %v25160_v36 = vld [vmem:[#allocation5 + $0x14b0] sm:$0xff]   ;;  %v25161_v38 = vld [vmem:[#allocation5 + $0x1478] sm:$0xff]  }
 0x2af   :  { %v22585_v45 = vpop.f32.mrb[51].mxu0  ;;  %v22604_v46 = vpop.f32.mrb[49].mxu1  ;;  %22885 = vmatprep.subr.bf16.mxu0 %v25124_v44  ;;  %v25162_v39 = vld [vmem:[#allocation5 + $0x1438] sm:$0xff]  }
 0x2b0   :  { %v16809_v48 = vadd.f32 %v22583_v40, %v26568_v59  ;;  %v22605_v49 = vadd.f32 %v22604_v46, %v22603_v42  ;;  %v22606_v51 = vpop.f32.mrb[50].mxu1  ;;  %22906 = vmatpush3.bf16.msra.mxu1 %v25123_v43  ;;  %v4115_v59 = vrot.slane %v26573_v8, %v26434_v34  ;;  %v25144_v8 = vld [vmem:[#allocation5 + $0x1490] sm:$0xff]   ;;  %v25163_v40 = vld [vmem:[#allocation5 + $0x14f8] sm:$0xff]   ;;  %v25165_v45 = vld [vmem:[#allocation5 + $0x1540] sm:$0xff]  }
 0x2b1   :  { %v22607_v53 = vpop.f32.mrb[51].mxu1  ;;  %22907 = vmatprep.subr.bf16.mxu1 %v25126_v50  ;;  %v63_v41 = vld [vmem:[#allocation2 + $0x50] sm:$0xff]  ;;  %v25166_v51 = vld [vmem:[#allocation5 + $0x1500] sm:$0xff]  }
 0x2b2   :  { %v26580_v54 = vadd.f32 %v22605_v49, %v16809_v48  ;;  %22886 = vmatpush3.bf16.msra.mxu0 %v25125_v47  ;;  %v4131_v0 = vcombine.high %v4115_v59, %v4115_v59  ;;  %v4141_v42 = vrot.slane %v63_v41, %v26434_v34  ;;  %v25164_v43 = vld [vmem:[#allocation5 + $0x14b8] sm:$0xff]   ;;  %v4134_v44 = vcombine.high %v63_v41, %v63_v41  ;;  %v25167_v49 = vld [vmem:[#allocation5 + $0x15c0] sm:$0xff]   ;;  %v25202_v41 = vld [vmem:[#allocation5 + $0x1648] sm:$0xff]  }
 0x2b3   :  { %22887 = vmatprep.subr.bf16.mxu0 %v25128_v55 }
 0x2b4   :  { %22908 = vmatpush3.bf16.msra.mxu1 %v25127_v52  ;;  %v4149_v46 = vcombine.high %v4141_v42, %v4141_v42  ;;  %v4157_v47 = vrot.slane %v4141_v42, %v26434_v34  ;;  %v26590_v48 = vrot.slane %v4134_v44, %v26434_v34  ;;  %v25203_v42 = vld [vmem:[#allocation5 + $0x1608] sm:$0xff]  }
 0x2b5   :  { %22909 = vmatprep.subr.bf16.mxu1 %v25130_v57  ;;  %v25205_v44 = vld [vmem:[#allocation5 + $0x1688] sm:$0xff]  }
 0x2b6   :  { %22888 = vmatpush3.bf16.msra.mxu0 %v25129_v56  ;;  %v4171_v50 = vrot.slane %v4149_v46, %v26434_v34  ;;  %v4150_v52 = vcombine.high %v26590_v48, %v26590_v48  ;;  %v4179_v53 = vcombine.high %v4157_v47, %v4157_v47  ;;  %v25168_v56 = vld [vmem:[#allocation5 + $0x1580] sm:$0xff]   ;;  %v25207_v46 = vld [vmem:[#allocation5 + $0x1610] sm:$0xff]  }
 0x2b7   :  { %22917 = vmatprep.subr.bf16.mxu0 %v25133_v60 }
 0x2b8   :  { %22910 = vmatpush3.bf16.msra.mxu1 %v25132_v58  ;;  %v4181_v55 = vcombine.high %v4171_v50, %v4171_v50  ;;  %v4178_v57 = vrot.slane %v4150_v52, %v26434_v34  ;;  %v25171_v58 = vld [vmem:[#allocation5 + $0x15c8] sm:$0xff]   ;;  %v25213_v52 = vld [vmem:[#allocation5 + $0x1698] sm:$0xff]  }
 0x2b9   :  { %17367 = vmatmul.mubr.bf16.vlgmr.msra.gmra.mrb[76].mxu0 %v4115_v59  ;;  %22939 = vmatprep.subr.bf16.mxu1 %v25135_v62  ;;  %v25170_v59 = vld [vmem:[#allocation5 + $0x1508] sm:$0xff]  }
 0x2ba   :  { %22918 = vmatpush3.bf16.msra.mxu0 %v25134_v61  ;;  %17446 = vmatprep.mubr.bf16.mxu0 %v4171_v50  ;;  %v4182_v60 = vcombine.high %v4178_v57, %v4178_v57  ;;  %v25173_v61 = vld [vmem:[#allocation5 + $0x1550] sm:$0xff]   ;;  %v25172_v62 = vld [vmem:[#allocation5 + $0x1588] sm:$0xff]   ;;  %v25211_v50 = vld [vmem:[#allocation5 + $0x1618] sm:$0xff]  }
 0x2bb   :  { %17407 = vmatmul.mubr.bf16.vlgmr.msra.gmra.mrb[76].mxu1 %v4131_v0  ;;  %22919 = vmatprep.subr.bf16.mxu0 %v25137_v1  ;;  %v25174_v0 = vld [vmem:[#allocation5 + $0x1510] sm:$0xff]   ;;  %v25177_v1 = vld [vmem:[#allocation5 + $0x1558] sm:$0xff]  }
 0x2bc   :  { %22940 = vmatpush3.bf16.msra.mxu1 %v25136_v63  ;;  %17486 = vmatprep.mubr.bf16.mxu1 %v4181_v55  ;;  %v25175_v63 = vld [vmem:[#allocation5 + $0x15d0] sm:$0xff]   ;;  %v25216_v55 = vld [vmem:[#allocation5 + $0x16e0] sm:$0xff]  }
 0x2bd   :  { %22941 = vmatprep.subr.bf16.mxu1 %v25139_v3  ;;  %v25179_v3 = vld [vmem:[#allocation5 + $0x15d8] sm:$0xff]  }
 0x2be   :  { %22920 = vmatpush3.bf16.msra.mxu0 %v25138_v2  ;;  %v25176_v2 = vld [vmem:[#allocation5 + $0x1590] sm:$0xff]  }
 0x2bf   :  { %22921 = vmatprep.subr.bf16.mxu0 %v25141_v5  ;;  %v25181_v5 = vld [vmem:[#allocation5 + $0x1560] sm:$0xff]  }
 0x2c0   :  { %22942 = vmatpush3.bf16.msra.mxu1 %v25140_v4  ;;  %v25178_v4 = vld [vmem:[#allocation5 + $0x1518] sm:$0xff]  }
 0x2c1   :  { %22943 = vmatprep.subr.bf16.mxu1 %v25143_v7  ;;  %v25183_v7 = vld [vmem:[#allocation5 + $0x15e0] sm:$0xff]  }
 0x2c2   :  { %22922 = vmatpush3.bf16.msra.mxu0 %v25142_v6  ;;  %v25180_v6 = vld [vmem:[#allocation5 + $0x1598] sm:$0xff]  }
 0x2c3   :  { %22923 = vmatprep.subr.bf16.mxu0 %v25145_v9  ;;  %v25185_v9 = vld [vmem:[#allocation5 + $0x1568] sm:$0xff]  }
 0x2c4   :  { %22944 = vmatpush3.bf16.msra.mxu1 %v25144_v8  ;;  %v25182_v8 = vld [vmem:[#allocation5 + $0x1520] sm:$0xff]  }
 0x2c5   :  { %22945 = vmatprep.subr.bf16.mxu1 %v25147_v11 }
 0x2c6   :  { %22924 = vmatpush3.bf16.msra.mxu0 %v25146_v10  ;;  %v25184_v10 = vld [vmem:[#allocation5 + $0x15a0] sm:$0xff]  }
 0x2c7   :  { %22925 = vmatprep.subr.bf16.mxu0 %v25149_v13 }
 0x2c8   :  { %22946 = vmatpush3.bf16.msra.mxu1 %v25148_v12  ;;  %v25187_v12 = vld [vmem:[#allocation5 + $0x15e8] sm:$0xff]  }
 0x2c9   :  { %22947 = vmatprep.subr.bf16.mxu1 %v25151_v15 }
 0x2ca   :  { %22926 = vmatpush3.bf16.msra.mxu0 %v25150_v14  ;;  %v25186_v14 = vld [vmem:[#allocation5 + $0x1528] sm:$0xff]  }
 0x2cb   :  { %22927 = vmatprep.subr.bf16.mxu0 %v25153_v17 }
 0x2cc   :  { %v22625_v19 = vpop.f32.mrb[52].mxu0  ;;  %22948 = vmatpush3.bf16.msra.mxu1 %v25152_v16 }
 0x2cd   :  { %v22626_v21 = vpop.f32.mrb[53].mxu0  ;;  %22949 = vmatprep.subr.bf16.mxu1 %v25155_v20 }
 0x2ce   :  { %v22627_v23 = vadd.f32 %v22626_v21, %v22625_v19  ;;  %v22628_v24 = vpop.f32.mrb[54].mxu0  ;;  %v22647_v25 = vpop.f32.mrb[52].mxu1  ;;  %22928 = vmatpush3.bf16.msra.mxu0 %v25154_v18  ;;  %v25188_v18 = vld [vmem:[#allocation5 + $0x15a8] sm:$0xff]   ;;  %v25189_v19 = vld [vmem:[#allocation5 + $0x1570] sm:$0xff]  }
 0x2cf   :  { %v22629_v26 = vpop.f32.mrb[55].mxu0  ;;  %v22648_v27 = vpop.f32.mrb[53].mxu1  ;;  %22929 = vmatprep.subr.bf16.mxu0 %v25157_v28 }
 0x2d0   :  { %v16889_v30 = vadd.f32 %v22627_v23, %v26580_v54  ;;  %v22649_v31 = vadd.f32 %v22648_v27, %v22647_v25  ;;  %v22650_v33 = vpop.f32.mrb[54].mxu1  ;;  %22950 = vmatpush3.bf16.msra.mxu1 %v25156_v22  ;;  %v25169_v54 = vld [vmem:[#allocation5 + $0x1548] sm:$0xff]   ;;  %v25190_v22 = vld [vmem:[#allocation5 + $0x1530] sm:$0xff]  }
 0x2d1   :  { %v22651_v37 = vpop.f32.mrb[55].mxu1  ;;  %22951 = vmatprep.subr.bf16.mxu1 %v25159_v32  ;;  %v25191_v25 = vld [vmem:[#allocation5 + $0x15f0] sm:$0xff]   ;;  %v25195_v32 = vld [vmem:[#allocation5 + $0x15f8] sm:$0xff]  }
 0x2d2   :  { %v26585_v35 = vadd.f32 %v22649_v31, %v16889_v30  ;;  %22930 = vmatpush3.bf16.msra.mxu0 %v25158_v29  ;;  %v25192_v27 = vld [vmem:[#allocation5 + $0x15b0] sm:$0xff]   ;;  %v25193_v30 = vld [vmem:[#allocation5 + $0x1578] sm:$0xff]   ;;  %v25199_v37 = vld [vmem:[#allocation5 + $0x1600] sm:$0xff]  }
 0x2d3   :  { %22931 = vmatprep.subr.bf16.mxu0 %v25161_v38  ;;  %v25194_v31 = vld [vmem:[#allocation5 + $0x1538] sm:$0xff]   ;;  %v25200_v38 = vld [vmem:[#allocation5 + $0x16c0] sm:$0xff]  }
 0x2d4   :  { %22952 = vmatpush3.bf16.msra.mxu1 %v25160_v36  ;;  %v25197_v33 = vld [vmem:[#allocation5 + $0x15b8] sm:$0xff]   ;;  %v25198_v36 = vld [vmem:[#allocation5 + $0x1640] sm:$0xff]  }
 0x2d5   :  { %22953 = vmatprep.subr.bf16.mxu1 %v25163_v40 }
 0x2d6   :  { %22932 = vmatpush3.bf16.msra.mxu0 %v25162_v39  ;;  %v25201_v39 = vld [vmem:[#allocation5 + $0x1680] sm:$0xff]  }
 0x2d7   :  { %22961 = vmatprep.subr.bf16.mxu0 %v25165_v45  ;;  %v25206_v45 = vld [vmem:[#allocation5 + $0x1650] sm:$0xff]  }
 0x2d8   :  { %22954 = vmatpush3.bf16.msra.mxu1 %v25164_v43  ;;  %v25204_v43 = vld [vmem:[#allocation5 + $0x16c8] sm:$0xff]  }
 0x2d9   :  { %22983 = vmatprep.subr.bf16.mxu1 %v25167_v49  ;;  %17447 = vmatmul.mubr.bf16.vlgmr.msra.gmra.mrb[80].mxu0 %v4157_v47  ;;  %v25208_v47 = vld [vmem:[#allocation5 + $0x16d0] sm:$0xff]   ;;  %v25210_v49 = vld [vmem:[#allocation5 + $0x1658] sm:$0xff]  }
 0x2da   :  { %22962 = vmatpush3.bf16.msra.mxu0 %v25166_v51  ;;  %17526 = vmatprep.mubr.bf16.mxu0 %v4178_v57  ;;  %v25212_v51 = vld [vmem:[#allocation5 + $0x16d8] sm:$0xff]   ;;  %v25218_v57 = vld [vmem:[#allocation5 + $0x1668] sm:$0xff]  }
 0x2db   :  { %17487 = vmatmul.mubr.bf16.vlgmr.msra.gmra.mrb[80].mxu1 %v4179_v53  ;;  %22963 = vmatprep.subr.bf16.mxu0 %v25169_v54  ;;  %v25214_v53 = vld [vmem:[#allocation5 + $0x1660] sm:$0xff]  }
 0x2dc   :  { %22984 = vmatpush3.bf16.msra.mxu1 %v25168_v56  ;;  %17566 = vmatprep.mubr.bf16.mxu1 %v4182_v60  ;;  %v25215_v54 = vld [vmem:[#allocation5 + $0x1620] sm:$0xff]   ;;  %v25220_v60 = vld [vmem:[#allocation5 + $0x16e8] sm:$0xff]  }
 0x2dd   :  { %22985 = vmatprep.subr.bf16.mxu1 %v25171_v58  ;;  %v25217_v56 = vld [vmem:[#allocation5 + $0x16a0] sm:$0xff]   ;;  %v25219_v58 = vld [vmem:[#allocation5 + $0x1628] sm:$0xff]  }
 0x2de   :  { %22964 = vmatpush3.bf16.msra.mxu0 %v25170_v59 }
 0x2df   :  { %22965 = vmatprep.subr.bf16.mxu0 %v25173_v61 }
 0x2e0   :  { %22986 = vmatpush3.bf16.msra.mxu1 %v25172_v62  ;;  %v25221_v62 = vld [vmem:[#allocation5 + $0x16a8] sm:$0xff]  }
 0x2e1   :  { %22987 = vmatprep.subr.bf16.mxu1 %v25175_v63 }
 0x2e2   :  { %22966 = vmatpush3.bf16.msra.mxu0 %v25174_v0 }
 0x2e3   :  { %22967 = vmatprep.subr.bf16.mxu0 %v25177_v1 }
 0x2e4   :  { %22988 = vmatpush3.bf16.msra.mxu1 %v25176_v2 }
 0x2e5   :  { %22989 = vmatprep.subr.bf16.mxu1 %v25179_v3 }
 0x2e6   :  { %22968 = vmatpush3.bf16.msra.mxu0 %v25178_v4  ;;  %v25222_v4 = vld [vmem:[#allocation5 + $0x1670] sm:$0xff]  }
 0x2e7   :  { %22969 = vmatprep.subr.bf16.mxu0 %v25181_v5  ;;  %v25223_v5 = vld [vmem:[#allocation5 + $0x1630] sm:$0xff]  }
 0x2e8   :  { %22990 = vmatpush3.bf16.msra.mxu1 %v25180_v6 }
 0x2e9   :  { %22991 = vmatprep.subr.bf16.mxu1 %v25183_v7 }
 0x2ea   :  { %22970 = vmatpush3.bf16.msra.mxu0 %v25182_v8  ;;  %v25224_v8 = vld [vmem:[#allocation5 + $0x16f0] sm:$0xff]  }
 0x2eb   :  { %22971 = vmatprep.subr.bf16.mxu0 %v25185_v9 }
 0x2ec   :  { %v22669_v11 = vpop.f32.mrb[56].mxu0  ;;  %22992 = vmatpush3.bf16.msra.mxu1 %v25184_v10 }
 0x2ed   :  { %v22670_v13 = vpop.f32.mrb[57].mxu0  ;;  %22993 = vmatprep.subr.bf16.mxu1 %v25187_v12 }
 0x2ee   :  { %v22671_v15 = vadd.f32 %v22670_v13, %v22669_v11  ;;  %v22672_v16 = vpop.f32.mrb[58].mxu0  ;;  %v22691_v17 = vpop.f32.mrb[56].mxu1  ;;  %22972 = vmatpush3.bf16.msra.mxu0 %v25186_v14  ;;  %v25225_v11 = vld [vmem:[#allocation5 + $0x16b0] sm:$0xff]   ;;  %v25226_v13 = vld [vmem:[#allocation5 + $0x1678] sm:$0xff]  }
 0x2ef   :  { %v22673_v20 = vpop.f32.mrb[59].mxu0  ;;  %v22692_v21 = vpop.f32.mrb[57].mxu1  ;;  %22973 = vmatprep.subr.bf16.mxu0 %v25189_v19  ;;  %v25227_v14 = vld [vmem:[#allocation5 + $0x1638] sm:$0xff]  }
 0x2f0   :  { %v16969_v23 = vadd.f32 %v22671_v15, %v26585_v35  ;;  %v22693_v24 = vadd.f32 %v22692_v21, %v22691_v17  ;;  %v22694_v26 = vpop.f32.mrb[58].mxu1  ;;  %22994 = vmatpush3.bf16.msra.mxu1 %v25188_v18  ;;  %v4164_v35 = vrot.slane %v26590_v48, %v26434_v34  ;;  %v25209_v48 = vld [vmem:[#allocation5 + $0x1690] sm:$0xff]   ;;  %v25228_v15 = vld [vmem:[#allocation5 + $0x16f8] sm:$0xff]   ;;  %v25230_v20 = vld [vmem:[#allocation5 + $0x1740] sm:$0xff]  }
 0x2f1   :  { %v22695_v28 = vpop.f32.mrb[59].mxu1  ;;  %22995 = vmatprep.subr.bf16.mxu1 %v25191_v25  ;;  %v64_v16 = vld [vmem:[#allocation2 + $0x58] sm:$0xff] }
 0x2f2   :  { %v26597_v29 = vadd.f32 %v22693_v24, %v16969_v23  ;;  %22974 = vmatpush3.bf16.msra.mxu0 %v25190_v22  ;;  %v4180_v40 = vcombine.high %v4164_v35, %v4164_v35  ;;  %v4190_v17 = vrot.slane %v64_v16, %v26434_v34  ;;  %v25229_v18 = vld [vmem:[#allocation5 + $0x16b8] sm:$0xff]   ;;  %v4183_v19 = vcombine.high %v64_v16, %v64_v16  ;;  %v25232_v24 = vld [vmem:[#allocation5 + $0x17c0] sm:$0xff]   ;;  %v25267_v16 = vld [vmem:[#allocation5 + $0x1848] sm:$0xff]  }
 0x2f3   :  { %22975 = vmatprep.subr.bf16.mxu0 %v25193_v30  ;;  %v25231_v26 = vld [vmem:[#allocation5 + $0x1700] sm:$0xff]  }
 0x2f4   :  { %22996 = vmatpush3.bf16.msra.mxu1 %v25192_v27  ;;  %v4198_v21 = vcombine.high %v4190_v17, %v4190_v17  ;;  %v4206_v22 = vrot.slane %v4190_v17, %v26434_v34  ;;  %v26607_v23 = vrot.slane %v4183_v19, %v26434_v34  ;;  %v25268_v17 = vld [vmem:[#allocation5 + $0x1808] sm:$0xff]  }
 0x2f5   :  { %22997 = vmatprep.subr.bf16.mxu1 %v25195_v32  ;;  %v25270_v19 = vld [vmem:[#allocation5 + $0x1888] sm:$0xff]  }
 0x2f6   :  { %22976 = vmatpush3.bf16.msra.mxu0 %v25194_v31  ;;  %v4220_v25 = vrot.slane %v4198_v21, %v26434_v34  ;;  %v4199_v27 = vcombine.high %v26607_v23, %v26607_v23  ;;  %v4228_v28 = vcombine.high %v4206_v22, %v4206_v22  ;;  %v25233_v31 = vld [vmem:[#allocation5 + $0x1780] sm:$0xff]   ;;  %v25272_v21 = vld [vmem:[#allocation5 + $0x1810] sm:$0xff]  }
 0x2f7   :  { %23005 = vmatprep.subr.bf16.mxu0 %v25198_v36 }
 0x2f8   :  { %22998 = vmatpush3.bf16.msra.mxu1 %v25197_v33  ;;  %v4230_v30 = vcombine.high %v4220_v25, %v4220_v25  ;;  %v4227_v32 = vrot.slane %v4199_v27, %v26434_v34  ;;  %v25236_v33 = vld [vmem:[#allocation5 + $0x17c8] sm:$0xff]   ;;  %v25278_v27 = vld [vmem:[#allocation5 + $0x1898] sm:$0xff]  }
 0x2f9   :  { %17527 = vmatmul.mubr.bf16.vlgmr.msra.gmra.mrb[84].mxu0 %v4164_v35  ;;  %23027 = vmatprep.subr.bf16.mxu1 %v25200_v38  ;;  %v25235_v35 = vld [vmem:[#allocation5 + $0x1708] sm:$0xff]  }
 0x2fa   :  { %23006 = vmatpush3.bf16.msra.mxu0 %v25199_v37  ;;  %17606 = vmatprep.mubr.bf16.mxu0 %v4220_v25  ;;  %v4231_v36 = vcombine.high %v4227_v32, %v4227_v32  ;;  %v25238_v37 = vld [vmem:[#allocation5 + $0x1750] sm:$0xff]   ;;  %v25237_v38 = vld [vmem:[#allocation5 + $0x1788] sm:$0xff]   ;;  %v25276_v25 = vld [vmem:[#allocation5 + $0x1818] sm:$0xff]  }
 0x2fb   :  { %17567 = vmatmul.mubr.bf16.vlgmr.msra.gmra.mrb[84].mxu1 %v4180_v40  ;;  %23007 = vmatprep.subr.bf16.mxu0 %v25202_v41  ;;  %v25239_v40 = vld [vmem:[#allocation5 + $0x1710] sm:$0xff]   ;;  %v25242_v41 = vld [vmem:[#allocation5 + $0x1758] sm:$0xff]  }
 0x2fc   :  { %23028 = vmatpush3.bf16.msra.mxu1 %v25201_v39  ;;  %17646 = vmatprep.mubr.bf16.mxu1 %v4230_v30  ;;  %v25240_v39 = vld [vmem:[#allocation5 + $0x17d0] sm:$0xff]   ;;  %v25281_v30 = vld [vmem:[#allocation5 + $0x18e0] sm:$0xff]  }
 0x2fd   :  { %23029 = vmatprep.subr.bf16.mxu1 %v25204_v43  ;;  %v25244_v43 = vld [vmem:[#allocation5 + $0x17d8] sm:$0xff]  }
 0x2fe   :  { %23008 = vmatpush3.bf16.msra.mxu0 %v25203_v42  ;;  %v25241_v42 = vld [vmem:[#allocation5 + $0x1790] sm:$0xff]  }
 0x2ff   :  { %23009 = vmatprep.subr.bf16.mxu0 %v25206_v45  ;;  %v25246_v45 = vld [vmem:[#allocation5 + $0x1760] sm:$0xff]  }
 0x300   :  { %23030 = vmatpush3.bf16.msra.mxu1 %v25205_v44  ;;  %v25243_v44 = vld [vmem:[#allocation5 + $0x1718] sm:$0xff]  }
 0x301   :  { %23031 = vmatprep.subr.bf16.mxu1 %v25208_v47  ;;  %v25248_v47 = vld [vmem:[#allocation5 + $0x17e0] sm:$0xff]  }
 0x302   :  { %23010 = vmatpush3.bf16.msra.mxu0 %v25207_v46  ;;  %v25245_v46 = vld [vmem:[#allocation5 + $0x1798] sm:$0xff]  }
 0x303   :  { %23011 = vmatprep.subr.bf16.mxu0 %v25210_v49  ;;  %v25250_v49 = vld [vmem:[#allocation5 + $0x1768] sm:$0xff]  }
 0x304   :  { %23032 = vmatpush3.bf16.msra.mxu1 %v25209_v48  ;;  %v25247_v48 = vld [vmem:[#allocation5 + $0x1720] sm:$0xff]  }
 0x305   :  { %23033 = vmatprep.subr.bf16.mxu1 %v25212_v51 }
 0x306   :  { %23012 = vmatpush3.bf16.msra.mxu0 %v25211_v50  ;;  %v25249_v50 = vld [vmem:[#allocation5 + $0x17a0] sm:$0xff]  }
 0x307   :  { %23013 = vmatprep.subr.bf16.mxu0 %v25214_v53 }
 0x308   :  { %23034 = vmatpush3.bf16.msra.mxu1 %v25213_v52  ;;  %v25252_v52 = vld [vmem:[#allocation5 + $0x17e8] sm:$0xff]  }
 0x309   :  { %23035 = vmatprep.subr.bf16.mxu1 %v25216_v55 }
 0x30a   :  { %23014 = vmatpush3.bf16.msra.mxu0 %v25215_v54  ;;  %v25251_v54 = vld [vmem:[#allocation5 + $0x1728] sm:$0xff]  }
 0x30b   :  { %23015 = vmatprep.subr.bf16.mxu0 %v25218_v57 }
 0x30c   :  { %v22713_v59 = vpop.f32.mrb[60].mxu0  ;;  %23036 = vmatpush3.bf16.msra.mxu1 %v25217_v56 }
 0x30d   :  { %v22714_v61 = vpop.f32.mrb[61].mxu0  ;;  %23037 = vmatprep.subr.bf16.mxu1 %v25220_v60 }
 0x30e   :  { %v22715_v63 = vadd.f32 %v22714_v61, %v22713_v59  ;;  %v22716_v0 = vpop.f32.mrb[62].mxu0  ;;  %v22735_v1 = vpop.f32.mrb[60].mxu1  ;;  %23016 = vmatpush3.bf16.msra.mxu0 %v25219_v58  ;;  %v25253_v58 = vld [vmem:[#allocation5 + $0x17a8] sm:$0xff]   ;;  %v25254_v59 = vld [vmem:[#allocation5 + $0x1770] sm:$0xff]  }
 0x30f   :  { %v22717_v2 = vpop.f32.mrb[63].mxu0  ;;  %v22736_v3 = vpop.f32.mrb[61].mxu1  ;;  %23017 = vmatprep.subr.bf16.mxu0 %v25222_v4 }
 0x310   :  { %v17049_v6 = vadd.f32 %v22715_v63, %v26597_v29  ;;  %v22737_v7 = vadd.f32 %v22736_v3, %v22735_v1  ;;  %v22738_v9 = vpop.f32.mrb[62].mxu1  ;;  %23038 = vmatpush3.bf16.msra.mxu1 %v25221_v62  ;;  %v25234_v29 = vld [vmem:[#allocation5 + $0x1748] sm:$0xff]   ;;  %v25255_v62 = vld [vmem:[#allocation5 + $0x1730] sm:$0xff]  }
 0x311   :  { %v22739_v12 = vpop.f32.mrb[63].mxu1  ;;  %23039 = vmatprep.subr.bf16.mxu1 %v25224_v8  ;;  %v25256_v1 = vld [vmem:[#allocation5 + $0x17f0] sm:$0xff]   ;;  %v25260_v8 = vld [vmem:[#allocation5 + $0x17f8] sm:$0xff]  }
 0x312   :  { %v26602_v10 = vadd.f32 %v22737_v7, %v17049_v6  ;;  %23018 = vmatpush3.bf16.msra.mxu0 %v25223_v5  ;;  %v25257_v3 = vld [vmem:[#allocation5 + $0x17b0] sm:$0xff]   ;;  %v25258_v6 = vld [vmem:[#allocation5 + $0x1778] sm:$0xff]   ;;  %v25264_v12 = vld [vmem:[#allocation5 + $0x1800] sm:$0xff]  }
 0x313   :  { %23019 = vmatprep.subr.bf16.mxu0 %v25226_v13  ;;  %v25259_v7 = vld [vmem:[#allocation5 + $0x1738] sm:$0xff]   ;;  %v25265_v13 = vld [vmem:[#allocation5 + $0x18c0] sm:$0xff]  }
 0x314   :  { %23040 = vmatpush3.bf16.msra.mxu1 %v25225_v11  ;;  %v25262_v9 = vld [vmem:[#allocation5 + $0x17b8] sm:$0xff]   ;;  %v25263_v11 = vld [vmem:[#allocation5 + $0x1840] sm:$0xff]  }
 0x315   :  { %23041 = vmatprep.subr.bf16.mxu1 %v25228_v15 }
 0x316   :  { %23020 = vmatpush3.bf16.msra.mxu0 %v25227_v14  ;;  %v25266_v14 = vld [vmem:[#allocation5 + $0x1880] sm:$0xff]  }
 0x317   :  { %23049 = vmatprep.subr.bf16.mxu0 %v25230_v20  ;;  %v25271_v20 = vld [vmem:[#allocation5 + $0x1850] sm:$0xff]  }
 0x318   :  { %23042 = vmatpush3.bf16.msra.mxu1 %v25229_v18  ;;  %v25269_v18 = vld [vmem:[#allocation5 + $0x18c8] sm:$0xff]  }
 0x319   :  { %23071 = vmatprep.subr.bf16.mxu1 %v25232_v24  ;;  %17607 = vmatmul.mubr.bf16.vlgmr.msra.gmra.mrb[88].mxu0 %v4206_v22  ;;  %v25273_v22 = vld [vmem:[#allocation5 + $0x18d0] sm:$0xff]   ;;  %v25275_v24 = vld [vmem:[#allocation5 + $0x1858] sm:$0xff]  }
 0x31a   :  { %23050 = vmatpush3.bf16.msra.mxu0 %v25231_v26  ;;  %17686 = vmatprep.mubr.bf16.mxu0 %v4227_v32  ;;  %v25277_v26 = vld [vmem:[#allocation5 + $0x18d8] sm:$0xff]   ;;  %v25283_v32 = vld [vmem:[#allocation5 + $0x1868] sm:$0xff]  }
 0x31b   :  { %17647 = vmatmul.mubr.bf16.vlgmr.msra.gmra.mrb[88].mxu1 %v4228_v28  ;;  %23051 = vmatprep.subr.bf16.mxu0 %v25234_v29  ;;  %v25279_v28 = vld [vmem:[#allocation5 + $0x1860] sm:$0xff]  }
 0x31c   :  { %23072 = vmatpush3.bf16.msra.mxu1 %v25233_v31  ;;  %17726 = vmatprep.mubr.bf16.mxu1 %v4231_v36  ;;  %v25280_v29 = vld [vmem:[#allocation5 + $0x1820] sm:$0xff]   ;;  %v25285_v36 = vld [vmem:[#allocation5 + $0x18e8] sm:$0xff]  }
 0x31d   :  { %23073 = vmatprep.subr.bf16.mxu1 %v25236_v33  ;;  %v25282_v31 = vld [vmem:[#allocation5 + $0x18a0] sm:$0xff]   ;;  %v25284_v33 = vld [vmem:[#allocation5 + $0x1828] sm:$0xff]  }
 0x31e   :  { %23052 = vmatpush3.bf16.msra.mxu0 %v25235_v35 }
 0x31f   :  { %23053 = vmatprep.subr.bf16.mxu0 %v25238_v37 }
 0x320   :  { %23074 = vmatpush3.bf16.msra.mxu1 %v25237_v38  ;;  %v25286_v38 = vld [vmem:[#allocation5 + $0x18a8] sm:$0xff]  }
 0x321   :  { %23075 = vmatprep.subr.bf16.mxu1 %v25240_v39 }
 0x322   :  { %23054 = vmatpush3.bf16.msra.mxu0 %v25239_v40 }
 0x323   :  { %23055 = vmatprep.subr.bf16.mxu0 %v25242_v41 }
 0x324   :  { %23076 = vmatpush3.bf16.msra.mxu1 %v25241_v42 }
 0x325   :  { %23077 = vmatprep.subr.bf16.mxu1 %v25244_v43 }
 0x326   :  { %23056 = vmatpush3.bf16.msra.mxu0 %v25243_v44  ;;  %v25287_v44 = vld [vmem:[#allocation5 + $0x1870] sm:$0xff]  }
 0x327   :  { %23057 = vmatprep.subr.bf16.mxu0 %v25246_v45  ;;  %v25288_v45 = vld [vmem:[#allocation5 + $0x1830] sm:$0xff]  }
 0x328   :  { %23078 = vmatpush3.bf16.msra.mxu1 %v25245_v46 }
 0x329   :  { %23079 = vmatprep.subr.bf16.mxu1 %v25248_v47 }
 0x32a   :  { %23058 = vmatpush3.bf16.msra.mxu0 %v25247_v48  ;;  %v25289_v48 = vld [vmem:[#allocation5 + $0x18f0] sm:$0xff]  }
 0x32b   :  { %23059 = vmatprep.subr.bf16.mxu0 %v25250_v49 }
 0x32c   :  { %v22757_v51 = vpop.f32.mrb[64].mxu0  ;;  %23080 = vmatpush3.bf16.msra.mxu1 %v25249_v50 }
 0x32d   :  { %v22758_v53 = vpop.f32.mrb[65].mxu0  ;;  %23081 = vmatprep.subr.bf16.mxu1 %v25252_v52 }
 0x32e   :  { %v22759_v55 = vadd.f32 %v22758_v53, %v22757_v51  ;;  %v22760_v56 = vpop.f32.mrb[66].mxu0  ;;  %v22779_v57 = vpop.f32.mrb[64].mxu1  ;;  %23060 = vmatpush3.bf16.msra.mxu0 %v25251_v54  ;;  %v25290_v51 = vld [vmem:[#allocation5 + $0x18b0] sm:$0xff]   ;;  %v25291_v53 = vld [vmem:[#allocation5 + $0x1878] sm:$0xff]  }
 0x32f   :  { %v22761_v60 = vpop.f32.mrb[67].mxu0  ;;  %v22780_v61 = vpop.f32.mrb[65].mxu1  ;;  %23061 = vmatprep.subr.bf16.mxu0 %v25254_v59  ;;  %v25292_v54 = vld [vmem:[#allocation5 + $0x1838] sm:$0xff]   ;;  %v65_v56 = vld [vmem:[#allocation2 + $0x60] sm:$0xff] }
 0x330   :  { %v17129_v63 = vadd.f32 %v22759_v55, %v26602_v10  ;;  %v22781_v0 = vadd.f32 %v22780_v61, %v22779_v57  ;;  %v22782_v2 = vpop.f32.mrb[66].mxu1  ;;  %23082 = vmatpush3.bf16.msra.mxu1 %v25253_v58  ;;  %v4213_v10 = vrot.slane %v26607_v23, %v26434_v34  ;;  %v25274_v23 = vld [vmem:[#allocation5 + $0x1890] sm:$0xff]   ;;  %v25293_v55 = vld [vmem:[#allocation5 + $0x18f8] sm:$0xff]   ;;  %v4239_v57 = vrot.slane %v65_v56, %v26434_v34  ;;  %v25295_v60 = vld [vmem:[#allocation5 + $0x1940] sm:$0xff]  }
 0x331   :  { %v22783_v4 = vpop.f32.mrb[67].mxu1  ;;  %23083 = vmatprep.subr.bf16.mxu1 %v25256_v1  ;;  %v25294_v58 = vld [vmem:[#allocation5 + $0x18b8] sm:$0xff]   ;;  %v4232_v59 = vcombine.high %v65_v56, %v65_v56  ;;  %v25296_v2 = vld [vmem:[#allocation5 + $0x1900] sm:$0xff]   ;;  %v25332_v56 = vld [vmem:[#allocation5 + $0x1a48] sm:$0xff]  }
 0x332   :  { %v26614_v5 = vadd.f32 %v22781_v0, %v17129_v63  ;;  %23062 = vmatpush3.bf16.msra.mxu0 %v25255_v62  ;;  %v4229_v15 = vcombine.high %v4213_v10, %v4213_v10  ;;  %v4247_v61 = vcombine.high %v4239_v57, %v4239_v57  ;;  %v4255_v62 = vrot.slane %v4239_v57, %v26434_v34  ;;  %v25297_v0 = vld [vmem:[#allocation5 + $0x19c0] sm:$0xff]   ;;  %v25333_v57 = vld [vmem:[#allocation5 + $0x1a08] sm:$0xff]  }
 0x333   :  { %23063 = vmatprep.subr.bf16.mxu0 %v25258_v6  ;;  %v26624_v63 = vrot.slane %v4232_v59, %v26434_v34  ;;  %v25335_v59 = vld [vmem:[#allocation5 + $0x1a88] sm:$0xff]  }
 0x334   :  { %23084 = vmatpush3.bf16.msra.mxu1 %v25257_v3  ;;  %v4269_v1 = vrot.slane %v4247_v61, %v26434_v34  ;;  %v4277_v4 = vcombine.high %v4255_v62, %v4255_v62  ;;  %v25337_v61 = vld [vmem:[#allocation5 + $0x1a10] sm:$0xff]  }
 0x335   :  { %23085 = vmatprep.subr.bf16.mxu1 %v25260_v8  ;;  %v4248_v3 = vcombine.high %v26624_v63, %v26624_v63 }
 0x336   :  { %23064 = vmatpush3.bf16.msra.mxu0 %v25259_v7  ;;  %v4279_v6 = vcombine.high %v4269_v1, %v4269_v1  ;;  %v25298_v7 = vld [vmem:[#allocation5 + $0x1980] sm:$0xff]  }
 0x337   :  { %23093 = vmatprep.subr.bf16.mxu0 %v25263_v11  ;;  %v4276_v8 = vrot.slane %v4248_v3, %v26434_v34  ;;  %v25343_v3 = vld [vmem:[#allocation5 + $0x1a98] sm:$0xff]  }
 0x338   :  { %23086 = vmatpush3.bf16.msra.mxu1 %v25262_v9  ;;  %v25301_v9 = vld [vmem:[#allocation5 + $0x19c8] sm:$0xff]  }
 0x339   :  { %17687 = vmatmul.mubr.bf16.vlgmr.msra.gmra.mrb[92].mxu0 %v4213_v10  ;;  %23115 = vmatprep.subr.bf16.mxu1 %v25265_v13  ;;  %v25300_v10 = vld [vmem:[#allocation5 + $0x1908] sm:$0xff]   ;;  %v4280_v11 = vcombine.high %v4276_v8, %v4276_v8 }
 0x33a   :  { %23094 = vmatpush3.bf16.msra.mxu0 %v25264_v12  ;;  %17766 = vmatprep.mubr.bf16.mxu0 %v4269_v1  ;;  %v25303_v12 = vld [vmem:[#allocation5 + $0x1950] sm:$0xff]   ;;  %v25302_v13 = vld [vmem:[#allocation5 + $0x1988] sm:$0xff]   ;;  %v25341_v1 = vld [vmem:[#allocation5 + $0x1a18] sm:$0xff]  }
 0x33b   :  { %17727 = vmatmul.mubr.bf16.vlgmr.msra.gmra.mrb[92].mxu1 %v4229_v15  ;;  %23095 = vmatprep.subr.bf16.mxu0 %v25267_v16  ;;  %v25304_v15 = vld [vmem:[#allocation5 + $0x1910] sm:$0xff]   ;;  %v25307_v16 = vld [vmem:[#allocation5 + $0x1958] sm:$0xff]  }
 0x33c   :  { %23116 = vmatpush3.bf16.msra.mxu1 %v25266_v14  ;;  %17806 = vmatprep.mubr.bf16.mxu1 %v4279_v6  ;;  %v25305_v14 = vld [vmem:[#allocation5 + $0x19d0] sm:$0xff]   ;;  %v25346_v6 = vld [vmem:[#allocation5 + $0x1ae0] sm:$0xff]  }
 0x33d   :  { %23117 = vmatprep.subr.bf16.mxu1 %v25269_v18  ;;  %v25309_v18 = vld [vmem:[#allocation5 + $0x19d8] sm:$0xff]  }
 0x33e   :  { %23096 = vmatpush3.bf16.msra.mxu0 %v25268_v17  ;;  %v25306_v17 = vld [vmem:[#allocation5 + $0x1990] sm:$0xff]  }
 0x33f   :  { %23097 = vmatprep.subr.bf16.mxu0 %v25271_v20  ;;  %v25311_v20 = vld [vmem:[#allocation5 + $0x1960] sm:$0xff]  }
 0x340   :  { %23118 = vmatpush3.bf16.msra.mxu1 %v25270_v19  ;;  %v25308_v19 = vld [vmem:[#allocation5 + $0x1918] sm:$0xff]  }
 0x341   :  { %23119 = vmatprep.subr.bf16.mxu1 %v25273_v22  ;;  %v25313_v22 = vld [vmem:[#allocation5 + $0x19e0] sm:$0xff]  }
 0x342   :  { %23098 = vmatpush3.bf16.msra.mxu0 %v25272_v21  ;;  %v25310_v21 = vld [vmem:[#allocation5 + $0x1998] sm:$0xff]  }
 0x343   :  { %23099 = vmatprep.subr.bf16.mxu0 %v25275_v24  ;;  %v25315_v24 = vld [vmem:[#allocation5 + $0x1968] sm:$0xff]  }
 0x344   :  { %23120 = vmatpush3.bf16.msra.mxu1 %v25274_v23  ;;  %v25312_v23 = vld [vmem:[#allocation5 + $0x1920] sm:$0xff]  }
 0x345   :  { %23121 = vmatprep.subr.bf16.mxu1 %v25277_v26 }
 0x346   :  { %23100 = vmatpush3.bf16.msra.mxu0 %v25276_v25  ;;  %v25314_v25 = vld [vmem:[#allocation5 + $0x19a0] sm:$0xff]  }
 0x347   :  { %23101 = vmatprep.subr.bf16.mxu0 %v25279_v28 }
 0x348   :  { %23122 = vmatpush3.bf16.msra.mxu1 %v25278_v27  ;;  %v25317_v27 = vld [vmem:[#allocation5 + $0x19e8] sm:$0xff]  }
 0x349   :  { %23123 = vmatprep.subr.bf16.mxu1 %v25281_v30 }
 0x34a   :  { %23102 = vmatpush3.bf16.msra.mxu0 %v25280_v29  ;;  %v25316_v29 = vld [vmem:[#allocation5 + $0x1928] sm:$0xff]  }
 0x34b   :  { %23103 = vmatprep.subr.bf16.mxu0 %v25283_v32 }
 0x34c   :  { %v22801_v35 = vpop.f32.mrb[68].mxu0  ;;  %23124 = vmatpush3.bf16.msra.mxu1 %v25282_v31 }
 0x34d   :  { %v22802_v37 = vpop.f32.mrb[69].mxu0  ;;  %23125 = vmatprep.subr.bf16.mxu1 %v25285_v36 }
 0x34e   :  { %v22803_v39 = vadd.f32 %v22802_v37, %v22801_v35  ;;  %v22804_v40 = vpop.f32.mrb[70].mxu0  ;;  %v22823_v41 = vpop.f32.mrb[68].mxu1  ;;  %23104 = vmatpush3.bf16.msra.mxu0 %v25284_v33  ;;  %v25318_v33 = vld [vmem:[#allocation5 + $0x19a8] sm:$0xff]   ;;  %v25319_v35 = vld [vmem:[#allocation5 + $0x1970] sm:$0xff]  }
 0x34f   :  { %v22805_v42 = vpop.f32.mrb[71].mxu0  ;;  %v22824_v43 = vpop.f32.mrb[69].mxu1  ;;  %23105 = vmatprep.subr.bf16.mxu0 %v25287_v44 }
 0x350   :  { %v17209_v46 = vadd.f32 %v22803_v39, %v26614_v5  ;;  %v22825_v47 = vadd.f32 %v22824_v43, %v22823_v41  ;;  %v22826_v49 = vpop.f32.mrb[70].mxu1  ;;  %23126 = vmatpush3.bf16.msra.mxu1 %v25286_v38  ;;  %v25299_v5 = vld [vmem:[#allocation5 + $0x1948] sm:$0xff]   ;;  %v25320_v38 = vld [vmem:[#allocation5 + $0x1930] sm:$0xff]  }
 0x351   :  { %v22827_v52 = vpop.f32.mrb[71].mxu1  ;;  %23127 = vmatprep.subr.bf16.mxu1 %v25289_v48  ;;  %v25321_v41 = vld [vmem:[#allocation5 + $0x19f0] sm:$0xff]   ;;  %v25325_v48 = vld [vmem:[#allocation5 + $0x19f8] sm:$0xff]  }
 0x352   :  { %v26619_v50 = vadd.f32 %v22825_v47, %v17209_v46  ;;  %23106 = vmatpush3.bf16.msra.mxu0 %v25288_v45  ;;  %v25322_v43 = vld [vmem:[#allocation5 + $0x19b0] sm:$0xff]   ;;  %v25323_v46 = vld [vmem:[#allocation5 + $0x1978] sm:$0xff]   ;;  %v25329_v52 = vld [vmem:[#allocation5 + $0x1a00] sm:$0xff]  }
 0x353   :  { %23107 = vmatprep.subr.bf16.mxu0 %v25291_v53  ;;  %v25324_v47 = vld [vmem:[#allocation5 + $0x1938] sm:$0xff]   ;;  %v25330_v53 = vld [vmem:[#allocation5 + $0x1ac0] sm:$0xff]  }
 0x354   :  { %23128 = vmatpush3.bf16.msra.mxu1 %v25290_v51  ;;  %v25327_v49 = vld [vmem:[#allocation5 + $0x19b8] sm:$0xff]   ;;  %v25328_v51 = vld [vmem:[#allocation5 + $0x1a40] sm:$0xff]  }
 0x355   :  { %23129 = vmatprep.subr.bf16.mxu1 %v25293_v55 }
 0x356   :  { %23108 = vmatpush3.bf16.msra.mxu0 %v25292_v54  ;;  %v25331_v54 = vld [vmem:[#allocation5 + $0x1a80] sm:$0xff]  }
 0x357   :  { %23137 = vmatprep.subr.bf16.mxu0 %v25295_v60  ;;  %v25336_v60 = vld [vmem:[#allocation5 + $0x1a50] sm:$0xff]  }
 0x358   :  { %23130 = vmatpush3.bf16.msra.mxu1 %v25294_v58  ;;  %v25334_v58 = vld [vmem:[#allocation5 + $0x1ac8] sm:$0xff]  }
 0x359   :  { %23159 = vmatprep.subr.bf16.mxu1 %v25297_v0  ;;  %17767 = vmatmul.mubr.bf16.vlgmr.msra.gmra.mrb[96].mxu0 %v4255_v62  ;;  %v25338_v62 = vld [vmem:[#allocation5 + $0x1ad0] sm:$0xff]   ;;  %v25340_v0 = vld [vmem:[#allocation5 + $0x1a58] sm:$0xff]  }
 0x35a   :  { %23138 = vmatpush3.bf16.msra.mxu0 %v25296_v2  ;;  %17846 = vmatprep.mubr.bf16.mxu0 %v4276_v8  ;;  %v25342_v2 = vld [vmem:[#allocation5 + $0x1ad8] sm:$0xff]   ;;  %v25348_v8 = vld [vmem:[#allocation5 + $0x1a68] sm:$0xff]  }
 0x35b   :  { %17807 = vmatmul.mubr.bf16.vlgmr.msra.gmra.mrb[96].mxu1 %v4277_v4  ;;  %23139 = vmatprep.subr.bf16.mxu0 %v25299_v5  ;;  %v25344_v4 = vld [vmem:[#allocation5 + $0x1a60] sm:$0xff]  }
 0x35c   :  { %23160 = vmatpush3.bf16.msra.mxu1 %v25298_v7  ;;  %17886 = vmatprep.mubr.bf16.mxu1 %v4280_v11  ;;  %v25345_v5 = vld [vmem:[#allocation5 + $0x1a20] sm:$0xff]   ;;  %v25350_v11 = vld [vmem:[#allocation5 + $0x1ae8] sm:$0xff]  }
 0x35d   :  { %23161 = vmatprep.subr.bf16.mxu1 %v25301_v9  ;;  %v25347_v7 = vld [vmem:[#allocation5 + $0x1aa0] sm:$0xff]   ;;  %v25349_v9 = vld [vmem:[#allocation5 + $0x1a28] sm:$0xff]  }
 0x35e   :  { %23140 = vmatpush3.bf16.msra.mxu0 %v25300_v10 }
 0x35f   :  { %23141 = vmatprep.subr.bf16.mxu0 %v25303_v12 }
 0x360   :  { %23162 = vmatpush3.bf16.msra.mxu1 %v25302_v13  ;;  %v25351_v13 = vld [vmem:[#allocation5 + $0x1aa8] sm:$0xff]  }
 0x361   :  { %23163 = vmatprep.subr.bf16.mxu1 %v25305_v14 }
 0x362   :  { %23142 = vmatpush3.bf16.msra.mxu0 %v25304_v15 }
 0x363   :  { %23143 = vmatprep.subr.bf16.mxu0 %v25307_v16 }
 0x364   :  { %23164 = vmatpush3.bf16.msra.mxu1 %v25306_v17 }
 0x365   :  { %23165 = vmatprep.subr.bf16.mxu1 %v25309_v18 }
 0x366   :  { %23144 = vmatpush3.bf16.msra.mxu0 %v25308_v19  ;;  %v25352_v19 = vld [vmem:[#allocation5 + $0x1a70] sm:$0xff]  }
 0x367   :  { %23145 = vmatprep.subr.bf16.mxu0 %v25311_v20  ;;  %v25353_v20 = vld [vmem:[#allocation5 + $0x1a30] sm:$0xff]  }
 0x368   :  { %23166 = vmatpush3.bf16.msra.mxu1 %v25310_v21 }
 0x369   :  { %23167 = vmatprep.subr.bf16.mxu1 %v25313_v22 }
 0x36a   :  { %23146 = vmatpush3.bf16.msra.mxu0 %v25312_v23  ;;  %v25354_v23 = vld [vmem:[#allocation5 + $0x1af0] sm:$0xff]  }
 0x36b   :  { %23147 = vmatprep.subr.bf16.mxu0 %v25315_v24 }
 0x36c   :  { %v22845_v26 = vpop.f32.mrb[72].mxu0  ;;  %23168 = vmatpush3.bf16.msra.mxu1 %v25314_v25 }
 0x36d   :  { %v22846_v28 = vpop.f32.mrb[73].mxu0  ;;  %23169 = vmatprep.subr.bf16.mxu1 %v25317_v27 }
 0x36e   :  { %v22847_v30 = vadd.f32 %v22846_v28, %v22845_v26  ;;  %v22848_v31 = vpop.f32.mrb[74].mxu0  ;;  %v22867_v32 = vpop.f32.mrb[72].mxu1  ;;  %23148 = vmatpush3.bf16.msra.mxu0 %v25316_v29  ;;  %v25355_v26 = vld [vmem:[#allocation5 + $0x1ab0] sm:$0xff]   ;;  %v25356_v28 = vld [vmem:[#allocation5 + $0x1a78] sm:$0xff]  }
 0x36f   :  { %v22849_v36 = vpop.f32.mrb[75].mxu0  ;;  %v22868_v37 = vpop.f32.mrb[73].mxu1  ;;  %23149 = vmatprep.subr.bf16.mxu0 %v25319_v35  ;;  %v25357_v29 = vld [vmem:[#allocation5 + $0x1a38] sm:$0xff]   ;;  %v66_v31 = vld [vmem:[#allocation2 + $0x68] sm:$0xff] }
 0x370   :  { %v17289_v39 = vadd.f32 %v22847_v30, %v26619_v50  ;;  %v22869_v40 = vadd.f32 %v22868_v37, %v22867_v32  ;;  %v22870_v42 = vpop.f32.mrb[74].mxu1  ;;  %23170 = vmatpush3.bf16.msra.mxu1 %v25318_v33  ;;  %v4262_v50 = vrot.slane %v26624_v63, %v26434_v34  ;;  %v25339_v63 = vld [vmem:[#allocation5 + $0x1a90] sm:$0xff]   ;;  %v25358_v30 = vld [vmem:[#allocation5 + $0x1af8] sm:$0xff]   ;;  %v4288_v32 = vrot.slane %v66_v31, %v26434_v34  ;;  %v25360_v36 = vld [vmem:[#allocation5 + $0x1b40] sm:$0xff]  }
 0x371   :  { %v22871_v44 = vpop.f32.mrb[75].mxu1  ;;  %23171 = vmatprep.subr.bf16.mxu1 %v25321_v41  ;;  %v25359_v33 = vld [vmem:[#allocation5 + $0x1ab8] sm:$0xff]   ;;  %v4281_v35 = vcombine.high %v66_v31, %v66_v31  ;;  %v25361_v42 = vld [vmem:[#allocation5 + $0x1b00] sm:$0xff]   ;;  %v25397_v31 = vld [vmem:[#allocation5 + $0x1c48] sm:$0xff]  }
 0x372   :  { %v26631_v45 = vadd.f32 %v22869_v40, %v17289_v39  ;;  %23150 = vmatpush3.bf16.msra.mxu0 %v25320_v38  ;;  %v4278_v55 = vcombine.high %v4262_v50, %v4262_v50  ;;  %v4296_v37 = vcombine.high %v4288_v32, %v4288_v32  ;;  %v4304_v38 = vrot.slane %v4288_v32, %v26434_v34  ;;  %v25362_v40 = vld [vmem:[#allocation5 + $0x1bc0] sm:$0xff]   ;;  %v25398_v32 = vld [vmem:[#allocation5 + $0x1c08] sm:$0xff]  }
 0x373   :  { %23151 = vmatprep.subr.bf16.mxu0 %v25323_v46  ;;  %v26641_v39 = vrot.slane %v4281_v35, %v26434_v34  ;;  %v25400_v35 = vld [vmem:[#allocation5 + $0x1c88] sm:$0xff]  }
 0x374   :  { %23172 = vmatpush3.bf16.msra.mxu1 %v25322_v43  ;;  %v4318_v41 = vrot.slane %v4296_v37, %v26434_v34  ;;  %v4326_v44 = vcombine.high %v4304_v38, %v4304_v38  ;;  %v25402_v37 = vld [vmem:[#allocation5 + $0x1c10] sm:$0xff]  }
 0x375   :  { %23173 = vmatprep.subr.bf16.mxu1 %v25325_v48  ;;  %v4297_v43 = vcombine.high %v26641_v39, %v26641_v39 }
 0x376   :  { %23152 = vmatpush3.bf16.msra.mxu0 %v25324_v47  ;;  %v4328_v46 = vcombine.high %v4318_v41, %v4318_v41  ;;  %v25363_v47 = vld [vmem:[#allocation5 + $0x1b80] sm:$0xff]  }
 0x377   :  { %23181 = vmatprep.subr.bf16.mxu0 %v25328_v51  ;;  %v4325_v48 = vrot.slane %v4297_v43, %v26434_v34  ;;  %v25408_v43 = vld [vmem:[#allocation5 + $0x1c98] sm:$0xff]  }
 0x378   :  { %23174 = vmatpush3.bf16.msra.mxu1 %v25327_v49  ;;  %v25366_v49 = vld [vmem:[#allocation5 + $0x1bc8] sm:$0xff]  }
 0x379   :  { %17847 = vmatmul.mubr.bf16.vlgmr.msra.gmra.mrb[100].mxu0 %v4262_v50  ;;  %23203 = vmatprep.subr.bf16.mxu1 %v25330_v53  ;;  %v25365_v50 = vld [vmem:[#allocation5 + $0x1b08] sm:$0xff]   ;;  %v4329_v51 = vcombine.high %v4325_v48, %v4325_v48 }
 0x37a   :  { %23182 = vmatpush3.bf16.msra.mxu0 %v25329_v52  ;;  %17926 = vmatprep.mubr.bf16.mxu0 %v4318_v41  ;;  %v25368_v52 = vld [vmem:[#allocation5 + $0x1b50] sm:$0xff]   ;;  %v25367_v53 = vld [vmem:[#allocation5 + $0x1b88] sm:$0xff]   ;;  %v25406_v41 = vld [vmem:[#allocation5 + $0x1c18] sm:$0xff]  }
 0x37b   :  { %17887 = vmatmul.mubr.bf16.vlgmr.msra.gmra.mrb[100].mxu1 %v4278_v55  ;;  %23183 = vmatprep.subr.bf16.mxu0 %v25332_v56  ;;  %v25369_v55 = vld [vmem:[#allocation5 + $0x1b10] sm:$0xff]   ;;  %v25372_v56 = vld [vmem:[#allocation5 + $0x1b58] sm:$0xff]  }
 0x37c   :  { %23204 = vmatpush3.bf16.msra.mxu1 %v25331_v54  ;;  %17966 = vmatprep.mubr.bf16.mxu1 %v4328_v46  ;;  %v25370_v54 = vld [vmem:[#allocation5 + $0x1bd0] sm:$0xff]   ;;  %v25411_v46 = vld [vmem:[#allocation5 + $0x1ce0] sm:$0xff]  }
 0x37d   :  { %23205 = vmatprep.subr.bf16.mxu1 %v25334_v58  ;;  %v25374_v58 = vld [vmem:[#allocation5 + $0x1bd8] sm:$0xff]  }
 0x37e   :  { %23184 = vmatpush3.bf16.msra.mxu0 %v25333_v57  ;;  %v25371_v57 = vld [vmem:[#allocation5 + $0x1b90] sm:$0xff]  }
 0x37f   :  { %23185 = vmatprep.subr.bf16.mxu0 %v25336_v60  ;;  %v25376_v60 = vld [vmem:[#allocation5 + $0x1b60] sm:$0xff]  }
 0x380   :  { %23206 = vmatpush3.bf16.msra.mxu1 %v25335_v59  ;;  %v25373_v59 = vld [vmem:[#allocation5 + $0x1b18] sm:$0xff]  }
 0x381   :  { %23207 = vmatprep.subr.bf16.mxu1 %v25338_v62  ;;  %v25378_v62 = vld [vmem:[#allocation5 + $0x1be0] sm:$0xff]  }
 0x382   :  { %23186 = vmatpush3.bf16.msra.mxu0 %v25337_v61  ;;  %v25375_v61 = vld [vmem:[#allocation5 + $0x1b98] sm:$0xff]  }
 0x383   :  { %23187 = vmatprep.subr.bf16.mxu0 %v25340_v0  ;;  %v25380_v0 = vld [vmem:[#allocation5 + $0x1b68] sm:$0xff]  }
 0x384   :  { %23208 = vmatpush3.bf16.msra.mxu1 %v25339_v63  ;;  %v25377_v63 = vld [vmem:[#allocation5 + $0x1b20] sm:$0xff]  }
 0x385   :  { %23209 = vmatprep.subr.bf16.mxu1 %v25342_v2 }
 0x386   :  { %23188 = vmatpush3.bf16.msra.mxu0 %v25341_v1  ;;  %v25379_v1 = vld [vmem:[#allocation5 + $0x1ba0] sm:$0xff]  }
 0x387   :  { %23189 = vmatprep.subr.bf16.mxu0 %v25344_v4 }
 0x388   :  { %23210 = vmatpush3.bf16.msra.mxu1 %v25343_v3  ;;  %v25382_v3 = vld [vmem:[#allocation5 + $0x1be8] sm:$0xff]  }
 0x389   :  { %23211 = vmatprep.subr.bf16.mxu1 %v25346_v6 }
 0x38a   :  { %23190 = vmatpush3.bf16.msra.mxu0 %v25345_v5  ;;  %v25381_v5 = vld [vmem:[#allocation5 + $0x1b28] sm:$0xff]  }
 0x38b   :  { %23191 = vmatprep.subr.bf16.mxu0 %v25348_v8 }
 0x38c   :  { %v22889_v10 = vpop.f32.mrb[76].mxu0  ;;  %23212 = vmatpush3.bf16.msra.mxu1 %v25347_v7 }
 0x38d   :  { %v22890_v12 = vpop.f32.mrb[77].mxu0  ;;  %23213 = vmatprep.subr.bf16.mxu1 %v25350_v11 }
 0x38e   :  { %v22891_v14 = vadd.f32 %v22890_v12, %v22889_v10  ;;  %v22892_v15 = vpop.f32.mrb[78].mxu0  ;;  %v22911_v16 = vpop.f32.mrb[76].mxu1  ;;  %23192 = vmatpush3.bf16.msra.mxu0 %v25349_v9  ;;  %v25383_v9 = vld [vmem:[#allocation5 + $0x1ba8] sm:$0xff]   ;;  %v25384_v10 = vld [vmem:[#allocation5 + $0x1b70] sm:$0xff]  }
 0x38f   :  { %v22893_v17 = vpop.f32.mrb[79].mxu0  ;;  %v22912_v18 = vpop.f32.mrb[77].mxu1  ;;  %23193 = vmatprep.subr.bf16.mxu0 %v25352_v19 }
 0x390   :  { %v17369_v21 = vadd.f32 %v22891_v14, %v26631_v45  ;;  %v22913_v22 = vadd.f32 %v22912_v18, %v22911_v16  ;;  %v22914_v24 = vpop.f32.mrb[78].mxu1  ;;  %23214 = vmatpush3.bf16.msra.mxu1 %v25351_v13  ;;  %v25364_v45 = vld [vmem:[#allocation5 + $0x1b48] sm:$0xff]   ;;  %v25385_v13 = vld [vmem:[#allocation5 + $0x1b30] sm:$0xff]  }
 0x391   :  { %v22915_v27 = vpop.f32.mrb[79].mxu1  ;;  %23215 = vmatprep.subr.bf16.mxu1 %v25354_v23  ;;  %v25386_v16 = vld [vmem:[#allocation5 + $0x1bf0] sm:$0xff]   ;;  %v25390_v23 = vld [vmem:[#allocation5 + $0x1bf8] sm:$0xff]  }
 0x392   :  { %v26636_v25 = vadd.f32 %v22913_v22, %v17369_v21  ;;  %23194 = vmatpush3.bf16.msra.mxu0 %v25353_v20  ;;  %v25387_v18 = vld [vmem:[#allocation5 + $0x1bb0] sm:$0xff]   ;;  %v25388_v21 = vld [vmem:[#allocation5 + $0x1b78] sm:$0xff]   ;;  %v25394_v27 = vld [vmem:[#allocation5 + $0x1c00] sm:$0xff]  }
 0x393   :  { %23195 = vmatprep.subr.bf16.mxu0 %v25356_v28  ;;  %v25389_v22 = vld [vmem:[#allocation5 + $0x1b38] sm:$0xff]   ;;  %v25395_v28 = vld [vmem:[#allocation5 + $0x1cc0] sm:$0xff]  }
 0x394   :  { %23216 = vmatpush3.bf16.msra.mxu1 %v25355_v26  ;;  %v25392_v24 = vld [vmem:[#allocation5 + $0x1bb8] sm:$0xff]   ;;  %v25393_v26 = vld [vmem:[#allocation5 + $0x1c40] sm:$0xff]  }
 0x395   :  { %23217 = vmatprep.subr.bf16.mxu1 %v25358_v30 }
 0x396   :  { %23196 = vmatpush3.bf16.msra.mxu0 %v25357_v29  ;;  %v25396_v29 = vld [vmem:[#allocation5 + $0x1c80] sm:$0xff]  }
 0x397   :  { %23225 = vmatprep.subr.bf16.mxu0 %v25360_v36  ;;  %v25401_v36 = vld [vmem:[#allocation5 + $0x1c50] sm:$0xff]  }
 0x398   :  { %23218 = vmatpush3.bf16.msra.mxu1 %v25359_v33  ;;  %v25399_v33 = vld [vmem:[#allocation5 + $0x1cc8] sm:$0xff]  }
 0x399   :  { %23247 = vmatprep.subr.bf16.mxu1 %v25362_v40  ;;  %17927 = vmatmul.mubr.bf16.vlgmr.msra.gmra.mrb[104].mxu0 %v4304_v38  ;;  %v25403_v38 = vld [vmem:[#allocation5 + $0x1cd0] sm:$0xff]   ;;  %v25405_v40 = vld [vmem:[#allocation5 + $0x1c58] sm:$0xff]  }
 0x39a   :  { %23226 = vmatpush3.bf16.msra.mxu0 %v25361_v42  ;;  %18006 = vmatprep.mubr.bf16.mxu0 %v4325_v48  ;;  %v25407_v42 = vld [vmem:[#allocation5 + $0x1cd8] sm:$0xff]   ;;  %v25413_v48 = vld [vmem:[#allocation5 + $0x1c68] sm:$0xff]  }
 0x39b   :  { %17967 = vmatmul.mubr.bf16.vlgmr.msra.gmra.mrb[104].mxu1 %v4326_v44  ;;  %23227 = vmatprep.subr.bf16.mxu0 %v25364_v45  ;;  %v25409_v44 = vld [vmem:[#allocation5 + $0x1c60] sm:$0xff]  }
 0x39c   :  { %23248 = vmatpush3.bf16.msra.mxu1 %v25363_v47  ;;  %18046 = vmatprep.mubr.bf16.mxu1 %v4329_v51  ;;  %v25410_v45 = vld [vmem:[#allocation5 + $0x1c20] sm:$0xff]   ;;  %v25415_v51 = vld [vmem:[#allocation5 + $0x1ce8] sm:$0xff]  }
 0x39d   :  { %23249 = vmatprep.subr.bf16.mxu1 %v25366_v49  ;;  %v25412_v47 = vld [vmem:[#allocation5 + $0x1ca0] sm:$0xff]   ;;  %v25414_v49 = vld [vmem:[#allocation5 + $0x1c28] sm:$0xff]  }
 0x39e   :  { %23228 = vmatpush3.bf16.msra.mxu0 %v25365_v50 }
 0x39f   :  { %23229 = vmatprep.subr.bf16.mxu0 %v25368_v52 }
 0x3a0   :  { %23250 = vmatpush3.bf16.msra.mxu1 %v25367_v53  ;;  %v25416_v53 = vld [vmem:[#allocation5 + $0x1ca8] sm:$0xff]  }
 0x3a1   :  { %23251 = vmatprep.subr.bf16.mxu1 %v25370_v54 }
 0x3a2   :  { %23230 = vmatpush3.bf16.msra.mxu0 %v25369_v55 }
 0x3a3   :  { %23231 = vmatprep.subr.bf16.mxu0 %v25372_v56 }
 0x3a4   :  { %23252 = vmatpush3.bf16.msra.mxu1 %v25371_v57 }
 0x3a5   :  { %23253 = vmatprep.subr.bf16.mxu1 %v25374_v58 }
 0x3a6   :  { %23232 = vmatpush3.bf16.msra.mxu0 %v25373_v59  ;;  %v25417_v59 = vld [vmem:[#allocation5 + $0x1c70] sm:$0xff]  }
 0x3a7   :  { %23233 = vmatprep.subr.bf16.mxu0 %v25376_v60  ;;  %v25418_v60 = vld [vmem:[#allocation5 + $0x1c30] sm:$0xff]  }
 0x3a8   :  { %23254 = vmatpush3.bf16.msra.mxu1 %v25375_v61 }
 0x3a9   :  { %23255 = vmatprep.subr.bf16.mxu1 %v25378_v62 }
 0x3aa   :  { %23234 = vmatpush3.bf16.msra.mxu0 %v25377_v63  ;;  %v25419_v63 = vld [vmem:[#allocation5 + $0x1cf0] sm:$0xff]  }
 0x3ab   :  { %23235 = vmatprep.subr.bf16.mxu0 %v25380_v0 }
 0x3ac   :  { %v22933_v2 = vpop.f32.mrb[80].mxu0  ;;  %23256 = vmatpush3.bf16.msra.mxu1 %v25379_v1 }
 0x3ad   :  { %v22934_v4 = vpop.f32.mrb[81].mxu0  ;;  %23257 = vmatprep.subr.bf16.mxu1 %v25382_v3 }
 0x3ae   :  { %v22935_v6 = vadd.f32 %v22934_v4, %v22933_v2  ;;  %v22936_v7 = vpop.f32.mrb[82].mxu0  ;;  %v22955_v8 = vpop.f32.mrb[80].mxu1  ;;  %23236 = vmatpush3.bf16.msra.mxu0 %v25381_v5  ;;  %v25420_v2 = vld [vmem:[#allocation5 + $0x1cb0] sm:$0xff]   ;;  %v25421_v4 = vld [vmem:[#allocation5 + $0x1c78] sm:$0xff]  }
 0x3af   :  { %v22937_v11 = vpop.f32.mrb[83].mxu0  ;;  %v22956_v12 = vpop.f32.mrb[81].mxu1  ;;  %23237 = vmatprep.subr.bf16.mxu0 %v25384_v10  ;;  %v25422_v5 = vld [vmem:[#allocation5 + $0x1c38] sm:$0xff]  }
 0x3b0   :  { %v17449_v14 = vadd.f32 %v22935_v6, %v26636_v25  ;;  %v22957_v15 = vadd.f32 %v22956_v12, %v22955_v8  ;;  %v22958_v17 = vpop.f32.mrb[82].mxu1  ;;  %23258 = vmatpush3.bf16.msra.mxu1 %v25383_v9  ;;  %v4311_v25 = vrot.slane %v26641_v39, %v26434_v34  ;;  %v25404_v39 = vld [vmem:[#allocation5 + $0x1c90] sm:$0xff]   ;;  %v25423_v6 = vld [vmem:[#allocation5 + $0x1cf8] sm:$0xff]   ;;  %v25425_v11 = vld [vmem:[#allocation5 + $0x1d40] sm:$0xff]  }
 0x3b1   :  { %v22959_v19 = vpop.f32.mrb[83].mxu1  ;;  %23259 = vmatprep.subr.bf16.mxu1 %v25386_v16  ;;  %v67_v7 = vld [vmem:[#allocation2 + $0x70] sm:$0xff]  ;;  %v25426_v17 = vld [vmem:[#allocation5 + $0x1d00] sm:$0xff]  }
 0x3b2   :  { %v26648_v20 = vadd.f32 %v22957_v15, %v17449_v14  ;;  %23238 = vmatpush3.bf16.msra.mxu0 %v25385_v13  ;;  %v4327_v30 = vcombine.high %v4311_v25, %v4311_v25  ;;  %v4337_v8 = vrot.slane %v67_v7, %v26434_v34  ;;  %v25424_v9 = vld [vmem:[#allocation5 + $0x1cb8] sm:$0xff]   ;;  %v4330_v10 = vcombine.high %v67_v7, %v67_v7  ;;  %v25427_v15 = vld [vmem:[#allocation5 + $0x1dc0] sm:$0xff]   ;;  %v25462_v7 = vld [vmem:[#allocation5 + $0x1e48] sm:$0xff]  }
 0x3b3   :  { %23239 = vmatprep.subr.bf16.mxu0 %v25388_v21 }
 0x3b4   :  { %23260 = vmatpush3.bf16.msra.mxu1 %v25387_v18  ;;  %v4345_v12 = vcombine.high %v4337_v8, %v4337_v8  ;;  %v4353_v13 = vrot.slane %v4337_v8, %v26434_v34  ;;  %v26658_v14 = vrot.slane %v4330_v10, %v26434_v34  ;;  %v25463_v8 = vld [vmem:[#allocation5 + $0x1e08] sm:$0xff]  }
 0x3b5   :  { %23261 = vmatprep.subr.bf16.mxu1 %v25390_v23  ;;  %v25465_v10 = vld [vmem:[#allocation5 + $0x1e88] sm:$0xff]  }
 0x3b6   :  { %23240 = vmatpush3.bf16.msra.mxu0 %v25389_v22  ;;  %v4367_v16 = vrot.slane %v4345_v12, %v26434_v34  ;;  %v4346_v18 = vcombine.high %v26658_v14, %v26658_v14  ;;  %v4375_v19 = vcombine.high %v4353_v13, %v4353_v13  ;;  %v25428_v22 = vld [vmem:[#allocation5 + $0x1d80] sm:$0xff]   ;;  %v25467_v12 = vld [vmem:[#allocation5 + $0x1e10] sm:$0xff]  }
 0x3b7   :  { %23269 = vmatprep.subr.bf16.mxu0 %v25393_v26 }
 0x3b8   :  { %23262 = vmatpush3.bf16.msra.mxu1 %v25392_v24  ;;  %v4377_v21 = vcombine.high %v4367_v16, %v4367_v16  ;;  %v4374_v23 = vrot.slane %v4346_v18, %v26434_v34  ;;  %v25431_v24 = vld [vmem:[#allocation5 + $0x1dc8] sm:$0xff]   ;;  %v25473_v18 = vld [vmem:[#allocation5 + $0x1e98] sm:$0xff]  }
 0x3b9   :  { %18007 = vmatmul.mubr.bf16.vlgmr.msra.gmra.mrb[108].mxu0 %v4311_v25  ;;  %23291 = vmatprep.subr.bf16.mxu1 %v25395_v28  ;;  %v25430_v25 = vld [vmem:[#allocation5 + $0x1d08] sm:$0xff]  }
 0x3ba   :  { %23270 = vmatpush3.bf16.msra.mxu0 %v25394_v27  ;;  %18086 = vmatprep.mubr.bf16.mxu0 %v4367_v16  ;;  %v4378_v26 = vcombine.high %v4374_v23, %v4374_v23  ;;  %v25433_v27 = vld [vmem:[#allocation5 + $0x1d50] sm:$0xff]   ;;  %v25432_v28 = vld [vmem:[#allocation5 + $0x1d88] sm:$0xff]   ;;  %v25471_v16 = vld [vmem:[#allocation5 + $0x1e18] sm:$0xff]  }
 0x3bb   :  { %18047 = vmatmul.mubr.bf16.vlgmr.msra.gmra.mrb[108].mxu1 %v4327_v30  ;;  %23271 = vmatprep.subr.bf16.mxu0 %v25397_v31  ;;  %v25434_v30 = vld [vmem:[#allocation5 + $0x1d10] sm:$0xff]   ;;  %v25437_v31 = vld [vmem:[#allocation5 + $0x1d58] sm:$0xff]  }
 0x3bc   :  { %23292 = vmatpush3.bf16.msra.mxu1 %v25396_v29  ;;  %18126 = vmatprep.mubr.bf16.mxu1 %v4377_v21  ;;  %v25435_v29 = vld [vmem:[#allocation5 + $0x1dd0] sm:$0xff]   ;;  %v25476_v21 = vld [vmem:[#allocation5 + $0x1ee0] sm:$0xff]  }
 0x3bd   :  { %23293 = vmatprep.subr.bf16.mxu1 %v25399_v33  ;;  %v25439_v33 = vld [vmem:[#allocation5 + $0x1dd8] sm:$0xff]  }
 0x3be   :  { %23272 = vmatpush3.bf16.msra.mxu0 %v25398_v32  ;;  %v25436_v32 = vld [vmem:[#allocation5 + $0x1d90] sm:$0xff]  }
 0x3bf   :  { %23273 = vmatprep.subr.bf16.mxu0 %v25401_v36  ;;  %v25441_v36 = vld [vmem:[#allocation5 + $0x1d60] sm:$0xff]  }
 0x3c0   :  { %23294 = vmatpush3.bf16.msra.mxu1 %v25400_v35  ;;  %v25438_v35 = vld [vmem:[#allocation5 + $0x1d18] sm:$0xff]  }
 0x3c1   :  { %23295 = vmatprep.subr.bf16.mxu1 %v25403_v38  ;;  %v25443_v38 = vld [vmem:[#allocation5 + $0x1de0] sm:$0xff]  }
 0x3c2   :  { %23274 = vmatpush3.bf16.msra.mxu0 %v25402_v37  ;;  %v25440_v37 = vld [vmem:[#allocation5 + $0x1d98] sm:$0xff]  }
 0x3c3   :  { %23275 = vmatprep.subr.bf16.mxu0 %v25405_v40  ;;  %v25445_v40 = vld [vmem:[#allocation5 + $0x1d68] sm:$0xff]  }
 0x3c4   :  { %23296 = vmatpush3.bf16.msra.mxu1 %v25404_v39  ;;  %v25442_v39 = vld [vmem:[#allocation5 + $0x1d20] sm:$0xff]  }
 0x3c5   :  { %23297 = vmatprep.subr.bf16.mxu1 %v25407_v42 }
 0x3c6   :  { %23276 = vmatpush3.bf16.msra.mxu0 %v25406_v41  ;;  %v25444_v41 = vld [vmem:[#allocation5 + $0x1da0] sm:$0xff]  }
 0x3c7   :  { %23277 = vmatprep.subr.bf16.mxu0 %v25409_v44 }
 0x3c8   :  { %23298 = vmatpush3.bf16.msra.mxu1 %v25408_v43  ;;  %v25447_v43 = vld [vmem:[#allocation5 + $0x1de8] sm:$0xff]  }
 0x3c9   :  { %23299 = vmatprep.subr.bf16.mxu1 %v25411_v46 }
 0x3ca   :  { %23278 = vmatpush3.bf16.msra.mxu0 %v25410_v45  ;;  %v25446_v45 = vld [vmem:[#allocation5 + $0x1d28] sm:$0xff]  }
 0x3cb   :  { %23279 = vmatprep.subr.bf16.mxu0 %v25413_v48 }
 0x3cc   :  { %v22977_v50 = vpop.f32.mrb[84].mxu0  ;;  %23300 = vmatpush3.bf16.msra.mxu1 %v25412_v47 }
 0x3cd   :  { %v22978_v52 = vpop.f32.mrb[85].mxu0  ;;  %23301 = vmatprep.subr.bf16.mxu1 %v25415_v51 }
 0x3ce   :  { %v22979_v54 = vadd.f32 %v22978_v52, %v22977_v50  ;;  %v22980_v55 = vpop.f32.mrb[86].mxu0  ;;  %v22999_v56 = vpop.f32.mrb[84].mxu1  ;;  %23280 = vmatpush3.bf16.msra.mxu0 %v25414_v49  ;;  %v25448_v49 = vld [vmem:[#allocation5 + $0x1da8] sm:$0xff]   ;;  %v25449_v50 = vld [vmem:[#allocation5 + $0x1d70] sm:$0xff]  }
 0x3cf   :  { %v22981_v57 = vpop.f32.mrb[87].mxu0  ;;  %v23000_v58 = vpop.f32.mrb[85].mxu1  ;;  %23281 = vmatprep.subr.bf16.mxu0 %v25417_v59 }
 0x3d0   :  { %v17529_v61 = vadd.f32 %v22979_v54, %v26648_v20  ;;  %v23001_v62 = vadd.f32 %v23000_v58, %v22999_v56  ;;  %v23002_v0 = vpop.f32.mrb[86].mxu1  ;;  %23302 = vmatpush3.bf16.msra.mxu1 %v25416_v53  ;;  %v25429_v20 = vld [vmem:[#allocation5 + $0x1d48] sm:$0xff]   ;;  %v25450_v53 = vld [vmem:[#allocation5 + $0x1d30] sm:$0xff]  }
 0x3d1   :  { %v23003_v3 = vpop.f32.mrb[87].mxu1  ;;  %23303 = vmatprep.subr.bf16.mxu1 %v25419_v63  ;;  %v25451_v56 = vld [vmem:[#allocation5 + $0x1df0] sm:$0xff]   ;;  %v25455_v63 = vld [vmem:[#allocation5 + $0x1df8] sm:$0xff]  }
 0x3d2   :  { %v26653_v1 = vadd.f32 %v23001_v62, %v17529_v61  ;;  %23282 = vmatpush3.bf16.msra.mxu0 %v25418_v60  ;;  %v25452_v58 = vld [vmem:[#allocation5 + $0x1db0] sm:$0xff]   ;;  %v25453_v61 = vld [vmem:[#allocation5 + $0x1d78] sm:$0xff]   ;;  %v25459_v3 = vld [vmem:[#allocation5 + $0x1e00] sm:$0xff]  }
 0x3d3   :  { %23283 = vmatprep.subr.bf16.mxu0 %v25421_v4  ;;  %v25454_v62 = vld [vmem:[#allocation5 + $0x1d38] sm:$0xff]   ;;  %v25460_v4 = vld [vmem:[#allocation5 + $0x1ec0] sm:$0xff]  }
 0x3d4   :  { %23304 = vmatpush3.bf16.msra.mxu1 %v25420_v2  ;;  %v25457_v0 = vld [vmem:[#allocation5 + $0x1db8] sm:$0xff]   ;;  %v25458_v2 = vld [vmem:[#allocation5 + $0x1e40] sm:$0xff]  }
 0x3d5   :  { %23305 = vmatprep.subr.bf16.mxu1 %v25423_v6 }
 0x3d6   :  { %23284 = vmatpush3.bf16.msra.mxu0 %v25422_v5  ;;  %v25461_v5 = vld [vmem:[#allocation5 + $0x1e80] sm:$0xff]  }
 0x3d7   :  { %23313 = vmatprep.subr.bf16.mxu0 %v25425_v11  ;;  %v25466_v11 = vld [vmem:[#allocation5 + $0x1e50] sm:$0xff]  }
 0x3d8   :  { %23306 = vmatpush3.bf16.msra.mxu1 %v25424_v9  ;;  %v25464_v9 = vld [vmem:[#allocation5 + $0x1ec8] sm:$0xff]  }
 0x3d9   :  { %23335 = vmatprep.subr.bf16.mxu1 %v25427_v15  ;;  %18087 = vmatmul.mubr.bf16.vlgmr.msra.gmra.mrb[112].mxu0 %v4353_v13  ;;  %v25468_v13 = vld [vmem:[#allocation5 + $0x1ed0] sm:$0xff]   ;;  %v25470_v15 = vld [vmem:[#allocation5 + $0x1e58] sm:$0xff]  }
 0x3da   :  { %23314 = vmatpush3.bf16.msra.mxu0 %v25426_v17  ;;  %18166 = vmatprep.mubr.bf16.mxu0 %v4374_v23  ;;  %v25472_v17 = vld [vmem:[#allocation5 + $0x1ed8] sm:$0xff]   ;;  %v25478_v23 = vld [vmem:[#allocation5 + $0x1e68] sm:$0xff]  }
 0x3db   :  { %18127 = vmatmul.mubr.bf16.vlgmr.msra.gmra.mrb[112].mxu1 %v4375_v19  ;;  %23315 = vmatprep.subr.bf16.mxu0 %v25429_v20  ;;  %v25474_v19 = vld [vmem:[#allocation5 + $0x1e60] sm:$0xff]  }
 0x3dc   :  { %23336 = vmatpush3.bf16.msra.mxu1 %v25428_v22  ;;  %18206 = vmatprep.mubr.bf16.mxu1 %v4378_v26  ;;  %v25475_v20 = vld [vmem:[#allocation5 + $0x1e20] sm:$0xff]   ;;  %v25480_v26 = vld [vmem:[#allocation5 + $0x1ee8] sm:$0xff]  }
 0x3dd   :  { %23337 = vmatprep.subr.bf16.mxu1 %v25431_v24  ;;  %v25477_v22 = vld [vmem:[#allocation5 + $0x1ea0] sm:$0xff]   ;;  %v25479_v24 = vld [vmem:[#allocation5 + $0x1e28] sm:$0xff]  }
 0x3de   :  { %23316 = vmatpush3.bf16.msra.mxu0 %v25430_v25 }
 0x3df   :  { %23317 = vmatprep.subr.bf16.mxu0 %v25433_v27 }
 0x3e0   :  { %23338 = vmatpush3.bf16.msra.mxu1 %v25432_v28  ;;  %v25481_v28 = vld [vmem:[#allocation5 + $0x1ea8] sm:$0xff]  }
 0x3e1   :  { %23339 = vmatprep.subr.bf16.mxu1 %v25435_v29 }
 0x3e2   :  { %23318 = vmatpush3.bf16.msra.mxu0 %v25434_v30 }
 0x3e3   :  { %23319 = vmatprep.subr.bf16.mxu0 %v25437_v31 }
 0x3e4   :  { %23340 = vmatpush3.bf16.msra.mxu1 %v25436_v32 }
 0x3e5   :  { %23341 = vmatprep.subr.bf16.mxu1 %v25439_v33 }
 0x3e6   :  { %23320 = vmatpush3.bf16.msra.mxu0 %v25438_v35  ;;  %v25482_v35 = vld [vmem:[#allocation5 + $0x1e70] sm:$0xff]  }
 0x3e7   :  { %23321 = vmatprep.subr.bf16.mxu0 %v25441_v36  ;;  %v25483_v36 = vld [vmem:[#allocation5 + $0x1e30] sm:$0xff]  }
 0x3e8   :  { %23342 = vmatpush3.bf16.msra.mxu1 %v25440_v37 }
 0x3e9   :  { %23343 = vmatprep.subr.bf16.mxu1 %v25443_v38 }
 0x3ea   :  { %23322 = vmatpush3.bf16.msra.mxu0 %v25442_v39  ;;  %v25484_v39 = vld [vmem:[#allocation5 + $0x1ef0] sm:$0xff]  }
 0x3eb   :  { %23323 = vmatprep.subr.bf16.mxu0 %v25445_v40 }
 0x3ec   :  { %v23021_v42 = vpop.f32.mrb[88].mxu0  ;;  %23344 = vmatpush3.bf16.msra.mxu1 %v25444_v41 }
 0x3ed   :  { %v23022_v44 = vpop.f32.mrb[89].mxu0  ;;  %23345 = vmatprep.subr.bf16.mxu1 %v25447_v43 }
 0x3ee   :  { %v23023_v46 = vadd.f32 %v23022_v44, %v23021_v42  ;;  %v23024_v47 = vpop.f32.mrb[90].mxu0  ;;  %v23043_v48 = vpop.f32.mrb[88].mxu1  ;;  %23324 = vmatpush3.bf16.msra.mxu0 %v25446_v45  ;;  %v25485_v42 = vld [vmem:[#allocation5 + $0x1eb0] sm:$0xff]   ;;  %v25486_v44 = vld [vmem:[#allocation5 + $0x1e78] sm:$0xff]  }
 0x3ef   :  { %v23025_v51 = vpop.f32.mrb[91].mxu0  ;;  %v23044_v52 = vpop.f32.mrb[89].mxu1  ;;  %23325 = vmatprep.subr.bf16.mxu0 %v25449_v50  ;;  %v25487_v45 = vld [vmem:[#allocation5 + $0x1e38] sm:$0xff]  }
 0x3f0   :  { %v17609_v54 = vadd.f32 %v23023_v46, %v26653_v1  ;;  %v23045_v55 = vadd.f32 %v23044_v52, %v23043_v48  ;;  %v23046_v57 = vpop.f32.mrb[90].mxu1  ;;  %23346 = vmatpush3.bf16.msra.mxu1 %v25448_v49  ;;  %v4360_v1 = vrot.slane %v26658_v14, %v26434_v34  ;;  %v25469_v14 = vld [vmem:[#allocation5 + $0x1e90] sm:$0xff]   ;;  %v25488_v46 = vld [vmem:[#allocation5 + $0x1ef8] sm:$0xff]   ;;  %v25490_v51 = vld [vmem:[#allocation5 + $0x1f40] sm:$0xff]  }
 0x3f1   :  { %v23047_v59 = vpop.f32.mrb[91].mxu1  ;;  %23347 = vmatprep.subr.bf16.mxu1 %v25451_v56  ;;  %v68_v47 = vld [vmem:[#allocation2 + $0x78] sm:$0xff] }
 0x3f2   :  { %v26665_v60 = vadd.f32 %v23045_v55, %v17609_v54  ;;  %23326 = vmatpush3.bf16.msra.mxu0 %v25450_v53  ;;  %v4376_v6 = vcombine.high %v4360_v1, %v4360_v1  ;;  %v4386_v48 = vrot.slane %v68_v47, %v26434_v34  ;;  %v25489_v49 = vld [vmem:[#allocation5 + $0x1eb8] sm:$0xff]   ;;  %v4379_v50 = vcombine.high %v68_v47, %v68_v47  ;;  %v25492_v55 = vld [vmem:[#allocation5 + $0x1fc0] sm:$0xff]   ;;  %v25527_v47 = vld [vmem:[#allocation5 + $0x2048] sm:$0xff]  }
 0x3f3   :  { %23327 = vmatprep.subr.bf16.mxu0 %v25453_v61  ;;  %v25491_v57 = vld [vmem:[#allocation5 + $0x1f00] sm:$0xff]  }
 0x3f4   :  { %23348 = vmatpush3.bf16.msra.mxu1 %v25452_v58  ;;  %v4394_v52 = vcombine.high %v4386_v48, %v4386_v48  ;;  %v4402_v53 = vrot.slane %v4386_v48, %v26434_v34  ;;  %v26675_v54 = vrot.slane %v4379_v50, %v26434_v34  ;;  %v25528_v48 = vld [vmem:[#allocation5 + $0x2008] sm:$0xff]  }
 0x3f5   :  { %23349 = vmatprep.subr.bf16.mxu1 %v25455_v63  ;;  %v25530_v50 = vld [vmem:[#allocation5 + $0x2088] sm:$0xff]  }
 0x3f6   :  { %23328 = vmatpush3.bf16.msra.mxu0 %v25454_v62  ;;  %v4416_v56 = vrot.slane %v4394_v52, %v26434_v34  ;;  %v4395_v58 = vcombine.high %v26675_v54, %v26675_v54  ;;  %v4424_v59 = vcombine.high %v4402_v53, %v4402_v53  ;;  %v25493_v62 = vld [vmem:[#allocation5 + $0x1f80] sm:$0xff]   ;;  %v25532_v52 = vld [vmem:[#allocation5 + $0x2010] sm:$0xff]  }
 0x3f7   :  { %23357 = vmatprep.subr.bf16.mxu0 %v25458_v2 }
 0x3f8   :  { %23350 = vmatpush3.bf16.msra.mxu1 %v25457_v0  ;;  %v4426_v61 = vcombine.high %v4416_v56, %v4416_v56  ;;  %v4423_v63 = vrot.slane %v4395_v58, %v26434_v34  ;;  %v25496_v0 = vld [vmem:[#allocation5 + $0x1fc8] sm:$0xff]   ;;  %v25538_v58 = vld [vmem:[#allocation5 + $0x2098] sm:$0xff]  }
 0x3f9   :  { %18167 = vmatmul.mubr.bf16.vlgmr.msra.gmra.mrb[116].mxu0 %v4360_v1  ;;  %23379 = vmatprep.subr.bf16.mxu1 %v25460_v4  ;;  %v25495_v1 = vld [vmem:[#allocation5 + $0x1f08] sm:$0xff]  }
 0x3fa   :  { %23358 = vmatpush3.bf16.msra.mxu0 %v25459_v3  ;;  %18246 = vmatprep.mubr.bf16.mxu0 %v4416_v56  ;;  %v4427_v2 = vcombine.high %v4423_v63, %v4423_v63  ;;  %v25498_v3 = vld [vmem:[#allocation5 + $0x1f50] sm:$0xff]   ;;  %v25497_v4 = vld [vmem:[#allocation5 + $0x1f88] sm:$0xff]   ;;  %v25536_v56 = vld [vmem:[#allocation5 + $0x2018] sm:$0xff]  }
 0x3fb   :  { %18207 = vmatmul.mubr.bf16.vlgmr.msra.gmra.mrb[116].mxu1 %v4376_v6  ;;  %23359 = vmatprep.subr.bf16.mxu0 %v25462_v7  ;;  %v25499_v6 = vld [vmem:[#allocation5 + $0x1f10] sm:$0xff]   ;;  %v25502_v7 = vld [vmem:[#allocation5 + $0x1f58] sm:$0xff]  }
 0x3fc   :  { %23380 = vmatpush3.bf16.msra.mxu1 %v25461_v5  ;;  %18286 = vmatprep.mubr.bf16.mxu1 %v4426_v61  ;;  %v25500_v5 = vld [vmem:[#allocation5 + $0x1fd0] sm:$0xff]   ;;  %v25541_v61 = vld [vmem:[#allocation5 + $0x20e0] sm:$0xff]  }
 0x3fd   :  { %23381 = vmatprep.subr.bf16.mxu1 %v25464_v9  ;;  %v25504_v9 = vld [vmem:[#allocation5 + $0x1fd8] sm:$0xff]  }
 0x3fe   :  { %23360 = vmatpush3.bf16.msra.mxu0 %v25463_v8  ;;  %v25501_v8 = vld [vmem:[#allocation5 + $0x1f90] sm:$0xff]  }
 0x3ff   :  { %23361 = vmatprep.subr.bf16.mxu0 %v25466_v11  ;;  %v25506_v11 = vld [vmem:[#allocation5 + $0x1f60] sm:$0xff]  }
 0x400   :  { %23382 = vmatpush3.bf16.msra.mxu1 %v25465_v10  ;;  %v25503_v10 = vld [vmem:[#allocation5 + $0x1f18] sm:$0xff]  }
 0x401   :  { %23383 = vmatprep.subr.bf16.mxu1 %v25468_v13  ;;  %v25508_v13 = vld [vmem:[#allocation5 + $0x1fe0] sm:$0xff]  }
 0x402   :  { %23362 = vmatpush3.bf16.msra.mxu0 %v25467_v12  ;;  %v25505_v12 = vld [vmem:[#allocation5 + $0x1f98] sm:$0xff]  }
 0x403   :  { %23363 = vmatprep.subr.bf16.mxu0 %v25470_v15  ;;  %v25510_v15 = vld [vmem:[#allocation5 + $0x1f68] sm:$0xff]  }
 0x404   :  { %23384 = vmatpush3.bf16.msra.mxu1 %v25469_v14  ;;  %v25507_v14 = vld [vmem:[#allocation5 + $0x1f20] sm:$0xff]  }
 0x405   :  { %23385 = vmatprep.subr.bf16.mxu1 %v25472_v17 }
 0x406   :  { %23364 = vmatpush3.bf16.msra.mxu0 %v25471_v16  ;;  %v25509_v16 = vld [vmem:[#allocation5 + $0x1fa0] sm:$0xff]  }
 0x407   :  { %23365 = vmatprep.subr.bf16.mxu0 %v25474_v19 }
 0x408   :  { %23386 = vmatpush3.bf16.msra.mxu1 %v25473_v18  ;;  %v25512_v18 = vld [vmem:[#allocation5 + $0x1fe8] sm:$0xff]  }
 0x409   :  { %23387 = vmatprep.subr.bf16.mxu1 %v25476_v21 }
 0x40a   :  { %23366 = vmatpush3.bf16.msra.mxu0 %v25475_v20  ;;  %v25511_v20 = vld [vmem:[#allocation5 + $0x1f28] sm:$0xff]  }
 0x40b   :  { %23367 = vmatprep.subr.bf16.mxu0 %v25478_v23 }
 0x40c   :  { %v23065_v25 = vpop.f32.mrb[92].mxu0  ;;  %23388 = vmatpush3.bf16.msra.mxu1 %v25477_v22 }
 0x40d   :  { %v23066_v27 = vpop.f32.mrb[93].mxu0  ;;  %23389 = vmatprep.subr.bf16.mxu1 %v25480_v26 }
 0x40e   :  { %v23067_v29 = vadd.f32 %v23066_v27, %v23065_v25  ;;  %v23068_v30 = vpop.f32.mrb[94].mxu0  ;;  %v23087_v31 = vpop.f32.mrb[92].mxu1  ;;  %23368 = vmatpush3.bf16.msra.mxu0 %v25479_v24  ;;  %v25513_v24 = vld [vmem:[#allocation5 + $0x1fa8] sm:$0xff]   ;;  %v25514_v25 = vld [vmem:[#allocation5 + $0x1f70] sm:$0xff]  }
 0x40f   :  { %v23069_v32 = vpop.f32.mrb[95].mxu0  ;;  %v23088_v33 = vpop.f32.mrb[93].mxu1  ;;  %23369 = vmatprep.subr.bf16.mxu0 %v25482_v35 }
 0x410   :  { %v17689_v37 = vadd.f32 %v23067_v29, %v26665_v60  ;;  %v23089_v38 = vadd.f32 %v23088_v33, %v23087_v31  ;;  %v23090_v40 = vpop.f32.mrb[94].mxu1  ;;  %23390 = vmatpush3.bf16.msra.mxu1 %v25481_v28  ;;  %v25494_v60 = vld [vmem:[#allocation5 + $0x1f48] sm:$0xff]   ;;  %v25515_v28 = vld [vmem:[#allocation5 + $0x1f30] sm:$0xff]  }
 0x411   :  { %v23091_v43 = vpop.f32.mrb[95].mxu1  ;;  %23391 = vmatprep.subr.bf16.mxu1 %v25484_v39  ;;  %v25516_v31 = vld [vmem:[#allocation5 + $0x1ff0] sm:$0xff]   ;;  %v25520_v39 = vld [vmem:[#allocation5 + $0x1ff8] sm:$0xff]  }
 0x412   :  { %v26670_v41 = vadd.f32 %v23089_v38, %v17689_v37  ;;  %23370 = vmatpush3.bf16.msra.mxu0 %v25483_v36  ;;  %v25517_v33 = vld [vmem:[#allocation5 + $0x1fb0] sm:$0xff]   ;;  %v25518_v37 = vld [vmem:[#allocation5 + $0x1f78] sm:$0xff]   ;;  %v25524_v43 = vld [vmem:[#allocation5 + $0x2000] sm:$0xff]  }
 0x413   :  { %23371 = vmatprep.subr.bf16.mxu0 %v25486_v44  ;;  %v25519_v38 = vld [vmem:[#allocation5 + $0x1f38] sm:$0xff]   ;;  %v25525_v44 = vld [vmem:[#allocation5 + $0x20c0] sm:$0xff]  }
 0x414   :  { %23392 = vmatpush3.bf16.msra.mxu1 %v25485_v42  ;;  %v25522_v40 = vld [vmem:[#allocation5 + $0x1fb8] sm:$0xff]   ;;  %v25523_v42 = vld [vmem:[#allocation5 + $0x2040] sm:$0xff]  }
 0x415   :  { %23393 = vmatprep.subr.bf16.mxu1 %v25488_v46 }
 0x416   :  { %23372 = vmatpush3.bf16.msra.mxu0 %v25487_v45  ;;  %v25526_v45 = vld [vmem:[#allocation5 + $0x2080] sm:$0xff]  }
 0x417   :  { %23401 = vmatprep.subr.bf16.mxu0 %v25490_v51  ;;  %v25531_v51 = vld [vmem:[#allocation5 + $0x2050] sm:$0xff]  }
 0x418   :  { %23394 = vmatpush3.bf16.msra.mxu1 %v25489_v49  ;;  %v25529_v49 = vld [vmem:[#allocation5 + $0x20c8] sm:$0xff]  }
 0x419   :  { %23423 = vmatprep.subr.bf16.mxu1 %v25492_v55  ;;  %18247 = vmatmul.mubr.bf16.vlgmr.msra.gmra.mrb[120].mxu0 %v4402_v53  ;;  %v25533_v53 = vld [vmem:[#allocation5 + $0x20d0] sm:$0xff]   ;;  %v25535_v55 = vld [vmem:[#allocation5 + $0x2058] sm:$0xff]  }
 0x41a   :  { %23402 = vmatpush3.bf16.msra.mxu0 %v25491_v57  ;;  %18326 = vmatprep.mubr.bf16.mxu0 %v4423_v63  ;;  %v25537_v57 = vld [vmem:[#allocation5 + $0x20d8] sm:$0xff]   ;;  %v25543_v63 = vld [vmem:[#allocation5 + $0x2068] sm:$0xff]  }
 0x41b   :  { %18287 = vmatmul.mubr.bf16.vlgmr.msra.gmra.mrb[120].mxu1 %v4424_v59  ;;  %23403 = vmatprep.subr.bf16.mxu0 %v25494_v60  ;;  %v25539_v59 = vld [vmem:[#allocation5 + $0x2060] sm:$0xff]  }
 0x41c   :  { %23424 = vmatpush3.bf16.msra.mxu1 %v25493_v62  ;;  %18366 = vmatprep.mubr.bf16.mxu1 %v4427_v2  ;;  %v25540_v60 = vld [vmem:[#allocation5 + $0x2020] sm:$0xff]   ;;  %v25545_v2 = vld [vmem:[#allocation5 + $0x20e8] sm:$0xff]  }
 0x41d   :  { %23425 = vmatprep.subr.bf16.mxu1 %v25496_v0  ;;  %v25542_v62 = vld [vmem:[#allocation5 + $0x20a0] sm:$0xff]   ;;  %v25544_v0 = vld [vmem:[#allocation5 + $0x2028] sm:$0xff]  }
 0x41e   :  { %23404 = vmatpush3.bf16.msra.mxu0 %v25495_v1 }
 0x41f   :  { %23405 = vmatprep.subr.bf16.mxu0 %v25498_v3 }
 0x420   :  { %23426 = vmatpush3.bf16.msra.mxu1 %v25497_v4  ;;  %v25546_v4 = vld [vmem:[#allocation5 + $0x20a8] sm:$0xff]  }
 0x421   :  { %23427 = vmatprep.subr.bf16.mxu1 %v25500_v5 }
 0x422   :  { %23406 = vmatpush3.bf16.msra.mxu0 %v25499_v6 }
 0x423   :  { %23407 = vmatprep.subr.bf16.mxu0 %v25502_v7 }
 0x424   :  { %23428 = vmatpush3.bf16.msra.mxu1 %v25501_v8 }
 0x425   :  { %23429 = vmatprep.subr.bf16.mxu1 %v25504_v9 }
 0x426   :  { %23408 = vmatpush3.bf16.msra.mxu0 %v25503_v10  ;;  %v25547_v10 = vld [vmem:[#allocation5 + $0x2070] sm:$0xff]  }
 0x427   :  { %23409 = vmatprep.subr.bf16.mxu0 %v25506_v11  ;;  %v25548_v11 = vld [vmem:[#allocation5 + $0x2030] sm:$0xff]  }
 0x428   :  { %23430 = vmatpush3.bf16.msra.mxu1 %v25505_v12 }
 0x429   :  { %23431 = vmatprep.subr.bf16.mxu1 %v25508_v13 }
 0x42a   :  { %23410 = vmatpush3.bf16.msra.mxu0 %v25507_v14  ;;  %v25549_v14 = vld [vmem:[#allocation5 + $0x20f0] sm:$0xff]  }
 0x42b   :  { %23411 = vmatprep.subr.bf16.mxu0 %v25510_v15 }
 0x42c   :  { %v23109_v17 = vpop.f32.mrb[96].mxu0  ;;  %23432 = vmatpush3.bf16.msra.mxu1 %v25509_v16 }
 0x42d   :  { %v23110_v19 = vpop.f32.mrb[97].mxu0  ;;  %23433 = vmatprep.subr.bf16.mxu1 %v25512_v18 }
 0x42e   :  { %v23111_v21 = vadd.f32 %v23110_v19, %v23109_v17  ;;  %v23112_v22 = vpop.f32.mrb[98].mxu0  ;;  %v23131_v23 = vpop.f32.mrb[96].mxu1  ;;  %23412 = vmatpush3.bf16.msra.mxu0 %v25511_v20  ;;  %v25550_v17 = vld [vmem:[#allocation5 + $0x20b0] sm:$0xff]   ;;  %v25551_v19 = vld [vmem:[#allocation5 + $0x2078] sm:$0xff]  }
 0x42f   :  { %v23113_v26 = vpop.f32.mrb[99].mxu0  ;;  %v23132_v27 = vpop.f32.mrb[97].mxu1  ;;  %23413 = vmatprep.subr.bf16.mxu0 %v25514_v25  ;;  %v25552_v20 = vld [vmem:[#allocation5 + $0x2038] sm:$0xff]   ;;  %v69_v22 = vld [vmem:[#allocation2 + $0x80] sm:$0xff] }
 0x430   :  { %v17769_v29 = vadd.f32 %v23111_v21, %v26670_v41  ;;  %v23133_v30 = vadd.f32 %v23132_v27, %v23131_v23  ;;  %v23134_v32 = vpop.f32.mrb[98].mxu1  ;;  %23434 = vmatpush3.bf16.msra.mxu1 %v25513_v24  ;;  %v4409_v41 = vrot.slane %v26675_v54, %v26434_v34  ;;  %v25534_v54 = vld [vmem:[#allocation5 + $0x2090] sm:$0xff]   ;;  %v25553_v21 = vld [vmem:[#allocation5 + $0x20f8] sm:$0xff]   ;;  %v4435_v23 = vrot.slane %v69_v22, %v26434_v34  ;;  %v25555_v26 = vld [vmem:[#allocation5 + $0x2140] sm:$0xff]  }
 0x431   :  { %v23135_v35 = vpop.f32.mrb[99].mxu1  ;;  %23435 = vmatprep.subr.bf16.mxu1 %v25516_v31  ;;  %v25554_v24 = vld [vmem:[#allocation5 + $0x20b8] sm:$0xff]   ;;  %v4428_v25 = vcombine.high %v69_v22, %v69_v22  ;;  %v25556_v32 = vld [vmem:[#allocation5 + $0x2100] sm:$0xff]   ;;  %v25592_v22 = vld [vmem:[#allocation5 + $0x2248] sm:$0xff]  }
 0x432   :  { %v26682_v36 = vadd.f32 %v23133_v30, %v17769_v29  ;;  %23414 = vmatpush3.bf16.msra.mxu0 %v25515_v28  ;;  %v4425_v46 = vcombine.high %v4409_v41, %v4409_v41  ;;  %v4443_v27 = vcombine.high %v4435_v23, %v4435_v23  ;;  %v4451_v28 = vrot.slane %v4435_v23, %v26434_v34  ;;  %v25557_v30 = vld [vmem:[#allocation5 + $0x21c0] sm:$0xff]   ;;  %v25593_v23 = vld [vmem:[#allocation5 + $0x2208] sm:$0xff]  }
 0x433   :  { %23415 = vmatprep.subr.bf16.mxu0 %v25518_v37  ;;  %v26692_v29 = vrot.slane %v4428_v25, %v26434_v34  ;;  %v25595_v25 = vld [vmem:[#allocation5 + $0x2288] sm:$0xff]  }
 0x434   :  { %23436 = vmatpush3.bf16.msra.mxu1 %v25517_v33  ;;  %v4465_v31 = vrot.slane %v4443_v27, %v26434_v34  ;;  %v4473_v35 = vcombine.high %v4451_v28, %v4451_v28  ;;  %v25597_v27 = vld [vmem:[#allocation5 + $0x2210] sm:$0xff]  }
 0x435   :  { %23437 = vmatprep.subr.bf16.mxu1 %v25520_v39  ;;  %v4444_v33 = vcombine.high %v26692_v29, %v26692_v29 }
 0x436   :  { %23416 = vmatpush3.bf16.msra.mxu0 %v25519_v38  ;;  %v4475_v37 = vcombine.high %v4465_v31, %v4465_v31  ;;  %v25558_v38 = vld [vmem:[#allocation5 + $0x2180] sm:$0xff]  }
 0x437   :  { %23445 = vmatprep.subr.bf16.mxu0 %v25523_v42  ;;  %v4472_v39 = vrot.slane %v4444_v33, %v26434_v34  ;;  %v25603_v33 = vld [vmem:[#allocation5 + $0x2298] sm:$0xff]  }
 0x438   :  { %23438 = vmatpush3.bf16.msra.mxu1 %v25522_v40  ;;  %v25561_v40 = vld [vmem:[#allocation5 + $0x21c8] sm:$0xff]  }
 0x439   :  { %18327 = vmatmul.mubr.bf16.vlgmr.msra.gmra.mrb[124].mxu0 %v4409_v41  ;;  %23467 = vmatprep.subr.bf16.mxu1 %v25525_v44  ;;  %v25560_v41 = vld [vmem:[#allocation5 + $0x2108] sm:$0xff]   ;;  %v4476_v42 = vcombine.high %v4472_v39, %v4472_v39 }
 0x43a   :  { %23446 = vmatpush3.bf16.msra.mxu0 %v25524_v43  ;;  %18406 = vmatprep.mubr.bf16.mxu0 %v4465_v31  ;;  %v25563_v43 = vld [vmem:[#allocation5 + $0x2150] sm:$0xff]   ;;  %v25562_v44 = vld [vmem:[#allocation5 + $0x2188] sm:$0xff]   ;;  %v25601_v31 = vld [vmem:[#allocation5 + $0x2218] sm:$0xff]  }
 0x43b   :  { %18367 = vmatmul.mubr.bf16.vlgmr.msra.gmra.mrb[124].mxu1 %v4425_v46  ;;  %23447 = vmatprep.subr.bf16.mxu0 %v25527_v47  ;;  %v25564_v46 = vld [vmem:[#allocation5 + $0x2110] sm:$0xff]   ;;  %v25567_v47 = vld [vmem:[#allocation5 + $0x2158] sm:$0xff]  }
 0x43c   :  { %23468 = vmatpush3.bf16.msra.mxu1 %v25526_v45  ;;  %18446 = vmatprep.mubr.bf16.mxu1 %v4475_v37  ;;  %v25565_v45 = vld [vmem:[#allocation5 + $0x21d0] sm:$0xff]   ;;  %v25606_v37 = vld [vmem:[#allocation5 + $0x22e0] sm:$0xff]  }
 0x43d   :  { %23469 = vmatprep.subr.bf16.mxu1 %v25529_v49  ;;  %v25569_v49 = vld [vmem:[#allocation5 + $0x21d8] sm:$0xff]  }
 0x43e   :  { %23448 = vmatpush3.bf16.msra.mxu0 %v25528_v48  ;;  %v25566_v48 = vld [vmem:[#allocation5 + $0x2190] sm:$0xff]  }
 0x43f   :  { %23449 = vmatprep.subr.bf16.mxu0 %v25531_v51  ;;  %v25571_v51 = vld [vmem:[#allocation5 + $0x2160] sm:$0xff]  }
 0x440   :  { %23470 = vmatpush3.bf16.msra.mxu1 %v25530_v50  ;;  %v25568_v50 = vld [vmem:[#allocation5 + $0x2118] sm:$0xff]  }
 0x441   :  { %23471 = vmatprep.subr.bf16.mxu1 %v25533_v53  ;;  %v25573_v53 = vld [vmem:[#allocation5 + $0x21e0] sm:$0xff]  }
 0x442   :  { %23450 = vmatpush3.bf16.msra.mxu0 %v25532_v52  ;;  %v25570_v52 = vld [vmem:[#allocation5 + $0x2198] sm:$0xff]  }
 0x443   :  { %23451 = vmatprep.subr.bf16.mxu0 %v25535_v55  ;;  %v25575_v55 = vld [vmem:[#allocation5 + $0x2168] sm:$0xff]  }
 0x444   :  { %23472 = vmatpush3.bf16.msra.mxu1 %v25534_v54  ;;  %v25572_v54 = vld [vmem:[#allocation5 + $0x2120] sm:$0xff]  }
 0x445   :  { %23473 = vmatprep.subr.bf16.mxu1 %v25537_v57 }
 0x446   :  { %23452 = vmatpush3.bf16.msra.mxu0 %v25536_v56  ;;  %v25574_v56 = vld [vmem:[#allocation5 + $0x21a0] sm:$0xff]  }
 0x447   :  { %23453 = vmatprep.subr.bf16.mxu0 %v25539_v59 }
 0x448   :  { %23474 = vmatpush3.bf16.msra.mxu1 %v25538_v58  ;;  %v25577_v58 = vld [vmem:[#allocation5 + $0x21e8] sm:$0xff]  }
 0x449   :  { %23475 = vmatprep.subr.bf16.mxu1 %v25541_v61 }
 0x44a   :  { %23454 = vmatpush3.bf16.msra.mxu0 %v25540_v60  ;;  %v25576_v60 = vld [vmem:[#allocation5 + $0x2128] sm:$0xff]  }
 0x44b   :  { %23455 = vmatprep.subr.bf16.mxu0 %v25543_v63 }
 0x44c   :  { %v23153_v1 = vpop.f32.mrb[100].mxu0  ;;  %23476 = vmatpush3.bf16.msra.mxu1 %v25542_v62 }
 0x44d   :  { %v23154_v3 = vpop.f32.mrb[101].mxu0  ;;  %23477 = vmatprep.subr.bf16.mxu1 %v25545_v2 }
 0x44e   :  { %v23155_v5 = vadd.f32 %v23154_v3, %v23153_v1  ;;  %v23156_v6 = vpop.f32.mrb[102].mxu0  ;;  %v23175_v7 = vpop.f32.mrb[100].mxu1  ;;  %23456 = vmatpush3.bf16.msra.mxu0 %v25544_v0  ;;  %v25578_v0 = vld [vmem:[#allocation5 + $0x21a8] sm:$0xff]   ;;  %v25579_v1 = vld [vmem:[#allocation5 + $0x2170] sm:$0xff]  }
 0x44f   :  { %v23157_v8 = vpop.f32.mrb[103].mxu0  ;;  %v23176_v9 = vpop.f32.mrb[101].mxu1  ;;  %23457 = vmatprep.subr.bf16.mxu0 %v25547_v10 }
 0x450   :  { %v17849_v12 = vadd.f32 %v23155_v5, %v26682_v36  ;;  %v23177_v13 = vadd.f32 %v23176_v9, %v23175_v7  ;;  %v23178_v15 = vpop.f32.mrb[102].mxu1  ;;  %23478 = vmatpush3.bf16.msra.mxu1 %v25546_v4  ;;  %v25559_v36 = vld [vmem:[#allocation5 + $0x2148] sm:$0xff]   ;;  %v25580_v4 = vld [vmem:[#allocation5 + $0x2130] sm:$0xff]  }
 0x451   :  { %v23179_v18 = vpop.f32.mrb[103].mxu1  ;;  %23479 = vmatprep.subr.bf16.mxu1 %v25549_v14  ;;  %v25581_v7 = vld [vmem:[#allocation5 + $0x21f0] sm:$0xff]   ;;  %v25585_v14 = vld [vmem:[#allocation5 + $0x21f8] sm:$0xff]  }
 0x452   :  { %v26687_v16 = vadd.f32 %v23177_v13, %v17849_v12  ;;  %23458 = vmatpush3.bf16.msra.mxu0 %v25548_v11  ;;  %v25582_v9 = vld [vmem:[#allocation5 + $0x21b0] sm:$0xff]   ;;  %v25583_v12 = vld [vmem:[#allocation5 + $0x2178] sm:$0xff]   ;;  %v25589_v18 = vld [vmem:[#allocation5 + $0x2200] sm:$0xff]  }
 0x453   :  { %23459 = vmatprep.subr.bf16.mxu0 %v25551_v19  ;;  %v25584_v13 = vld [vmem:[#allocation5 + $0x2138] sm:$0xff]   ;;  %v25590_v19 = vld [vmem:[#allocation5 + $0x22c0] sm:$0xff]  }
 0x454   :  { %23480 = vmatpush3.bf16.msra.mxu1 %v25550_v17  ;;  %v25587_v15 = vld [vmem:[#allocation5 + $0x21b8] sm:$0xff]   ;;  %v25588_v17 = vld [vmem:[#allocation5 + $0x2240] sm:$0xff]  }
 0x455   :  { %23481 = vmatprep.subr.bf16.mxu1 %v25553_v21 }
 0x456   :  { %23460 = vmatpush3.bf16.msra.mxu0 %v25552_v20  ;;  %v25591_v20 = vld [vmem:[#allocation5 + $0x2280] sm:$0xff]  }
 0x457   :  { %23489 = vmatprep.subr.bf16.mxu0 %v25555_v26  ;;  %v25596_v26 = vld [vmem:[#allocation5 + $0x2250] sm:$0xff]  }
 0x458   :  { %23482 = vmatpush3.bf16.msra.mxu1 %v25554_v24  ;;  %v25594_v24 = vld [vmem:[#allocation5 + $0x22c8] sm:$0xff]  }
 0x459   :  { %23511 = vmatprep.subr.bf16.mxu1 %v25557_v30  ;;  %18407 = vmatmul.mubr.bf16.vlgmr.msra.gmra.mrb[128].mxu0 %v4451_v28  ;;  %v25598_v28 = vld [vmem:[#allocation5 + $0x22d0] sm:$0xff]   ;;  %v25600_v30 = vld [vmem:[#allocation5 + $0x2258] sm:$0xff]  }
 0x45a   :  { %23490 = vmatpush3.bf16.msra.mxu0 %v25556_v32  ;;  %18486 = vmatprep.mubr.bf16.mxu0 %v4472_v39  ;;  %v25602_v32 = vld [vmem:[#allocation5 + $0x22d8] sm:$0xff]   ;;  %v25608_v39 = vld [vmem:[#allocation5 + $0x2268] sm:$0xff]  }
 0x45b   :  { %18447 = vmatmul.mubr.bf16.vlgmr.msra.gmra.mrb[128].mxu1 %v4473_v35  ;;  %23491 = vmatprep.subr.bf16.mxu0 %v25559_v36  ;;  %v25604_v35 = vld [vmem:[#allocation5 + $0x2260] sm:$0xff]  }
 0x45c   :  { %23512 = vmatpush3.bf16.msra.mxu1 %v25558_v38  ;;  %18526 = vmatprep.mubr.bf16.mxu1 %v4476_v42  ;;  %v25605_v36 = vld [vmem:[#allocation5 + $0x2220] sm:$0xff]   ;;  %v25610_v42 = vld [vmem:[#allocation5 + $0x22e8] sm:$0xff]  }
 0x45d   :  { %23513 = vmatprep.subr.bf16.mxu1 %v25561_v40  ;;  %v25607_v38 = vld [vmem:[#allocation5 + $0x22a0] sm:$0xff]   ;;  %v25609_v40 = vld [vmem:[#allocation5 + $0x2228] sm:$0xff]  }
 0x45e   :  { %23492 = vmatpush3.bf16.msra.mxu0 %v25560_v41 }
 0x45f   :  { %23493 = vmatprep.subr.bf16.mxu0 %v25563_v43 }
 0x460   :  { %23514 = vmatpush3.bf16.msra.mxu1 %v25562_v44  ;;  %v25611_v44 = vld [vmem:[#allocation5 + $0x22a8] sm:$0xff]  }
 0x461   :  { %23515 = vmatprep.subr.bf16.mxu1 %v25565_v45 }
 0x462   :  { %23494 = vmatpush3.bf16.msra.mxu0 %v25564_v46 }
 0x463   :  { %23495 = vmatprep.subr.bf16.mxu0 %v25567_v47 }
 0x464   :  { %23516 = vmatpush3.bf16.msra.mxu1 %v25566_v48 }
 0x465   :  { %23517 = vmatprep.subr.bf16.mxu1 %v25569_v49 }
 0x466   :  { %23496 = vmatpush3.bf16.msra.mxu0 %v25568_v50  ;;  %v25612_v50 = vld [vmem:[#allocation5 + $0x2270] sm:$0xff]  }
 0x467   :  { %23497 = vmatprep.subr.bf16.mxu0 %v25571_v51  ;;  %v25613_v51 = vld [vmem:[#allocation5 + $0x2230] sm:$0xff]  }
 0x468   :  { %23518 = vmatpush3.bf16.msra.mxu1 %v25570_v52 }
 0x469   :  { %23519 = vmatprep.subr.bf16.mxu1 %v25573_v53 }
 0x46a   :  { %23498 = vmatpush3.bf16.msra.mxu0 %v25572_v54  ;;  %v25614_v54 = vld [vmem:[#allocation5 + $0x22f0] sm:$0xff]  }
 0x46b   :  { %23499 = vmatprep.subr.bf16.mxu0 %v25575_v55 }
 0x46c   :  { %v23197_v57 = vpop.f32.mrb[104].mxu0  ;;  %23520 = vmatpush3.bf16.msra.mxu1 %v25574_v56 }
 0x46d   :  { %v23198_v59 = vpop.f32.mrb[105].mxu0  ;;  %23521 = vmatprep.subr.bf16.mxu1 %v25577_v58 }
 0x46e   :  { %v23199_v61 = vadd.f32 %v23198_v59, %v23197_v57  ;;  %v23200_v62 = vpop.f32.mrb[106].mxu0  ;;  %v23219_v63 = vpop.f32.mrb[104].mxu1  ;;  %23500 = vmatpush3.bf16.msra.mxu0 %v25576_v60  ;;  %v25615_v57 = vld [vmem:[#allocation5 + $0x22b0] sm:$0xff]   ;;  %v25616_v59 = vld [vmem:[#allocation5 + $0x2278] sm:$0xff]  }
 0x46f   :  { %v23201_v2 = vpop.f32.mrb[107].mxu0  ;;  %v23220_v3 = vpop.f32.mrb[105].mxu1  ;;  %23501 = vmatprep.subr.bf16.mxu0 %v25579_v1  ;;  %v25617_v60 = vld [vmem:[#allocation5 + $0x2238] sm:$0xff]   ;;  %v70_v62 = vld [vmem:[#allocation2 + $0x88] sm:$0xff] }
 0x470   :  { %v17929_v5 = vadd.f32 %v23199_v61, %v26687_v16  ;;  %v23221_v6 = vadd.f32 %v23220_v3, %v23219_v63  ;;  %v23222_v8 = vpop.f32.mrb[106].mxu1  ;;  %23522 = vmatpush3.bf16.msra.mxu1 %v25578_v0  ;;  %v4458_v16 = vrot.slane %v26692_v29, %v26434_v34  ;;  %v25599_v29 = vld [vmem:[#allocation5 + $0x2290] sm:$0xff]   ;;  %v25618_v61 = vld [vmem:[#allocation5 + $0x22f8] sm:$0xff]   ;;  %v4484_v63 = vrot.slane %v70_v62, %v26434_v34  ;;  %v25620_v2 = vld [vmem:[#allocation5 + $0x2340] sm:$0xff]  }
 0x471   :  { %v23223_v10 = vpop.f32.mrb[107].mxu1  ;;  %23523 = vmatprep.subr.bf16.mxu1 %v25581_v7  ;;  %v25619_v0 = vld [vmem:[#allocation5 + $0x22b8] sm:$0xff]   ;;  %v4477_v1 = vcombine.high %v70_v62, %v70_v62  ;;  %v25621_v8 = vld [vmem:[#allocation5 + $0x2300] sm:$0xff]   ;;  %v25657_v62 = vld [vmem:[#allocation5 + $0x2448] sm:$0xff]  }
 0x472   :  { %v26699_v11 = vadd.f32 %v23221_v6, %v17929_v5  ;;  %23502 = vmatpush3.bf16.msra.mxu0 %v25580_v4  ;;  %v4474_v21 = vcombine.high %v4458_v16, %v4458_v16  ;;  %v4492_v3 = vcombine.high %v4484_v63, %v4484_v63  ;;  %v4500_v4 = vrot.slane %v4484_v63, %v26434_v34  ;;  %v25622_v6 = vld [vmem:[#allocation5 + $0x23c0] sm:$0xff]   ;;  %v25658_v63 = vld [vmem:[#allocation5 + $0x2408] sm:$0xff]  }
 0x473   :  { %23503 = vmatprep.subr.bf16.mxu0 %v25583_v12  ;;  %v26709_v5 = vrot.slane %v4477_v1, %v26434_v34  ;;  %v25660_v1 = vld [vmem:[#allocation5 + $0x2488] sm:$0xff]  }
 0x474   :  { %23524 = vmatpush3.bf16.msra.mxu1 %v25582_v9  ;;  %v4514_v7 = vrot.slane %v4492_v3, %v26434_v34  ;;  %v4522_v10 = vcombine.high %v4500_v4, %v4500_v4  ;;  %v25662_v3 = vld [vmem:[#allocation5 + $0x2410] sm:$0xff]  }
 0x475   :  { %23525 = vmatprep.subr.bf16.mxu1 %v25585_v14  ;;  %v4493_v9 = vcombine.high %v26709_v5, %v26709_v5 }
 0x476   :  { %23504 = vmatpush3.bf16.msra.mxu0 %v25584_v13  ;;  %v4524_v12 = vcombine.high %v4514_v7, %v4514_v7  ;;  %v25623_v13 = vld [vmem:[#allocation5 + $0x2380] sm:$0xff]  }
 0x477   :  { %23533 = vmatprep.subr.bf16.mxu0 %v25588_v17  ;;  %v4521_v14 = vrot.slane %v4493_v9, %v26434_v34  ;;  %v25668_v9 = vld [vmem:[#allocation5 + $0x2498] sm:$0xff]  }
 0x478   :  { %23526 = vmatpush3.bf16.msra.mxu1 %v25587_v15  ;;  %v25626_v15 = vld [vmem:[#allocation5 + $0x23c8] sm:$0xff]  }
 0x479   :  { %18487 = vmatmul.mubr.bf16.vlgmr.msra.gmra.mrb[132].mxu0 %v4458_v16  ;;  %23555 = vmatprep.subr.bf16.mxu1 %v25590_v19  ;;  %v25625_v16 = vld [vmem:[#allocation5 + $0x2308] sm:$0xff]   ;;  %v4525_v17 = vcombine.high %v4521_v14, %v4521_v14 }
 0x47a   :  { %23534 = vmatpush3.bf16.msra.mxu0 %v25589_v18  ;;  %18566 = vmatprep.mubr.bf16.mxu0 %v4514_v7  ;;  %v25628_v18 = vld [vmem:[#allocation5 + $0x2350] sm:$0xff]   ;;  %v25627_v19 = vld [vmem:[#allocation5 + $0x2388] sm:$0xff]   ;;  %v25666_v7 = vld [vmem:[#allocation5 + $0x2418] sm:$0xff]  }
 0x47b   :  { %18527 = vmatmul.mubr.bf16.vlgmr.msra.gmra.mrb[132].mxu1 %v4474_v21  ;;  %23535 = vmatprep.subr.bf16.mxu0 %v25592_v22  ;;  %v25629_v21 = vld [vmem:[#allocation5 + $0x2310] sm:$0xff]   ;;  %v25632_v22 = vld [vmem:[#allocation5 + $0x2358] sm:$0xff]  }
 0x47c   :  { %23556 = vmatpush3.bf16.msra.mxu1 %v25591_v20  ;;  %18606 = vmatprep.mubr.bf16.mxu1 %v4524_v12  ;;  %v25630_v20 = vld [vmem:[#allocation5 + $0x23d0] sm:$0xff]   ;;  %v25671_v12 = vld [vmem:[#allocation5 + $0x24e0] sm:$0xff]  }
 0x47d   :  { %23557 = vmatprep.subr.bf16.mxu1 %v25594_v24  ;;  %v25634_v24 = vld [vmem:[#allocation5 + $0x23d8] sm:$0xff]  }
 0x47e   :  { %23536 = vmatpush3.bf16.msra.mxu0 %v25593_v23  ;;  %v25631_v23 = vld [vmem:[#allocation5 + $0x2390] sm:$0xff]  }
 0x47f   :  { %23537 = vmatprep.subr.bf16.mxu0 %v25596_v26  ;;  %v25636_v26 = vld [vmem:[#allocation5 + $0x2360] sm:$0xff]  }
 0x480   :  { %23558 = vmatpush3.bf16.msra.mxu1 %v25595_v25  ;;  %v25633_v25 = vld [vmem:[#allocation5 + $0x2318] sm:$0xff]  }
 0x481   :  { %23559 = vmatprep.subr.bf16.mxu1 %v25598_v28  ;;  %v25638_v28 = vld [vmem:[#allocation5 + $0x23e0] sm:$0xff]  }
 0x482   :  { %23538 = vmatpush3.bf16.msra.mxu0 %v25597_v27  ;;  %v25635_v27 = vld [vmem:[#allocation5 + $0x2398] sm:$0xff]  }
 0x483   :  { %23539 = vmatprep.subr.bf16.mxu0 %v25600_v30  ;;  %v25640_v30 = vld [vmem:[#allocation5 + $0x2368] sm:$0xff]  }
 0x484   :  { %23560 = vmatpush3.bf16.msra.mxu1 %v25599_v29  ;;  %v25637_v29 = vld [vmem:[#allocation5 + $0x2320] sm:$0xff]  }
 0x485   :  { %23561 = vmatprep.subr.bf16.mxu1 %v25602_v32 }
 0x486   :  { %23540 = vmatpush3.bf16.msra.mxu0 %v25601_v31  ;;  %v25639_v31 = vld [vmem:[#allocation5 + $0x23a0] sm:$0xff]  }
 0x487   :  { %23541 = vmatprep.subr.bf16.mxu0 %v25604_v35 }
 0x488   :  { %23562 = vmatpush3.bf16.msra.mxu1 %v25603_v33  ;;  %v25642_v33 = vld [vmem:[#allocation5 + $0x23e8] sm:$0xff]  }
 0x489   :  { %23563 = vmatprep.subr.bf16.mxu1 %v25606_v37 }
 0x48a   :  { %23542 = vmatpush3.bf16.msra.mxu0 %v25605_v36  ;;  %v25641_v36 = vld [vmem:[#allocation5 + $0x2328] sm:$0xff]  }
 0x48b   :  { %23543 = vmatprep.subr.bf16.mxu0 %v25608_v39 }
 0x48c   :  { %v23241_v41 = vpop.f32.mrb[108].mxu0  ;;  %23564 = vmatpush3.bf16.msra.mxu1 %v25607_v38 }
 0x48d   :  { %v23242_v43 = vpop.f32.mrb[109].mxu0  ;;  %23565 = vmatprep.subr.bf16.mxu1 %v25610_v42 }
 0x48e   :  { %v23243_v45 = vadd.f32 %v23242_v43, %v23241_v41  ;;  %v23244_v46 = vpop.f32.mrb[110].mxu0  ;;  %v23263_v47 = vpop.f32.mrb[108].mxu1  ;;  %23544 = vmatpush3.bf16.msra.mxu0 %v25609_v40  ;;  %v25643_v40 = vld [vmem:[#allocation5 + $0x23a8] sm:$0xff]   ;;  %v25644_v41 = vld [vmem:[#allocation5 + $0x2370] sm:$0xff]  }
 0x48f   :  { %v23245_v48 = vpop.f32.mrb[111].mxu0  ;;  %v23264_v49 = vpop.f32.mrb[109].mxu1  ;;  %23545 = vmatprep.subr.bf16.mxu0 %v25612_v50 }
 0x490   :  { %v18009_v52 = vadd.f32 %v23243_v45, %v26699_v11  ;;  %v23265_v53 = vadd.f32 %v23264_v49, %v23263_v47  ;;  %v23266_v55 = vpop.f32.mrb[110].mxu1  ;;  %23566 = vmatpush3.bf16.msra.mxu1 %v25611_v44  ;;  %v25624_v11 = vld [vmem:[#allocation5 + $0x2348] sm:$0xff]   ;;  %v25645_v44 = vld [vmem:[#allocation5 + $0x2330] sm:$0xff]  }
 0x491   :  { %v23267_v58 = vpop.f32.mrb[111].mxu1  ;;  %23567 = vmatprep.subr.bf16.mxu1 %v25614_v54  ;;  %v25646_v47 = vld [vmem:[#allocation5 + $0x23f0] sm:$0xff]   ;;  %v25650_v54 = vld [vmem:[#allocation5 + $0x23f8] sm:$0xff]  }
 0x492   :  { %v26704_v56 = vadd.f32 %v23265_v53, %v18009_v52  ;;  %23546 = vmatpush3.bf16.msra.mxu0 %v25613_v51  ;;  %v25647_v49 = vld [vmem:[#allocation5 + $0x23b0] sm:$0xff]   ;;  %v25648_v52 = vld [vmem:[#allocation5 + $0x2378] sm:$0xff]   ;;  %v25654_v58 = vld [vmem:[#allocation5 + $0x2400] sm:$0xff]  }
 0x493   :  { %23547 = vmatprep.subr.bf16.mxu0 %v25616_v59  ;;  %v25649_v53 = vld [vmem:[#allocation5 + $0x2338] sm:$0xff]   ;;  %v25655_v59 = vld [vmem:[#allocation5 + $0x24c0] sm:$0xff]  }
 0x494   :  { %23568 = vmatpush3.bf16.msra.mxu1 %v25615_v57  ;;  %v25652_v55 = vld [vmem:[#allocation5 + $0x23b8] sm:$0xff]   ;;  %v25653_v57 = vld [vmem:[#allocation5 + $0x2440] sm:$0xff]  }
 0x495   :  { %23569 = vmatprep.subr.bf16.mxu1 %v25618_v61 }
 0x496   :  { %23548 = vmatpush3.bf16.msra.mxu0 %v25617_v60  ;;  %v25656_v60 = vld [vmem:[#allocation5 + $0x2480] sm:$0xff]  }
 0x497   :  { %23577 = vmatprep.subr.bf16.mxu0 %v25620_v2  ;;  %v25661_v2 = vld [vmem:[#allocation5 + $0x2450] sm:$0xff]  }
 0x498   :  { %23570 = vmatpush3.bf16.msra.mxu1 %v25619_v0  ;;  %v25659_v0 = vld [vmem:[#allocation5 + $0x24c8] sm:$0xff]  }
 0x499   :  { %23599 = vmatprep.subr.bf16.mxu1 %v25622_v6  ;;  %18567 = vmatmul.mubr.bf16.vlgmr.msra.gmra.mrb[136].mxu0 %v4500_v4  ;;  %v25663_v4 = vld [vmem:[#allocation5 + $0x24d0] sm:$0xff]   ;;  %v25665_v6 = vld [vmem:[#allocation5 + $0x2458] sm:$0xff]  }
 0x49a   :  { %23578 = vmatpush3.bf16.msra.mxu0 %v25621_v8  ;;  %18646 = vmatprep.mubr.bf16.mxu0 %v4521_v14  ;;  %v25667_v8 = vld [vmem:[#allocation5 + $0x24d8] sm:$0xff]   ;;  %v25673_v14 = vld [vmem:[#allocation5 + $0x2468] sm:$0xff]  }
 0x49b   :  { %18607 = vmatmul.mubr.bf16.vlgmr.msra.gmra.mrb[136].mxu1 %v4522_v10  ;;  %23579 = vmatprep.subr.bf16.mxu0 %v25624_v11  ;;  %v25669_v10 = vld [vmem:[#allocation5 + $0x2460] sm:$0xff]  }
 0x49c   :  { %23600 = vmatpush3.bf16.msra.mxu1 %v25623_v13  ;;  %18686 = vmatprep.mubr.bf16.mxu1 %v4525_v17  ;;  %v25670_v11 = vld [vmem:[#allocation5 + $0x2420] sm:$0xff]   ;;  %v25675_v17 = vld [vmem:[#allocation5 + $0x24e8] sm:$0xff]  }
 0x49d   :  { %23601 = vmatprep.subr.bf16.mxu1 %v25626_v15  ;;  %v25672_v13 = vld [vmem:[#allocation5 + $0x24a0] sm:$0xff]   ;;  %v25674_v15 = vld [vmem:[#allocation5 + $0x2428] sm:$0xff]  }
 0x49e   :  { %23580 = vmatpush3.bf16.msra.mxu0 %v25625_v16 }
 0x49f   :  { %23581 = vmatprep.subr.bf16.mxu0 %v25628_v18 }
 0x4a0   :  { %23602 = vmatpush3.bf16.msra.mxu1 %v25627_v19  ;;  %v25676_v19 = vld [vmem:[#allocation5 + $0x24a8] sm:$0xff]  }
 0x4a1   :  { %23603 = vmatprep.subr.bf16.mxu1 %v25630_v20 }
 0x4a2   :  { %23582 = vmatpush3.bf16.msra.mxu0 %v25629_v21 }
 0x4a3   :  { %23583 = vmatprep.subr.bf16.mxu0 %v25632_v22 }
 0x4a4   :  { %23604 = vmatpush3.bf16.msra.mxu1 %v25631_v23 }
 0x4a5   :  { %23605 = vmatprep.subr.bf16.mxu1 %v25634_v24 }
 0x4a6   :  { %23584 = vmatpush3.bf16.msra.mxu0 %v25633_v25  ;;  %v25677_v25 = vld [vmem:[#allocation5 + $0x2470] sm:$0xff]  }
 0x4a7   :  { %23585 = vmatprep.subr.bf16.mxu0 %v25636_v26  ;;  %v25678_v26 = vld [vmem:[#allocation5 + $0x2430] sm:$0xff]  }
 0x4a8   :  { %23606 = vmatpush3.bf16.msra.mxu1 %v25635_v27 }
 0x4a9   :  { %23607 = vmatprep.subr.bf16.mxu1 %v25638_v28 }
 0x4aa   :  { %23586 = vmatpush3.bf16.msra.mxu0 %v25637_v29  ;;  %v25679_v29 = vld [vmem:[#allocation5 + $0x24f0] sm:$0xff]  }
 0x4ab   :  { %23587 = vmatprep.subr.bf16.mxu0 %v25640_v30 }
 0x4ac   :  { %v23285_v32 = vpop.f32.mrb[112].mxu0  ;;  %23608 = vmatpush3.bf16.msra.mxu1 %v25639_v31 }
 0x4ad   :  { %v23286_v35 = vpop.f32.mrb[113].mxu0  ;;  %23609 = vmatprep.subr.bf16.mxu1 %v25642_v33 }
 0x4ae   :  { %v23287_v37 = vadd.f32 %v23286_v35, %v23285_v32  ;;  %v23288_v38 = vpop.f32.mrb[114].mxu0  ;;  %v23307_v39 = vpop.f32.mrb[112].mxu1  ;;  %23588 = vmatpush3.bf16.msra.mxu0 %v25641_v36  ;;  %v25680_v32 = vld [vmem:[#allocation5 + $0x24b0] sm:$0xff]   ;;  %v25681_v35 = vld [vmem:[#allocation5 + $0x2478] sm:$0xff]  }
 0x4af   :  { %v23289_v42 = vpop.f32.mrb[115].mxu0  ;;  %v23308_v43 = vpop.f32.mrb[113].mxu1  ;;  %23589 = vmatprep.subr.bf16.mxu0 %v25644_v41  ;;  %v25682_v36 = vld [vmem:[#allocation5 + $0x2438] sm:$0xff]  }
 0x4b0   :  { %v18089_v45 = vadd.f32 %v23287_v37, %v26704_v56  ;;  %v23309_v46 = vadd.f32 %v23308_v43, %v23307_v39  ;;  %v23310_v48 = vpop.f32.mrb[114].mxu1  ;;  %23610 = vmatpush3.bf16.msra.mxu1 %v25643_v40  ;;  %v4507_v56 = vrot.slane %v26709_v5, %v26434_v34  ;;  %v25664_v5 = vld [vmem:[#allocation5 + $0x2490] sm:$0xff]   ;;  %v25683_v37 = vld [vmem:[#allocation5 + $0x24f8] sm:$0xff]   ;;  %v25685_v42 = vld [vmem:[#allocation5 + $0x2540] sm:$0xff]  }
 0x4b1   :  { %v23311_v50 = vpop.f32.mrb[115].mxu1  ;;  %23611 = vmatprep.subr.bf16.mxu1 %v25646_v47  ;;  %v71_v38 = vld [vmem:[#allocation2 + $0x90] sm:$0xff]  ;;  %v25686_v48 = vld [vmem:[#allocation5 + $0x2500] sm:$0xff]  }
 0x4b2   :  { %v26716_v51 = vadd.f32 %v23309_v46, %v18089_v45  ;;  %23590 = vmatpush3.bf16.msra.mxu0 %v25645_v44  ;;  %v4523_v61 = vcombine.high %v4507_v56, %v4507_v56  ;;  %v4533_v39 = vrot.slane %v71_v38, %v26434_v34  ;;  %v25684_v40 = vld [vmem:[#allocation5 + $0x24b8] sm:$0xff]   ;;  %v4526_v41 = vcombine.high %v71_v38, %v71_v38  ;;  %v25687_v46 = vld [vmem:[#allocation5 + $0x25c0] sm:$0xff]   ;;  %v25722_v38 = vld [vmem:[#allocation5 + $0x2648] sm:$0xff]  }
 0x4b3   :  { %23591 = vmatprep.subr.bf16.mxu0 %v25648_v52 }
 0x4b4   :  { %23612 = vmatpush3.bf16.msra.mxu1 %v25647_v49  ;;  %v4541_v43 = vcombine.high %v4533_v39, %v4533_v39  ;;  %v4549_v44 = vrot.slane %v4533_v39, %v26434_v34  ;;  %v26726_v45 = vrot.slane %v4526_v41, %v26434_v34  ;;  %v25723_v39 = vld [vmem:[#allocation5 + $0x2608] sm:$0xff]  }
 0x4b5   :  { %23613 = vmatprep.subr.bf16.mxu1 %v25650_v54  ;;  %v25725_v41 = vld [vmem:[#allocation5 + $0x2688] sm:$0xff]  }
 0x4b6   :  { %23592 = vmatpush3.bf16.msra.mxu0 %v25649_v53  ;;  %v4563_v47 = vrot.slane %v4541_v43, %v26434_v34  ;;  %v4542_v49 = vcombine.high %v26726_v45, %v26726_v45  ;;  %v4571_v50 = vcombine.high %v4549_v44, %v4549_v44  ;;  %v25688_v53 = vld [vmem:[#allocation5 + $0x2580] sm:$0xff]   ;;  %v25727_v43 = vld [vmem:[#allocation5 + $0x2610] sm:$0xff]  }
 0x4b7   :  { %23621 = vmatprep.subr.bf16.mxu0 %v25653_v57 }
 0x4b8   :  { %23614 = vmatpush3.bf16.msra.mxu1 %v25652_v55  ;;  %v4573_v52 = vcombine.high %v4563_v47, %v4563_v47  ;;  %v4570_v54 = vrot.slane %v4542_v49, %v26434_v34  ;;  %v25691_v55 = vld [vmem:[#allocation5 + $0x25c8] sm:$0xff]   ;;  %v25733_v49 = vld [vmem:[#allocation5 + $0x2698] sm:$0xff]  }
 0x4b9   :  { %18647 = vmatmul.mubr.bf16.vlgmr.msra.gmra.mrb[140].mxu0 %v4507_v56  ;;  %23643 = vmatprep.subr.bf16.mxu1 %v25655_v59  ;;  %v25690_v56 = vld [vmem:[#allocation5 + $0x2508] sm:$0xff]  }
 0x4ba   :  { %23622 = vmatpush3.bf16.msra.mxu0 %v25654_v58  ;;  %18726 = vmatprep.mubr.bf16.mxu0 %v4563_v47  ;;  %v4574_v57 = vcombine.high %v4570_v54, %v4570_v54  ;;  %v25693_v58 = vld [vmem:[#allocation5 + $0x2550] sm:$0xff]   ;;  %v25692_v59 = vld [vmem:[#allocation5 + $0x2588] sm:$0xff]   ;;  %v25731_v47 = vld [vmem:[#allocation5 + $0x2618] sm:$0xff]  }
 0x4bb   :  { %18687 = vmatmul.mubr.bf16.vlgmr.msra.gmra.mrb[140].mxu1 %v4523_v61  ;;  %23623 = vmatprep.subr.bf16.mxu0 %v25657_v62  ;;  %v25694_v61 = vld [vmem:[#allocation5 + $0x2510] sm:$0xff]   ;;  %v25697_v62 = vld [vmem:[#allocation5 + $0x2558] sm:$0xff]  }
 0x4bc   :  { %23644 = vmatpush3.bf16.msra.mxu1 %v25656_v60  ;;  %18766 = vmatprep.mubr.bf16.mxu1 %v4573_v52  ;;  %v25695_v60 = vld [vmem:[#allocation5 + $0x25d0] sm:$0xff]   ;;  %v25736_v52 = vld [vmem:[#allocation5 + $0x26e0] sm:$0xff]  }
 0x4bd   :  { %23645 = vmatprep.subr.bf16.mxu1 %v25659_v0  ;;  %v25699_v0 = vld [vmem:[#allocation5 + $0x25d8] sm:$0xff]  }
 0x4be   :  { %23624 = vmatpush3.bf16.msra.mxu0 %v25658_v63  ;;  %v25696_v63 = vld [vmem:[#allocation5 + $0x2590] sm:$0xff]  }
 0x4bf   :  { %23625 = vmatprep.subr.bf16.mxu0 %v25661_v2  ;;  %v25701_v2 = vld [vmem:[#allocation5 + $0x2560] sm:$0xff]  }
 0x4c0   :  { %23646 = vmatpush3.bf16.msra.mxu1 %v25660_v1  ;;  %v25698_v1 = vld [vmem:[#allocation5 + $0x2518] sm:$0xff]  }
 0x4c1   :  { %23647 = vmatprep.subr.bf16.mxu1 %v25663_v4  ;;  %v25703_v4 = vld [vmem:[#allocation5 + $0x25e0] sm:$0xff]  }
 0x4c2   :  { %23626 = vmatpush3.bf16.msra.mxu0 %v25662_v3  ;;  %v25700_v3 = vld [vmem:[#allocation5 + $0x2598] sm:$0xff]  }
 0x4c3   :  { %23627 = vmatprep.subr.bf16.mxu0 %v25665_v6  ;;  %v25705_v6 = vld [vmem:[#allocation5 + $0x2568] sm:$0xff]  }
 0x4c4   :  { %23648 = vmatpush3.bf16.msra.mxu1 %v25664_v5  ;;  %v25702_v5 = vld [vmem:[#allocation5 + $0x2520] sm:$0xff]  }
 0x4c5   :  { %23649 = vmatprep.subr.bf16.mxu1 %v25667_v8 }
 0x4c6   :  { %23628 = vmatpush3.bf16.msra.mxu0 %v25666_v7  ;;  %v25704_v7 = vld [vmem:[#allocation5 + $0x25a0] sm:$0xff]  }
 0x4c7   :  { %23629 = vmatprep.subr.bf16.mxu0 %v25669_v10 }
 0x4c8   :  { %23650 = vmatpush3.bf16.msra.mxu1 %v25668_v9  ;;  %v25707_v9 = vld [vmem:[#allocation5 + $0x25e8] sm:$0xff]  }
 0x4c9   :  { %23651 = vmatprep.subr.bf16.mxu1 %v25671_v12 }
 0x4ca   :  { %23630 = vmatpush3.bf16.msra.mxu0 %v25670_v11  ;;  %v25706_v11 = vld [vmem:[#allocation5 + $0x2528] sm:$0xff]  }
 0x4cb   :  { %23631 = vmatprep.subr.bf16.mxu0 %v25673_v14 }
 0x4cc   :  { %v23329_v16 = vpop.f32.mrb[116].mxu0  ;;  %23652 = vmatpush3.bf16.msra.mxu1 %v25672_v13 }
 0x4cd   :  { %v23330_v18 = vpop.f32.mrb[117].mxu0  ;;  %23653 = vmatprep.subr.bf16.mxu1 %v25675_v17 }
 0x4ce   :  { %v23331_v20 = vadd.f32 %v23330_v18, %v23329_v16  ;;  %v23332_v21 = vpop.f32.mrb[118].mxu0  ;;  %v23351_v22 = vpop.f32.mrb[116].mxu1  ;;  %23632 = vmatpush3.bf16.msra.mxu0 %v25674_v15  ;;  %v25708_v15 = vld [vmem:[#allocation5 + $0x25a8] sm:$0xff]   ;;  %v25709_v16 = vld [vmem:[#allocation5 + $0x2570] sm:$0xff]  }
 0x4cf   :  { %v23333_v23 = vpop.f32.mrb[119].mxu0  ;;  %v23352_v24 = vpop.f32.mrb[117].mxu1  ;;  %23633 = vmatprep.subr.bf16.mxu0 %v25677_v25 }
 0x4d0   :  { %v18169_v27 = vadd.f32 %v23331_v20, %v26716_v51  ;;  %v23353_v28 = vadd.f32 %v23352_v24, %v23351_v22  ;;  %v23354_v30 = vpop.f32.mrb[118].mxu1  ;;  %23654 = vmatpush3.bf16.msra.mxu1 %v25676_v19  ;;  %v25689_v51 = vld [vmem:[#allocation5 + $0x2548] sm:$0xff]   ;;  %v25710_v19 = vld [vmem:[#allocation5 + $0x2530] sm:$0xff]  }
 0x4d1   :  { %v23355_v33 = vpop.f32.mrb[119].mxu1  ;;  %23655 = vmatprep.subr.bf16.mxu1 %v25679_v29  ;;  %v25711_v22 = vld [vmem:[#allocation5 + $0x25f0] sm:$0xff]   ;;  %v25715_v29 = vld [vmem:[#allocation5 + $0x25f8] sm:$0xff]  }
 0x4d2   :  { %v26721_v31 = vadd.f32 %v23353_v28, %v18169_v27  ;;  %23634 = vmatpush3.bf16.msra.mxu0 %v25678_v26  ;;  %v25712_v24 = vld [vmem:[#allocation5 + $0x25b0] sm:$0xff]   ;;  %v25713_v27 = vld [vmem:[#allocation5 + $0x2578] sm:$0xff]   ;;  %v25719_v33 = vld [vmem:[#allocation5 + $0x2600] sm:$0xff]  }
 0x4d3   :  { %23635 = vmatprep.subr.bf16.mxu0 %v25681_v35  ;;  %v25714_v28 = vld [vmem:[#allocation5 + $0x2538] sm:$0xff]   ;;  %v25720_v35 = vld [vmem:[#allocation5 + $0x26c0] sm:$0xff]  }
 0x4d4   :  { %23656 = vmatpush3.bf16.msra.mxu1 %v25680_v32  ;;  %v25717_v30 = vld [vmem:[#allocation5 + $0x25b8] sm:$0xff]   ;;  %v25718_v32 = vld [vmem:[#allocation5 + $0x2640] sm:$0xff]  }
 0x4d5   :  { %23657 = vmatprep.subr.bf16.mxu1 %v25683_v37 }
 0x4d6   :  { %23636 = vmatpush3.bf16.msra.mxu0 %v25682_v36  ;;  %v25721_v36 = vld [vmem:[#allocation5 + $0x2680] sm:$0xff]  }
 0x4d7   :  { %23665 = vmatprep.subr.bf16.mxu0 %v25685_v42  ;;  %v25726_v42 = vld [vmem:[#allocation5 + $0x2650] sm:$0xff]  }
 0x4d8   :  { %23658 = vmatpush3.bf16.msra.mxu1 %v25684_v40  ;;  %v25724_v40 = vld [vmem:[#allocation5 + $0x26c8] sm:$0xff]  }
 0x4d9   :  { %23687 = vmatprep.subr.bf16.mxu1 %v25687_v46  ;;  %18727 = vmatmul.mubr.bf16.vlgmr.msra.gmra.mrb[144].mxu0 %v4549_v44  ;;  %v25728_v44 = vld [vmem:[#allocation5 + $0x26d0] sm:$0xff]   ;;  %v25730_v46 = vld [vmem:[#allocation5 + $0x2658] sm:$0xff]  }
 0x4da   :  { %23666 = vmatpush3.bf16.msra.mxu0 %v25686_v48  ;;  %18806 = vmatprep.mubr.bf16.mxu0 %v4570_v54  ;;  %v25732_v48 = vld [vmem:[#allocation5 + $0x26d8] sm:$0xff]   ;;  %v25738_v54 = vld [vmem:[#allocation5 + $0x2668] sm:$0xff]  }
 0x4db   :  { %18767 = vmatmul.mubr.bf16.vlgmr.msra.gmra.mrb[144].mxu1 %v4571_v50  ;;  %23667 = vmatprep.subr.bf16.mxu0 %v25689_v51  ;;  %v25734_v50 = vld [vmem:[#allocation5 + $0x2660] sm:$0xff]  }
 0x4dc   :  { %23688 = vmatpush3.bf16.msra.mxu1 %v25688_v53  ;;  %18846 = vmatprep.mubr.bf16.mxu1 %v4574_v57  ;;  %v25735_v51 = vld [vmem:[#allocation5 + $0x2620] sm:$0xff]   ;;  %v25740_v57 = vld [vmem:[#allocation5 + $0x26e8] sm:$0xff]  }
 0x4dd   :  { %23689 = vmatprep.subr.bf16.mxu1 %v25691_v55  ;;  %v25737_v53 = vld [vmem:[#allocation5 + $0x26a0] sm:$0xff]   ;;  %v25739_v55 = vld [vmem:[#allocation5 + $0x2628] sm:$0xff]  }
 0x4de   :  { %23668 = vmatpush3.bf16.msra.mxu0 %v25690_v56 }
 0x4df   :  { %23669 = vmatprep.subr.bf16.mxu0 %v25693_v58 }
 0x4e0   :  { %23690 = vmatpush3.bf16.msra.mxu1 %v25692_v59  ;;  %v25741_v59 = vld [vmem:[#allocation5 + $0x26a8] sm:$0xff]  }
 0x4e1   :  { %23691 = vmatprep.subr.bf16.mxu1 %v25695_v60 }
 0x4e2   :  { %23670 = vmatpush3.bf16.msra.mxu0 %v25694_v61 }
 0x4e3   :  { %23671 = vmatprep.subr.bf16.mxu0 %v25697_v62 }
 0x4e4   :  { %23692 = vmatpush3.bf16.msra.mxu1 %v25696_v63 }
 0x4e5   :  { %23693 = vmatprep.subr.bf16.mxu1 %v25699_v0 }
 0x4e6   :  { %23672 = vmatpush3.bf16.msra.mxu0 %v25698_v1  ;;  %v25742_v1 = vld [vmem:[#allocation5 + $0x2670] sm:$0xff]  }
 0x4e7   :  { %23673 = vmatprep.subr.bf16.mxu0 %v25701_v2  ;;  %v25743_v2 = vld [vmem:[#allocation5 + $0x2630] sm:$0xff]  }
 0x4e8   :  { %23694 = vmatpush3.bf16.msra.mxu1 %v25700_v3 }
 0x4e9   :  { %23695 = vmatprep.subr.bf16.mxu1 %v25703_v4 }
 0x4ea   :  { %23674 = vmatpush3.bf16.msra.mxu0 %v25702_v5  ;;  %v25744_v5 = vld [vmem:[#allocation5 + $0x26f0] sm:$0xff]  }
 0x4eb   :  { %23675 = vmatprep.subr.bf16.mxu0 %v25705_v6 }
 0x4ec   :  { %v23373_v8 = vpop.f32.mrb[120].mxu0  ;;  %23696 = vmatpush3.bf16.msra.mxu1 %v25704_v7 }
 0x4ed   :  { %v23374_v10 = vpop.f32.mrb[121].mxu0  ;;  %23697 = vmatprep.subr.bf16.mxu1 %v25707_v9 }
 0x4ee   :  { %v23375_v12 = vadd.f32 %v23374_v10, %v23373_v8  ;;  %v23376_v13 = vpop.f32.mrb[122].mxu0  ;;  %v23395_v14 = vpop.f32.mrb[120].mxu1  ;;  %23676 = vmatpush3.bf16.msra.mxu0 %v25706_v11  ;;  %v25745_v8 = vld [vmem:[#allocation5 + $0x26b0] sm:$0xff]   ;;  %v25746_v10 = vld [vmem:[#allocation5 + $0x2678] sm:$0xff]  }
 0x4ef   :  { %v23377_v17 = vpop.f32.mrb[123].mxu0  ;;  %v23396_v18 = vpop.f32.mrb[121].mxu1  ;;  %23677 = vmatprep.subr.bf16.mxu0 %v25709_v16  ;;  %v25747_v11 = vld [vmem:[#allocation5 + $0x2638] sm:$0xff]  }
 0x4f0   :  { %v18249_v20 = vadd.f32 %v23375_v12, %v26721_v31  ;;  %v23397_v21 = vadd.f32 %v23396_v18, %v23395_v14  ;;  %v23398_v23 = vpop.f32.mrb[122].mxu1  ;;  %23698 = vmatpush3.bf16.msra.mxu1 %v25708_v15  ;;  %v4556_v31 = vrot.slane %v26726_v45, %v26434_v34  ;;  %v25729_v45 = vld [vmem:[#allocation5 + $0x2690] sm:$0xff]   ;;  %v25748_v12 = vld [vmem:[#allocation5 + $0x26f8] sm:$0xff]   ;;  %v25750_v17 = vld [vmem:[#allocation5 + $0x2740] sm:$0xff]  }
 0x4f1   :  { %v23399_v25 = vpop.f32.mrb[123].mxu1  ;;  %23699 = vmatprep.subr.bf16.mxu1 %v25711_v22  ;;  %v72_v13 = vld [vmem:[#allocation2 + $0x98] sm:$0xff] }
 0x4f2   :  { %v26733_v26 = vadd.f32 %v23397_v21, %v18249_v20  ;;  %23678 = vmatpush3.bf16.msra.mxu0 %v25710_v19  ;;  %v4572_v37 = vcombine.high %v4556_v31, %v4556_v31  ;;  %v4582_v14 = vrot.slane %v72_v13, %v26434_v34  ;;  %v25749_v15 = vld [vmem:[#allocation5 + $0x26b8] sm:$0xff]   ;;  %v4575_v16 = vcombine.high %v72_v13, %v72_v13  ;;  %v25752_v21 = vld [vmem:[#allocation5 + $0x27c0] sm:$0xff]   ;;  %v25787_v13 = vld [vmem:[#allocation5 + $0x2848] sm:$0xff]  }
 0x4f3   :  { %23679 = vmatprep.subr.bf16.mxu0 %v25713_v27  ;;  %v25751_v23 = vld [vmem:[#allocation5 + $0x2700] sm:$0xff]  }
 0x4f4   :  { %23700 = vmatpush3.bf16.msra.mxu1 %v25712_v24  ;;  %v4590_v18 = vcombine.high %v4582_v14, %v4582_v14  ;;  %v4598_v19 = vrot.slane %v4582_v14, %v26434_v34  ;;  %v26743_v20 = vrot.slane %v4575_v16, %v26434_v34  ;;  %v25788_v14 = vld [vmem:[#allocation5 + $0x2808] sm:$0xff]  }
 0x4f5   :  { %23701 = vmatprep.subr.bf16.mxu1 %v25715_v29  ;;  %v25790_v16 = vld [vmem:[#allocation5 + $0x2888] sm:$0xff]  }
 0x4f6   :  { %23680 = vmatpush3.bf16.msra.mxu0 %v25714_v28  ;;  %v4612_v22 = vrot.slane %v4590_v18, %v26434_v34  ;;  %v4591_v24 = vcombine.high %v26743_v20, %v26743_v20  ;;  %v4620_v25 = vcombine.high %v4598_v19, %v4598_v19  ;;  %v25753_v28 = vld [vmem:[#allocation5 + $0x2780] sm:$0xff]   ;;  %v25792_v18 = vld [vmem:[#allocation5 + $0x2810] sm:$0xff]  }
 0x4f7   :  { %23709 = vmatprep.subr.bf16.mxu0 %v25718_v32 }
 0x4f8   :  { %23702 = vmatpush3.bf16.msra.mxu1 %v25717_v30  ;;  %v4622_v27 = vcombine.high %v4612_v22, %v4612_v22  ;;  %v4619_v29 = vrot.slane %v4591_v24, %v26434_v34  ;;  %v25756_v30 = vld [vmem:[#allocation5 + $0x27c8] sm:$0xff]   ;;  %v25798_v24 = vld [vmem:[#allocation5 + $0x2898] sm:$0xff]  }
 0x4f9   :  { %18807 = vmatmul.mubr.bf16.vlgmr.msra.gmra.mrb[148].mxu0 %v4556_v31  ;;  %23731 = vmatprep.subr.bf16.mxu1 %v25720_v35  ;;  %v25755_v31 = vld [vmem:[#allocation5 + $0x2708] sm:$0xff]  }
 0x4fa   :  { %23710 = vmatpush3.bf16.msra.mxu0 %v25719_v33  ;;  %18886 = vmatprep.mubr.bf16.mxu0 %v4612_v22  ;;  %v4623_v32 = vcombine.high %v4619_v29, %v4619_v29  ;;  %v25758_v33 = vld [vmem:[#allocation5 + $0x2750] sm:$0xff]   ;;  %v25757_v35 = vld [vmem:[#allocation5 + $0x2788] sm:$0xff]   ;;  %v25796_v22 = vld [vmem:[#allocation5 + $0x2818] sm:$0xff]  }
 0x4fb   :  { %18847 = vmatmul.mubr.bf16.vlgmr.msra.gmra.mrb[148].mxu1 %v4572_v37  ;;  %23711 = vmatprep.subr.bf16.mxu0 %v25722_v38  ;;  %v25759_v37 = vld [vmem:[#allocation5 + $0x2710] sm:$0xff]   ;;  %v25762_v38 = vld [vmem:[#allocation5 + $0x2758] sm:$0xff]  }
 0x4fc   :  { %23732 = vmatpush3.bf16.msra.mxu1 %v25721_v36  ;;  %18926 = vmatprep.mubr.bf16.mxu1 %v4622_v27  ;;  %v25760_v36 = vld [vmem:[#allocation5 + $0x27d0] sm:$0xff]   ;;  %v25801_v27 = vld [vmem:[#allocation5 + $0x28e0] sm:$0xff]  }
 0x4fd   :  { %23733 = vmatprep.subr.bf16.mxu1 %v25724_v40  ;;  %v25764_v40 = vld [vmem:[#allocation5 + $0x27d8] sm:$0xff]  }
 0x4fe   :  { %23712 = vmatpush3.bf16.msra.mxu0 %v25723_v39  ;;  %v25761_v39 = vld [vmem:[#allocation5 + $0x2790] sm:$0xff]  }
 0x4ff   :  { %23713 = vmatprep.subr.bf16.mxu0 %v25726_v42  ;;  %v25766_v42 = vld [vmem:[#allocation5 + $0x2760] sm:$0xff]  }
 0x500   :  { %23734 = vmatpush3.bf16.msra.mxu1 %v25725_v41  ;;  %v25763_v41 = vld [vmem:[#allocation5 + $0x2718] sm:$0xff]  }
 0x501   :  { %23735 = vmatprep.subr.bf16.mxu1 %v25728_v44  ;;  %v25768_v44 = vld [vmem:[#allocation5 + $0x27e0] sm:$0xff]  }
 0x502   :  { %23714 = vmatpush3.bf16.msra.mxu0 %v25727_v43  ;;  %v25765_v43 = vld [vmem:[#allocation5 + $0x2798] sm:$0xff]  }
 0x503   :  { %23715 = vmatprep.subr.bf16.mxu0 %v25730_v46  ;;  %v25770_v46 = vld [vmem:[#allocation5 + $0x2768] sm:$0xff]  }
 0x504   :  { %23736 = vmatpush3.bf16.msra.mxu1 %v25729_v45  ;;  %v25767_v45 = vld [vmem:[#allocation5 + $0x2720] sm:$0xff]  }
 0x505   :  { %23737 = vmatprep.subr.bf16.mxu1 %v25732_v48 }
 0x506   :  { %23716 = vmatpush3.bf16.msra.mxu0 %v25731_v47  ;;  %v25769_v47 = vld [vmem:[#allocation5 + $0x27a0] sm:$0xff]  }
 0x507   :  { %23717 = vmatprep.subr.bf16.mxu0 %v25734_v50 }
 0x508   :  { %23738 = vmatpush3.bf16.msra.mxu1 %v25733_v49  ;;  %v25772_v49 = vld [vmem:[#allocation5 + $0x27e8] sm:$0xff]  }
 0x509   :  { %23739 = vmatprep.subr.bf16.mxu1 %v25736_v52 }
 0x50a   :  { %23718 = vmatpush3.bf16.msra.mxu0 %v25735_v51  ;;  %v25771_v51 = vld [vmem:[#allocation5 + $0x2728] sm:$0xff]  }
 0x50b   :  { %23719 = vmatprep.subr.bf16.mxu0 %v25738_v54 }
 0x50c   :  { %v23417_v56 = vpop.f32.mrb[124].mxu0  ;;  %23740 = vmatpush3.bf16.msra.mxu1 %v25737_v53 }
 0x50d   :  { %v23418_v58 = vpop.f32.mrb[125].mxu0  ;;  %23741 = vmatprep.subr.bf16.mxu1 %v25740_v57 }
 0x50e   :  { %v23419_v60 = vadd.f32 %v23418_v58, %v23417_v56  ;;  %v23420_v61 = vpop.f32.mrb[126].mxu0  ;;  %v23439_v62 = vpop.f32.mrb[124].mxu1  ;;  %23720 = vmatpush3.bf16.msra.mxu0 %v25739_v55  ;;  %v25773_v55 = vld [vmem:[#allocation5 + $0x27a8] sm:$0xff]   ;;  %v25774_v56 = vld [vmem:[#allocation5 + $0x2770] sm:$0xff]  }
 0x50f   :  { %v23421_v63 = vpop.f32.mrb[127].mxu0  ;;  %v23440_v0 = vpop.f32.mrb[125].mxu1  ;;  %23721 = vmatprep.subr.bf16.mxu0 %v25742_v1 }
 0x510   :  { %v18329_v3 = vadd.f32 %v23419_v60, %v26733_v26  ;;  %v23441_v4 = vadd.f32 %v23440_v0, %v23439_v62  ;;  %v23442_v6 = vpop.f32.mrb[126].mxu1  ;;  %23742 = vmatpush3.bf16.msra.mxu1 %v25741_v59  ;;  %v25754_v26 = vld [vmem:[#allocation5 + $0x2748] sm:$0xff]   ;;  %v25775_v59 = vld [vmem:[#allocation5 + $0x2730] sm:$0xff]  }
 0x511   :  { %v23443_v9 = vpop.f32.mrb[127].mxu1  ;;  %23743 = vmatprep.subr.bf16.mxu1 %v25744_v5  ;;  %v25776_v62 = vld [vmem:[#allocation5 + $0x27f0] sm:$0xff]   ;;  %v25780_v5 = vld [vmem:[#allocation5 + $0x27f8] sm:$0xff]  }
 0x512   :  { %v26738_v7 = vadd.f32 %v23441_v4, %v18329_v3  ;;  %23722 = vmatpush3.bf16.msra.mxu0 %v25743_v2  ;;  %v25777_v0 = vld [vmem:[#allocation5 + $0x27b0] sm:$0xff]   ;;  %v25778_v3 = vld [vmem:[#allocation5 + $0x2778] sm:$0xff]   ;;  %v25784_v9 = vld [vmem:[#allocation5 + $0x2800] sm:$0xff]  }
 0x513   :  { %23723 = vmatprep.subr.bf16.mxu0 %v25746_v10  ;;  %v25779_v4 = vld [vmem:[#allocation5 + $0x2738] sm:$0xff]   ;;  %v25785_v10 = vld [vmem:[#allocation5 + $0x28c0] sm:$0xff]  }
 0x514   :  { %23744 = vmatpush3.bf16.msra.mxu1 %v25745_v8  ;;  %v25782_v6 = vld [vmem:[#allocation5 + $0x27b8] sm:$0xff]   ;;  %v25783_v8 = vld [vmem:[#allocation5 + $0x2840] sm:$0xff]  }
 0x515   :  { %23745 = vmatprep.subr.bf16.mxu1 %v25748_v12 }
 0x516   :  { %23724 = vmatpush3.bf16.msra.mxu0 %v25747_v11  ;;  %v25786_v11 = vld [vmem:[#allocation5 + $0x2880] sm:$0xff]  }
 0x517   :  { %23753 = vmatprep.subr.bf16.mxu0 %v25750_v17  ;;  %v25791_v17 = vld [vmem:[#allocation5 + $0x2850] sm:$0xff]  }
 0x518   :  { %23746 = vmatpush3.bf16.msra.mxu1 %v25749_v15  ;;  %v25789_v15 = vld [vmem:[#allocation5 + $0x28c8] sm:$0xff]  }
 0x519   :  { %23775 = vmatprep.subr.bf16.mxu1 %v25752_v21  ;;  %18887 = vmatmul.mubr.bf16.vlgmr.msra.gmra.mrb[152].mxu0 %v4598_v19  ;;  %v25793_v19 = vld [vmem:[#allocation5 + $0x28d0] sm:$0xff]   ;;  %v25795_v21 = vld [vmem:[#allocation5 + $0x2858] sm:$0xff]  }
 0x51a   :  { %23754 = vmatpush3.bf16.msra.mxu0 %v25751_v23  ;;  %18966 = vmatprep.mubr.bf16.mxu0 %v4619_v29  ;;  %v25797_v23 = vld [vmem:[#allocation5 + $0x28d8] sm:$0xff]   ;;  %v25803_v29 = vld [vmem:[#allocation5 + $0x2868] sm:$0xff]  }
 0x51b   :  { %18927 = vmatmul.mubr.bf16.vlgmr.msra.gmra.mrb[152].mxu1 %v4620_v25  ;;  %23755 = vmatprep.subr.bf16.mxu0 %v25754_v26  ;;  %v25799_v25 = vld [vmem:[#allocation5 + $0x2860] sm:$0xff]  }
 0x51c   :  { %23776 = vmatpush3.bf16.msra.mxu1 %v25753_v28  ;;  %19006 = vmatprep.mubr.bf16.mxu1 %v4623_v32  ;;  %v25800_v26 = vld [vmem:[#allocation5 + $0x2820] sm:$0xff]   ;;  %v25805_v32 = vld [vmem:[#allocation5 + $0x28e8] sm:$0xff]  }
 0x51d   :  { %23777 = vmatprep.subr.bf16.mxu1 %v25756_v30  ;;  %v25802_v28 = vld [vmem:[#allocation5 + $0x28a0] sm:$0xff]   ;;  %v25804_v30 = vld [vmem:[#allocation5 + $0x2828] sm:$0xff]  }
 0x51e   :  { %23756 = vmatpush3.bf16.msra.mxu0 %v25755_v31 }
 0x51f   :  { %23757 = vmatprep.subr.bf16.mxu0 %v25758_v33 }
 0x520   :  { %23778 = vmatpush3.bf16.msra.mxu1 %v25757_v35  ;;  %v25806_v35 = vld [vmem:[#allocation5 + $0x28a8] sm:$0xff]  }
 0x521   :  { %23779 = vmatprep.subr.bf16.mxu1 %v25760_v36 }
 0x522   :  { %23758 = vmatpush3.bf16.msra.mxu0 %v25759_v37 }
 0x523   :  { %23759 = vmatprep.subr.bf16.mxu0 %v25762_v38 }
 0x524   :  { %23780 = vmatpush3.bf16.msra.mxu1 %v25761_v39 }
 0x525   :  { %23781 = vmatprep.subr.bf16.mxu1 %v25764_v40 }
 0x526   :  { %23760 = vmatpush3.bf16.msra.mxu0 %v25763_v41  ;;  %v25807_v41 = vld [vmem:[#allocation5 + $0x2870] sm:$0xff]  }
 0x527   :  { %23761 = vmatprep.subr.bf16.mxu0 %v25766_v42  ;;  %v25808_v42 = vld [vmem:[#allocation5 + $0x2830] sm:$0xff]  }
 0x528   :  { %23782 = vmatpush3.bf16.msra.mxu1 %v25765_v43 }
 0x529   :  { %23783 = vmatprep.subr.bf16.mxu1 %v25768_v44 }
 0x52a   :  { %23762 = vmatpush3.bf16.msra.mxu0 %v25767_v45  ;;  %v25809_v45 = vld [vmem:[#allocation5 + $0x28f0] sm:$0xff]  }
 0x52b   :  { %23763 = vmatprep.subr.bf16.mxu0 %v25770_v46 }
 0x52c   :  { %v23461_v48 = vpop.f32.mrb[128].mxu0  ;;  %23784 = vmatpush3.bf16.msra.mxu1 %v25769_v47 }
 0x52d   :  { %v23462_v50 = vpop.f32.mrb[129].mxu0  ;;  %23785 = vmatprep.subr.bf16.mxu1 %v25772_v49 }
 0x52e   :  { %v23463_v52 = vadd.f32 %v23462_v50, %v23461_v48  ;;  %v23464_v53 = vpop.f32.mrb[130].mxu0  ;;  %v23483_v54 = vpop.f32.mrb[128].mxu1  ;;  %23764 = vmatpush3.bf16.msra.mxu0 %v25771_v51  ;;  %v25810_v48 = vld [vmem:[#allocation5 + $0x28b0] sm:$0xff]   ;;  %v25811_v50 = vld [vmem:[#allocation5 + $0x2878] sm:$0xff]  }
 0x52f   :  { %v23465_v57 = vpop.f32.mrb[131].mxu0  ;;  %v23484_v58 = vpop.f32.mrb[129].mxu1  ;;  %23765 = vmatprep.subr.bf16.mxu0 %v25774_v56  ;;  %v25812_v51 = vld [vmem:[#allocation5 + $0x2838] sm:$0xff]   ;;  %v73_v53 = vld [vmem:[#allocation2 + $0xa0] sm:$0xff] }
 0x530   :  { %v18409_v60 = vadd.f32 %v23463_v52, %v26738_v7  ;;  %v23485_v61 = vadd.f32 %v23484_v58, %v23483_v54  ;;  %v23486_v63 = vpop.f32.mrb[130].mxu1  ;;  %23786 = vmatpush3.bf16.msra.mxu1 %v25773_v55  ;;  %v4605_v7 = vrot.slane %v26743_v20, %v26434_v34  ;;  %v25794_v20 = vld [vmem:[#allocation5 + $0x2890] sm:$0xff]   ;;  %v25813_v52 = vld [vmem:[#allocation5 + $0x28f8] sm:$0xff]   ;;  %v4631_v54 = vrot.slane %v73_v53, %v26434_v34  ;;  %v25815_v57 = vld [vmem:[#allocation5 + $0x2940] sm:$0xff]  }
 0x531   :  { %v23487_v1 = vpop.f32.mrb[131].mxu1  ;;  %23787 = vmatprep.subr.bf16.mxu1 %v25776_v62  ;;  %v25814_v55 = vld [vmem:[#allocation5 + $0x28b8] sm:$0xff]   ;;  %v4624_v56 = vcombine.high %v73_v53, %v73_v53  ;;  %v25816_v63 = vld [vmem:[#allocation5 + $0x2900] sm:$0xff]   ;;  %v25852_v53 = vld [vmem:[#allocation5 + $0x2a48] sm:$0xff]  }
 0x532   :  { %v26750_v2 = vadd.f32 %v23485_v61, %v18409_v60  ;;  %23766 = vmatpush3.bf16.msra.mxu0 %v25775_v59  ;;  %v4621_v12 = vcombine.high %v4605_v7, %v4605_v7  ;;  %v4639_v58 = vcombine.high %v4631_v54, %v4631_v54  ;;  %v4647_v59 = vrot.slane %v4631_v54, %v26434_v34  ;;  %v25817_v61 = vld [vmem:[#allocation5 + $0x29c0] sm:$0xff]   ;;  %v25853_v54 = vld [vmem:[#allocation5 + $0x2a08] sm:$0xff]  }
 0x533   :  { %23767 = vmatprep.subr.bf16.mxu0 %v25778_v3  ;;  %v26760_v60 = vrot.slane %v4624_v56, %v26434_v34  ;;  %v25855_v56 = vld [vmem:[#allocation5 + $0x2a88] sm:$0xff]  }
 0x534   :  { %23788 = vmatpush3.bf16.msra.mxu1 %v25777_v0  ;;  %v4661_v62 = vrot.slane %v4639_v58, %v26434_v34  ;;  %v4669_v1 = vcombine.high %v4647_v59, %v4647_v59  ;;  %v25857_v58 = vld [vmem:[#allocation5 + $0x2a10] sm:$0xff]  }
 0x535   :  { %23789 = vmatprep.subr.bf16.mxu1 %v25780_v5  ;;  %v4640_v0 = vcombine.high %v26760_v60, %v26760_v60 }
 0x536   :  { %23768 = vmatpush3.bf16.msra.mxu0 %v25779_v4  ;;  %v4671_v3 = vcombine.high %v4661_v62, %v4661_v62  ;;  %v25818_v4 = vld [vmem:[#allocation5 + $0x2980] sm:$0xff]  }
 0x537   :  { %23797 = vmatprep.subr.bf16.mxu0 %v25783_v8  ;;  %v4668_v5 = vrot.slane %v4640_v0, %v26434_v34  ;;  %v25863_v0 = vld [vmem:[#allocation5 + $0x2a98] sm:$0xff]  }
 0x538   :  { %23790 = vmatpush3.bf16.msra.mxu1 %v25782_v6  ;;  %v25821_v6 = vld [vmem:[#allocation5 + $0x29c8] sm:$0xff]  }
 0x539   :  { %18967 = vmatmul.mubr.bf16.vlgmr.msra.gmra.mrb[156].mxu0 %v4605_v7  ;;  %23819 = vmatprep.subr.bf16.mxu1 %v25785_v10  ;;  %v25820_v7 = vld [vmem:[#allocation5 + $0x2908] sm:$0xff]   ;;  %v4672_v8 = vcombine.high %v4668_v5, %v4668_v5 }
 0x53a   :  { %23798 = vmatpush3.bf16.msra.mxu0 %v25784_v9  ;;  %19046 = vmatprep.mubr.bf16.mxu0 %v4661_v62  ;;  %v25823_v9 = vld [vmem:[#allocation5 + $0x2950] sm:$0xff]   ;;  %v25822_v10 = vld [vmem:[#allocation5 + $0x2988] sm:$0xff]   ;;  %v25861_v62 = vld [vmem:[#allocation5 + $0x2a18] sm:$0xff]  }
 0x53b   :  { %19007 = vmatmul.mubr.bf16.vlgmr.msra.gmra.mrb[156].mxu1 %v4621_v12  ;;  %23799 = vmatprep.subr.bf16.mxu0 %v25787_v13  ;;  %v25824_v12 = vld [vmem:[#allocation5 + $0x2910] sm:$0xff]   ;;  %v25827_v13 = vld [vmem:[#allocation5 + $0x2958] sm:$0xff]  }
 0x53c   :  { %23820 = vmatpush3.bf16.msra.mxu1 %v25786_v11  ;;  %19086 = vmatprep.mubr.bf16.mxu1 %v4671_v3  ;;  %v25825_v11 = vld [vmem:[#allocation5 + $0x29d0] sm:$0xff]   ;;  %v25866_v3 = vld [vmem:[#allocation5 + $0x2ae0] sm:$0xff]  }
 0x53d   :  { %23821 = vmatprep.subr.bf16.mxu1 %v25789_v15  ;;  %v25829_v15 = vld [vmem:[#allocation5 + $0x29d8] sm:$0xff]  }
 0x53e   :  { %23800 = vmatpush3.bf16.msra.mxu0 %v25788_v14  ;;  %v25826_v14 = vld [vmem:[#allocation5 + $0x2990] sm:$0xff]  }
 0x53f   :  { %23801 = vmatprep.subr.bf16.mxu0 %v25791_v17  ;;  %v25831_v17 = vld [vmem:[#allocation5 + $0x2960] sm:$0xff]  }
 0x540   :  { %23822 = vmatpush3.bf16.msra.mxu1 %v25790_v16  ;;  %v25828_v16 = vld [vmem:[#allocation5 + $0x2918] sm:$0xff]  }
 0x541   :  { %23823 = vmatprep.subr.bf16.mxu1 %v25793_v19  ;;  %v25833_v19 = vld [vmem:[#allocation5 + $0x29e0] sm:$0xff]  }
 0x542   :  { %23802 = vmatpush3.bf16.msra.mxu0 %v25792_v18  ;;  %v25830_v18 = vld [vmem:[#allocation5 + $0x2998] sm:$0xff]  }
 0x543   :  { %23803 = vmatprep.subr.bf16.mxu0 %v25795_v21  ;;  %v25835_v21 = vld [vmem:[#allocation5 + $0x2968] sm:$0xff]  }
 0x544   :  { %23824 = vmatpush3.bf16.msra.mxu1 %v25794_v20  ;;  %v25832_v20 = vld [vmem:[#allocation5 + $0x2920] sm:$0xff]  }
 0x545   :  { %23825 = vmatprep.subr.bf16.mxu1 %v25797_v23 }
 0x546   :  { %23804 = vmatpush3.bf16.msra.mxu0 %v25796_v22  ;;  %v25834_v22 = vld [vmem:[#allocation5 + $0x29a0] sm:$0xff]  }
 0x547   :  { %23805 = vmatprep.subr.bf16.mxu0 %v25799_v25 }
 0x548   :  { %23826 = vmatpush3.bf16.msra.mxu1 %v25798_v24  ;;  %v25837_v24 = vld [vmem:[#allocation5 + $0x29e8] sm:$0xff]  }
 0x549   :  { %23827 = vmatprep.subr.bf16.mxu1 %v25801_v27 }
 0x54a   :  { %23806 = vmatpush3.bf16.msra.mxu0 %v25800_v26  ;;  %v25836_v26 = vld [vmem:[#allocation5 + $0x2928] sm:$0xff]  }
 0x54b   :  { %23807 = vmatprep.subr.bf16.mxu0 %v25803_v29 }
 0x54c   :  { %v23505_v31 = vpop.f32.mrb[132].mxu0  ;;  %23828 = vmatpush3.bf16.msra.mxu1 %v25802_v28 }
 0x54d   :  { %v23506_v33 = vpop.f32.mrb[133].mxu0  ;;  %23829 = vmatprep.subr.bf16.mxu1 %v25805_v32 }
 0x54e   :  { %v23507_v36 = vadd.f32 %v23506_v33, %v23505_v31  ;;  %v23508_v37 = vpop.f32.mrb[134].mxu0  ;;  %v23527_v38 = vpop.f32.mrb[132].mxu1  ;;  %23808 = vmatpush3.bf16.msra.mxu0 %v25804_v30  ;;  %v25838_v30 = vld [vmem:[#allocation5 + $0x29a8] sm:$0xff]   ;;  %v25839_v31 = vld [vmem:[#allocation5 + $0x2970] sm:$0xff]  }
 0x54f   :  { %v23509_v39 = vpop.f32.mrb[135].mxu0  ;;  %v23528_v40 = vpop.f32.mrb[133].mxu1  ;;  %23809 = vmatprep.subr.bf16.mxu0 %v25807_v41 }
 0x550   :  { %v18489_v43 = vadd.f32 %v23507_v36, %v26750_v2  ;;  %v23529_v44 = vadd.f32 %v23528_v40, %v23527_v38  ;;  %v23530_v46 = vpop.f32.mrb[134].mxu1  ;;  %23830 = vmatpush3.bf16.msra.mxu1 %v25806_v35  ;;  %v25819_v2 = vld [vmem:[#allocation5 + $0x2948] sm:$0xff]   ;;  %v25840_v35 = vld [vmem:[#allocation5 + $0x2930] sm:$0xff]  }
 0x551   :  { %v23531_v49 = vpop.f32.mrb[135].mxu1  ;;  %23831 = vmatprep.subr.bf16.mxu1 %v25809_v45  ;;  %v25841_v38 = vld [vmem:[#allocation5 + $0x29f0] sm:$0xff]   ;;  %v25845_v45 = vld [vmem:[#allocation5 + $0x29f8] sm:$0xff]  }
 0x552   :  { %v26755_v47 = vadd.f32 %v23529_v44, %v18489_v43  ;;  %23810 = vmatpush3.bf16.msra.mxu0 %v25808_v42  ;;  %v25842_v40 = vld [vmem:[#allocation5 + $0x29b0] sm:$0xff]   ;;  %v25843_v43 = vld [vmem:[#allocation5 + $0x2978] sm:$0xff]   ;;  %v25849_v49 = vld [vmem:[#allocation5 + $0x2a00] sm:$0xff]  }
 0x553   :  { %23811 = vmatprep.subr.bf16.mxu0 %v25811_v50  ;;  %v25844_v44 = vld [vmem:[#allocation5 + $0x2938] sm:$0xff]   ;;  %v25850_v50 = vld [vmem:[#allocation5 + $0x2ac0] sm:$0xff]  }
 0x554   :  { %23832 = vmatpush3.bf16.msra.mxu1 %v25810_v48  ;;  %v25847_v46 = vld [vmem:[#allocation5 + $0x29b8] sm:$0xff]   ;;  %v25848_v48 = vld [vmem:[#allocation5 + $0x2a40] sm:$0xff]  }
 0x555   :  { %23833 = vmatprep.subr.bf16.mxu1 %v25813_v52 }
 0x556   :  { %23812 = vmatpush3.bf16.msra.mxu0 %v25812_v51  ;;  %v25851_v51 = vld [vmem:[#allocation5 + $0x2a80] sm:$0xff]  }
 0x557   :  { %23841 = vmatprep.subr.bf16.mxu0 %v25815_v57  ;;  %v25856_v57 = vld [vmem:[#allocation5 + $0x2a50] sm:$0xff]  }
 0x558   :  { %23834 = vmatpush3.bf16.msra.mxu1 %v25814_v55  ;;  %v25854_v55 = vld [vmem:[#allocation5 + $0x2ac8] sm:$0xff]  }
 0x559   :  { %23863 = vmatprep.subr.bf16.mxu1 %v25817_v61  ;;  %19047 = vmatmul.mubr.bf16.vlgmr.msra.gmra.mrb[160].mxu0 %v4647_v59  ;;  %v25858_v59 = vld [vmem:[#allocation5 + $0x2ad0] sm:$0xff]   ;;  %v25860_v61 = vld [vmem:[#allocation5 + $0x2a58] sm:$0xff]  }
 0x55a   :  { %23842 = vmatpush3.bf16.msra.mxu0 %v25816_v63  ;;  %19126 = vmatprep.mubr.bf16.mxu0 %v4668_v5  ;;  %v25862_v63 = vld [vmem:[#allocation5 + $0x2ad8] sm:$0xff]   ;;  %v25868_v5 = vld [vmem:[#allocation5 + $0x2a68] sm:$0xff]  }
 0x55b   :  { %19087 = vmatmul.mubr.bf16.vlgmr.msra.gmra.mrb[160].mxu1 %v4669_v1  ;;  %23843 = vmatprep.subr.bf16.mxu0 %v25819_v2  ;;  %v25864_v1 = vld [vmem:[#allocation5 + $0x2a60] sm:$0xff]  }
 0x55c   :  { %23864 = vmatpush3.bf16.msra.mxu1 %v25818_v4  ;;  %19166 = vmatprep.mubr.bf16.mxu1 %v4672_v8  ;;  %v25865_v2 = vld [vmem:[#allocation5 + $0x2a20] sm:$0xff]   ;;  %v25870_v8 = vld [vmem:[#allocation5 + $0x2ae8] sm:$0xff]  }
 0x55d   :  { %23865 = vmatprep.subr.bf16.mxu1 %v25821_v6  ;;  %v25867_v4 = vld [vmem:[#allocation5 + $0x2aa0] sm:$0xff]   ;;  %v25869_v6 = vld [vmem:[#allocation5 + $0x2a28] sm:$0xff]  }
 0x55e   :  { %23844 = vmatpush3.bf16.msra.mxu0 %v25820_v7 }
 0x55f   :  { %23845 = vmatprep.subr.bf16.mxu0 %v25823_v9 }
 0x560   :  { %23866 = vmatpush3.bf16.msra.mxu1 %v25822_v10  ;;  %v25871_v10 = vld [vmem:[#allocation5 + $0x2aa8] sm:$0xff]  }
 0x561   :  { %23867 = vmatprep.subr.bf16.mxu1 %v25825_v11 }
 0x562   :  { %23846 = vmatpush3.bf16.msra.mxu0 %v25824_v12 }
 0x563   :  { %23847 = vmatprep.subr.bf16.mxu0 %v25827_v13 }
 0x564   :  { %23868 = vmatpush3.bf16.msra.mxu1 %v25826_v14 }
 0x565   :  { %23869 = vmatprep.subr.bf16.mxu1 %v25829_v15 }
 0x566   :  { %23848 = vmatpush3.bf16.msra.mxu0 %v25828_v16  ;;  %v25872_v16 = vld [vmem:[#allocation5 + $0x2a70] sm:$0xff]  }
 0x567   :  { %23849 = vmatprep.subr.bf16.mxu0 %v25831_v17  ;;  %v25873_v17 = vld [vmem:[#allocation5 + $0x2a30] sm:$0xff]  }
 0x568   :  { %23870 = vmatpush3.bf16.msra.mxu1 %v25830_v18 }
 0x569   :  { %23871 = vmatprep.subr.bf16.mxu1 %v25833_v19 }
 0x56a   :  { %23850 = vmatpush3.bf16.msra.mxu0 %v25832_v20  ;;  %v25874_v20 = vld [vmem:[#allocation5 + $0x2af0] sm:$0xff]  }
 0x56b   :  { %23851 = vmatprep.subr.bf16.mxu0 %v25835_v21 }
 0x56c   :  { %v23549_v23 = vpop.f32.mrb[136].mxu0  ;;  %23872 = vmatpush3.bf16.msra.mxu1 %v25834_v22 }
 0x56d   :  { %v23550_v25 = vpop.f32.mrb[137].mxu0  ;;  %23873 = vmatprep.subr.bf16.mxu1 %v25837_v24 }
 0x56e   :  { %v23551_v27 = vadd.f32 %v23550_v25, %v23549_v23  ;;  %v23552_v28 = vpop.f32.mrb[138].mxu0  ;;  %v23571_v29 = vpop.f32.mrb[136].mxu1  ;;  %23852 = vmatpush3.bf16.msra.mxu0 %v25836_v26  ;;  %v25875_v23 = vld [vmem:[#allocation5 + $0x2ab0] sm:$0xff]   ;;  %v25876_v25 = vld [vmem:[#allocation5 + $0x2a78] sm:$0xff]  }
 0x56f   :  { %v23553_v32 = vpop.f32.mrb[139].mxu0  ;;  %v23572_v33 = vpop.f32.mrb[137].mxu1  ;;  %23853 = vmatprep.subr.bf16.mxu0 %v25839_v31  ;;  %v25877_v26 = vld [vmem:[#allocation5 + $0x2a38] sm:$0xff]   ;;  %v74_v28 = vld [vmem:[#allocation2 + $0xa8] sm:$0xff] }
 0x570   :  { %v18569_v36 = vadd.f32 %v23551_v27, %v26755_v47  ;;  %v23573_v37 = vadd.f32 %v23572_v33, %v23571_v29  ;;  %v23574_v39 = vpop.f32.mrb[138].mxu1  ;;  %23874 = vmatpush3.bf16.msra.mxu1 %v25838_v30  ;;  %v4654_v47 = vrot.slane %v26760_v60, %v26434_v34  ;;  %v25859_v60 = vld [vmem:[#allocation5 + $0x2a90] sm:$0xff]   ;;  %v25878_v27 = vld [vmem:[#allocation5 + $0x2af8] sm:$0xff]   ;;  %v4680_v29 = vrot.slane %v74_v28, %v26434_v34  ;;  %v25880_v32 = vld [vmem:[#allocation5 + $0x2b40] sm:$0xff]  }
 0x571   :  { %v23575_v41 = vpop.f32.mrb[139].mxu1  ;;  %23875 = vmatprep.subr.bf16.mxu1 %v25841_v38  ;;  %v25879_v30 = vld [vmem:[#allocation5 + $0x2ab8] sm:$0xff]   ;;  %v4673_v31 = vcombine.high %v74_v28, %v74_v28  ;;  %v25881_v39 = vld [vmem:[#allocation5 + $0x2b00] sm:$0xff]   ;;  %v25917_v28 = vld [vmem:[#allocation5 + $0x2c48] sm:$0xff]  }
 0x572   :  { %v26767_v42 = vadd.f32 %v23573_v37, %v18569_v36  ;;  %23854 = vmatpush3.bf16.msra.mxu0 %v25840_v35  ;;  %v4670_v52 = vcombine.high %v4654_v47, %v4654_v47  ;;  %v4688_v33 = vcombine.high %v4680_v29, %v4680_v29  ;;  %v4696_v35 = vrot.slane %v4680_v29, %v26434_v34  ;;  %v25882_v37 = vld [vmem:[#allocation5 + $0x2bc0] sm:$0xff]   ;;  %v25918_v29 = vld [vmem:[#allocation5 + $0x2c08] sm:$0xff]  }
 0x573   :  { %23855 = vmatprep.subr.bf16.mxu0 %v25843_v43  ;;  %v26777_v36 = vrot.slane %v4673_v31, %v26434_v34  ;;  %v25920_v31 = vld [vmem:[#allocation5 + $0x2c88] sm:$0xff]  }
 0x574   :  { %23876 = vmatpush3.bf16.msra.mxu1 %v25842_v40  ;;  %v4710_v38 = vrot.slane %v4688_v33, %v26434_v34  ;;  %v4718_v41 = vcombine.high %v4696_v35, %v4696_v35  ;;  %v25922_v33 = vld [vmem:[#allocation5 + $0x2c10] sm:$0xff]  }
 0x575   :  { %23877 = vmatprep.subr.bf16.mxu1 %v25845_v45  ;;  %v4689_v40 = vcombine.high %v26777_v36, %v26777_v36 }
 0x576   :  { %23856 = vmatpush3.bf16.msra.mxu0 %v25844_v44  ;;  %v4720_v43 = vcombine.high %v4710_v38, %v4710_v38  ;;  %v25883_v44 = vld [vmem:[#allocation5 + $0x2b80] sm:$0xff]  }
 0x577   :  { %23885 = vmatprep.subr.bf16.mxu0 %v25848_v48  ;;  %v4717_v45 = vrot.slane %v4689_v40, %v26434_v34  ;;  %v25928_v40 = vld [vmem:[#allocation5 + $0x2c98] sm:$0xff]  }
 0x578   :  { %23878 = vmatpush3.bf16.msra.mxu1 %v25847_v46  ;;  %v25886_v46 = vld [vmem:[#allocation5 + $0x2bc8] sm:$0xff]  }
 0x579   :  { %19127 = vmatmul.mubr.bf16.vlgmr.msra.gmra.mrb[164].mxu0 %v4654_v47  ;;  %23907 = vmatprep.subr.bf16.mxu1 %v25850_v50  ;;  %v25885_v47 = vld [vmem:[#allocation5 + $0x2b08] sm:$0xff]   ;;  %v4721_v48 = vcombine.high %v4717_v45, %v4717_v45 }
 0x57a   :  { %23886 = vmatpush3.bf16.msra.mxu0 %v25849_v49  ;;  %19206 = vmatprep.mubr.bf16.mxu0 %v4710_v38  ;;  %v25888_v49 = vld [vmem:[#allocation5 + $0x2b50] sm:$0xff]   ;;  %v25887_v50 = vld [vmem:[#allocation5 + $0x2b88] sm:$0xff]   ;;  %v25926_v38 = vld [vmem:[#allocation5 + $0x2c18] sm:$0xff]  }
 0x57b   :  { %19167 = vmatmul.mubr.bf16.vlgmr.msra.gmra.mrb[164].mxu1 %v4670_v52  ;;  %23887 = vmatprep.subr.bf16.mxu0 %v25852_v53  ;;  %v25889_v52 = vld [vmem:[#allocation5 + $0x2b10] sm:$0xff]   ;;  %v25892_v53 = vld [vmem:[#allocation5 + $0x2b58] sm:$0xff]  }
 0x57c   :  { %23908 = vmatpush3.bf16.msra.mxu1 %v25851_v51  ;;  %19246 = vmatprep.mubr.bf16.mxu1 %v4720_v43  ;;  %v25890_v51 = vld [vmem:[#allocation5 + $0x2bd0] sm:$0xff]   ;;  %v25931_v43 = vld [vmem:[#allocation5 + $0x2ce0] sm:$0xff]  }
 0x57d   :  { %23909 = vmatprep.subr.bf16.mxu1 %v25854_v55  ;;  %v25894_v55 = vld [vmem:[#allocation5 + $0x2bd8] sm:$0xff]  }
 0x57e   :  { %23888 = vmatpush3.bf16.msra.mxu0 %v25853_v54  ;;  %v25891_v54 = vld [vmem:[#allocation5 + $0x2b90] sm:$0xff]  }
 0x57f   :  { %23889 = vmatprep.subr.bf16.mxu0 %v25856_v57  ;;  %v25896_v57 = vld [vmem:[#allocation5 + $0x2b60] sm:$0xff]  }
 0x580   :  { %23910 = vmatpush3.bf16.msra.mxu1 %v25855_v56  ;;  %v25893_v56 = vld [vmem:[#allocation5 + $0x2b18] sm:$0xff]  }
 0x581   :  { %23911 = vmatprep.subr.bf16.mxu1 %v25858_v59  ;;  %v25898_v59 = vld [vmem:[#allocation5 + $0x2be0] sm:$0xff]  }
 0x582   :  { %23890 = vmatpush3.bf16.msra.mxu0 %v25857_v58  ;;  %v25895_v58 = vld [vmem:[#allocation5 + $0x2b98] sm:$0xff]  }
 0x583   :  { %23891 = vmatprep.subr.bf16.mxu0 %v25860_v61  ;;  %v25900_v61 = vld [vmem:[#allocation5 + $0x2b68] sm:$0xff]  }
 0x584   :  { %23912 = vmatpush3.bf16.msra.mxu1 %v25859_v60  ;;  %v25897_v60 = vld [vmem:[#allocation5 + $0x2b20] sm:$0xff]  }
 0x585   :  { %23913 = vmatprep.subr.bf16.mxu1 %v25862_v63 }
 0x586   :  { %23892 = vmatpush3.bf16.msra.mxu0 %v25861_v62  ;;  %v25899_v62 = vld [vmem:[#allocation5 + $0x2ba0] sm:$0xff]  }
 0x587   :  { %23893 = vmatprep.subr.bf16.mxu0 %v25864_v1 }
 0x588   :  { %23914 = vmatpush3.bf16.msra.mxu1 %v25863_v0  ;;  %v25902_v0 = vld [vmem:[#allocation5 + $0x2be8] sm:$0xff]  }
 0x589   :  { %23915 = vmatprep.subr.bf16.mxu1 %v25866_v3 }
 0x58a   :  { %23894 = vmatpush3.bf16.msra.mxu0 %v25865_v2  ;;  %v25901_v2 = vld [vmem:[#allocation5 + $0x2b28] sm:$0xff]  }
 0x58b   :  { %23895 = vmatprep.subr.bf16.mxu0 %v25868_v5 }
 0x58c   :  { %v23593_v7 = vpop.f32.mrb[140].mxu0  ;;  %23916 = vmatpush3.bf16.msra.mxu1 %v25867_v4 }
 0x58d   :  { %v23594_v9 = vpop.f32.mrb[141].mxu0  ;;  %23917 = vmatprep.subr.bf16.mxu1 %v25870_v8 }
 0x58e   :  { %v23595_v11 = vadd.f32 %v23594_v9, %v23593_v7  ;;  %v23596_v12 = vpop.f32.mrb[142].mxu0  ;;  %v23615_v13 = vpop.f32.mrb[140].mxu1  ;;  %23896 = vmatpush3.bf16.msra.mxu0 %v25869_v6  ;;  %v25903_v6 = vld [vmem:[#allocation5 + $0x2ba8] sm:$0xff]   ;;  %v25904_v7 = vld [vmem:[#allocation5 + $0x2b70] sm:$0xff]  }
 0x58f   :  { %v23597_v14 = vpop.f32.mrb[143].mxu0  ;;  %v23616_v15 = vpop.f32.mrb[141].mxu1  ;;  %23897 = vmatprep.subr.bf16.mxu0 %v25872_v16 }
 0x590   :  { %v18649_v18 = vadd.f32 %v23595_v11, %v26767_v42  ;;  %v23617_v19 = vadd.f32 %v23616_v15, %v23615_v13  ;;  %v23618_v21 = vpop.f32.mrb[142].mxu1  ;;  %23918 = vmatpush3.bf16.msra.mxu1 %v25871_v10  ;;  %v25884_v42 = vld [vmem:[#allocation5 + $0x2b48] sm:$0xff]   ;;  %v25905_v10 = vld [vmem:[#allocation5 + $0x2b30] sm:$0xff]  }
 0x591   :  { %v23619_v24 = vpop.f32.mrb[143].mxu1  ;;  %23919 = vmatprep.subr.bf16.mxu1 %v25874_v20  ;;  %v25906_v13 = vld [vmem:[#allocation5 + $0x2bf0] sm:$0xff]   ;;  %v25910_v20 = vld [vmem:[#allocation5 + $0x2bf8] sm:$0xff]  }
 0x592   :  { %v26772_v22 = vadd.f32 %v23617_v19, %v18649_v18  ;;  %23898 = vmatpush3.bf16.msra.mxu0 %v25873_v17  ;;  %v25907_v15 = vld [vmem:[#allocation5 + $0x2bb0] sm:$0xff]   ;;  %v25908_v18 = vld [vmem:[#allocation5 + $0x2b78] sm:$0xff]   ;;  %v25914_v24 = vld [vmem:[#allocation5 + $0x2c00] sm:$0xff]  }
 0x593   :  { %23899 = vmatprep.subr.bf16.mxu0 %v25876_v25  ;;  %v25909_v19 = vld [vmem:[#allocation5 + $0x2b38] sm:$0xff]   ;;  %v25915_v25 = vld [vmem:[#allocation5 + $0x2cc0] sm:$0xff]  }
 0x594   :  { %23920 = vmatpush3.bf16.msra.mxu1 %v25875_v23  ;;  %v25912_v21 = vld [vmem:[#allocation5 + $0x2bb8] sm:$0xff]   ;;  %v25913_v23 = vld [vmem:[#allocation5 + $0x2c40] sm:$0xff]  }
 0x595   :  { %23921 = vmatprep.subr.bf16.mxu1 %v25878_v27 }
 0x596   :  { %23900 = vmatpush3.bf16.msra.mxu0 %v25877_v26  ;;  %v25916_v26 = vld [vmem:[#allocation5 + $0x2c80] sm:$0xff]  }
 0x597   :  { %23929 = vmatprep.subr.bf16.mxu0 %v25880_v32  ;;  %v25921_v32 = vld [vmem:[#allocation5 + $0x2c50] sm:$0xff]  }
 0x598   :  { %23922 = vmatpush3.bf16.msra.mxu1 %v25879_v30  ;;  %v25919_v30 = vld [vmem:[#allocation5 + $0x2cc8] sm:$0xff]  }
 0x599   :  { %23951 = vmatprep.subr.bf16.mxu1 %v25882_v37  ;;  %19207 = vmatmul.mubr.bf16.vlgmr.msra.gmra.mrb[168].mxu0 %v4696_v35  ;;  %v25923_v35 = vld [vmem:[#allocation5 + $0x2cd0] sm:$0xff]   ;;  %v25925_v37 = vld [vmem:[#allocation5 + $0x2c58] sm:$0xff]  }
 0x59a   :  { %23930 = vmatpush3.bf16.msra.mxu0 %v25881_v39  ;;  %19286 = vmatprep.mubr.bf16.mxu0 %v4717_v45  ;;  %v25927_v39 = vld [vmem:[#allocation5 + $0x2cd8] sm:$0xff]   ;;  %v25933_v45 = vld [vmem:[#allocation5 + $0x2c68] sm:$0xff]  }
 0x59b   :  { %19247 = vmatmul.mubr.bf16.vlgmr.msra.gmra.mrb[168].mxu1 %v4718_v41  ;;  %23931 = vmatprep.subr.bf16.mxu0 %v25884_v42  ;;  %v25929_v41 = vld [vmem:[#allocation5 + $0x2c60] sm:$0xff]  }
 0x59c   :  { %23952 = vmatpush3.bf16.msra.mxu1 %v25883_v44  ;;  %19326 = vmatprep.mubr.bf16.mxu1 %v4721_v48  ;;  %v25930_v42 = vld [vmem:[#allocation5 + $0x2c20] sm:$0xff]   ;;  %v25935_v48 = vld [vmem:[#allocation5 + $0x2ce8] sm:$0xff]  }
 0x59d   :  { %23953 = vmatprep.subr.bf16.mxu1 %v25886_v46  ;;  %v25932_v44 = vld [vmem:[#allocation5 + $0x2ca0] sm:$0xff]   ;;  %v25934_v46 = vld [vmem:[#allocation5 + $0x2c28] sm:$0xff]  }
 0x59e   :  { %23932 = vmatpush3.bf16.msra.mxu0 %v25885_v47 }
 0x59f   :  { %23933 = vmatprep.subr.bf16.mxu0 %v25888_v49 }
 0x5a0   :  { %23954 = vmatpush3.bf16.msra.mxu1 %v25887_v50  ;;  %v25936_v50 = vld [vmem:[#allocation5 + $0x2ca8] sm:$0xff]  }
 0x5a1   :  { %23955 = vmatprep.subr.bf16.mxu1 %v25890_v51 }
 0x5a2   :  { %23934 = vmatpush3.bf16.msra.mxu0 %v25889_v52 }
 0x5a3   :  { %23935 = vmatprep.subr.bf16.mxu0 %v25892_v53 }
 0x5a4   :  { %23956 = vmatpush3.bf16.msra.mxu1 %v25891_v54 }
 0x5a5   :  { %23957 = vmatprep.subr.bf16.mxu1 %v25894_v55 }
 0x5a6   :  { %23936 = vmatpush3.bf16.msra.mxu0 %v25893_v56  ;;  %v25937_v56 = vld [vmem:[#allocation5 + $0x2c70] sm:$0xff]  }
 0x5a7   :  { %23937 = vmatprep.subr.bf16.mxu0 %v25896_v57  ;;  %v25938_v57 = vld [vmem:[#allocation5 + $0x2c30] sm:$0xff]  }
 0x5a8   :  { %23958 = vmatpush3.bf16.msra.mxu1 %v25895_v58 }
 0x5a9   :  { %23959 = vmatprep.subr.bf16.mxu1 %v25898_v59 }
 0x5aa   :  { %23938 = vmatpush3.bf16.msra.mxu0 %v25897_v60  ;;  %v25939_v60 = vld [vmem:[#allocation5 + $0x2cf0] sm:$0xff]  }
 0x5ab   :  { %23939 = vmatprep.subr.bf16.mxu0 %v25900_v61 }
 0x5ac   :  { %v23637_v63 = vpop.f32.mrb[144].mxu0  ;;  %23960 = vmatpush3.bf16.msra.mxu1 %v25899_v62 }
 0x5ad   :  { %v23638_v1 = vpop.f32.mrb[145].mxu0  ;;  %23961 = vmatprep.subr.bf16.mxu1 %v25902_v0 }
 0x5ae   :  { %v23639_v3 = vadd.f32 %v23638_v1, %v23637_v63  ;;  %v23640_v4 = vpop.f32.mrb[146].mxu0  ;;  %v23659_v5 = vpop.f32.mrb[144].mxu1  ;;  %23940 = vmatpush3.bf16.msra.mxu0 %v25901_v2  ;;  %v25940_v63 = vld [vmem:[#allocation5 + $0x2cb0] sm:$0xff]   ;;  %v25941_v1 = vld [vmem:[#allocation5 + $0x2c78] sm:$0xff]  }
 0x5af   :  { %v23641_v8 = vpop.f32.mrb[147].mxu0  ;;  %v23660_v9 = vpop.f32.mrb[145].mxu1  ;;  %23941 = vmatprep.subr.bf16.mxu0 %v25904_v7  ;;  %v25942_v2 = vld [vmem:[#allocation5 + $0x2c38] sm:$0xff]  }
 0x5b0   :  { %v18729_v11 = vadd.f32 %v23639_v3, %v26772_v22  ;;  %v23661_v12 = vadd.f32 %v23660_v9, %v23659_v5  ;;  %v23662_v14 = vpop.f32.mrb[146].mxu1  ;;  %23962 = vmatpush3.bf16.msra.mxu1 %v25903_v6  ;;  %v4703_v22 = vrot.slane %v26777_v36, %v26434_v34  ;;  %v25924_v36 = vld [vmem:[#allocation5 + $0x2c90] sm:$0xff]   ;;  %v25943_v3 = vld [vmem:[#allocation5 + $0x2cf8] sm:$0xff]   ;;  %v25945_v8 = vld [vmem:[#allocation5 + $0x2d40] sm:$0xff]  }
 0x5b1   :  { %v23663_v16 = vpop.f32.mrb[147].mxu1  ;;  %23963 = vmatprep.subr.bf16.mxu1 %v25906_v13  ;;  %v75_v4 = vld [vmem:[#allocation2 + $0xb0] sm:$0xff]  ;;  %v25946_v14 = vld [vmem:[#allocation5 + $0x2d00] sm:$0xff]  }
 0x5b2   :  { %v26784_v17 = vadd.f32 %v23661_v12, %v18729_v11  ;;  %23942 = vmatpush3.bf16.msra.mxu0 %v25905_v10  ;;  %v4719_v27 = vcombine.high %v4703_v22, %v4703_v22  ;;  %v4729_v5 = vrot.slane %v75_v4, %v26434_v34  ;;  %v25944_v6 = vld [vmem:[#allocation5 + $0x2cb8] sm:$0xff]   ;;  %v4722_v7 = vcombine.high %v75_v4, %v75_v4  ;;  %v25947_v12 = vld [vmem:[#allocation5 + $0x2dc0] sm:$0xff]   ;;  %v25982_v4 = vld [vmem:[#allocation5 + $0x2e48] sm:$0xff]  }
 0x5b3   :  { %23943 = vmatprep.subr.bf16.mxu0 %v25908_v18 }
 0x5b4   :  { %23964 = vmatpush3.bf16.msra.mxu1 %v25907_v15  ;;  %v4737_v9 = vcombine.high %v4729_v5, %v4729_v5  ;;  %v4745_v10 = vrot.slane %v4729_v5, %v26434_v34  ;;  %v26794_v11 = vrot.slane %v4722_v7, %v26434_v34  ;;  %v25983_v5 = vld [vmem:[#allocation5 + $0x2e08] sm:$0xff]  }
 0x5b5   :  { %23965 = vmatprep.subr.bf16.mxu1 %v25910_v20  ;;  %v25985_v7 = vld [vmem:[#allocation5 + $0x2e88] sm:$0xff]  }
 0x5b6   :  { %23944 = vmatpush3.bf16.msra.mxu0 %v25909_v19  ;;  %v4759_v13 = vrot.slane %v4737_v9, %v26434_v34  ;;  %v4738_v15 = vcombine.high %v26794_v11, %v26794_v11  ;;  %v4767_v16 = vcombine.high %v4745_v10, %v4745_v10  ;;  %v25948_v19 = vld [vmem:[#allocation5 + $0x2d80] sm:$0xff]   ;;  %v25987_v9 = vld [vmem:[#allocation5 + $0x2e10] sm:$0xff]  }
 0x5b7   :  { %23973 = vmatprep.subr.bf16.mxu0 %v25913_v23 }
 0x5b8   :  { %23966 = vmatpush3.bf16.msra.mxu1 %v25912_v21  ;;  %v4769_v18 = vcombine.high %v4759_v13, %v4759_v13  ;;  %v4766_v20 = vrot.slane %v4738_v15, %v26434_v34  ;;  %v25951_v21 = vld [vmem:[#allocation5 + $0x2dc8] sm:$0xff]   ;;  %v25993_v15 = vld [vmem:[#allocation5 + $0x2e98] sm:$0xff]  }
 0x5b9   :  { %19287 = vmatmul.mubr.bf16.vlgmr.msra.gmra.mrb[172].mxu0 %v4703_v22  ;;  %23995 = vmatprep.subr.bf16.mxu1 %v25915_v25  ;;  %v25950_v22 = vld [vmem:[#allocation5 + $0x2d08] sm:$0xff]  }
 0x5ba   :  { %23974 = vmatpush3.bf16.msra.mxu0 %v25914_v24  ;;  %19366 = vmatprep.mubr.bf16.mxu0 %v4759_v13  ;;  %v4770_v23 = vcombine.high %v4766_v20, %v4766_v20  ;;  %v25953_v24 = vld [vmem:[#allocation5 + $0x2d50] sm:$0xff]   ;;  %v25952_v25 = vld [vmem:[#allocation5 + $0x2d88] sm:$0xff]   ;;  %v25991_v13 = vld [vmem:[#allocation5 + $0x2e18] sm:$0xff]  }
 0x5bb   :  { %19327 = vmatmul.mubr.bf16.vlgmr.msra.gmra.mrb[172].mxu1 %v4719_v27  ;;  %23975 = vmatprep.subr.bf16.mxu0 %v25917_v28  ;;  %v25954_v27 = vld [vmem:[#allocation5 + $0x2d10] sm:$0xff]   ;;  %v25957_v28 = vld [vmem:[#allocation5 + $0x2d58] sm:$0xff]  }
 0x5bc   :  { %23996 = vmatpush3.bf16.msra.mxu1 %v25916_v26  ;;  %19406 = vmatprep.mubr.bf16.mxu1 %v4769_v18  ;;  %v25955_v26 = vld [vmem:[#allocation5 + $0x2dd0] sm:$0xff]   ;;  %v25996_v18 = vld [vmem:[#allocation5 + $0x2ee0] sm:$0xff]  }
 0x5bd   :  { %23997 = vmatprep.subr.bf16.mxu1 %v25919_v30  ;;  %v25959_v30 = vld [vmem:[#allocation5 + $0x2dd8] sm:$0xff]  }
 0x5be   :  { %23976 = vmatpush3.bf16.msra.mxu0 %v25918_v29  ;;  %v25956_v29 = vld [vmem:[#allocation5 + $0x2d90] sm:$0xff]  }
 0x5bf   :  { %23977 = vmatprep.subr.bf16.mxu0 %v25921_v32  ;;  %v25961_v32 = vld [vmem:[#allocation5 + $0x2d60] sm:$0xff]  }
 0x5c0   :  { %23998 = vmatpush3.bf16.msra.mxu1 %v25920_v31  ;;  %v25958_v31 = vld [vmem:[#allocation5 + $0x2d18] sm:$0xff]  }
 0x5c1   :  { %23999 = vmatprep.subr.bf16.mxu1 %v25923_v35  ;;  %v25963_v35 = vld [vmem:[#allocation5 + $0x2de0] sm:$0xff]  }
 0x5c2   :  { %23978 = vmatpush3.bf16.msra.mxu0 %v25922_v33  ;;  %v25960_v33 = vld [vmem:[#allocation5 + $0x2d98] sm:$0xff]  }
 0x5c3   :  { %23979 = vmatprep.subr.bf16.mxu0 %v25925_v37  ;;  %v25965_v37 = vld [vmem:[#allocation5 + $0x2d68] sm:$0xff]  }
 0x5c4   :  { %24000 = vmatpush3.bf16.msra.mxu1 %v25924_v36  ;;  %v25962_v36 = vld [vmem:[#allocation5 + $0x2d20] sm:$0xff]  }
 0x5c5   :  { %24001 = vmatprep.subr.bf16.mxu1 %v25927_v39 }
 0x5c6   :  { %23980 = vmatpush3.bf16.msra.mxu0 %v25926_v38  ;;  %v25964_v38 = vld [vmem:[#allocation5 + $0x2da0] sm:$0xff]  }
 0x5c7   :  { %23981 = vmatprep.subr.bf16.mxu0 %v25929_v41 }
 0x5c8   :  { %24002 = vmatpush3.bf16.msra.mxu1 %v25928_v40  ;;  %v25967_v40 = vld [vmem:[#allocation5 + $0x2de8] sm:$0xff]  }
 0x5c9   :  { %24003 = vmatprep.subr.bf16.mxu1 %v25931_v43 }
 0x5ca   :  { %23982 = vmatpush3.bf16.msra.mxu0 %v25930_v42  ;;  %v25966_v42 = vld [vmem:[#allocation5 + $0x2d28] sm:$0xff]  }
 0x5cb   :  { %23983 = vmatprep.subr.bf16.mxu0 %v25933_v45 }
 0x5cc   :  { %v23681_v47 = vpop.f32.mrb[148].mxu0  ;;  %24004 = vmatpush3.bf16.msra.mxu1 %v25932_v44 }
 0x5cd   :  { %v23682_v49 = vpop.f32.mrb[149].mxu0  ;;  %24005 = vmatprep.subr.bf16.mxu1 %v25935_v48 }
 0x5ce   :  { %v23683_v51 = vadd.f32 %v23682_v49, %v23681_v47  ;;  %v23684_v52 = vpop.f32.mrb[150].mxu0  ;;  %v23703_v53 = vpop.f32.mrb[148].mxu1  ;;  %23984 = vmatpush3.bf16.msra.mxu0 %v25934_v46  ;;  %v25968_v46 = vld [vmem:[#allocation5 + $0x2da8] sm:$0xff]   ;;  %v25969_v47 = vld [vmem:[#allocation5 + $0x2d70] sm:$0xff]  }
 0x5cf   :  { %v23685_v54 = vpop.f32.mrb[151].mxu0  ;;  %v23704_v55 = vpop.f32.mrb[149].mxu1  ;;  %23985 = vmatprep.subr.bf16.mxu0 %v25937_v56 }
 0x5d0   :  { %v18809_v58 = vadd.f32 %v23683_v51, %v26784_v17  ;;  %v23705_v59 = vadd.f32 %v23704_v55, %v23703_v53  ;;  %v23706_v61 = vpop.f32.mrb[150].mxu1  ;;  %24006 = vmatpush3.bf16.msra.mxu1 %v25936_v50  ;;  %v25949_v17 = vld [vmem:[#allocation5 + $0x2d48] sm:$0xff]   ;;  %v25970_v50 = vld [vmem:[#allocation5 + $0x2d30] sm:$0xff]  }
 0x5d1   :  { %v23707_v0 = vpop.f32.mrb[151].mxu1  ;;  %24007 = vmatprep.subr.bf16.mxu1 %v25939_v60  ;;  %v25971_v53 = vld [vmem:[#allocation5 + $0x2df0] sm:$0xff]   ;;  %v25975_v60 = vld [vmem:[#allocation5 + $0x2df8] sm:$0xff]  }
 0x5d2   :  { %v26789_v62 = vadd.f32 %v23705_v59, %v18809_v58  ;;  %23986 = vmatpush3.bf16.msra.mxu0 %v25938_v57  ;;  %v25972_v55 = vld [vmem:[#allocation5 + $0x2db0] sm:$0xff]   ;;  %v25973_v58 = vld [vmem:[#allocation5 + $0x2d78] sm:$0xff]   ;;  %v25979_v0 = vld [vmem:[#allocation5 + $0x2e00] sm:$0xff]  }
 0x5d3   :  { %23987 = vmatprep.subr.bf16.mxu0 %v25941_v1  ;;  %v25974_v59 = vld [vmem:[#allocation5 + $0x2d38] sm:$0xff]   ;;  %v25980_v1 = vld [vmem:[#allocation5 + $0x2ec0] sm:$0xff]  }
 0x5d4   :  { %24008 = vmatpush3.bf16.msra.mxu1 %v25940_v63  ;;  %v25977_v61 = vld [vmem:[#allocation5 + $0x2db8] sm:$0xff]   ;;  %v25978_v63 = vld [vmem:[#allocation5 + $0x2e40] sm:$0xff]  }
 0x5d5   :  { %24009 = vmatprep.subr.bf16.mxu1 %v25943_v3 }
 0x5d6   :  { %23988 = vmatpush3.bf16.msra.mxu0 %v25942_v2  ;;  %v25981_v2 = vld [vmem:[#allocation5 + $0x2e80] sm:$0xff]  }
 0x5d7   :  { %24017 = vmatprep.subr.bf16.mxu0 %v25945_v8  ;;  %v25986_v8 = vld [vmem:[#allocation5 + $0x2e50] sm:$0xff]  }
 0x5d8   :  { %24010 = vmatpush3.bf16.msra.mxu1 %v25944_v6  ;;  %v25984_v6 = vld [vmem:[#allocation5 + $0x2ec8] sm:$0xff]  }
 0x5d9   :  { %24039 = vmatprep.subr.bf16.mxu1 %v25947_v12  ;;  %19367 = vmatmul.mubr.bf16.vlgmr.msra.gmra.mrb[176].mxu0 %v4745_v10  ;;  %v25988_v10 = vld [vmem:[#allocation5 + $0x2ed0] sm:$0xff]   ;;  %v25990_v12 = vld [vmem:[#allocation5 + $0x2e58] sm:$0xff]  }
 0x5da   :  { %24018 = vmatpush3.bf16.msra.mxu0 %v25946_v14  ;;  %19446 = vmatprep.mubr.bf16.mxu0 %v4766_v20  ;;  %v25992_v14 = vld [vmem:[#allocation5 + $0x2ed8] sm:$0xff]   ;;  %v25998_v20 = vld [vmem:[#allocation5 + $0x2e68] sm:$0xff]  }
 0x5db   :  { %19407 = vmatmul.mubr.bf16.vlgmr.msra.gmra.mrb[176].mxu1 %v4767_v16  ;;  %24019 = vmatprep.subr.bf16.mxu0 %v25949_v17  ;;  %v25994_v16 = vld [vmem:[#allocation5 + $0x2e60] sm:$0xff]  }
 0x5dc   :  { %24040 = vmatpush3.bf16.msra.mxu1 %v25948_v19  ;;  %19486 = vmatprep.mubr.bf16.mxu1 %v4770_v23  ;;  %v25995_v17 = vld [vmem:[#allocation5 + $0x2e20] sm:$0xff]   ;;  %v26000_v23 = vld [vmem:[#allocation5 + $0x2ee8] sm:$0xff]  }
 0x5dd   :  { %24041 = vmatprep.subr.bf16.mxu1 %v25951_v21  ;;  %v25997_v19 = vld [vmem:[#allocation5 + $0x2ea0] sm:$0xff]   ;;  %v25999_v21 = vld [vmem:[#allocation5 + $0x2e28] sm:$0xff]  }
 0x5de   :  { %24020 = vmatpush3.bf16.msra.mxu0 %v25950_v22 }
 0x5df   :  { %24021 = vmatprep.subr.bf16.mxu0 %v25953_v24 }
 0x5e0   :  { %24042 = vmatpush3.bf16.msra.mxu1 %v25952_v25  ;;  %v26001_v25 = vld [vmem:[#allocation5 + $0x2ea8] sm:$0xff]  }
 0x5e1   :  { %24043 = vmatprep.subr.bf16.mxu1 %v25955_v26 }
 0x5e2   :  { %24022 = vmatpush3.bf16.msra.mxu0 %v25954_v27 }
 0x5e3   :  { %24023 = vmatprep.subr.bf16.mxu0 %v25957_v28 }
 0x5e4   :  { %24044 = vmatpush3.bf16.msra.mxu1 %v25956_v29 }
 0x5e5   :  { %24045 = vmatprep.subr.bf16.mxu1 %v25959_v30 }
 0x5e6   :  { %24024 = vmatpush3.bf16.msra.mxu0 %v25958_v31  ;;  %v26002_v31 = vld [vmem:[#allocation5 + $0x2e70] sm:$0xff]  }
 0x5e7   :  { %24025 = vmatprep.subr.bf16.mxu0 %v25961_v32  ;;  %v26003_v32 = vld [vmem:[#allocation5 + $0x2e30] sm:$0xff]  }
 0x5e8   :  { %24046 = vmatpush3.bf16.msra.mxu1 %v25960_v33 }
 0x5e9   :  { %24047 = vmatprep.subr.bf16.mxu1 %v25963_v35 }
 0x5ea   :  { %24026 = vmatpush3.bf16.msra.mxu0 %v25962_v36  ;;  %v26004_v36 = vld [vmem:[#allocation5 + $0x2ef0] sm:$0xff]  }
 0x5eb   :  { %24027 = vmatprep.subr.bf16.mxu0 %v25965_v37 }
 0x5ec   :  { %v23725_v39 = vpop.f32.mrb[152].mxu0  ;;  %24048 = vmatpush3.bf16.msra.mxu1 %v25964_v38 }
 0x5ed   :  { %v23726_v41 = vpop.f32.mrb[153].mxu0  ;;  %24049 = vmatprep.subr.bf16.mxu1 %v25967_v40 }
 0x5ee   :  { %v23727_v43 = vadd.f32 %v23726_v41, %v23725_v39  ;;  %v23728_v44 = vpop.f32.mrb[154].mxu0  ;;  %v23747_v45 = vpop.f32.mrb[152].mxu1  ;;  %24028 = vmatpush3.bf16.msra.mxu0 %v25966_v42  ;;  %v26005_v39 = vld [vmem:[#allocation5 + $0x2eb0] sm:$0xff]   ;;  %v26006_v41 = vld [vmem:[#allocation5 + $0x2e78] sm:$0xff]  }
 0x5ef   :  { %v23729_v48 = vpop.f32.mrb[155].mxu0  ;;  %v23748_v49 = vpop.f32.mrb[153].mxu1  ;;  %24029 = vmatprep.subr.bf16.mxu0 %v25969_v47  ;;  %v26007_v42 = vld [vmem:[#allocation5 + $0x2e38] sm:$0xff]  }
 0x5f0   :  { %v18889_v51 = vadd.f32 %v23727_v43, %v26789_v62  ;;  %v23749_v52 = vadd.f32 %v23748_v49, %v23747_v45  ;;  %v23750_v54 = vpop.f32.mrb[154].mxu1  ;;  %24050 = vmatpush3.bf16.msra.mxu1 %v25968_v46  ;;  %v4752_v62 = vrot.slane %v26794_v11, %v26434_v34  ;;  %v25989_v11 = vld [vmem:[#allocation5 + $0x2e90] sm:$0xff]   ;;  %v26008_v43 = vld [vmem:[#allocation5 + $0x2ef8] sm:$0xff]   ;;  %v26010_v48 = vld [vmem:[#allocation5 + $0x2f40] sm:$0xff]  }
 0x5f1   :  { %v23751_v56 = vpop.f32.mrb[155].mxu1  ;;  %24051 = vmatprep.subr.bf16.mxu1 %v25971_v53  ;;  %v76_v44 = vld [vmem:[#allocation2 + $0xb8] sm:$0xff] }
 0x5f2   :  { %v26801_v57 = vadd.f32 %v23749_v52, %v18889_v51  ;;  %24030 = vmatpush3.bf16.msra.mxu0 %v25970_v50  ;;  %v4768_v3 = vcombine.high %v4752_v62, %v4752_v62  ;;  %v4778_v45 = vrot.slane %v76_v44, %v26434_v34  ;;  %v26009_v46 = vld [vmem:[#allocation5 + $0x2eb8] sm:$0xff]   ;;  %v4771_v47 = vcombine.high %v76_v44, %v76_v44  ;;  %v26012_v52 = vld [vmem:[#allocation5 + $0x2fc0] sm:$0xff]   ;;  %v26047_v44 = vld [vmem:[#allocation5 + $0x3048] sm:$0xff]  }
 0x5f3   :  { %24031 = vmatprep.subr.bf16.mxu0 %v25973_v58  ;;  %v26011_v54 = vld [vmem:[#allocation5 + $0x2f00] sm:$0xff]  }
 0x5f4   :  { %24052 = vmatpush3.bf16.msra.mxu1 %v25972_v55  ;;  %v4786_v49 = vcombine.high %v4778_v45, %v4778_v45  ;;  %v4794_v50 = vrot.slane %v4778_v45, %v26434_v34  ;;  %v26811_v51 = vrot.slane %v4771_v47, %v26434_v34  ;;  %v26048_v45 = vld [vmem:[#allocation5 + $0x3008] sm:$0xff]  }
 0x5f5   :  { %24053 = vmatprep.subr.bf16.mxu1 %v25975_v60  ;;  %v26050_v47 = vld [vmem:[#allocation5 + $0x3088] sm:$0xff]  }
 0x5f6   :  { %24032 = vmatpush3.bf16.msra.mxu0 %v25974_v59  ;;  %v4808_v53 = vrot.slane %v4786_v49, %v26434_v34  ;;  %v4787_v55 = vcombine.high %v26811_v51, %v26811_v51  ;;  %v4816_v56 = vcombine.high %v4794_v50, %v4794_v50  ;;  %v26013_v59 = vld [vmem:[#allocation5 + $0x2f80] sm:$0xff]   ;;  %v26052_v49 = vld [vmem:[#allocation5 + $0x3010] sm:$0xff]  }
 0x5f7   :  { %24061 = vmatprep.subr.bf16.mxu0 %v25978_v63 }
 0x5f8   :  { %24054 = vmatpush3.bf16.msra.mxu1 %v25977_v61  ;;  %v4818_v58 = vcombine.high %v4808_v53, %v4808_v53  ;;  %v4815_v60 = vrot.slane %v4787_v55, %v26434_v34  ;;  %v26016_v61 = vld [vmem:[#allocation5 + $0x2fc8] sm:$0xff]   ;;  %v26058_v55 = vld [vmem:[#allocation5 + $0x3098] sm:$0xff]  }
 0x5f9   :  { %19447 = vmatmul.mubr.bf16.vlgmr.msra.gmra.mrb[180].mxu0 %v4752_v62  ;;  %24083 = vmatprep.subr.bf16.mxu1 %v25980_v1  ;;  %v26015_v62 = vld [vmem:[#allocation5 + $0x2f08] sm:$0xff]  }
 0x5fa   :  { %24062 = vmatpush3.bf16.msra.mxu0 %v25979_v0  ;;  %19526 = vmatprep.mubr.bf16.mxu0 %v4808_v53  ;;  %v4819_v63 = vcombine.high %v4815_v60, %v4815_v60  ;;  %v26018_v0 = vld [vmem:[#allocation5 + $0x2f50] sm:$0xff]   ;;  %v26017_v1 = vld [vmem:[#allocation5 + $0x2f88] sm:$0xff]   ;;  %v26056_v53 = vld [vmem:[#allocation5 + $0x3018] sm:$0xff]  }
 0x5fb   :  { %19487 = vmatmul.mubr.bf16.vlgmr.msra.gmra.mrb[180].mxu1 %v4768_v3  ;;  %24063 = vmatprep.subr.bf16.mxu0 %v25982_v4  ;;  %v26019_v3 = vld [vmem:[#allocation5 + $0x2f10] sm:$0xff]   ;;  %v26022_v4 = vld [vmem:[#allocation5 + $0x2f58] sm:$0xff]  }
 0x5fc   :  { %24084 = vmatpush3.bf16.msra.mxu1 %v25981_v2  ;;  %19566 = vmatprep.mubr.bf16.mxu1 %v4818_v58  ;;  %v26020_v2 = vld [vmem:[#allocation5 + $0x2fd0] sm:$0xff]   ;;  %v26061_v58 = vld [vmem:[#allocation5 + $0x30e0] sm:$0xff]  }
 0x5fd   :  { %24085 = vmatprep.subr.bf16.mxu1 %v25984_v6  ;;  %v26024_v6 = vld [vmem:[#allocation5 + $0x2fd8] sm:$0xff]  }
 0x5fe   :  { %24064 = vmatpush3.bf16.msra.mxu0 %v25983_v5  ;;  %v26021_v5 = vld [vmem:[#allocation5 + $0x2f90] sm:$0xff]  }
 0x5ff   :  { %24065 = vmatprep.subr.bf16.mxu0 %v25986_v8  ;;  %v26026_v8 = vld [vmem:[#allocation5 + $0x2f60] sm:$0xff]  }
 0x600   :  { %24086 = vmatpush3.bf16.msra.mxu1 %v25985_v7  ;;  %v26023_v7 = vld [vmem:[#allocation5 + $0x2f18] sm:$0xff]  }
 0x601   :  { %24087 = vmatprep.subr.bf16.mxu1 %v25988_v10  ;;  %v26028_v10 = vld [vmem:[#allocation5 + $0x2fe0] sm:$0xff]  }
 0x602   :  { %24066 = vmatpush3.bf16.msra.mxu0 %v25987_v9  ;;  %v26025_v9 = vld [vmem:[#allocation5 + $0x2f98] sm:$0xff]  }
 0x603   :  { %24067 = vmatprep.subr.bf16.mxu0 %v25990_v12  ;;  %v26030_v12 = vld [vmem:[#allocation5 + $0x2f68] sm:$0xff]  }
 0x604   :  { %24088 = vmatpush3.bf16.msra.mxu1 %v25989_v11  ;;  %v26027_v11 = vld [vmem:[#allocation5 + $0x2f20] sm:$0xff]  }
 0x605   :  { %24089 = vmatprep.subr.bf16.mxu1 %v25992_v14 }
 0x606   :  { %24068 = vmatpush3.bf16.msra.mxu0 %v25991_v13  ;;  %v26029_v13 = vld [vmem:[#allocation5 + $0x2fa0] sm:$0xff]  }
 0x607   :  { %24069 = vmatprep.subr.bf16.mxu0 %v25994_v16 }
 0x608   :  { %24090 = vmatpush3.bf16.msra.mxu1 %v25993_v15  ;;  %v26032_v15 = vld [vmem:[#allocation5 + $0x2fe8] sm:$0xff]  }
 0x609   :  { %24091 = vmatprep.subr.bf16.mxu1 %v25996_v18 }
 0x60a   :  { %24070 = vmatpush3.bf16.msra.mxu0 %v25995_v17  ;;  %v26031_v17 = vld [vmem:[#allocation5 + $0x2f28] sm:$0xff]  }
 0x60b   :  { %24071 = vmatprep.subr.bf16.mxu0 %v25998_v20 }
 0x60c   :  { %v23769_v22 = vpop.f32.mrb[156].mxu0  ;;  %24092 = vmatpush3.bf16.msra.mxu1 %v25997_v19 }
 0x60d   :  { %v23770_v24 = vpop.f32.mrb[157].mxu0  ;;  %24093 = vmatprep.subr.bf16.mxu1 %v26000_v23 }
 0x60e   :  { %v23771_v26 = vadd.f32 %v23770_v24, %v23769_v22  ;;  %v23772_v27 = vpop.f32.mrb[158].mxu0  ;;  %v23791_v28 = vpop.f32.mrb[156].mxu1  ;;  %24072 = vmatpush3.bf16.msra.mxu0 %v25999_v21  ;;  %v26033_v21 = vld [vmem:[#allocation5 + $0x2fa8] sm:$0xff]   ;;  %v26034_v22 = vld [vmem:[#allocation5 + $0x2f70] sm:$0xff]  }
 0x60f   :  { %v23773_v29 = vpop.f32.mrb[159].mxu0  ;;  %v23792_v30 = vpop.f32.mrb[157].mxu1  ;;  %24073 = vmatprep.subr.bf16.mxu0 %v26002_v31 }
 0x610   :  { %v18969_v33 = vadd.f32 %v23771_v26, %v26801_v57  ;;  %v23793_v35 = vadd.f32 %v23792_v30, %v23791_v28  ;;  %v23794_v37 = vpop.f32.mrb[158].mxu1  ;;  %24094 = vmatpush3.bf16.msra.mxu1 %v26001_v25  ;;  %v26014_v57 = vld [vmem:[#allocation5 + $0x2f48] sm:$0xff]   ;;  %v26035_v25 = vld [vmem:[#allocation5 + $0x2f30] sm:$0xff]  }
 0x611   :  { %v23795_v40 = vpop.f32.mrb[159].mxu1  ;;  %24095 = vmatprep.subr.bf16.mxu1 %v26004_v36  ;;  %v26036_v28 = vld [vmem:[#allocation5 + $0x2ff0] sm:$0xff]   ;;  %v26040_v36 = vld [vmem:[#allocation5 + $0x2ff8] sm:$0xff]  }
 0x612   :  { %v26806_v38 = vadd.f32 %v23793_v35, %v18969_v33  ;;  %24074 = vmatpush3.bf16.msra.mxu0 %v26003_v32  ;;  %v26037_v30 = vld [vmem:[#allocation5 + $0x2fb0] sm:$0xff]   ;;  %v26038_v33 = vld [vmem:[#allocation5 + $0x2f78] sm:$0xff]   ;;  %v26044_v40 = vld [vmem:[#allocation5 + $0x3000] sm:$0xff]  }
 0x613   :  { %24075 = vmatprep.subr.bf16.mxu0 %v26006_v41  ;;  %v26039_v35 = vld [vmem:[#allocation5 + $0x2f38] sm:$0xff]   ;;  %v26045_v41 = vld [vmem:[#allocation5 + $0x30c0] sm:$0xff]  }
 0x614   :  { %24096 = vmatpush3.bf16.msra.mxu1 %v26005_v39  ;;  %v26042_v37 = vld [vmem:[#allocation5 + $0x2fb8] sm:$0xff]   ;;  %v26043_v39 = vld [vmem:[#allocation5 + $0x3040] sm:$0xff]  }
 0x615   :  { %24097 = vmatprep.subr.bf16.mxu1 %v26008_v43 }
 0x616   :  { %24076 = vmatpush3.bf16.msra.mxu0 %v26007_v42  ;;  %v26046_v42 = vld [vmem:[#allocation5 + $0x3080] sm:$0xff]  }
 0x617   :  { %24105 = vmatprep.subr.bf16.mxu0 %v26010_v48  ;;  %v26051_v48 = vld [vmem:[#allocation5 + $0x3050] sm:$0xff]  }
 0x618   :  { %24098 = vmatpush3.bf16.msra.mxu1 %v26009_v46  ;;  %v26049_v46 = vld [vmem:[#allocation5 + $0x30c8] sm:$0xff]  }
 0x619   :  { %24127 = vmatprep.subr.bf16.mxu1 %v26012_v52  ;;  %19527 = vmatmul.mubr.bf16.vlgmr.msra.gmra.mrb[184].mxu0 %v4794_v50  ;;  %v26053_v50 = vld [vmem:[#allocation5 + $0x30d0] sm:$0xff]   ;;  %v26055_v52 = vld [vmem:[#allocation5 + $0x3058] sm:$0xff]  }
 0x61a   :  { %24106 = vmatpush3.bf16.msra.mxu0 %v26011_v54  ;;  %19606 = vmatprep.mubr.bf16.mxu0 %v4815_v60  ;;  %v26057_v54 = vld [vmem:[#allocation5 + $0x30d8] sm:$0xff]   ;;  %v26063_v60 = vld [vmem:[#allocation5 + $0x3068] sm:$0xff]  }
 0x61b   :  { %19567 = vmatmul.mubr.bf16.vlgmr.msra.gmra.mrb[184].mxu1 %v4816_v56  ;;  %24107 = vmatprep.subr.bf16.mxu0 %v26014_v57  ;;  %v26059_v56 = vld [vmem:[#allocation5 + $0x3060] sm:$0xff]  }
 0x61c   :  { %24128 = vmatpush3.bf16.msra.mxu1 %v26013_v59  ;;  %19646 = vmatprep.mubr.bf16.mxu1 %v4819_v63  ;;  %v26060_v57 = vld [vmem:[#allocation5 + $0x3020] sm:$0xff]   ;;  %v26065_v63 = vld [vmem:[#allocation5 + $0x30e8] sm:$0xff]  }
 0x61d   :  { %24129 = vmatprep.subr.bf16.mxu1 %v26016_v61  ;;  %v26062_v59 = vld [vmem:[#allocation5 + $0x30a0] sm:$0xff]   ;;  %v26064_v61 = vld [vmem:[#allocation5 + $0x3028] sm:$0xff]  }
 0x61e   :  { %24108 = vmatpush3.bf16.msra.mxu0 %v26015_v62 }
 0x61f   :  { %24109 = vmatprep.subr.bf16.mxu0 %v26018_v0 }
 0x620   :  { %24130 = vmatpush3.bf16.msra.mxu1 %v26017_v1  ;;  %v26066_v1 = vld [vmem:[#allocation5 + $0x30a8] sm:$0xff]  }
 0x621   :  { %24131 = vmatprep.subr.bf16.mxu1 %v26020_v2 }
 0x622   :  { %24110 = vmatpush3.bf16.msra.mxu0 %v26019_v3 }
 0x623   :  { %24111 = vmatprep.subr.bf16.mxu0 %v26022_v4 }
 0x624   :  { %24132 = vmatpush3.bf16.msra.mxu1 %v26021_v5 }
 0x625   :  { %24133 = vmatprep.subr.bf16.mxu1 %v26024_v6 }
 0x626   :  { %24112 = vmatpush3.bf16.msra.mxu0 %v26023_v7  ;;  %v26067_v7 = vld [vmem:[#allocation5 + $0x3070] sm:$0xff]  }
 0x627   :  { %24113 = vmatprep.subr.bf16.mxu0 %v26026_v8  ;;  %v26068_v8 = vld [vmem:[#allocation5 + $0x3030] sm:$0xff]  }
 0x628   :  { %24134 = vmatpush3.bf16.msra.mxu1 %v26025_v9 }
 0x629   :  { %24135 = vmatprep.subr.bf16.mxu1 %v26028_v10 }
 0x62a   :  { %24114 = vmatpush3.bf16.msra.mxu0 %v26027_v11  ;;  %v26069_v11 = vld [vmem:[#allocation5 + $0x30f0] sm:$0xff]  }
 0x62b   :  { %24115 = vmatprep.subr.bf16.mxu0 %v26030_v12 }
 0x62c   :  { %v23813_v14 = vpop.f32.mrb[160].mxu0  ;;  %24136 = vmatpush3.bf16.msra.mxu1 %v26029_v13 }
 0x62d   :  { %v23814_v16 = vpop.f32.mrb[161].mxu0  ;;  %24137 = vmatprep.subr.bf16.mxu1 %v26032_v15 }
 0x62e   :  { %v23815_v18 = vadd.f32 %v23814_v16, %v23813_v14  ;;  %v23816_v19 = vpop.f32.mrb[162].mxu0  ;;  %v23835_v20 = vpop.f32.mrb[160].mxu1  ;;  %24116 = vmatpush3.bf16.msra.mxu0 %v26031_v17  ;;  %v26070_v14 = vld [vmem:[#allocation5 + $0x30b0] sm:$0xff]   ;;  %v26071_v16 = vld [vmem:[#allocation5 + $0x3078] sm:$0xff]  }
 0x62f   :  { %v23817_v23 = vpop.f32.mrb[163].mxu0  ;;  %v23836_v24 = vpop.f32.mrb[161].mxu1  ;;  %24117 = vmatprep.subr.bf16.mxu0 %v26034_v22  ;;  %v26072_v17 = vld [vmem:[#allocation5 + $0x3038] sm:$0xff]   ;;  %v77_v19 = vld [vmem:[#allocation2 + $0xc0] sm:$0xff] }
 0x630   :  { %v19049_v26 = vadd.f32 %v23815_v18, %v26806_v38  ;;  %v23837_v27 = vadd.f32 %v23836_v24, %v23835_v20  ;;  %v23838_v29 = vpop.f32.mrb[162].mxu1  ;;  %24138 = vmatpush3.bf16.msra.mxu1 %v26033_v21  ;;  %v4801_v38 = vrot.slane %v26811_v51, %v26434_v34  ;;  %v26054_v51 = vld [vmem:[#allocation5 + $0x3090] sm:$0xff]   ;;  %v26073_v18 = vld [vmem:[#allocation5 + $0x30f8] sm:$0xff]   ;;  %v4827_v20 = vrot.slane %v77_v19, %v26434_v34  ;;  %v26075_v23 = vld [vmem:[#allocation5 + $0x3140] sm:$0xff]  }
 0x631   :  { %v23839_v31 = vpop.f32.mrb[163].mxu1  ;;  %24139 = vmatprep.subr.bf16.mxu1 %v26036_v28  ;;  %v26074_v21 = vld [vmem:[#allocation5 + $0x30b8] sm:$0xff]   ;;  %v4820_v22 = vcombine.high %v77_v19, %v77_v19  ;;  %v26076_v29 = vld [vmem:[#allocation5 + $0x3100] sm:$0xff]   ;;  %v26112_v19 = vld [vmem:[#allocation5 + $0x3248] sm:$0xff]  }
 0x632   :  { %v26818_v32 = vadd.f32 %v23837_v27, %v19049_v26  ;;  %24118 = vmatpush3.bf16.msra.mxu0 %v26035_v25  ;;  %v4817_v43 = vcombine.high %v4801_v38, %v4801_v38  ;;  %v4835_v24 = vcombine.high %v4827_v20, %v4827_v20  ;;  %v4843_v25 = vrot.slane %v4827_v20, %v26434_v34  ;;  %v26077_v27 = vld [vmem:[#allocation5 + $0x31c0] sm:$0xff]   ;;  %v26113_v20 = vld [vmem:[#allocation5 + $0x3208] sm:$0xff]  }
 0x633   :  { %24119 = vmatprep.subr.bf16.mxu0 %v26038_v33  ;;  %v26828_v26 = vrot.slane %v4820_v22, %v26434_v34  ;;  %v26115_v22 = vld [vmem:[#allocation5 + $0x3288] sm:$0xff]  }
 0x634   :  { %24140 = vmatpush3.bf16.msra.mxu1 %v26037_v30  ;;  %v4857_v28 = vrot.slane %v4835_v24, %v26434_v34  ;;  %v4865_v31 = vcombine.high %v4843_v25, %v4843_v25  ;;  %v26117_v24 = vld [vmem:[#allocation5 + $0x3210] sm:$0xff]  }
 0x635   :  { %24141 = vmatprep.subr.bf16.mxu1 %v26040_v36  ;;  %v4836_v30 = vcombine.high %v26828_v26, %v26828_v26 }
 0x636   :  { %24120 = vmatpush3.bf16.msra.mxu0 %v26039_v35  ;;  %v4867_v33 = vcombine.high %v4857_v28, %v4857_v28  ;;  %v26078_v35 = vld [vmem:[#allocation5 + $0x3180] sm:$0xff]  }
 0x637   :  { %24149 = vmatprep.subr.bf16.mxu0 %v26043_v39  ;;  %v4864_v36 = vrot.slane %v4836_v30, %v26434_v34  ;;  %v26123_v30 = vld [vmem:[#allocation5 + $0x3298] sm:$0xff]  }
 0x638   :  { %24142 = vmatpush3.bf16.msra.mxu1 %v26042_v37  ;;  %v26081_v37 = vld [vmem:[#allocation5 + $0x31c8] sm:$0xff]  }
 0x639   :  { %19607 = vmatmul.mubr.bf16.vlgmr.msra.gmra.mrb[188].mxu0 %v4801_v38  ;;  %24171 = vmatprep.subr.bf16.mxu1 %v26045_v41  ;;  %v26080_v38 = vld [vmem:[#allocation5 + $0x3108] sm:$0xff]   ;;  %v4868_v39 = vcombine.high %v4864_v36, %v4864_v36 }
 0x63a   :  { %24150 = vmatpush3.bf16.msra.mxu0 %v26044_v40  ;;  %19686 = vmatprep.mubr.bf16.mxu0 %v4857_v28  ;;  %v26083_v40 = vld [vmem:[#allocation5 + $0x3150] sm:$0xff]   ;;  %v26082_v41 = vld [vmem:[#allocation5 + $0x3188] sm:$0xff]   ;;  %v26121_v28 = vld [vmem:[#allocation5 + $0x3218] sm:$0xff]  }
 0x63b   :  { %19647 = vmatmul.mubr.bf16.vlgmr.msra.gmra.mrb[188].mxu1 %v4817_v43  ;;  %24151 = vmatprep.subr.bf16.mxu0 %v26047_v44  ;;  %v26084_v43 = vld [vmem:[#allocation5 + $0x3110] sm:$0xff]   ;;  %v26087_v44 = vld [vmem:[#allocation5 + $0x3158] sm:$0xff]  }
 0x63c   :  { %24172 = vmatpush3.bf16.msra.mxu1 %v26046_v42  ;;  %19726 = vmatprep.mubr.bf16.mxu1 %v4867_v33  ;;  %v26085_v42 = vld [vmem:[#allocation5 + $0x31d0] sm:$0xff]   ;;  %v26126_v33 = vld [vmem:[#allocation5 + $0x32e0] sm:$0xff]  }
 0x63d   :  { %24173 = vmatprep.subr.bf16.mxu1 %v26049_v46  ;;  %v26089_v46 = vld [vmem:[#allocation5 + $0x31d8] sm:$0xff]  }
 0x63e   :  { %24152 = vmatpush3.bf16.msra.mxu0 %v26048_v45  ;;  %v26086_v45 = vld [vmem:[#allocation5 + $0x3190] sm:$0xff]  }
 0x63f   :  { %24153 = vmatprep.subr.bf16.mxu0 %v26051_v48  ;;  %v26091_v48 = vld [vmem:[#allocation5 + $0x3160] sm:$0xff]  }
 0x640   :  { %24174 = vmatpush3.bf16.msra.mxu1 %v26050_v47  ;;  %v26088_v47 = vld [vmem:[#allocation5 + $0x3118] sm:$0xff]  }
 0x641   :  { %24175 = vmatprep.subr.bf16.mxu1 %v26053_v50  ;;  %v26093_v50 = vld [vmem:[#allocation5 + $0x31e0] sm:$0xff]  }
 0x642   :  { %24154 = vmatpush3.bf16.msra.mxu0 %v26052_v49  ;;  %v26090_v49 = vld [vmem:[#allocation5 + $0x3198] sm:$0xff]  }
 0x643   :  { %24155 = vmatprep.subr.bf16.mxu0 %v26055_v52  ;;  %v26095_v52 = vld [vmem:[#allocation5 + $0x3168] sm:$0xff]  }
 0x644   :  { %24176 = vmatpush3.bf16.msra.mxu1 %v26054_v51  ;;  %v26092_v51 = vld [vmem:[#allocation5 + $0x3120] sm:$0xff]  }
 0x645   :  { %24177 = vmatprep.subr.bf16.mxu1 %v26057_v54 }
 0x646   :  { %24156 = vmatpush3.bf16.msra.mxu0 %v26056_v53  ;;  %v26094_v53 = vld [vmem:[#allocation5 + $0x31a0] sm:$0xff]  }
 0x647   :  { %24157 = vmatprep.subr.bf16.mxu0 %v26059_v56 }
 0x648   :  { %24178 = vmatpush3.bf16.msra.mxu1 %v26058_v55  ;;  %v26097_v55 = vld [vmem:[#allocation5 + $0x31e8] sm:$0xff]  }
 0x649   :  { %24179 = vmatprep.subr.bf16.mxu1 %v26061_v58 }
 0x64a   :  { %24158 = vmatpush3.bf16.msra.mxu0 %v26060_v57  ;;  %v26096_v57 = vld [vmem:[#allocation5 + $0x3128] sm:$0xff]  }
 0x64b   :  { %24159 = vmatprep.subr.bf16.mxu0 %v26063_v60 }
 0x64c   :  { %v23857_v62 = vpop.f32.mrb[164].mxu0  ;;  %24180 = vmatpush3.bf16.msra.mxu1 %v26062_v59 }
 0x64d   :  { %v23858_v0 = vpop.f32.mrb[165].mxu0  ;;  %24181 = vmatprep.subr.bf16.mxu1 %v26065_v63 }
 0x64e   :  { %v23859_v2 = vadd.f32 %v23858_v0, %v23857_v62  ;;  %v23860_v3 = vpop.f32.mrb[166].mxu0  ;;  %v23879_v4 = vpop.f32.mrb[164].mxu1  ;;  %24160 = vmatpush3.bf16.msra.mxu0 %v26064_v61  ;;  %v26098_v61 = vld [vmem:[#allocation5 + $0x31a8] sm:$0xff]   ;;  %v26099_v62 = vld [vmem:[#allocation5 + $0x3170] sm:$0xff]  }
 0x64f   :  { %v23861_v5 = vpop.f32.mrb[167].mxu0  ;;  %v23880_v6 = vpop.f32.mrb[165].mxu1  ;;  %24161 = vmatprep.subr.bf16.mxu0 %v26067_v7 }
 0x650   :  { %v19129_v9 = vadd.f32 %v23859_v2, %v26818_v32  ;;  %v23881_v10 = vadd.f32 %v23880_v6, %v23879_v4  ;;  %v23882_v12 = vpop.f32.mrb[166].mxu1  ;;  %24182 = vmatpush3.bf16.msra.mxu1 %v26066_v1  ;;  %v26079_v32 = vld [vmem:[#allocation5 + $0x3148] sm:$0xff]   ;;  %v26100_v1 = vld [vmem:[#allocation5 + $0x3130] sm:$0xff]  }
 0x651   :  { %v23883_v15 = vpop.f32.mrb[167].mxu1  ;;  %24183 = vmatprep.subr.bf16.mxu1 %v26069_v11  ;;  %v26101_v4 = vld [vmem:[#allocation5 + $0x31f0] sm:$0xff]   ;;  %v26105_v11 = vld [vmem:[#allocation5 + $0x31f8] sm:$0xff]  }
 0x652   :  { %v26823_v13 = vadd.f32 %v23881_v10, %v19129_v9  ;;  %24162 = vmatpush3.bf16.msra.mxu0 %v26068_v8  ;;  %v26102_v6 = vld [vmem:[#allocation5 + $0x31b0] sm:$0xff]   ;;  %v26103_v9 = vld [vmem:[#allocation5 + $0x3178] sm:$0xff]   ;;  %v26109_v15 = vld [vmem:[#allocation5 + $0x3200] sm:$0xff]  }
 0x653   :  { %24163 = vmatprep.subr.bf16.mxu0 %v26071_v16  ;;  %v26104_v10 = vld [vmem:[#allocation5 + $0x3138] sm:$0xff]   ;;  %v26110_v16 = vld [vmem:[#allocation5 + $0x32c0] sm:$0xff]  }
 0x654   :  { %24184 = vmatpush3.bf16.msra.mxu1 %v26070_v14  ;;  %v26107_v12 = vld [vmem:[#allocation5 + $0x31b8] sm:$0xff]   ;;  %v26108_v14 = vld [vmem:[#allocation5 + $0x3240] sm:$0xff]  }
 0x655   :  { %24185 = vmatprep.subr.bf16.mxu1 %v26073_v18 }
 0x656   :  { %24164 = vmatpush3.bf16.msra.mxu0 %v26072_v17  ;;  %v26111_v17 = vld [vmem:[#allocation5 + $0x3280] sm:$0xff]  }
 0x657   :  { %24193 = vmatprep.subr.bf16.mxu0 %v26075_v23  ;;  %v26116_v23 = vld [vmem:[#allocation5 + $0x3250] sm:$0xff]  }
 0x658   :  { %24186 = vmatpush3.bf16.msra.mxu1 %v26074_v21  ;;  %v26114_v21 = vld [vmem:[#allocation5 + $0x32c8] sm:$0xff]  }
 0x659   :  { %24215 = vmatprep.subr.bf16.mxu1 %v26077_v27  ;;  %19687 = vmatmul.mubr.bf16.vlgmr.msra.gmra.mrb[192].mxu0 %v4843_v25  ;;  %v26118_v25 = vld [vmem:[#allocation5 + $0x32d0] sm:$0xff]   ;;  %v26120_v27 = vld [vmem:[#allocation5 + $0x3258] sm:$0xff]  }
 0x65a   :  { %24194 = vmatpush3.bf16.msra.mxu0 %v26076_v29  ;;  %19766 = vmatprep.mubr.bf16.mxu0 %v4864_v36  ;;  %v26122_v29 = vld [vmem:[#allocation5 + $0x32d8] sm:$0xff]   ;;  %v26128_v36 = vld [vmem:[#allocation5 + $0x3268] sm:$0xff]  }
 0x65b   :  { %19727 = vmatmul.mubr.bf16.vlgmr.msra.gmra.mrb[192].mxu1 %v4865_v31  ;;  %24195 = vmatprep.subr.bf16.mxu0 %v26079_v32  ;;  %v26124_v31 = vld [vmem:[#allocation5 + $0x3260] sm:$0xff]  }
 0x65c   :  { %24216 = vmatpush3.bf16.msra.mxu1 %v26078_v35  ;;  %19806 = vmatprep.mubr.bf16.mxu1 %v4868_v39  ;;  %v26125_v32 = vld [vmem:[#allocation5 + $0x3220] sm:$0xff]   ;;  %v26130_v39 = vld [vmem:[#allocation5 + $0x32e8] sm:$0xff]  }
 0x65d   :  { %24217 = vmatprep.subr.bf16.mxu1 %v26081_v37  ;;  %v26127_v35 = vld [vmem:[#allocation5 + $0x32a0] sm:$0xff]   ;;  %v26129_v37 = vld [vmem:[#allocation5 + $0x3228] sm:$0xff]  }
 0x65e   :  { %24196 = vmatpush3.bf16.msra.mxu0 %v26080_v38 }
 0x65f   :  { %24197 = vmatprep.subr.bf16.mxu0 %v26083_v40 }
 0x660   :  { %24218 = vmatpush3.bf16.msra.mxu1 %v26082_v41  ;;  %v26131_v41 = vld [vmem:[#allocation5 + $0x32a8] sm:$0xff]  }
 0x661   :  { %24219 = vmatprep.subr.bf16.mxu1 %v26085_v42 }
 0x662   :  { %24198 = vmatpush3.bf16.msra.mxu0 %v26084_v43 }
 0x663   :  { %24199 = vmatprep.subr.bf16.mxu0 %v26087_v44 }
 0x664   :  { %24220 = vmatpush3.bf16.msra.mxu1 %v26086_v45 }
 0x665   :  { %24221 = vmatprep.subr.bf16.mxu1 %v26089_v46 }
 0x666   :  { %24200 = vmatpush3.bf16.msra.mxu0 %v26088_v47  ;;  %v26132_v47 = vld [vmem:[#allocation5 + $0x3270] sm:$0xff]  }
 0x667   :  { %24201 = vmatprep.subr.bf16.mxu0 %v26091_v48  ;;  %v26133_v48 = vld [vmem:[#allocation5 + $0x3230] sm:$0xff]  }
 0x668   :  { %24222 = vmatpush3.bf16.msra.mxu1 %v26090_v49 }
 0x669   :  { %24223 = vmatprep.subr.bf16.mxu1 %v26093_v50 }
 0x66a   :  { %24202 = vmatpush3.bf16.msra.mxu0 %v26092_v51  ;;  %v26134_v51 = vld [vmem:[#allocation5 + $0x32f0] sm:$0xff]  }
 0x66b   :  { %24203 = vmatprep.subr.bf16.mxu0 %v26095_v52 }
 0x66c   :  { %v23901_v54 = vpop.f32.mrb[168].mxu0  ;;  %24224 = vmatpush3.bf16.msra.mxu1 %v26094_v53 }
 0x66d   :  { %v23902_v56 = vpop.f32.mrb[169].mxu0  ;;  %24225 = vmatprep.subr.bf16.mxu1 %v26097_v55 }
 0x66e   :  { %v23903_v58 = vadd.f32 %v23902_v56, %v23901_v54  ;;  %v23904_v59 = vpop.f32.mrb[170].mxu0  ;;  %v23923_v60 = vpop.f32.mrb[168].mxu1  ;;  %24204 = vmatpush3.bf16.msra.mxu0 %v26096_v57  ;;  %v26135_v54 = vld [vmem:[#allocation5 + $0x32b0] sm:$0xff]   ;;  %v26136_v56 = vld [vmem:[#allocation5 + $0x3278] sm:$0xff]  }
 0x66f   :  { %v23905_v63 = vpop.f32.mrb[171].mxu0  ;;  %v23924_v0 = vpop.f32.mrb[169].mxu1  ;;  %24205 = vmatprep.subr.bf16.mxu0 %v26099_v62  ;;  %v26137_v57 = vld [vmem:[#allocation5 + $0x3238] sm:$0xff]   ;;  %v78_v59 = vld [vmem:[#allocation2 + $0xc8] sm:$0xff] }
 0x670   :  { %v19209_v2 = vadd.f32 %v23903_v58, %v26823_v13  ;;  %v23925_v3 = vadd.f32 %v23924_v0, %v23923_v60  ;;  %v23926_v5 = vpop.f32.mrb[170].mxu1  ;;  %24226 = vmatpush3.bf16.msra.mxu1 %v26098_v61  ;;  %v4850_v13 = vrot.slane %v26828_v26, %v26434_v34  ;;  %v26119_v26 = vld [vmem:[#allocation5 + $0x3290] sm:$0xff]   ;;  %v26138_v58 = vld [vmem:[#allocation5 + $0x32f8] sm:$0xff]   ;;  %v4876_v60 = vrot.slane %v78_v59, %v26434_v34  ;;  %v26140_v63 = vld [vmem:[#allocation5 + $0x3340] sm:$0xff]  }
 0x671   :  { %v23927_v7 = vpop.f32.mrb[171].mxu1  ;;  %24227 = vmatprep.subr.bf16.mxu1 %v26101_v4  ;;  %v26139_v61 = vld [vmem:[#allocation5 + $0x32b8] sm:$0xff]   ;;  %v4869_v62 = vcombine.high %v78_v59, %v78_v59  ;;  %v26141_v5 = vld [vmem:[#allocation5 + $0x3300] sm:$0xff]   ;;  %v26177_v59 = vld [vmem:[#allocation5 + $0x3448] sm:$0xff]  }
 0x672   :  { %v26835_v8 = vadd.f32 %v23925_v3, %v19209_v2  ;;  %24206 = vmatpush3.bf16.msra.mxu0 %v26100_v1  ;;  %v4866_v18 = vcombine.high %v4850_v13, %v4850_v13  ;;  %v4884_v0 = vcombine.high %v4876_v60, %v4876_v60  ;;  %v4892_v1 = vrot.slane %v4876_v60, %v26434_v34  ;;  %v26142_v3 = vld [vmem:[#allocation5 + $0x33c0] sm:$0xff]   ;;  %v26178_v60 = vld [vmem:[#allocation5 + $0x3408] sm:$0xff]  }
 0x673   :  { %24207 = vmatprep.subr.bf16.mxu0 %v26103_v9  ;;  %v26845_v2 = vrot.slane %v4869_v62, %v26434_v34  ;;  %v26180_v62 = vld [vmem:[#allocation5 + $0x3488] sm:$0xff]  }
 0x674   :  { %24228 = vmatpush3.bf16.msra.mxu1 %v26102_v6  ;;  %v4906_v4 = vrot.slane %v4884_v0, %v26434_v34  ;;  %v4914_v7 = vcombine.high %v4892_v1, %v4892_v1  ;;  %v26182_v0 = vld [vmem:[#allocation5 + $0x3410] sm:$0xff]  }
 0x675   :  { %24229 = vmatprep.subr.bf16.mxu1 %v26105_v11  ;;  %v4885_v6 = vcombine.high %v26845_v2, %v26845_v2 }
 0x676   :  { %24208 = vmatpush3.bf16.msra.mxu0 %v26104_v10  ;;  %v4916_v9 = vcombine.high %v4906_v4, %v4906_v4  ;;  %v26143_v10 = vld [vmem:[#allocation5 + $0x3380] sm:$0xff]  }
 0x677   :  { %24237 = vmatprep.subr.bf16.mxu0 %v26108_v14  ;;  %v4913_v11 = vrot.slane %v4885_v6, %v26434_v34  ;;  %v26188_v6 = vld [vmem:[#allocation5 + $0x3498] sm:$0xff]  }
 0x678   :  { %24230 = vmatpush3.bf16.msra.mxu1 %v26107_v12  ;;  %v26146_v12 = vld [vmem:[#allocation5 + $0x33c8] sm:$0xff]  }
 0x679   :  { %19767 = vmatmul.mubr.bf16.vlgmr.msra.gmra.mrb[196].mxu0 %v4850_v13  ;;  %24259 = vmatprep.subr.bf16.mxu1 %v26110_v16  ;;  %v26145_v13 = vld [vmem:[#allocation5 + $0x3308] sm:$0xff]   ;;  %v4917_v14 = vcombine.high %v4913_v11, %v4913_v11 }
 0x67a   :  { %24238 = vmatpush3.bf16.msra.mxu0 %v26109_v15  ;;  %19846 = vmatprep.mubr.bf16.mxu0 %v4906_v4  ;;  %v26148_v15 = vld [vmem:[#allocation5 + $0x3350] sm:$0xff]   ;;  %v26147_v16 = vld [vmem:[#allocation5 + $0x3388] sm:$0xff]   ;;  %v26186_v4 = vld [vmem:[#allocation5 + $0x3418] sm:$0xff]  }
 0x67b   :  { %19807 = vmatmul.mubr.bf16.vlgmr.msra.gmra.mrb[196].mxu1 %v4866_v18  ;;  %24239 = vmatprep.subr.bf16.mxu0 %v26112_v19  ;;  %v26149_v18 = vld [vmem:[#allocation5 + $0x3310] sm:$0xff]   ;;  %v26152_v19 = vld [vmem:[#allocation5 + $0x3358] sm:$0xff]  }
 0x67c   :  { %24260 = vmatpush3.bf16.msra.mxu1 %v26111_v17  ;;  %19886 = vmatprep.mubr.bf16.mxu1 %v4916_v9  ;;  %v26150_v17 = vld [vmem:[#allocation5 + $0x33d0] sm:$0xff]   ;;  %v26191_v9 = vld [vmem:[#allocation5 + $0x34e0] sm:$0xff]  }
 0x67d   :  { %24261 = vmatprep.subr.bf16.mxu1 %v26114_v21  ;;  %v26154_v21 = vld [vmem:[#allocation5 + $0x33d8] sm:$0xff]  }
 0x67e   :  { %24240 = vmatpush3.bf16.msra.mxu0 %v26113_v20  ;;  %v26151_v20 = vld [vmem:[#allocation5 + $0x3390] sm:$0xff]  }
 0x67f   :  { %24241 = vmatprep.subr.bf16.mxu0 %v26116_v23  ;;  %v26156_v23 = vld [vmem:[#allocation5 + $0x3360] sm:$0xff]  }
 0x680   :  { %24262 = vmatpush3.bf16.msra.mxu1 %v26115_v22  ;;  %v26153_v22 = vld [vmem:[#allocation5 + $0x3318] sm:$0xff]  }
 0x681   :  { %24263 = vmatprep.subr.bf16.mxu1 %v26118_v25  ;;  %v26158_v25 = vld [vmem:[#allocation5 + $0x33e0] sm:$0xff]  }
 0x682   :  { %24242 = vmatpush3.bf16.msra.mxu0 %v26117_v24  ;;  %v26155_v24 = vld [vmem:[#allocation5 + $0x3398] sm:$0xff]  }
 0x683   :  { %24243 = vmatprep.subr.bf16.mxu0 %v26120_v27  ;;  %v26160_v27 = vld [vmem:[#allocation5 + $0x3368] sm:$0xff]  }
 0x684   :  { %24264 = vmatpush3.bf16.msra.mxu1 %v26119_v26  ;;  %v26157_v26 = vld [vmem:[#allocation5 + $0x3320] sm:$0xff]  }
 0x685   :  { %24265 = vmatprep.subr.bf16.mxu1 %v26122_v29 }
 0x686   :  { %24244 = vmatpush3.bf16.msra.mxu0 %v26121_v28  ;;  %v26159_v28 = vld [vmem:[#allocation5 + $0x33a0] sm:$0xff]  }
 0x687   :  { %24245 = vmatprep.subr.bf16.mxu0 %v26124_v31 }
 0x688   :  { %24266 = vmatpush3.bf16.msra.mxu1 %v26123_v30  ;;  %v26162_v30 = vld [vmem:[#allocation5 + $0x33e8] sm:$0xff]  }
 0x689   :  { %24267 = vmatprep.subr.bf16.mxu1 %v26126_v33 }
 0x68a   :  { %24246 = vmatpush3.bf16.msra.mxu0 %v26125_v32  ;;  %v26161_v32 = vld [vmem:[#allocation5 + $0x3328] sm:$0xff]  }
 0x68b   :  { %24247 = vmatprep.subr.bf16.mxu0 %v26128_v36 }
 0x68c   :  { %v23945_v38 = vpop.f32.mrb[172].mxu0  ;;  %24268 = vmatpush3.bf16.msra.mxu1 %v26127_v35 }
 0x68d   :  { %v23946_v40 = vpop.f32.mrb[173].mxu0  ;;  %24269 = vmatprep.subr.bf16.mxu1 %v26130_v39 }
 0x68e   :  { %v23947_v42 = vadd.f32 %v23946_v40, %v23945_v38  ;;  %v23948_v43 = vpop.f32.mrb[174].mxu0  ;;  %v23967_v44 = vpop.f32.mrb[172].mxu1  ;;  %24248 = vmatpush3.bf16.msra.mxu0 %v26129_v37  ;;  %v26163_v37 = vld [vmem:[#allocation5 + $0x33a8] sm:$0xff]   ;;  %v26164_v38 = vld [vmem:[#allocation5 + $0x3370] sm:$0xff]  }
 0x68f   :  { %v23949_v45 = vpop.f32.mrb[175].mxu0  ;;  %v23968_v46 = vpop.f32.mrb[173].mxu1  ;;  %24249 = vmatprep.subr.bf16.mxu0 %v26132_v47 }
 0x690   :  { %v19289_v49 = vadd.f32 %v23947_v42, %v26835_v8  ;;  %v23969_v50 = vadd.f32 %v23968_v46, %v23967_v44  ;;  %v23970_v52 = vpop.f32.mrb[174].mxu1  ;;  %24270 = vmatpush3.bf16.msra.mxu1 %v26131_v41  ;;  %v26144_v8 = vld [vmem:[#allocation5 + $0x3348] sm:$0xff]   ;;  %v26165_v41 = vld [vmem:[#allocation5 + $0x3330] sm:$0xff]  }
 0x691   :  { %v23971_v55 = vpop.f32.mrb[175].mxu1  ;;  %24271 = vmatprep.subr.bf16.mxu1 %v26134_v51  ;;  %v26166_v44 = vld [vmem:[#allocation5 + $0x33f0] sm:$0xff]   ;;  %v26170_v51 = vld [vmem:[#allocation5 + $0x33f8] sm:$0xff]  }
 0x692   :  { %v26840_v53 = vadd.f32 %v23969_v50, %v19289_v49  ;;  %24250 = vmatpush3.bf16.msra.mxu0 %v26133_v48  ;;  %v26167_v46 = vld [vmem:[#allocation5 + $0x33b0] sm:$0xff]   ;;  %v26168_v49 = vld [vmem:[#allocation5 + $0x3378] sm:$0xff]   ;;  %v26174_v55 = vld [vmem:[#allocation5 + $0x3400] sm:$0xff]  }
 0x693   :  { %24251 = vmatprep.subr.bf16.mxu0 %v26136_v56  ;;  %v26169_v50 = vld [vmem:[#allocation5 + $0x3338] sm:$0xff]   ;;  %v26175_v56 = vld [vmem:[#allocation5 + $0x34c0] sm:$0xff]  }
 0x694   :  { %24272 = vmatpush3.bf16.msra.mxu1 %v26135_v54  ;;  %v26172_v52 = vld [vmem:[#allocation5 + $0x33b8] sm:$0xff]   ;;  %v26173_v54 = vld [vmem:[#allocation5 + $0x3440] sm:$0xff]  }
 0x695   :  { %24273 = vmatprep.subr.bf16.mxu1 %v26138_v58 }
 0x696   :  { %24252 = vmatpush3.bf16.msra.mxu0 %v26137_v57  ;;  %v26176_v57 = vld [vmem:[#allocation5 + $0x3480] sm:$0xff]  }
 0x697   :  { %24281 = vmatprep.subr.bf16.mxu0 %v26140_v63  ;;  %v26181_v63 = vld [vmem:[#allocation5 + $0x3450] sm:$0xff]  }
 0x698   :  { %24274 = vmatpush3.bf16.msra.mxu1 %v26139_v61  ;;  %v26179_v61 = vld [vmem:[#allocation5 + $0x34c8] sm:$0xff]  }
 0x699   :  { %24303 = vmatprep.subr.bf16.mxu1 %v26142_v3  ;;  %19847 = vmatmul.mubr.bf16.vlgmr.msra.gmra.mrb[200].mxu0 %v4892_v1  ;;  %v26183_v1 = vld [vmem:[#allocation5 + $0x34d0] sm:$0xff]   ;;  %v26185_v3 = vld [vmem:[#allocation5 + $0x3458] sm:$0xff]  }
 0x69a   :  { %24282 = vmatpush3.bf16.msra.mxu0 %v26141_v5  ;;  %19926 = vmatprep.mubr.bf16.mxu0 %v4913_v11  ;;  %v26187_v5 = vld [vmem:[#allocation5 + $0x34d8] sm:$0xff]   ;;  %v26193_v11 = vld [vmem:[#allocation5 + $0x3468] sm:$0xff]  }
 0x69b   :  { %19887 = vmatmul.mubr.bf16.vlgmr.msra.gmra.mrb[200].mxu1 %v4914_v7  ;;  %24283 = vmatprep.subr.bf16.mxu0 %v26144_v8  ;;  %v26189_v7 = vld [vmem:[#allocation5 + $0x3460] sm:$0xff]  }
 0x69c   :  { %24304 = vmatpush3.bf16.msra.mxu1 %v26143_v10  ;;  %19966 = vmatprep.mubr.bf16.mxu1 %v4917_v14  ;;  %v26190_v8 = vld [vmem:[#allocation5 + $0x3420] sm:$0xff]   ;;  %v26195_v14 = vld [vmem:[#allocation5 + $0x34e8] sm:$0xff]  }
 0x69d   :  { %24305 = vmatprep.subr.bf16.mxu1 %v26146_v12  ;;  %v26192_v10 = vld [vmem:[#allocation5 + $0x34a0] sm:$0xff]   ;;  %v26194_v12 = vld [vmem:[#allocation5 + $0x3428] sm:$0xff]  }
 0x69e   :  { %24284 = vmatpush3.bf16.msra.mxu0 %v26145_v13 }
 0x69f   :  { %24285 = vmatprep.subr.bf16.mxu0 %v26148_v15 }
 0x6a0   :  { %24306 = vmatpush3.bf16.msra.mxu1 %v26147_v16  ;;  %v26196_v16 = vld [vmem:[#allocation5 + $0x34a8] sm:$0xff]  }
 0x6a1   :  { %24307 = vmatprep.subr.bf16.mxu1 %v26150_v17 }
 0x6a2   :  { %24286 = vmatpush3.bf16.msra.mxu0 %v26149_v18 }
 0x6a3   :  { %24287 = vmatprep.subr.bf16.mxu0 %v26152_v19 }
 0x6a4   :  { %24308 = vmatpush3.bf16.msra.mxu1 %v26151_v20 }
 0x6a5   :  { %24309 = vmatprep.subr.bf16.mxu1 %v26154_v21 }
 0x6a6   :  { %24288 = vmatpush3.bf16.msra.mxu0 %v26153_v22  ;;  %v26197_v22 = vld [vmem:[#allocation5 + $0x3470] sm:$0xff]  }
 0x6a7   :  { %24289 = vmatprep.subr.bf16.mxu0 %v26156_v23  ;;  %v26198_v23 = vld [vmem:[#allocation5 + $0x3430] sm:$0xff]  }
 0x6a8   :  { %24310 = vmatpush3.bf16.msra.mxu1 %v26155_v24 }
 0x6a9   :  { %24311 = vmatprep.subr.bf16.mxu1 %v26158_v25 }
 0x6aa   :  { %24290 = vmatpush3.bf16.msra.mxu0 %v26157_v26  ;;  %v26199_v26 = vld [vmem:[#allocation5 + $0x34f0] sm:$0xff]  }
 0x6ab   :  { %24291 = vmatprep.subr.bf16.mxu0 %v26160_v27 }
 0x6ac   :  { %v23989_v29 = vpop.f32.mrb[176].mxu0  ;;  %24312 = vmatpush3.bf16.msra.mxu1 %v26159_v28 }
 0x6ad   :  { %v23990_v31 = vpop.f32.mrb[177].mxu0  ;;  %24313 = vmatprep.subr.bf16.mxu1 %v26162_v30 }
 0x6ae   :  { %v23991_v33 = vadd.f32 %v23990_v31, %v23989_v29  ;;  %v23992_v35 = vpop.f32.mrb[178].mxu0  ;;  %v24011_v36 = vpop.f32.mrb[176].mxu1  ;;  %24292 = vmatpush3.bf16.msra.mxu0 %v26161_v32  ;;  %v26200_v29 = vld [vmem:[#allocation5 + $0x34b0] sm:$0xff]   ;;  %v26201_v31 = vld [vmem:[#allocation5 + $0x3478] sm:$0xff]  }
 0x6af   :  { %v23993_v39 = vpop.f32.mrb[179].mxu0  ;;  %v24012_v40 = vpop.f32.mrb[177].mxu1  ;;  %24293 = vmatprep.subr.bf16.mxu0 %v26164_v38  ;;  %v26202_v32 = vld [vmem:[#allocation5 + $0x3438] sm:$0xff]  }
 0x6b0   :  { %v19369_v42 = vadd.f32 %v23991_v33, %v26840_v53  ;;  %v24013_v43 = vadd.f32 %v24012_v40, %v24011_v36  ;;  %v24014_v45 = vpop.f32.mrb[178].mxu1  ;;  %24314 = vmatpush3.bf16.msra.mxu1 %v26163_v37  ;;  %v4899_v53 = vrot.slane %v26845_v2, %v26434_v34  ;;  %v26184_v2 = vld [vmem:[#allocation5 + $0x3490] sm:$0xff]   ;;  %v26203_v33 = vld [vmem:[#allocation5 + $0x34f8] sm:$0xff]   ;;  %v26205_v39 = vld [vmem:[#allocation5 + $0x3540] sm:$0xff]  }
 0x6b1   :  { %v24015_v47 = vpop.f32.mrb[179].mxu1  ;;  %24315 = vmatprep.subr.bf16.mxu1 %v26166_v44  ;;  %v79_v35 = vld [vmem:[#allocation2 + $0xd0] sm:$0xff]  ;;  %v26206_v45 = vld [vmem:[#allocation5 + $0x3500] sm:$0xff]  }
 0x6b2   :  { %v26852_v48 = vadd.f32 %v24013_v43, %v19369_v42  ;;  %24294 = vmatpush3.bf16.msra.mxu0 %v26165_v41  ;;  %v4915_v58 = vcombine.high %v4899_v53, %v4899_v53  ;;  %v4925_v36 = vrot.slane %v79_v35, %v26434_v34  ;;  %v26204_v37 = vld [vmem:[#allocation5 + $0x34b8] sm:$0xff]   ;;  %v4918_v38 = vcombine.high %v79_v35, %v79_v35  ;;  %v26207_v43 = vld [vmem:[#allocation5 + $0x35c0] sm:$0xff]   ;;  %v26242_v35 = vld [vmem:[#allocation5 + $0x3648] sm:$0xff]  }
 0x6b3   :  { %24295 = vmatprep.subr.bf16.mxu0 %v26168_v49 }
 0x6b4   :  { %24316 = vmatpush3.bf16.msra.mxu1 %v26167_v46  ;;  %v4933_v40 = vcombine.high %v4925_v36, %v4925_v36  ;;  %v4941_v41 = vrot.slane %v4925_v36, %v26434_v34  ;;  %v26862_v42 = vrot.slane %v4918_v38, %v26434_v34  ;;  %v26243_v36 = vld [vmem:[#allocation5 + $0x3608] sm:$0xff]  }
 0x6b5   :  { %24317 = vmatprep.subr.bf16.mxu1 %v26170_v51  ;;  %v26245_v38 = vld [vmem:[#allocation5 + $0x3688] sm:$0xff]  }
 0x6b6   :  { %24296 = vmatpush3.bf16.msra.mxu0 %v26169_v50  ;;  %v4955_v44 = vrot.slane %v4933_v40, %v26434_v34  ;;  %v4934_v46 = vcombine.high %v26862_v42, %v26862_v42  ;;  %v4963_v47 = vcombine.high %v4941_v41, %v4941_v41  ;;  %v26208_v50 = vld [vmem:[#allocation5 + $0x3580] sm:$0xff]   ;;  %v26247_v40 = vld [vmem:[#allocation5 + $0x3610] sm:$0xff]  }
 0x6b7   :  { %24325 = vmatprep.subr.bf16.mxu0 %v26173_v54 }
 0x6b8   :  { %24318 = vmatpush3.bf16.msra.mxu1 %v26172_v52  ;;  %v4965_v49 = vcombine.high %v4955_v44, %v4955_v44  ;;  %v4962_v51 = vrot.slane %v4934_v46, %v26434_v34  ;;  %v26211_v52 = vld [vmem:[#allocation5 + $0x35c8] sm:$0xff]   ;;  %v26253_v46 = vld [vmem:[#allocation5 + $0x3698] sm:$0xff]  }
 0x6b9   :  { %19927 = vmatmul.mubr.bf16.vlgmr.msra.gmra.mrb[204].mxu0 %v4899_v53  ;;  %24347 = vmatprep.subr.bf16.mxu1 %v26175_v56  ;;  %v26210_v53 = vld [vmem:[#allocation5 + $0x3508] sm:$0xff]  }
 0x6ba   :  { %24326 = vmatpush3.bf16.msra.mxu0 %v26174_v55  ;;  %20006 = vmatprep.mubr.bf16.mxu0 %v4955_v44  ;;  %v4966_v54 = vcombine.high %v4962_v51, %v4962_v51  ;;  %v26213_v55 = vld [vmem:[#allocation5 + $0x3550] sm:$0xff]   ;;  %v26212_v56 = vld [vmem:[#allocation5 + $0x3588] sm:$0xff]   ;;  %v26251_v44 = vld [vmem:[#allocation5 + $0x3618] sm:$0xff]  }
 0x6bb   :  { %19967 = vmatmul.mubr.bf16.vlgmr.msra.gmra.mrb[204].mxu1 %v4915_v58  ;;  %24327 = vmatprep.subr.bf16.mxu0 %v26177_v59  ;;  %v26214_v58 = vld [vmem:[#allocation5 + $0x3510] sm:$0xff]   ;;  %v26217_v59 = vld [vmem:[#allocation5 + $0x3558] sm:$0xff]  }
 0x6bc   :  { %24348 = vmatpush3.bf16.msra.mxu1 %v26176_v57  ;;  %20046 = vmatprep.mubr.bf16.mxu1 %v4965_v49  ;;  %v26215_v57 = vld [vmem:[#allocation5 + $0x35d0] sm:$0xff]   ;;  %v26256_v49 = vld [vmem:[#allocation5 + $0x36e0] sm:$0xff]  }
 0x6bd   :  { %24349 = vmatprep.subr.bf16.mxu1 %v26179_v61  ;;  %v26219_v61 = vld [vmem:[#allocation5 + $0x35d8] sm:$0xff]  }
 0x6be   :  { %24328 = vmatpush3.bf16.msra.mxu0 %v26178_v60  ;;  %v26216_v60 = vld [vmem:[#allocation5 + $0x3590] sm:$0xff]  }
 0x6bf   :  { %24329 = vmatprep.subr.bf16.mxu0 %v26181_v63  ;;  %v26221_v63 = vld [vmem:[#allocation5 + $0x3560] sm:$0xff]  }
 0x6c0   :  { %24350 = vmatpush3.bf16.msra.mxu1 %v26180_v62  ;;  %v26218_v62 = vld [vmem:[#allocation5 + $0x3518] sm:$0xff]  }
 0x6c1   :  { %24351 = vmatprep.subr.bf16.mxu1 %v26183_v1  ;;  %v26223_v1 = vld [vmem:[#allocation5 + $0x35e0] sm:$0xff]  }
 0x6c2   :  { %24330 = vmatpush3.bf16.msra.mxu0 %v26182_v0  ;;  %v26220_v0 = vld [vmem:[#allocation5 + $0x3598] sm:$0xff]  }
 0x6c3   :  { %24331 = vmatprep.subr.bf16.mxu0 %v26185_v3  ;;  %v26225_v3 = vld [vmem:[#allocation5 + $0x3568] sm:$0xff]  }
 0x6c4   :  { %24352 = vmatpush3.bf16.msra.mxu1 %v26184_v2  ;;  %v26222_v2 = vld [vmem:[#allocation5 + $0x3520] sm:$0xff]  }
 0x6c5   :  { %24353 = vmatprep.subr.bf16.mxu1 %v26187_v5 }
 0x6c6   :  { %24332 = vmatpush3.bf16.msra.mxu0 %v26186_v4  ;;  %v26224_v4 = vld [vmem:[#allocation5 + $0x35a0] sm:$0xff]  }
 0x6c7   :  { %24333 = vmatprep.subr.bf16.mxu0 %v26189_v7 }
 0x6c8   :  { %24354 = vmatpush3.bf16.msra.mxu1 %v26188_v6  ;;  %v26227_v6 = vld [vmem:[#allocation5 + $0x35e8] sm:$0xff]  }
 0x6c9   :  { %24355 = vmatprep.subr.bf16.mxu1 %v26191_v9 }
 0x6ca   :  { %24334 = vmatpush3.bf16.msra.mxu0 %v26190_v8  ;;  %v26226_v8 = vld [vmem:[#allocation5 + $0x3528] sm:$0xff]  }
 0x6cb   :  { %24335 = vmatprep.subr.bf16.mxu0 %v26193_v11 }
 0x6cc   :  { %v24033_v13 = vpop.f32.mrb[180].mxu0  ;;  %24356 = vmatpush3.bf16.msra.mxu1 %v26192_v10 }
 0x6cd   :  { %v24034_v15 = vpop.f32.mrb[181].mxu0  ;;  %24357 = vmatprep.subr.bf16.mxu1 %v26195_v14 }
 0x6ce   :  { %v24035_v17 = vadd.f32 %v24034_v15, %v24033_v13  ;;  %v24036_v18 = vpop.f32.mrb[182].mxu0  ;;  %v24055_v19 = vpop.f32.mrb[180].mxu1  ;;  %24336 = vmatpush3.bf16.msra.mxu0 %v26194_v12  ;;  %v26228_v12 = vld [vmem:[#allocation5 + $0x35a8] sm:$0xff]   ;;  %v26229_v13 = vld [vmem:[#allocation5 + $0x3570] sm:$0xff]  }
 0x6cf   :  { %v24037_v20 = vpop.f32.mrb[183].mxu0  ;;  %v24056_v21 = vpop.f32.mrb[181].mxu1  ;;  %24337 = vmatprep.subr.bf16.mxu0 %v26197_v22 }
 0x6d0   :  { %v19449_v24 = vadd.f32 %v24035_v17, %v26852_v48  ;;  %v24057_v25 = vadd.f32 %v24056_v21, %v24055_v19  ;;  %v24058_v27 = vpop.f32.mrb[182].mxu1  ;;  %24358 = vmatpush3.bf16.msra.mxu1 %v26196_v16  ;;  %v26209_v48 = vld [vmem:[#allocation5 + $0x3548] sm:$0xff]   ;;  %v26230_v16 = vld [vmem:[#allocation5 + $0x3530] sm:$0xff]  }
 0x6d1   :  { %v24059_v30 = vpop.f32.mrb[183].mxu1  ;;  %24359 = vmatprep.subr.bf16.mxu1 %v26199_v26  ;;  %v26231_v19 = vld [vmem:[#allocation5 + $0x35f0] sm:$0xff]   ;;  %v26235_v26 = vld [vmem:[#allocation5 + $0x35f8] sm:$0xff]  }
 0x6d2   :  { %v26857_v28 = vadd.f32 %v24057_v25, %v19449_v24  ;;  %24338 = vmatpush3.bf16.msra.mxu0 %v26198_v23  ;;  %v26232_v21 = vld [vmem:[#allocation5 + $0x35b0] sm:$0xff]   ;;  %v26233_v24 = vld [vmem:[#allocation5 + $0x3578] sm:$0xff]   ;;  %v26239_v30 = vld [vmem:[#allocation5 + $0x3600] sm:$0xff]  }
 0x6d3   :  { %24339 = vmatprep.subr.bf16.mxu0 %v26201_v31  ;;  %v26234_v25 = vld [vmem:[#allocation5 + $0x3538] sm:$0xff]   ;;  %v26240_v31 = vld [vmem:[#allocation5 + $0x36c0] sm:$0xff]  }
 0x6d4   :  { %24360 = vmatpush3.bf16.msra.mxu1 %v26200_v29  ;;  %v26237_v27 = vld [vmem:[#allocation5 + $0x35b8] sm:$0xff]   ;;  %v26238_v29 = vld [vmem:[#allocation5 + $0x3640] sm:$0xff]  }
 0x6d5   :  { %24361 = vmatprep.subr.bf16.mxu1 %v26203_v33 }
 0x6d6   :  { %24340 = vmatpush3.bf16.msra.mxu0 %v26202_v32  ;;  %v26241_v32 = vld [vmem:[#allocation5 + $0x3680] sm:$0xff]  }
 0x6d7   :  { %24369 = vmatprep.subr.bf16.mxu0 %v26205_v39  ;;  %v26246_v39 = vld [vmem:[#allocation5 + $0x3650] sm:$0xff]  }
 0x6d8   :  { %24362 = vmatpush3.bf16.msra.mxu1 %v26204_v37  ;;  %v26244_v37 = vld [vmem:[#allocation5 + $0x36c8] sm:$0xff]  }
 0x6d9   :  { %24391 = vmatprep.subr.bf16.mxu1 %v26207_v43  ;;  %20007 = vmatmul.mubr.bf16.vlgmr.msra.gmra.mrb[208].mxu0 %v4941_v41  ;;  %v26248_v41 = vld [vmem:[#allocation5 + $0x36d0] sm:$0xff]   ;;  %v26250_v43 = vld [vmem:[#allocation5 + $0x3658] sm:$0xff]  }
 0x6da   :  { %24370 = vmatpush3.bf16.msra.mxu0 %v26206_v45  ;;  %20086 = vmatprep.mubr.bf16.mxu0 %v4962_v51  ;;  %v26252_v45 = vld [vmem:[#allocation5 + $0x36d8] sm:$0xff]   ;;  %v26258_v51 = vld [vmem:[#allocation5 + $0x3668] sm:$0xff]  }
 0x6db   :  { %20047 = vmatmul.mubr.bf16.vlgmr.msra.gmra.mrb[208].mxu1 %v4963_v47  ;;  %24371 = vmatprep.subr.bf16.mxu0 %v26209_v48  ;;  %v26254_v47 = vld [vmem:[#allocation5 + $0x3660] sm:$0xff]  }
 0x6dc   :  { %24392 = vmatpush3.bf16.msra.mxu1 %v26208_v50  ;;  %20126 = vmatprep.mubr.bf16.mxu1 %v4966_v54  ;;  %v26255_v48 = vld [vmem:[#allocation5 + $0x3620] sm:$0xff]   ;;  %v26260_v54 = vld [vmem:[#allocation5 + $0x36e8] sm:$0xff]  }
 0x6dd   :  { %24393 = vmatprep.subr.bf16.mxu1 %v26211_v52  ;;  %v26257_v50 = vld [vmem:[#allocation5 + $0x36a0] sm:$0xff]   ;;  %v26259_v52 = vld [vmem:[#allocation5 + $0x3628] sm:$0xff]  }
 0x6de   :  { %24372 = vmatpush3.bf16.msra.mxu0 %v26210_v53 }
 0x6df   :  { %24373 = vmatprep.subr.bf16.mxu0 %v26213_v55 }
 0x6e0   :  { %24394 = vmatpush3.bf16.msra.mxu1 %v26212_v56  ;;  %v26261_v56 = vld [vmem:[#allocation5 + $0x36a8] sm:$0xff]  }
 0x6e1   :  { %24395 = vmatprep.subr.bf16.mxu1 %v26215_v57 }
 0x6e2   :  { %24374 = vmatpush3.bf16.msra.mxu0 %v26214_v58 }
 0x6e3   :  { %24375 = vmatprep.subr.bf16.mxu0 %v26217_v59 }
 0x6e4   :  { %24396 = vmatpush3.bf16.msra.mxu1 %v26216_v60 }
 0x6e5   :  { %24397 = vmatprep.subr.bf16.mxu1 %v26219_v61 }
 0x6e6   :  { %24376 = vmatpush3.bf16.msra.mxu0 %v26218_v62  ;;  %v26262_v62 = vld [vmem:[#allocation5 + $0x3670] sm:$0xff]  }
 0x6e7   :  { %24377 = vmatprep.subr.bf16.mxu0 %v26221_v63  ;;  %v26263_v63 = vld [vmem:[#allocation5 + $0x3630] sm:$0xff]  }
 0x6e8   :  { %24398 = vmatpush3.bf16.msra.mxu1 %v26220_v0 }
 0x6e9   :  { %24399 = vmatprep.subr.bf16.mxu1 %v26223_v1 }
 0x6ea   :  { %24378 = vmatpush3.bf16.msra.mxu0 %v26222_v2  ;;  %v26264_v2 = vld [vmem:[#allocation5 + $0x36f0] sm:$0xff]  }
 0x6eb   :  { %24379 = vmatprep.subr.bf16.mxu0 %v26225_v3 }
 0x6ec   :  { %v24077_v5 = vpop.f32.mrb[184].mxu0  ;;  %24400 = vmatpush3.bf16.msra.mxu1 %v26224_v4 }
 0x6ed   :  { %v24078_v7 = vpop.f32.mrb[185].mxu0  ;;  %24401 = vmatprep.subr.bf16.mxu1 %v26227_v6 }
 0x6ee   :  { %v24079_v9 = vadd.f32 %v24078_v7, %v24077_v5  ;;  %v24080_v10 = vpop.f32.mrb[186].mxu0  ;;  %v24099_v11 = vpop.f32.mrb[184].mxu1  ;;  %24380 = vmatpush3.bf16.msra.mxu0 %v26226_v8  ;;  %v26265_v5 = vld [vmem:[#allocation5 + $0x36b0] sm:$0xff]   ;;  %v26266_v7 = vld [vmem:[#allocation5 + $0x3678] sm:$0xff]  }
 0x6ef   :  { %v24081_v14 = vpop.f32.mrb[187].mxu0  ;;  %v24100_v15 = vpop.f32.mrb[185].mxu1  ;;  %24381 = vmatprep.subr.bf16.mxu0 %v26229_v13  ;;  %v26267_v8 = vld [vmem:[#allocation5 + $0x3638] sm:$0xff]  }
 0x6f0   :  { %v19529_v17 = vadd.f32 %v24079_v9, %v26857_v28  ;;  %v24101_v18 = vadd.f32 %v24100_v15, %v24099_v11  ;;  %v24102_v20 = vpop.f32.mrb[186].mxu1  ;;  %24402 = vmatpush3.bf16.msra.mxu1 %v26228_v12  ;;  %v4948_v28 = vrot.slane %v26862_v42, %v26434_v34  ;;  %v26249_v42 = vld [vmem:[#allocation5 + $0x3690] sm:$0xff]   ;;  %v26268_v9 = vld [vmem:[#allocation5 + $0x36f8] sm:$0xff]  }
 0x6f1   :  { %v24103_v22 = vpop.f32.mrb[187].mxu1  ;;  %24403 = vmatprep.subr.bf16.mxu1 %v26231_v19  ;;  %v80_v10 = vld [vmem:[#allocation2 + $0xd8] sm:$0x1f]  ;;  %v26272_v20 = vld [vmem:[#allocation5 + $0x3708] sm:$0xff]  }
 0x6f2   :  { %v26869_v23 = vadd.f32 %v24101_v18, %v19529_v17  ;;  %24382 = vmatpush3.bf16.msra.mxu0 %v26230_v16  ;;  %v4964_v33 = vcombine.high %v4948_v28, %v4948_v28  ;;  %v4974_v11 = vrot.slane %v80_v10, %v26434_v34  ;;  %v26270_v12 = vld [vmem:[#allocation5 + $0x36b8] sm:$0xff]   ;;  %v26375_v16 = vmov 0.0   ;;  %v26271_v17 = vld [vmem:[#allocation5 + $0x3700] sm:$0xff]   ;;  %v26273_v22 = vld [vmem:[#allocation5 + $0x3710] sm:$0xff]  }
 0x6f3   :  { %24383 = vmatprep.subr.bf16.mxu0 %v26233_v24  ;;  %v26274_v24 = vld [vmem:[#allocation5 + $0x3718] sm:$0xff]  }
 0x6f4   :  { %24404 = vmatpush3.bf16.msra.mxu1 %v26232_v21  ;;  %v4982_v13 = vcombine.high %v4974_v11, %v4974_v11  ;;  %v4989_v14 = vrot.slane %v4974_v11, %v26434_v34  ;;  %v4967_v21 = vcombine.high %v80_v10, %v80_v10 }
 0x6f5   :  { %24405 = vmatprep.subr.bf16.mxu1 %v26235_v26 }
 0x6f6   :  { %24384 = vmatpush3.bf16.msra.mxu0 %v26234_v25  ;;  %v5003_v15 = vrot.slane %v4982_v13, %v26434_v34  ;;  %v5004_v18 = vcombine.high %v4989_v14, %v4989_v14 }
 0x6f7   :  { %24413 = vmatprep.subr.bf16.mxu0 %v26238_v29 }
 0x6f8   :  { %24406 = vmatpush3.bf16.msra.mxu1 %v26237_v27  ;;  %v5005_v19 = vcombine.high %v5003_v15, %v5003_v15 }
 0x6f9   :  { %20087 = vmatmul.mubr.bf16.vlgmr.msra.gmra.mrb[212].mxu0 %v4948_v28  ;;  %24435 = vmatprep.subr.bf16.mxu1 %v26240_v31 }
 0x6fa   :  { %24414 = vmatpush3.bf16.msra.mxu0 %v26239_v30  ;;  %20166 = vmatprep.mubr.bf16.mxu0 %v5003_v15 }
 0x6fb   :  { %20127 = vmatmul.mubr.bf16.vlgmr.msra.gmra.mrb[212].mxu1 %v4964_v33  ;;  %24415 = vmatprep.subr.bf16.mxu0 %v26242_v35 }
 0x6fc   :  { %24436 = vmatpush3.bf16.msra.mxu1 %v26241_v32  ;;  %20206 = vmatprep.mubr.bf16.mxu1 %v5005_v19 }
 0x6fd   :  { %24437 = vmatprep.subr.bf16.mxu1 %v26244_v37 }
 0x6fe   :  { %24416 = vmatpush3.bf16.msra.mxu0 %v26243_v36 }
 0x6ff   :  { %24417 = vmatprep.subr.bf16.mxu0 %v26246_v39 }
 0x700   :  { %24438 = vmatpush3.bf16.msra.mxu1 %v26245_v38 }
 0x701   :  { %24439 = vmatprep.subr.bf16.mxu1 %v26248_v41 }
 0x702   :  { %24418 = vmatpush3.bf16.msra.mxu0 %v26247_v40 }
 0x703   :  { %24419 = vmatprep.subr.bf16.mxu0 %v26250_v43 }
 0x704   :  { %24440 = vmatpush3.bf16.msra.mxu1 %v26249_v42 }
 0x705   :  { %24441 = vmatprep.subr.bf16.mxu1 %v26252_v45 }
 0x706   :  { %24420 = vmatpush3.bf16.msra.mxu0 %v26251_v44 }
 0x707   :  { %24421 = vmatprep.subr.bf16.mxu0 %v26254_v47 }
 0x708   :  { %24442 = vmatpush3.bf16.msra.mxu1 %v26253_v46 }
 0x709   :  { %24443 = vmatprep.subr.bf16.mxu1 %v26256_v49 }
 0x70a   :  { %24422 = vmatpush3.bf16.msra.mxu0 %v26255_v48 }
 0x70b   :  { %24423 = vmatprep.subr.bf16.mxu0 %v26258_v51 }
 0x70c   :  { %v24121_v53 = vpop.f32.mrb[188].mxu0  ;;  %24444 = vmatpush3.bf16.msra.mxu1 %v26257_v50 }
 0x70d   :  { %v24122_v55 = vpop.f32.mrb[189].mxu0  ;;  %24445 = vmatprep.subr.bf16.mxu1 %v26260_v54 }
 0x70e   :  { %v24123_v57 = vadd.f32 %v24122_v55, %v24121_v53  ;;  %v24124_v58 = vpop.f32.mrb[190].mxu0  ;;  %v24143_v59 = vpop.f32.mrb[188].mxu1  ;;  %24424 = vmatpush3.bf16.msra.mxu0 %v26259_v52 }
 0x70f   :  { %v24125_v60 = vpop.f32.mrb[191].mxu0  ;;  %v24144_v61 = vpop.f32.mrb[189].mxu1  ;;  %24425 = vmatprep.subr.bf16.mxu0 %v26262_v62 }
 0x710   :  { %v19609_v0 = vadd.f32 %v24123_v57, %v26869_v23  ;;  %v24145_v1 = vadd.f32 %v24144_v61, %v24143_v59  ;;  %v24146_v3 = vpop.f32.mrb[190].mxu1  ;;  %24446 = vmatpush3.bf16.msra.mxu1 %v26261_v56  ;;  %v4981_v23 = vrot.slane %v4967_v21, %v26434_v34 }
 0x711   :  { %v24147_v6 = vpop.f32.mrb[191].mxu1  ;;  %24447 = vmatprep.subr.bf16.mxu1 %v26264_v2 }
 0x712   :  { %v19649_v4 = vadd.f32 %v24145_v1, %v19609_v0  ;;  %24426 = vmatpush3.bf16.msra.mxu0 %v26263_v63  ;;  %v4996_v25 = vrot.slane %v4981_v23, %v26434_v34 }
 0x713   :  { %24427 = vmatprep.subr.bf16.mxu0 %v26266_v7 }
 0x714   :  { %24448 = vmatpush3.bf16.msra.mxu1 %v26265_v5 }
 0x715   :  { %24449 = vmatprep.subr.bf16.mxu1 %v26268_v9 }
 0x716   :  { %24428 = vmatpush3.bf16.msra.mxu0 %v26267_v8 }
 0x717   :  { %24462 = vmatprep.subr.bf16.mxu0 %v26375_v16 }
 0x718   :  { %24450 = vmatpush3.bf16.msra.mxu1 %v26270_v12 }
 0x719   :  { %20167 = vmatmul.mubr.bf16.vlgmr.msra.gmra.mrb[216].mxu0 %v4989_v14 }
 0x71a   :  { %24463 = vmatpush3.bf16.msra.mxu0 %v26271_v17  ;;  %24470 = vmatprep.mubr.msk.bf16.mxu0 %vm26376_vm0, %v26375_v16 }
 0x71b   :  { %20207 = vmatmul.mubr.bf16.vlgmr.msra.gmra.mrb[216].mxu1 %v5004_v18  ;;  %24464 = vmatprep.subr.bf16.mxu0 %v26375_v16 }
 0x71e   :  { %24465 = vmatpush3.bf16.msra.mxu0 %v26272_v20 }
 0x71f   :  { %24466 = vmatprep.subr.bf16.mxu0 %v26375_v16 }
 0x722   :  { %24467 = vmatpush3.bf16.msra.mxu0 %v26273_v22 }
 0x723   :  { %24468 = vmatprep.subr.bf16.mxu0 %v26375_v16 }
 0x726   :  { %24469 = vmatpush3.bf16.msra.mxu0 %v26274_v24 }
 0x729   :  { %24471 = vmatmul.mubr.msk.bf16.vlgmr.msra.gmra.mrb[220].mxu0 %vm15810_vm1, %v4996_v25 }
 0x72c   :  { %v24165_v26 = vpop.f32.mrb[192].mxu0 }
 0x72d   :  { %v24166_v27 = vpop.f32.mrb[193].mxu0 }
 0x72e   :  { %v24167_v28 = vadd.f32 %v24166_v27, %v24165_v26  ;;  %v24168_v29 = vpop.f32.mrb[194].mxu0  ;;  %v24187_v30 = vpop.f32.mrb[192].mxu1 }
 0x72f   :  { %v24169_v31 = vpop.f32.mrb[195].mxu0  ;;  %v24188_v32 = vpop.f32.mrb[193].mxu1 }
 0x730   :  { %v19689_v33 = vadd.f32 %v24167_v28, %v19649_v4  ;;  %v24189_v35 = vadd.f32 %v24188_v32, %v24187_v30  ;;  %v24190_v36 = vpop.f32.mrb[194].mxu1 }
 0x731   :  { %v24191_v37 = vpop.f32.mrb[195].mxu1 }
 0x732   :  { %v19729_v38 = vadd.f32 %v24189_v35, %v19689_v33 }
 0x74c   :  { %v24209_v39 = vpop.f32.mrb[196].mxu0 }
 0x74d   :  { %v24210_v40 = vpop.f32.mrb[197].mxu0 }
 0x74e   :  { %v24211_v41 = vadd.f32 %v24210_v40, %v24209_v39  ;;  %v24212_v42 = vpop.f32.mrb[198].mxu0  ;;  %v24231_v34 = vpop.f32.mrb[196].mxu1 }
 0x74f   :  { %v24213_v43 = vpop.f32.mrb[199].mxu0  ;;  %v24232_v44 = vpop.f32.mrb[197].mxu1 }
 0x750   :  { %v19769_v45 = vadd.f32 %v24211_v41, %v19729_v38  ;;  %v24233_v46 = vadd.f32 %v24232_v44, %v24231_v34  ;;  %v24234_v47 = vpop.f32.mrb[198].mxu1 }
 0x751   :  { %v24235_v48 = vpop.f32.mrb[199].mxu1 }
 0x752   :  { %v19809_v49 = vadd.f32 %v24233_v46, %v19769_v45 }
 0x76c   :  { %v24253_v50 = vpop.f32.mrb[200].mxu0 }
 0x76d   :  { %v24254_v51 = vpop.f32.mrb[201].mxu0 }
 0x76e   :  { %v24255_v52 = vadd.f32 %v24254_v51, %v24253_v50  ;;  %v24256_v53 = vpop.f32.mrb[202].mxu0  ;;  %v24275_v54 = vpop.f32.mrb[200].mxu1 }
 0x76f   :  { %v24257_v55 = vpop.f32.mrb[203].mxu0  ;;  %v24276_v56 = vpop.f32.mrb[201].mxu1 }
 0x770   :  { %v19849_v57 = vadd.f32 %v24255_v52, %v19809_v49  ;;  %v24277_v58 = vadd.f32 %v24276_v56, %v24275_v54  ;;  %v24278_v59 = vpop.f32.mrb[202].mxu1 }
 0x771   :  { %v24279_v60 = vpop.f32.mrb[203].mxu1 }
 0x772   :  { %v19889_v61 = vadd.f32 %v24277_v58, %v19849_v57 }
 0x78c   :  { %v24297_v62 = vpop.f32.mrb[204].mxu0 }
 0x78d   :  { %v24298_v63 = vpop.f32.mrb[205].mxu0 }
 0x78e   :  { %v24299_v0 = vadd.f32 %v24298_v63, %v24297_v62  ;;  %v24300_v1 = vpop.f32.mrb[206].mxu0  ;;  %v24319_v2 = vpop.f32.mrb[204].mxu1 }
 0x78f   :  { %v24301_v3 = vpop.f32.mrb[207].mxu0  ;;  %v24320_v4 = vpop.f32.mrb[205].mxu1 }
 0x790   :  { %v19929_v5 = vadd.f32 %v24299_v0, %v19889_v61  ;;  %v24321_v6 = vadd.f32 %v24320_v4, %v24319_v2  ;;  %v24322_v7 = vpop.f32.mrb[206].mxu1 }
 0x791   :  { %v24323_v8 = vpop.f32.mrb[207].mxu1 }
 0x792   :  { %v19969_v9 = vadd.f32 %v24321_v6, %v19929_v5 }
 0x7ac   :  { %v24341_v10 = vpop.f32.mrb[208].mxu0 }
 0x7ad   :  { %v24342_v11 = vpop.f32.mrb[209].mxu0 }
 0x7ae   :  { %v24343_v12 = vadd.f32 %v24342_v11, %v24341_v10  ;;  %v24344_v13 = vpop.f32.mrb[210].mxu0  ;;  %v24363_v14 = vpop.f32.mrb[208].mxu1 }
 0x7af   :  { %v24345_v15 = vpop.f32.mrb[211].mxu0  ;;  %v24364_v16 = vpop.f32.mrb[209].mxu1 }
 0x7b0   :  { %v20009_v17 = vadd.f32 %v24343_v12, %v19969_v9  ;;  %v24365_v18 = vadd.f32 %v24364_v16, %v24363_v14  ;;  %v24366_v19 = vpop.f32.mrb[210].mxu1 }
 0x7b1   :  { %v24367_v20 = vpop.f32.mrb[211].mxu1 }
 0x7b2   :  { %v20049_v21 = vadd.f32 %v24365_v18, %v20009_v17 }
 0x7cc   :  { %v24385_v22 = vpop.f32.mrb[212].mxu0 }
 0x7cd   :  { %v24386_v23 = vpop.f32.mrb[213].mxu0 }
 0x7ce   :  { %v24387_v24 = vadd.f32 %v24386_v23, %v24385_v22  ;;  %v24388_v25 = vpop.f32.mrb[214].mxu0  ;;  %v24407_v26 = vpop.f32.mrb[212].mxu1 }
 0x7cf   :  { %v24389_v27 = vpop.f32.mrb[215].mxu0  ;;  %v24408_v28 = vpop.f32.mrb[213].mxu1 }
 0x7d0   :  { %v20089_v29 = vadd.f32 %v24387_v24, %v20049_v21  ;;  %v24409_v30 = vadd.f32 %v24408_v28, %v24407_v26  ;;  %v24410_v31 = vpop.f32.mrb[214].mxu1 }
 0x7d1   :  { %v24411_v32 = vpop.f32.mrb[215].mxu1 }
 0x7d2   :  { %v20129_v33 = vadd.f32 %v24409_v30, %v20089_v29 }
 0x7ec   :  { %v24429_v35 = vpop.f32.mrb[216].mxu0 }
 0x7ed   :  { %v24430_v36 = vpop.f32.mrb[217].mxu0 }
 0x7ee   :  { %v24431_v37 = vadd.f32 %v24430_v36, %v24429_v35  ;;  %v24432_v38 = vpop.f32.mrb[218].mxu0  ;;  %v24451_v39 = vpop.f32.mrb[216].mxu1 }
 0x7ef   :  { %v24433_v40 = vpop.f32.mrb[219].mxu0  ;;  %v24452_v41 = vpop.f32.mrb[217].mxu1 }
 0x7f0   :  { %v20169_v42 = vadd.f32 %v24431_v37, %v20129_v33  ;;  %v24453_v34 = vadd.f32 %v24452_v41, %v24451_v39  ;;  %v24454_v43 = vpop.f32.mrb[218].mxu1 }
 0x7f1   :  { %v24455_v44 = vpop.f32.mrb[219].mxu1 }
 0x7f2   :  { %v20209_v45 = vadd.f32 %v24453_v34, %v20169_v42 }
 0x7fc   :  { %v20248_v46 = vpop.f32.mrb[220].mxu0 }
 0x7fd   :  { %v20249_v47 = vadd.f32 %v20248_v46, %v20209_v45  ;;  %v24472_v48 = vpop.f32.mrb[221].mxu0 }
 0x7fe   :  { %v20251_v49 = vpop.f32.mrb[222].mxu0 }
 0x7ff   :  { %20254 = vst [vmem:[#allocation8] sm:$0x3] %v20249_v47  ;;  %v24473_v50 = vpop.f32.mrb[223].mxu0 }
 0x800   :  { %26352 = shalt.err (!%p26349_p0)
}
 0x801   :  { %s26353_s27 = scalar_lea.hbm %s26894_s3, 32 }
 0x802   :  { %p26354_p1 = scmp.ne.s32.totalorder %s26894_s3, %s26353_s27  ;;  %p26357_p2 = scmp.lt.u32.totalorder %s26353_s27, %s26894_s3 }
 0x804   :  { %p26359_p3 = pnand %p26357_p2, %p26354_p1 }
 0x806   :  { %26362 = shalt.err (!%p26359_p3)
}
 0x807   :  { %20264 = dma.vmem_to_hbm [thread:$0]  %s20262_s23, 32, %s26894_s3, [#allocation4]  }
 0x808   :  { %26367 = dma.done.wait [#allocation4], 32  }
 0x809   :  { %26368 = vsyncadd [#allocation4], 4294967264 }
 0x80a   :  { %20268 = vsyncpa [#allocation3], 1 }
 0x80b   :  { %20269 = vsyncpa [#allocation6], 1 }
 0x80c   :  { %20270 = vsyncpa [#allocation4], 1 }

</bundles_post_ra>
